<compile_context>
chip_gen: v5e
topology: v5e:2x2
jax: 0.10.0
libtpu: 0.0.40
codegen_flags: <defaults>
</compile_context>

<pallas_src>
import math
import numpy as np
import jax
import jax.numpy as jnp
from jax import lax
from jax.experimental import pallas as pl
from jax.experimental.pallas import tpu as pltpu

# ----------------------------- hyper-parameters ------------------------------
B = 2
IMG = 16
PATCH = 4
IN_CH = 3
GRID = IMG // PATCH                 # 4
N_PATCH = GRID * GRID               # 16 patch tokens
SEQ = N_PATCH + 1                   # 17 (cls token)
SEQ_PAD = 24                        # token axis padded to a multiple of 8 sublanes
PATCH_DIM = IN_CH * PATCH * PATCH   # 48
EMBED = 128
NUM_HEADS = 4
HEAD_DIM = EMBED // NUM_HEADS       # 32
DEPTH = 2
MLP_HIDDEN = 4 * EMBED              # 512
RMAC_LEVELS = 3
NUM_REGIONS = sum(l * l for l in range(1, RMAC_LEVELS + 1))   # 14
CLASS_NUM = 16
CLASS_PAD = 128                     # classes padded to a full lane tile
NUM_VIEWS = 2
ARC_S = 64.0
ARC_M = 0.5
LN_EPS = 1e-6
GEM_EPS = 1e-6
BN_EPS = 1e-5

M_TOK = B * SEQ_PAD                 # 48 rows in the padded token slab
OUT_ROWS = 8                        # padded output sublanes

# --- per-view "vector slab" layout: (VEC_ROWS_PAD, 512), one parameter per row ---
VEC_LANES = 512
ROWS_PER_BLOCK = 8
(R_LN1_G, R_LN1_B, R_QKV_B, R_PROJ_B,
 R_LN2_G, R_LN2_B, R_FC1_B, R_FC2_B) = range(ROWS_PER_BLOCK)
ROW_GEM_P = DEPTH * ROWS_PER_BLOCK          # 16
ROW_LR_B = ROW_GEM_P + 1                    # 17
ROW_FUSE_B1 = ROW_GEM_P + 2                 # 18
ROW_FUSE_B2 = ROW_GEM_P + 3                 # 19
ROW_FUSE_W2 = ROW_GEM_P + 4                 # 20..22 (3 rows)
VEC_ROWS_PAD = 24

# --- per-view weight slabs ---
BLKW1_LANES = 3 * EMBED + EMBED + MLP_HIDDEN        # 1024: [qkv_w | proj_w | fc1_w]

# --- shared head vector slab (8, 128) ---
H_PROJ_B, H_BN_SCALE, H_BN_SHIFT, H_ARC_COS, H_ARC_SIN = range(5)
HEAD_ROWS = 8


# ----------------------------- in-kernel helpers ------------------------------
def _gelu(x):
    # tanh GELU approximation (EUP); exact erf GELU differs by <1e-3 absolute.
    return 0.5 * x * (1.0 + jnp.tanh(0.7978845608028654 * (x + 0.044715 * x * x * x)))


def _layer_norm(x, g, b):
    mu = jnp.mean(x, axis=-1, keepdims=True)
    var = jnp.mean((x - mu) ** 2, axis=-1, keepdims=True)
    return (x - mu) * lax.rsqrt(var + LN_EPS) * g + b


def _l2_normalize(x):
    return x * lax.rsqrt(jnp.maximum(jnp.sum(x * x, axis=-1, keepdims=True), 1e-24))


# ------------------------------- fused kernel ---------------------------------
def _two_view_kernel(
        # per-view (stacked) inputs
        patches_ref, onehot_ref, seq_add_ref, patch_w_ref,
        blk_w1_ref, blk_w2_ref, vec_ref, lrw_ref, fuse_w1_ref,
        # view-invariant (resident) inputs
        attn_bias_ref, cls_sel_ref, gem_avg_ref, rmac_pool_ref,
        hproj_w_ref, arc_w_ref, head_vec_ref,
        # output
        out_ref):
    f32 = jnp.float32

    def dot(a, b):
        return jnp.dot(a, b, preferred_element_type=f32)

    # ---- patch embed + cls token + pos embed (cls/pos/patch-bias folded in seq_add) ----
    x = dot(patches_ref[0], patch_w_ref[0]) + seq_add_ref[0]          # (48, 128)

    vec = vec_ref[0]                                                   # (24, 512)
    attn_bias = attn_bias_ref[...]                                     # (48, 48)
    scale = HEAD_DIM ** -0.5

    # ---- transformer blocks (unrolled; DEPTH=2) ----
    for d in range(DEPTH):
        rb = d * ROWS_PER_BLOCK
        wr = d * EMBED
        ln1_g = vec[rb + R_LN1_G:rb + R_LN1_G + 1, 0:EMBED]
        ln1_b = vec[rb + R_LN1_B:rb + R_LN1_B + 1, 0:EMBED]
        qkv_b = vec[rb + R_QKV_B:rb + R_QKV_B + 1, 0:3 * EMBED]
        proj_b = vec[rb + R_PROJ_B:rb + R_PROJ_B + 1, 0:EMBED]
        ln2_g = vec[rb + R_LN2_G:rb + R_LN2_G + 1, 0:EMBED]
        ln2_b = vec[rb + R_LN2_B:rb + R_LN2_B + 1, 0:EMBED]
        fc1_b = vec[rb + R_FC1_B:rb + R_FC1_B + 1, 0:MLP_HIDDEN]
        fc2_b = vec[rb + R_FC2_B:rb + R_FC2_B + 1, 0:EMBED]

        # --- multi-head self-attention (batch-fused over the whole 48-row slab) ---
        h = _layer_norm(x, ln1_g, ln1_b)
        qkv = dot(h, blk_w1_ref[0, wr:wr + EMBED, 0:3 * EMBED]) + qkv_b   # (48, 384)
        heads = []
        for hh in range(NUM_HEADS):
            c0 = hh * HEAD_DIM
            q = qkv[:, c0:c0 + HEAD_DIM]
            k = qkv[:, EMBED + c0:EMBED + c0 + HEAD_DIM]
            v = qkv[:, 2 * EMBED + c0:2 * EMBED + c0 + HEAD_DIM]
            s = lax.dot_general(q, k, (((1,), (1,)), ((), ())),
                                preferred_element_type=f32) * scale + attn_bias
            s = s - jnp.max(s, axis=-1, keepdims=True)
            p = jnp.exp(s)
            p = p / jnp.sum(p, axis=-1, keepdims=True)
            heads.append(dot(p, v))                                       # (48, 32)
        attn = dot(jnp.concatenate(heads, axis=-1),                       # (48, 128)
                   blk_w1_ref[0, wr:wr + EMBED, 3 * EMBED:4 * EMBED]) + proj_b
        x = x + attn

        # --- MLP ---
        h = _layer_norm(x, ln2_g, ln2_b)
        h = _gelu(dot(h, blk_w1_ref[0, wr:wr + EMBED,
                                    4 * EMBED:4 * EMBED + MLP_HIDDEN]) + fc1_b)
        x = x + dot(h, blk_w2_ref[0, d * MLP_HIDDEN:(d + 1) * MLP_HIDDEN, :]) + fc2_b

    # ---- class token (constant selector matmul) ----
    cls_tok = dot(cls_sel_ref[...], x)                                 # (B, 128)

    # ---- GeM pooling over patch tokens (non-patch rows get 0 weight in gem_avg) ----
    gem_p = vec[ROW_GEM_P:ROW_GEM_P + 1, 0:EMBED]
    xg = jnp.maximum(x, GEM_EPS)                                       # clamp(min=eps)
    y = jnp.exp(gem_p * jnp.log(xg))                                   # x ** p
    m = dot(gem_avg_ref[...], y)                                       # spatial mean
    gfeat = jnp.exp(jnp.log(m) / gem_p)                                # m ** (1/p)

    # ---- RMAC pooling + concat-descriptor L2 norm + local_reduce (single matmul) ----
    rf = dot(rmac_pool_ref[...], x)                                    # (R*B, 128) region-major
    rf_flat = jnp.concatenate(                                         # (B, R*E = 1792)
        [rf[r * B:(r + 1) * B, :] for r in range(NUM_REGIONS)], axis=1)
    inv_nrm = lax.rsqrt(jnp.maximum(
        jnp.sum(rf_flat * rf_flat, axis=-1, keepdims=True), 1e-24))    # (B, 1)
    lr_b = vec[ROW_LR_B:ROW_LR_B + 1, 0:EMBED]
    local = dot(rf_flat, lrw_ref[0]) * inv_nrm + lr_b                  # (B, 128)

    # ---- fusion MLP (softmax-weighted sum) + L2 normalize ----
    feats = jnp.concatenate([cls_tok, gfeat, local], axis=-1)          # (B, 384)
    fuse_b1 = vec[ROW_FUSE_B1:ROW_FUSE_B1 + 1, 0:EMBED]
    fh = jnp.maximum(dot(feats, fuse_w1_ref[0]) + fuse_b1, 0.0)        # (B, 128)
    fuse_w2 = vec[ROW_FUSE_W2:ROW_FUSE_W2 + 3, 0:EMBED]                # (3, 128)
    fuse_b2 = vec[ROW_FUSE_B2:ROW_FUSE_B2 + 1, 0:3]                    # (1, 3)
    lg = lax.dot_general(fh, fuse_w2, (((1,), (1,)), ((), ())),
                         preferred_element_type=f32) + fuse_b2          # (B, 3)
    lg = lg - jnp.max(lg, axis=-1, keepdims=True)
    ew = jnp.exp(lg)
    wts = ew / jnp.sum(ew, axis=-1, keepdims=True)
    fused = wts[:, 0:1] * cls_tok + wts[:, 1:2] * gfeat + wts[:, 2:3] * local
    fused = _l2_normalize(fused)                                        # Dropout == identity

    # ---- shared proj_head (Linear + folded BN + ReLU; Dropout == identity) ----
    hv = head_vec_ref[...]                                              # (8, 128)
    z = dot(fused, hproj_w_ref[...]) + hv[H_PROJ_B:H_PROJ_B + 1, :]
    z = jnp.maximum(z * hv[H_BN_SCALE:H_BN_SCALE + 1, :]
                    + hv[H_BN_SHIFT:H_BN_SHIFT + 1, :], 0.0)

    # ---- ArcFace (weights pre-normalized; per-class cos/sin margin precomputed) ----
    zn = _l2_normalize(z)
    cosine = dot(zn, arc_w_ref[...])                                    # (B, 128)
    sine = jnp.sqrt(1.0 - jnp.clip(cosine * cosine, 0.0, 1.0))
    phi = (cosine * hv[H_ARC_COS:H_ARC_COS + 1, :]
           - sine * hv[H_ARC_SIN:H_ARC_SIN + 1, :])
    onehot = onehot_ref[0]                                              # (B, 128)
    logits = ARC_S * (onehot * phi + (1.0 - onehot) * cosine)           # (B, 128)

    # lane-dense, full-tile store (padded rows are zero; wrapper slices to (B, 16))
    out_ref[0] = jnp.concatenate(
        [logits, jnp.zeros((OUT_ROWS - B, CLASS_PAD), f32)], axis=0)


# ------------------------------ parameter init --------------------------------
def _w(k, shape, scale=0.02):
    return scale * jax.random.normal(k, shape, dtype=jnp.float32)


def init_vit_params(key):
    ks = jax.random.split(key, 8 + DEPTH)
    p = {
        "patch_w": _w(ks[0], (EMBED, IN_CH, PATCH, PATCH)),
        "patch_b": jnp.zeros((EMBED,), jnp.float32),
        "cls": _w(ks[1], (1, 1, EMBED)),
        "pos": _w(ks[2], (1, SEQ, EMBED)),
        "gem_p": 3.0 * jnp.ones((EMBED,), jnp.float32),
        "lr_w": _w(ks[3], (EMBED, EMBED * NUM_REGIONS)),
        "lr_b": jnp.zeros((EMBED,), jnp.float32),
        "fuse_w1": _w(ks[4], (EMBED, 3 * EMBED)),
        "fuse_b1": jnp.zeros((EMBED,), jnp.float32),
        "fuse_w2": _w(ks[5], (3, EMBED)),
        "fuse_b2": jnp.zeros((3,), jnp.float32),
    }
    blocks = []
    for d in range(DEPTH):
        bk = jax.random.split(ks[8 + d], 4)
        blocks.append(dict(
            ln1_g=jnp.ones((EMBED,), jnp.float32), ln1_b=jnp.zeros((EMBED,), jnp.float32),
            qkv_w=_w(bk[0], (3 * EMBED, EMBED)), qkv_b=jnp.zeros((3 * EMBED,), jnp.float32),
            proj_w=_w(bk[1], (EMBED, EMBED)), proj_b=jnp.zeros((EMBED,), jnp.float32),
            ln2_g=jnp.ones((EMBED,), jnp.float32), ln2_b=jnp.zeros((EMBED,), jnp.float32),
            fc1_w=_w(bk[2], (MLP_HIDDEN, EMBED)), fc1_b=jnp.zeros((MLP_HIDDEN,), jnp.float32),
            fc2_w=_w(bk[3], (EMBED, MLP_HIDDEN)), fc2_b=jnp.zeros((EMBED,), jnp.float32),
        ))
    p["blocks"] = blocks
    return p


def init_head_params(key):
    k1, k2 = jax.random.split(key)
    return dict(
        proj_w=_w(k1, (EMBED, EMBED)), proj_b=jnp.zeros((EMBED,), jnp.float32),
        bn_g=jnp.ones((EMBED,), jnp.float32), bn_b=jnp.zeros((EMBED,), jnp.float32),
        bn_mean=jnp.zeros((EMBED,), jnp.float32), bn_var=jnp.ones((EMBED,), jnp.float32),
        arc_w=_w(k2, (CLASS_NUM, EMBED)),
        arc_m=ARC_M * jnp.ones((CLASS_NUM,), jnp.float32),
    )


# ---------------------------- constant matrices --------------------------------
def build_rmac_matrix(H, W, levels):
    """Rows = region-average weights over the flattened (H*W) spatial grid,
    in the exact region order produced by RMAC.forward (unfold -> row-major)."""
    rows = []
    for l in range(1, levels + 1):
        wl = int(2 * min(H, W) / (l + 1))
        hl = wl
        sh = math.floor((H - hl) / l) + 1
        sw = math.floor((W - wl) / l) + 1
        n1 = (H - hl) // sh + 1
        n2 = (W - wl) // sw + 1
        for i in range(n1):
            for j in range(n2):
                m = np.zeros((H, W), dtype=np.float32)
                m[i * sh:i * sh + hl, j * sw:j * sw + wl] = 1.0 / (hl * wl)
                rows.append(m.reshape(-1))
    mat = np.stack(rows, axis=0)
    assert mat.shape[0] == NUM_REGIONS
    return mat


def build_static_mats():
    """Constant selector / pooling / attention-bias matrices over the padded token slab."""
    pool = build_rmac_matrix(GRID, GRID, RMAC_LEVELS)                 # (R, HW)
    cls_sel = np.zeros((B, M_TOK), np.float32)
    gem_avg = np.zeros((B, M_TOK), np.float32)
    rmac_pool = np.zeros((NUM_REGIONS * B, M_TOK), np.float32)        # region-major rows
    attn_bias = np.full((M_TOK, M_TOK), -1e30, np.float32)
    for b in range(B):
        base = b * SEQ_PAD
        cls_sel[b, base] = 1.0
        gem_avg[b, base + 1:base + 1 + N_PATCH] = 1.0 / N_PATCH
        for r in range(NUM_REGIONS):
            rmac_pool[r * B + b, base + 1:base + 1 + N_PATCH] = pool[r]
        attn_bias[base:base + SEQ_PAD, base:base + SEQ] = 0.0          # same batch, valid keys
    return dict(cls_sel=jnp.asarray(cls_sel), gem_avg=jnp.asarray(gem_avg),
                rmac_pool=jnp.asarray(rmac_pool), attn_bias=jnp.asarray(attn_bias))


# ------------------------------ weight packing ---------------------------------
def _row512(v):
    out = jnp.zeros((VEC_LANES,), jnp.float32)
    return out.at[:v.shape[0]].set(v)


def _make_seq_add(p):
    """Per-row additive term for the padded token slab: cls+pos for row 0,
    pos+patch_bias for patch rows, 0 for pad rows; tiled over the batch."""
    cls_row = (p["cls"][0, 0] + p["pos"][0, 0]).reshape(1, EMBED)
    patch_rows = p["pos"][0, 1:] + p["patch_b"][None, :]
    pad_rows = jnp.zeros((SEQ_PAD - SEQ, EMBED), jnp.float32)
    per_item = jnp.concatenate([cls_row, patch_rows, pad_rows], axis=0)   # (SP, E)
    return jnp.tile(per_item, (B, 1))                                     # (B*SP, E)


def pack_view(params):
    """Pre-transposed / consolidated per-view weight list, in kernel argument order."""
    blocks = params["blocks"]

    # consolidated block weight slabs
    blk_w1 = jnp.concatenate(
        [jnp.concatenate([blk["qkv_w"].T, blk["proj_w"].T, blk["fc1_w"].T], axis=1)
         for blk in blocks], axis=0)                                   # (D*E, 1024)
    blk_w2 = jnp.concatenate([blk["fc2_w"].T for blk in blocks], axis=0)   # (D*H, E)

    # small-vector slab
    rows = []
    for blk in blocks:
        for name in ("ln1_g", "ln1_b", "qkv_b", "proj_b",
                     "ln2_g", "ln2_b", "fc1_b", "fc2_b"):
            rows.append(_row512(blk[name]))
    rows.append(_row512(params["gem_p"]))
    rows.append(_row512(params["lr_b"]))
    rows.append(_row512(params["fuse_b1"]))
    rows.append(_row512(params["fuse_b2"]))
    for j in range(3):
        rows.append(_row512(params["fuse_w2"][j]))
    while len(rows) < VEC_ROWS_PAD:
        rows.append(jnp.zeros((VEC_LANES,), jnp.float32))
    vec_slab = jnp.stack(rows, axis=0)                                 # (24, 512)

    return [
        _make_seq_add(params),                      # seq_add   (B*SP, E)
        params["patch_w"].reshape(EMBED, -1).T,     # patch_w_t (PD, E)
        blk_w1,                                     # (D*E, 1024)
        blk_w2,                                     # (D*H, E)
        vec_slab,                                   # (24, 512)
        params["lr_w"].T,                           # lr_w_flat (R*E, E) = (1792, 128)
        params["fuse_w1"].T,                        # (3E, E)
    ]


def pack_shared(head):
    """View-invariant constants: selector/pool matrices + shared proj_head / ArcFace."""
    consts = build_static_mats()
    bn_scale = head["bn_g"] / jnp.sqrt(head["bn_var"] + BN_EPS)
    bn_shift = head["bn_b"] - head["bn_mean"] * bn_scale
    arc_w = head["arc_w"]
    arc_wn = arc_w * lax.rsqrt(jnp.maximum(
        jnp.sum(arc_w * arc_w, axis=1, keepdims=True), 1e-24))
    arc_w_pad = jnp.zeros((EMBED, CLASS_PAD), jnp.float32).at[:, :CLASS_NUM].set(arc_wn.T)
    arc_cos = jnp.ones((CLASS_PAD,), jnp.float32).at[:CLASS_NUM].set(jnp.cos(head["arc_m"]))
    arc_sin = jnp.zeros((CLASS_PAD,), jnp.float32).at[:CLASS_NUM].set(jnp.sin(head["arc_m"]))
    head_vec = jnp.zeros((HEAD_ROWS, EMBED), jnp.float32)
    head_vec = head_vec.at[H_PROJ_B].set(head["proj_b"])
    head_vec = head_vec.at[H_BN_SCALE].set(bn_scale)
    head_vec = head_vec.at[H_BN_SHIFT].set(bn_shift)
    head_vec = head_vec.at[H_ARC_COS].set(arc_cos)
    head_vec = head_vec.at[H_ARC_SIN].set(arc_sin)
    return [consts["attn_bias"], consts["cls_sel"], consts["gem_avg"],
            consts["rmac_pool"], head["proj_w"].T, arc_w_pad, head_vec]


def stack_views(view1, view2):
    return [jnp.stack([a, b]) for a, b in zip(view1, view2)]


# ------------------------------- forward pass ---------------------------------
def extract_patches(x):
    """NCHW image -> padded (B*SEQ_PAD, PATCH_DIM) patch-pixel slab (row per token)."""
    p = x.reshape(B, IN_CH, GRID, PATCH, GRID, PATCH)
    p = p.transpose(0, 2, 4, 1, 3, 5).reshape(B, N_PATCH, PATCH_DIM)
    p = jnp.pad(p, ((0, 0), (1, SEQ_PAD - SEQ), (0, 0)))     # row 0 = cls, tail = pad
    return p.reshape(M_TOK, PATCH_DIM)


def two_view_net_forward(stacked_weights, shared_consts, x1, x2, labels1, labels2):
    patches = jnp.stack([extract_patches(x1), extract_patches(x2)])        # (2, 48, 48)
    onehot = jnp.stack([jax.nn.one_hot(labels1, CLASS_PAD, dtype=jnp.float32),
                        jax.nn.one_hot(labels2, CLASS_PAD, dtype=jnp.float32)])

    stacked_inputs = [patches, onehot] + list(stacked_weights)
    shared_inputs = list(shared_consts)

    def stacked_spec(a):
        nrest = a.ndim - 1
        return pl.BlockSpec((1,) + tuple(a.shape[1:]),
                            lambda v, n=nrest: (v,) + (0,) * n)

    def shared_spec(a):
        nd = a.ndim
        return pl.BlockSpec(tuple(a.shape), lambda v, n=nd: (0,) * n)

    in_specs = ([stacked_spec(a) for a in stacked_inputs]
                + [shared_spec(a) for a in shared_inputs])

    out = pl.pallas_call(
        _two_view_kernel,
        grid=(NUM_VIEWS,),
        in_specs=in_specs,
        out_specs=pl.BlockSpec((1, OUT_ROWS, CLASS_PAD), lambda v: (v, 0, 0)),
        out_shape=jax.ShapeDtypeStruct((NUM_VIEWS, OUT_ROWS, CLASS_PAD), jnp.float32),
        compiler_params=pltpu.CompilerParams(
            dimension_semantics=("parallel",)),
    )(*(stacked_inputs + shared_inputs))
    return out[0, :B, :CLASS_NUM], out[1, :B, :CLASS_NUM]


# ----------------------------------- main --------------------------------------
if __name__ == "__main__":
    key = jax.random.PRNGKey(0)
    k_p1, k_p2, k_head, k_x1, k_x2, k_l = jax.random.split(key, 6)

    params1 = init_vit_params(k_p1)      # model_1
    params2 = init_vit_params(k_p2)      # model_2 (share_weight=False)
    head = init_head_params(k_head)      # shared proj_head + metric_fc

    stacked_weights = stack_views(pack_view(params1), pack_view(params2))
    shared_consts = pack_shared(head)

    x1 = jax.random.normal(k_x1, (B, IN_CH, IMG, IMG), dtype=jnp.float32)
    x2 = jax.random.normal(k_x2, (B, IN_CH, IMG, IMG), dtype=jnp.float32)
    labels1 = jax.random.randint(k_l, (B,), 0, CLASS_NUM, dtype=jnp.int32)
    labels2 = (labels1 + 1) % CLASS_NUM

    @jax.jit
    def run(weights, shared, x1, x2, labels1, labels2):
        return two_view_net_forward(weights, shared, x1, x2, labels1, labels2)

    logits1, logits2 = run(stacked_weights, shared_consts, x1, x2, labels1, labels2)
    jax.block_until_ready((logits1, logits2))
    assert logits1.shape == (B, CLASS_NUM) and logits2.shape == (B, CLASS_NUM)
    assert bool(jnp.all(jnp.isfinite(logits1))) and bool(jnp.all(jnp.isfinite(logits2)))
    print("KERNEL_OK")
</pallas_src>

<mosaic_0001>
module attributes {stable_mosaic.version = 11 : i64} {
  func.func @_two_view_kernel(%arg0: i32, %arg1: memref<1x48x48xf32, #tpu.memory_space<vmem>>, %arg2: memref<1x2x128xf32, #tpu.memory_space<vmem>>, %arg3: memref<1x48x128xf32, #tpu.memory_space<vmem>>, %arg4: memref<1x48x128xf32, #tpu.memory_space<vmem>>, %arg5: memref<1x256x1024xf32, #tpu.memory_space<vmem>>, %arg6: memref<1x1024x128xf32, #tpu.memory_space<vmem>>, %arg7: memref<1x24x512xf32, #tpu.memory_space<vmem>>, %arg8: memref<1x1792x128xf32, #tpu.memory_space<vmem>>, %arg9: memref<1x384x128xf32, #tpu.memory_space<vmem>>, %arg10: memref<48x48xf32, #tpu.memory_space<vmem>>, %arg11: memref<2x48xf32, #tpu.memory_space<vmem>>, %arg12: memref<2x48xf32, #tpu.memory_space<vmem>>, %arg13: memref<28x48xf32, #tpu.memory_space<vmem>>, %arg14: memref<128x128xf32, #tpu.memory_space<vmem>>, %arg15: memref<128x128xf32, #tpu.memory_space<vmem>>, %arg16: memref<8x128xf32, #tpu.memory_space<vmem>>, %arg17: memref<1x8x128xf32, #tpu.memory_space<vmem>>) attributes {dimension_semantics = [#tpu.dimension_semantics<parallel>], iteration_bounds = array<i64: 2>, scalar_prefetch = 0 : i64, scratch_operands = 0 : i64, tpu.core_type = #tpu.core_type<tc>, window_params = [{transform_indices = @transform_0, window_bounds = array<i64: 1, 48, 48>}, {transform_indices = @transform_1, window_bounds = array<i64: 1, 2, 128>}, {transform_indices = @transform_2, window_bounds = array<i64: 1, 48, 128>}, {transform_indices = @transform_3, window_bounds = array<i64: 1, 48, 128>}, {transform_indices = @transform_4, window_bounds = array<i64: 1, 256, 1024>}, {transform_indices = @transform_5, window_bounds = array<i64: 1, 1024, 128>}, {transform_indices = @transform_6, window_bounds = array<i64: 1, 24, 512>}, {transform_indices = @transform_7, window_bounds = array<i64: 1, 1792, 128>}, {transform_indices = @transform_8, window_bounds = array<i64: 1, 384, 128>}, {pipeline_mode = #tpu.pipeline_mode<synchronous>, transform_indices = @transform_9, window_bounds = array<i64: 48, 48>}, {pipeline_mode = #tpu.pipeline_mode<synchronous>, transform_indices = @transform_10, window_bounds = array<i64: 2, 48>}, {pipeline_mode = #tpu.pipeline_mode<synchronous>, transform_indices = @transform_11, window_bounds = array<i64: 2, 48>}, {pipeline_mode = #tpu.pipeline_mode<synchronous>, transform_indices = @transform_12, window_bounds = array<i64: 28, 48>}, {pipeline_mode = #tpu.pipeline_mode<synchronous>, transform_indices = @transform_13, window_bounds = array<i64: 128, 128>}, {pipeline_mode = #tpu.pipeline_mode<synchronous>, transform_indices = @transform_14, window_bounds = array<i64: 128, 128>}, {pipeline_mode = #tpu.pipeline_mode<synchronous>, transform_indices = @transform_15, window_bounds = array<i64: 8, 128>}, {transform_indices = @transform_16, window_bounds = array<i64: 1, 8, 128>}]} {
    %c0 = arith.constant 0 : index
    %c0_0 = arith.constant 0 : index
    %c0_1 = arith.constant 0 : index
    %0 = vector.load %arg1[%c0, %c0_0, %c0_1] : memref<1x48x48xf32, #tpu.memory_space<vmem>>, vector<1x48x48xf32>
    %1 = vector.shape_cast %0 : vector<1x48x48xf32> to vector<48x48xf32>
    %c0_2 = arith.constant 0 : index
    %c0_3 = arith.constant 0 : index
    %c0_4 = arith.constant 0 : index
    %2 = vector.load %arg4[%c0_2, %c0_3, %c0_4] : memref<1x48x128xf32, #tpu.memory_space<vmem>>, vector<1x48x128xf32>
    %3 = vector.shape_cast %2 : vector<1x48x128xf32> to vector<48x128xf32>
    %cst = arith.constant dense<0.000000e+00> : vector<48x128xf32>
    %4 = tpu.matmul %1, %3, %cst {dimension_numbers = #tpu.dot_dimension_numbers<[1], [0], [0], [1], [0, 0, 1, 1], [], []>} : vector<48x48xf32>, vector<48x128xf32>, vector<48x128xf32> -> vector<48x128xf32>
    %c0_5 = arith.constant 0 : index
    %c0_6 = arith.constant 0 : index
    %c0_7 = arith.constant 0 : index
    %5 = vector.load %arg3[%c0_5, %c0_6, %c0_7] : memref<1x48x128xf32, #tpu.memory_space<vmem>>, vector<1x48x128xf32>
    %6 = vector.shape_cast %5 : vector<1x48x128xf32> to vector<48x128xf32>
    %7 = arith.addf %4, %6 : vector<48x128xf32>
    %c0_8 = arith.constant 0 : index
    %c0_9 = arith.constant 0 : index
    %c0_10 = arith.constant 0 : index
    %8 = vector.load %arg7[%c0_8, %c0_9, %c0_10] : memref<1x24x512xf32, #tpu.memory_space<vmem>>, vector<1x24x512xf32>
    %9 = vector.shape_cast %8 : vector<1x24x512xf32> to vector<24x512xf32>
    %c0_11 = arith.constant 0 : index
    %c0_12 = arith.constant 0 : index
    %10 = vector.load %arg10[%c0_11, %c0_12] : memref<48x48xf32, #tpu.memory_space<vmem>>, vector<48x48xf32>
    %11 = vector.extract_strided_slice %9 {offsets = [0, 0], sizes = [1, 128], strides = [1, 1]} : vector<24x512xf32> to vector<1x128xf32>
    %12 = vector.extract_strided_slice %9 {offsets = [1, 0], sizes = [1, 128], strides = [1, 1]} : vector<24x512xf32> to vector<1x128xf32>
    %13 = vector.extract_strided_slice %9 {offsets = [2, 0], sizes = [1, 384], strides = [1, 1]} : vector<24x512xf32> to vector<1x384xf32>
    %14 = vector.extract_strided_slice %9 {offsets = [3, 0], sizes = [1, 128], strides = [1, 1]} : vector<24x512xf32> to vector<1x128xf32>
    %15 = vector.extract_strided_slice %9 {offsets = [4, 0], sizes = [1, 128], strides = [1, 1]} : vector<24x512xf32> to vector<1x128xf32>
    %16 = vector.extract_strided_slice %9 {offsets = [5, 0], sizes = [1, 128], strides = [1, 1]} : vector<24x512xf32> to vector<1x128xf32>
    %17 = vector.extract_strided_slice %9 {offsets = [6, 0], sizes = [1, 512], strides = [1, 1]} : vector<24x512xf32> to vector<1x512xf32>
    %18 = vector.extract_strided_slice %9 {offsets = [7, 0], sizes = [1, 128], strides = [1, 1]} : vector<24x512xf32> to vector<1x128xf32>
    %cst_13 = arith.constant dense<0.000000e+00> : vector<48xf32>
    %19 = vector.multi_reduction <add>, %7, %cst_13 [1] : vector<48x128xf32> to vector<48xf32>
    %20 = vector.shape_cast %19 : vector<48xf32> to vector<48x1xf32>
    %cst_14 = arith.constant 1.280000e+02 : f32
    %21 = vector.broadcast %cst_14 : f32 to vector<48x1xf32>
    %22 = arith.divf %20, %21 : vector<48x1xf32>
    %23 = vector.broadcast %22 : vector<48x1xf32> to vector<48x128xf32>
    %24 = arith.subf %7, %23 : vector<48x128xf32>
    %25 = arith.mulf %24, %24 : vector<48x128xf32>
    %cst_15 = arith.constant dense<0.000000e+00> : vector<48xf32>
    %26 = vector.multi_reduction <add>, %25, %cst_15 [1] : vector<48x128xf32> to vector<48xf32>
    %27 = vector.shape_cast %26 : vector<48xf32> to vector<48x1xf32>
    %cst_16 = arith.constant 1.280000e+02 : f32
    %28 = vector.broadcast %cst_16 : f32 to vector<48x1xf32>
    %29 = arith.divf %27, %28 : vector<48x1xf32>
    %30 = vector.broadcast %22 : vector<48x1xf32> to vector<48x128xf32>
    %31 = arith.subf %7, %30 : vector<48x128xf32>
    %cst_17 = arith.constant 9.99999997E-7 : f32
    %32 = vector.broadcast %cst_17 : f32 to vector<48x1xf32>
    %33 = arith.addf %29, %32 : vector<48x1xf32>
    %34 = math.rsqrt %33 : vector<48x1xf32>
    %35 = vector.broadcast %34 : vector<48x1xf32> to vector<48x128xf32>
    %36 = arith.mulf %31, %35 : vector<48x128xf32>
    %37 = vector.broadcast %11 : vector<1x128xf32> to vector<48x128xf32>
    %38 = arith.mulf %36, %37 : vector<48x128xf32>
    %39 = vector.broadcast %12 : vector<1x128xf32> to vector<48x128xf32>
    %40 = arith.addf %38, %39 : vector<48x128xf32>
    %c0_18 = arith.constant 0 : index
    %c0_19 = arith.constant 0 : index
    %c0_20 = arith.constant 0 : index
    %41 = vector.load %arg5[%c0_18, %c0_19, %c0_20] : memref<1x256x1024xf32, #tpu.memory_space<vmem>>, vector<1x128x384xf32>
    %42 = vector.shape_cast %41 : vector<1x128x384xf32> to vector<128x384xf32>
    %cst_21 = arith.constant dense<0.000000e+00> : vector<48x384xf32>
    %43 = tpu.matmul %40, %42, %cst_21 {dimension_numbers = #tpu.dot_dimension_numbers<[1], [0], [0], [1], [0, 0, 1, 1], [], []>} : vector<48x128xf32>, vector<128x384xf32>, vector<48x384xf32> -> vector<48x384xf32>
    %44 = vector.broadcast %13 : vector<1x384xf32> to vector<48x384xf32>
    %45 = arith.addf %43, %44 : vector<48x384xf32>
    %46 = vector.extract_strided_slice %45 {offsets = [0, 0], sizes = [48, 32], strides = [1, 1]} : vector<48x384xf32> to vector<48x32xf32>
    %47 = vector.extract_strided_slice %45 {offsets = [0, 128], sizes = [48, 32], strides = [1, 1]} : vector<48x384xf32> to vector<48x32xf32>
    %48 = vector.extract_strided_slice %45 {offsets = [0, 256], sizes = [48, 32], strides = [1, 1]} : vector<48x384xf32> to vector<48x32xf32>
    %cst_22 = arith.constant dense<0.000000e+00> : vector<48x48xf32>
    %49 = tpu.matmul %46, %47, %cst_22 {dimension_numbers = #tpu.dot_dimension_numbers<[1], [1], [0], [0], [0, 0, 1, 0], [], []>} : vector<48x32xf32>, vector<48x32xf32>, vector<48x48xf32> -> vector<48x48xf32>
    %cst_23 = arith.constant 0.176776692 : f32
    %50 = vector.broadcast %cst_23 : f32 to vector<48x48xf32>
    %51 = arith.mulf %49, %50 : vector<48x48xf32>
    %52 = arith.addf %51, %10 : vector<48x48xf32>
    %cst_24 = arith.constant dense<0xFF800000> : vector<48xf32>
    %53 = vector.multi_reduction <maximumf>, %52, %cst_24 [1] : vector<48x48xf32> to vector<48xf32>
    %54 = vector.shape_cast %53 : vector<48xf32> to vector<48x1xf32>
    %55 = vector.broadcast %54 : vector<48x1xf32> to vector<48x48xf32>
    %56 = arith.subf %52, %55 : vector<48x48xf32>
    %57 = math.exp %56 : vector<48x48xf32>
    %cst_25 = arith.constant dense<0.000000e+00> : vector<48xf32>
    %58 = vector.multi_reduction <add>, %57, %cst_25 [1] : vector<48x48xf32> to vector<48xf32>
    %59 = vector.shape_cast %58 : vector<48xf32> to vector<48x1xf32>
    %60 = vector.broadcast %59 : vector<48x1xf32> to vector<48x48xf32>
    %61 = arith.divf %57, %60 : vector<48x48xf32>
    %cst_26 = arith.constant dense<0.000000e+00> : vector<48x32xf32>
    %62 = tpu.matmul %61, %48, %cst_26 {dimension_numbers = #tpu.dot_dimension_numbers<[1], [0], [0], [1], [0, 0, 1, 1], [], []>} : vector<48x48xf32>, vector<48x32xf32>, vector<48x32xf32> -> vector<48x32xf32>
    %63 = vector.extract_strided_slice %45 {offsets = [0, 32], sizes = [48, 32], strides = [1, 1]} : vector<48x384xf32> to vector<48x32xf32>
    %64 = vector.extract_strided_slice %45 {offsets = [0, 160], sizes = [48, 32], strides = [1, 1]} : vector<48x384xf32> to vector<48x32xf32>
    %65 = vector.extract_strided_slice %45 {offsets = [0, 288], sizes = [48, 32], strides = [1, 1]} : vector<48x384xf32> to vector<48x32xf32>
    %cst_27 = arith.constant dense<0.000000e+00> : vector<48x48xf32>
    %66 = tpu.matmul %63, %64, %cst_27 {dimension_numbers = #tpu.dot_dimension_numbers<[1], [1], [0], [0], [0, 0, 1, 0], [], []>} : vector<48x32xf32>, vector<48x32xf32>, vector<48x48xf32> -> vector<48x48xf32>
    %cst_28 = arith.constant 0.176776692 : f32
    %67 = vector.broadcast %cst_28 : f32 to vector<48x48xf32>
    %68 = arith.mulf %66, %67 : vector<48x48xf32>
    %69 = arith.addf %68, %10 : vector<48x48xf32>
    %cst_29 = arith.constant dense<0xFF800000> : vector<48xf32>
    %70 = vector.multi_reduction <maximumf>, %69, %cst_29 [1] : vector<48x48xf32> to vector<48xf32>
    %71 = vector.shape_cast %70 : vector<48xf32> to vector<48x1xf32>
    %72 = vector.broadcast %71 : vector<48x1xf32> to vector<48x48xf32>
    %73 = arith.subf %69, %72 : vector<48x48xf32>
    %74 = math.exp %73 : vector<48x48xf32>
    %cst_30 = arith.constant dense<0.000000e+00> : vector<48xf32>
    %75 = vector.multi_reduction <add>, %74, %cst_30 [1] : vector<48x48xf32> to vector<48xf32>
    %76 = vector.shape_cast %75 : vector<48xf32> to vector<48x1xf32>
    %77 = vector.broadcast %76 : vector<48x1xf32> to vector<48x48xf32>
    %78 = arith.divf %74, %77 : vector<48x48xf32>
    %cst_31 = arith.constant dense<0.000000e+00> : vector<48x32xf32>
    %79 = tpu.matmul %78, %65, %cst_31 {dimension_numbers = #tpu.dot_dimension_numbers<[1], [0], [0], [1], [0, 0, 1, 1], [], []>} : vector<48x48xf32>, vector<48x32xf32>, vector<48x32xf32> -> vector<48x32xf32>
    %80 = vector.extract_strided_slice %45 {offsets = [0, 64], sizes = [48, 32], strides = [1, 1]} : vector<48x384xf32> to vector<48x32xf32>
    %81 = vector.extract_strided_slice %45 {offsets = [0, 192], sizes = [48, 32], strides = [1, 1]} : vector<48x384xf32> to vector<48x32xf32>
    %82 = vector.extract_strided_slice %45 {offsets = [0, 320], sizes = [48, 32], strides = [1, 1]} : vector<48x384xf32> to vector<48x32xf32>
    %cst_32 = arith.constant dense<0.000000e+00> : vector<48x48xf32>
    %83 = tpu.matmul %80, %81, %cst_32 {dimension_numbers = #tpu.dot_dimension_numbers<[1], [1], [0], [0], [0, 0, 1, 0], [], []>} : vector<48x32xf32>, vector<48x32xf32>, vector<48x48xf32> -> vector<48x48xf32>
    %cst_33 = arith.constant 0.176776692 : f32
    %84 = vector.broadcast %cst_33 : f32 to vector<48x48xf32>
    %85 = arith.mulf %83, %84 : vector<48x48xf32>
    %86 = arith.addf %85, %10 : vector<48x48xf32>
    %cst_34 = arith.constant dense<0xFF800000> : vector<48xf32>
    %87 = vector.multi_reduction <maximumf>, %86, %cst_34 [1] : vector<48x48xf32> to vector<48xf32>
    %88 = vector.shape_cast %87 : vector<48xf32> to vector<48x1xf32>
    %89 = vector.broadcast %88 : vector<48x1xf32> to vector<48x48xf32>
    %90 = arith.subf %86, %89 : vector<48x48xf32>
    %91 = math.exp %90 : vector<48x48xf32>
    %cst_35 = arith.constant dense<0.000000e+00> : vector<48xf32>
    %92 = vector.multi_reduction <add>, %91, %cst_35 [1] : vector<48x48xf32> to vector<48xf32>
    %93 = vector.shape_cast %92 : vector<48xf32> to vector<48x1xf32>
    %94 = vector.broadcast %93 : vector<48x1xf32> to vector<48x48xf32>
    %95 = arith.divf %91, %94 : vector<48x48xf32>
    %cst_36 = arith.constant dense<0.000000e+00> : vector<48x32xf32>
    %96 = tpu.matmul %95, %82, %cst_36 {dimension_numbers = #tpu.dot_dimension_numbers<[1], [0], [0], [1], [0, 0, 1, 1], [], []>} : vector<48x48xf32>, vector<48x32xf32>, vector<48x32xf32> -> vector<48x32xf32>
    %97 = vector.extract_strided_slice %45 {offsets = [0, 96], sizes = [48, 32], strides = [1, 1]} : vector<48x384xf32> to vector<48x32xf32>
    %98 = vector.extract_strided_slice %45 {offsets = [0, 224], sizes = [48, 32], strides = [1, 1]} : vector<48x384xf32> to vector<48x32xf32>
    %99 = vector.extract_strided_slice %45 {offsets = [0, 352], sizes = [48, 32], strides = [1, 1]} : vector<48x384xf32> to vector<48x32xf32>
    %cst_37 = arith.constant dense<0.000000e+00> : vector<48x48xf32>
    %100 = tpu.matmul %97, %98, %cst_37 {dimension_numbers = #tpu.dot_dimension_numbers<[1], [1], [0], [0], [0, 0, 1, 0], [], []>} : vector<48x32xf32>, vector<48x32xf32>, vector<48x48xf32> -> vector<48x48xf32>
    %cst_38 = arith.constant 0.176776692 : f32
    %101 = vector.broadcast %cst_38 : f32 to vector<48x48xf32>
    %102 = arith.mulf %100, %101 : vector<48x48xf32>
    %103 = arith.addf %102, %10 : vector<48x48xf32>
    %cst_39 = arith.constant dense<0xFF800000> : vector<48xf32>
    %104 = vector.multi_reduction <maximumf>, %103, %cst_39 [1] : vector<48x48xf32> to vector<48xf32>
    %105 = vector.shape_cast %104 : vector<48xf32> to vector<48x1xf32>
    %106 = vector.broadcast %105 : vector<48x1xf32> to vector<48x48xf32>
    %107 = arith.subf %103, %106 : vector<48x48xf32>
    %108 = math.exp %107 : vector<48x48xf32>
    %cst_40 = arith.constant dense<0.000000e+00> : vector<48xf32>
    %109 = vector.multi_reduction <add>, %108, %cst_40 [1] : vector<48x48xf32> to vector<48xf32>
    %110 = vector.shape_cast %109 : vector<48xf32> to vector<48x1xf32>
    %111 = vector.broadcast %110 : vector<48x1xf32> to vector<48x48xf32>
    %112 = arith.divf %108, %111 : vector<48x48xf32>
    %cst_41 = arith.constant dense<0.000000e+00> : vector<48x32xf32>
    %113 = tpu.matmul %112, %99, %cst_41 {dimension_numbers = #tpu.dot_dimension_numbers<[1], [0], [0], [1], [0, 0, 1, 1], [], []>} : vector<48x48xf32>, vector<48x32xf32>, vector<48x32xf32> -> vector<48x32xf32>
    %114 = tpu.concatenate %62, %79, %96, %113 in 1 : vector<48x32xf32>, vector<48x32xf32>, vector<48x32xf32>, vector<48x32xf32> -> vector<48x128xf32>
    %c0_42 = arith.constant 0 : index
    %c0_43 = arith.constant 0 : index
    %c384 = arith.constant 384 : index
    %115 = vector.load %arg5[%c0_42, %c0_43, %c384] : memref<1x256x1024xf32, #tpu.memory_space<vmem>>, vector<1x128x128xf32>
    %116 = vector.shape_cast %115 : vector<1x128x128xf32> to vector<128x128xf32>
    %cst_44 = arith.constant dense<0.000000e+00> : vector<48x128xf32>
    %117 = tpu.matmul %114, %116, %cst_44 {dimension_numbers = #tpu.dot_dimension_numbers<[1], [0], [0], [1], [0, 0, 1, 1], [], []>} : vector<48x128xf32>, vector<128x128xf32>, vector<48x128xf32> -> vector<48x128xf32>
    %118 = vector.broadcast %14 : vector<1x128xf32> to vector<48x128xf32>
    %119 = arith.addf %117, %118 : vector<48x128xf32>
    %120 = arith.addf %7, %119 : vector<48x128xf32>
    %cst_45 = arith.constant dense<0.000000e+00> : vector<48xf32>
    %121 = vector.multi_reduction <add>, %120, %cst_45 [1] : vector<48x128xf32> to vector<48xf32>
    %122 = vector.shape_cast %121 : vector<48xf32> to vector<48x1xf32>
    %cst_46 = arith.constant 1.280000e+02 : f32
    %123 = vector.broadcast %cst_46 : f32 to vector<48x1xf32>
    %124 = arith.divf %122, %123 : vector<48x1xf32>
    %125 = vector.broadcast %124 : vector<48x1xf32> to vector<48x128xf32>
    %126 = arith.subf %120, %125 : vector<48x128xf32>
    %127 = arith.mulf %126, %126 : vector<48x128xf32>
    %cst_47 = arith.constant dense<0.000000e+00> : vector<48xf32>
    %128 = vector.multi_reduction <add>, %127, %cst_47 [1] : vector<48x128xf32> to vector<48xf32>
    %129 = vector.shape_cast %128 : vector<48xf32> to vector<48x1xf32>
    %cst_48 = arith.constant 1.280000e+02 : f32
    %130 = vector.broadcast %cst_48 : f32 to vector<48x1xf32>
    %131 = arith.divf %129, %130 : vector<48x1xf32>
    %132 = vector.broadcast %124 : vector<48x1xf32> to vector<48x128xf32>
    %133 = arith.subf %120, %132 : vector<48x128xf32>
    %cst_49 = arith.constant 9.99999997E-7 : f32
    %134 = vector.broadcast %cst_49 : f32 to vector<48x1xf32>
    %135 = arith.addf %131, %134 : vector<48x1xf32>
    %136 = math.rsqrt %135 : vector<48x1xf32>
    %137 = vector.broadcast %136 : vector<48x1xf32> to vector<48x128xf32>
    %138 = arith.mulf %133, %137 : vector<48x128xf32>
    %139 = vector.broadcast %15 : vector<1x128xf32> to vector<48x128xf32>
    %140 = arith.mulf %138, %139 : vector<48x128xf32>
    %141 = vector.broadcast %16 : vector<1x128xf32> to vector<48x128xf32>
    %142 = arith.addf %140, %141 : vector<48x128xf32>
    %c0_50 = arith.constant 0 : index
    %c0_51 = arith.constant 0 : index
    %c512 = arith.constant 512 : index
    %143 = vector.load %arg5[%c0_50, %c0_51, %c512] : memref<1x256x1024xf32, #tpu.memory_space<vmem>>, vector<1x128x512xf32>
    %144 = vector.shape_cast %143 : vector<1x128x512xf32> to vector<128x512xf32>
    %cst_52 = arith.constant dense<0.000000e+00> : vector<48x512xf32>
    %145 = tpu.matmul %142, %144, %cst_52 {dimension_numbers = #tpu.dot_dimension_numbers<[1], [0], [0], [1], [0, 0, 1, 1], [], []>} : vector<48x128xf32>, vector<128x512xf32>, vector<48x512xf32> -> vector<48x512xf32>
    %146 = vector.broadcast %17 : vector<1x512xf32> to vector<48x512xf32>
    %147 = arith.addf %145, %146 : vector<48x512xf32>
    %cst_53 = arith.constant 5.000000e-01 : f32
    %148 = vector.broadcast %cst_53 : f32 to vector<48x512xf32>
    %149 = arith.mulf %148, %147 : vector<48x512xf32>
    %cst_54 = arith.constant 4.471500e-02 : f32
    %150 = vector.broadcast %cst_54 : f32 to vector<48x512xf32>
    %151 = arith.mulf %150, %147 : vector<48x512xf32>
    %152 = arith.mulf %151, %147 : vector<48x512xf32>
    %153 = arith.mulf %152, %147 : vector<48x512xf32>
    %154 = arith.addf %147, %153 : vector<48x512xf32>
    %cst_55 = arith.constant 0.797884583 : f32
    %155 = vector.broadcast %cst_55 : f32 to vector<48x512xf32>
    %156 = arith.mulf %155, %154 : vector<48x512xf32>
    %157 = math.tanh %156 : vector<48x512xf32>
    %cst_56 = arith.constant 1.000000e+00 : f32
    %158 = vector.broadcast %cst_56 : f32 to vector<48x512xf32>
    %159 = arith.addf %158, %157 : vector<48x512xf32>
    %160 = arith.mulf %149, %159 : vector<48x512xf32>
    %c0_57 = arith.constant 0 : index
    %c0_58 = arith.constant 0 : index
    %c0_59 = arith.constant 0 : index
    %161 = vector.load %arg6[%c0_57, %c0_58, %c0_59] : memref<1x1024x128xf32, #tpu.memory_space<vmem>>, vector<1x512x128xf32>
    %162 = vector.shape_cast %161 : vector<1x512x128xf32> to vector<512x128xf32>
    %cst_60 = arith.constant dense<0.000000e+00> : vector<48x128xf32>
    %163 = tpu.matmul %160, %162, %cst_60 {dimension_numbers = #tpu.dot_dimension_numbers<[1], [0], [0], [1], [0, 0, 1, 1], [], []>} : vector<48x512xf32>, vector<512x128xf32>, vector<48x128xf32> -> vector<48x128xf32>
    %164 = arith.addf %120, %163 : vector<48x128xf32>
    %165 = vector.broadcast %18 : vector<1x128xf32> to vector<48x128xf32>
    %166 = arith.addf %164, %165 : vector<48x128xf32>
    %167 = vector.extract_strided_slice %9 {offsets = [8, 0], sizes = [1, 128], strides = [1, 1]} : vector<24x512xf32> to vector<1x128xf32>
    %168 = vector.extract_strided_slice %9 {offsets = [9, 0], sizes = [1, 128], strides = [1, 1]} : vector<24x512xf32> to vector<1x128xf32>
    %169 = vector.extract_strided_slice %9 {offsets = [10, 0], sizes = [1, 384], strides = [1, 1]} : vector<24x512xf32> to vector<1x384xf32>
    %170 = vector.extract_strided_slice %9 {offsets = [11, 0], sizes = [1, 128], strides = [1, 1]} : vector<24x512xf32> to vector<1x128xf32>
    %171 = vector.extract_strided_slice %9 {offsets = [12, 0], sizes = [1, 128], strides = [1, 1]} : vector<24x512xf32> to vector<1x128xf32>
    %172 = vector.extract_strided_slice %9 {offsets = [13, 0], sizes = [1, 128], strides = [1, 1]} : vector<24x512xf32> to vector<1x128xf32>
    %173 = vector.extract_strided_slice %9 {offsets = [14, 0], sizes = [1, 512], strides = [1, 1]} : vector<24x512xf32> to vector<1x512xf32>
    %174 = vector.extract_strided_slice %9 {offsets = [15, 0], sizes = [1, 128], strides = [1, 1]} : vector<24x512xf32> to vector<1x128xf32>
    %cst_61 = arith.constant dense<0.000000e+00> : vector<48xf32>
    %175 = vector.multi_reduction <add>, %166, %cst_61 [1] : vector<48x128xf32> to vector<48xf32>
    %176 = vector.shape_cast %175 : vector<48xf32> to vector<48x1xf32>
    %cst_62 = arith.constant 1.280000e+02 : f32
    %177 = vector.broadcast %cst_62 : f32 to vector<48x1xf32>
    %178 = arith.divf %176, %177 : vector<48x1xf32>
    %179 = vector.broadcast %178 : vector<48x1xf32> to vector<48x128xf32>
    %180 = arith.subf %166, %179 : vector<48x128xf32>
    %181 = arith.mulf %180, %180 : vector<48x128xf32>
    %cst_63 = arith.constant dense<0.000000e+00> : vector<48xf32>
    %182 = vector.multi_reduction <add>, %181, %cst_63 [1] : vector<48x128xf32> to vector<48xf32>
    %183 = vector.shape_cast %182 : vector<48xf32> to vector<48x1xf32>
    %cst_64 = arith.constant 1.280000e+02 : f32
    %184 = vector.broadcast %cst_64 : f32 to vector<48x1xf32>
    %185 = arith.divf %183, %184 : vector<48x1xf32>
    %186 = vector.broadcast %178 : vector<48x1xf32> to vector<48x128xf32>
    %187 = arith.subf %166, %186 : vector<48x128xf32>
    %cst_65 = arith.constant 9.99999997E-7 : f32
    %188 = vector.broadcast %cst_65 : f32 to vector<48x1xf32>
    %189 = arith.addf %185, %188 : vector<48x1xf32>
    %190 = math.rsqrt %189 : vector<48x1xf32>
    %191 = vector.broadcast %190 : vector<48x1xf32> to vector<48x128xf32>
    %192 = arith.mulf %187, %191 : vector<48x128xf32>
    %193 = vector.broadcast %167 : vector<1x128xf32> to vector<48x128xf32>
    %194 = arith.mulf %192, %193 : vector<48x128xf32>
    %195 = vector.broadcast %168 : vector<1x128xf32> to vector<48x128xf32>
    %196 = arith.addf %194, %195 : vector<48x128xf32>
    %c0_66 = arith.constant 0 : index
    %c128 = arith.constant 128 : index
    %c0_67 = arith.constant 0 : index
    %197 = vector.load %arg5[%c0_66, %c128, %c0_67] : memref<1x256x1024xf32, #tpu.memory_space<vmem>>, vector<1x128x384xf32>
    %198 = vector.shape_cast %197 : vector<1x128x384xf32> to vector<128x384xf32>
    %cst_68 = arith.constant dense<0.000000e+00> : vector<48x384xf32>
    %199 = tpu.matmul %196, %198, %cst_68 {dimension_numbers = #tpu.dot_dimension_numbers<[1], [0], [0], [1], [0, 0, 1, 1], [], []>} : vector<48x128xf32>, vector<128x384xf32>, vector<48x384xf32> -> vector<48x384xf32>
    %200 = vector.broadcast %169 : vector<1x384xf32> to vector<48x384xf32>
    %201 = arith.addf %199, %200 : vector<48x384xf32>
    %202 = vector.extract_strided_slice %201 {offsets = [0, 0], sizes = [48, 32], strides = [1, 1]} : vector<48x384xf32> to vector<48x32xf32>
    %203 = vector.extract_strided_slice %201 {offsets = [0, 128], sizes = [48, 32], strides = [1, 1]} : vector<48x384xf32> to vector<48x32xf32>
    %204 = vector.extract_strided_slice %201 {offsets = [0, 256], sizes = [48, 32], strides = [1, 1]} : vector<48x384xf32> to vector<48x32xf32>
    %cst_69 = arith.constant dense<0.000000e+00> : vector<48x48xf32>
    %205 = tpu.matmul %202, %203, %cst_69 {dimension_numbers = #tpu.dot_dimension_numbers<[1], [1], [0], [0], [0, 0, 1, 0], [], []>} : vector<48x32xf32>, vector<48x32xf32>, vector<48x48xf32> -> vector<48x48xf32>
    %cst_70 = arith.constant 0.176776692 : f32
    %206 = vector.broadcast %cst_70 : f32 to vector<48x48xf32>
    %207 = arith.mulf %205, %206 : vector<48x48xf32>
    %208 = arith.addf %207, %10 : vector<48x48xf32>
    %cst_71 = arith.constant dense<0xFF800000> : vector<48xf32>
    %209 = vector.multi_reduction <maximumf>, %208, %cst_71 [1] : vector<48x48xf32> to vector<48xf32>
    %210 = vector.shape_cast %209 : vector<48xf32> to vector<48x1xf32>
    %211 = vector.broadcast %210 : vector<48x1xf32> to vector<48x48xf32>
    %212 = arith.subf %208, %211 : vector<48x48xf32>
    %213 = math.exp %212 : vector<48x48xf32>
    %cst_72 = arith.constant dense<0.000000e+00> : vector<48xf32>
    %214 = vector.multi_reduction <add>, %213, %cst_72 [1] : vector<48x48xf32> to vector<48xf32>
    %215 = vector.shape_cast %214 : vector<48xf32> to vector<48x1xf32>
    %216 = vector.broadcast %215 : vector<48x1xf32> to vector<48x48xf32>
    %217 = arith.divf %213, %216 : vector<48x48xf32>
    %cst_73 = arith.constant dense<0.000000e+00> : vector<48x32xf32>
    %218 = tpu.matmul %217, %204, %cst_73 {dimension_numbers = #tpu.dot_dimension_numbers<[1], [0], [0], [1], [0, 0, 1, 1], [], []>} : vector<48x48xf32>, vector<48x32xf32>, vector<48x32xf32> -> vector<48x32xf32>
    %219 = vector.extract_strided_slice %201 {offsets = [0, 32], sizes = [48, 32], strides = [1, 1]} : vector<48x384xf32> to vector<48x32xf32>
    %220 = vector.extract_strided_slice %201 {offsets = [0, 160], sizes = [48, 32], strides = [1, 1]} : vector<48x384xf32> to vector<48x32xf32>
    %221 = vector.extract_strided_slice %201 {offsets = [0, 288], sizes = [48, 32], strides = [1, 1]} : vector<48x384xf32> to vector<48x32xf32>
    %cst_74 = arith.constant dense<0.000000e+00> : vector<48x48xf32>
    %222 = tpu.matmul %219, %220, %cst_74 {dimension_numbers = #tpu.dot_dimension_numbers<[1], [1], [0], [0], [0, 0, 1, 0], [], []>} : vector<48x32xf32>, vector<48x32xf32>, vector<48x48xf32> -> vector<48x48xf32>
    %cst_75 = arith.constant 0.176776692 : f32
    %223 = vector.broadcast %cst_75 : f32 to vector<48x48xf32>
    %224 = arith.mulf %222, %223 : vector<48x48xf32>
    %225 = arith.addf %224, %10 : vector<48x48xf32>
    %cst_76 = arith.constant dense<0xFF800000> : vector<48xf32>
    %226 = vector.multi_reduction <maximumf>, %225, %cst_76 [1] : vector<48x48xf32> to vector<48xf32>
    %227 = vector.shape_cast %226 : vector<48xf32> to vector<48x1xf32>
    %228 = vector.broadcast %227 : vector<48x1xf32> to vector<48x48xf32>
    %229 = arith.subf %225, %228 : vector<48x48xf32>
    %230 = math.exp %229 : vector<48x48xf32>
    %cst_77 = arith.constant dense<0.000000e+00> : vector<48xf32>
    %231 = vector.multi_reduction <add>, %230, %cst_77 [1] : vector<48x48xf32> to vector<48xf32>
    %232 = vector.shape_cast %231 : vector<48xf32> to vector<48x1xf32>
    %233 = vector.broadcast %232 : vector<48x1xf32> to vector<48x48xf32>
    %234 = arith.divf %230, %233 : vector<48x48xf32>
    %cst_78 = arith.constant dense<0.000000e+00> : vector<48x32xf32>
    %235 = tpu.matmul %234, %221, %cst_78 {dimension_numbers = #tpu.dot_dimension_numbers<[1], [0], [0], [1], [0, 0, 1, 1], [], []>} : vector<48x48xf32>, vector<48x32xf32>, vector<48x32xf32> -> vector<48x32xf32>
    %236 = vector.extract_strided_slice %201 {offsets = [0, 64], sizes = [48, 32], strides = [1, 1]} : vector<48x384xf32> to vector<48x32xf32>
    %237 = vector.extract_strided_slice %201 {offsets = [0, 192], sizes = [48, 32], strides = [1, 1]} : vector<48x384xf32> to vector<48x32xf32>
    %238 = vector.extract_strided_slice %201 {offsets = [0, 320], sizes = [48, 32], strides = [1, 1]} : vector<48x384xf32> to vector<48x32xf32>
    %cst_79 = arith.constant dense<0.000000e+00> : vector<48x48xf32>
    %239 = tpu.matmul %236, %237, %cst_79 {dimension_numbers = #tpu.dot_dimension_numbers<[1], [1], [0], [0], [0, 0, 1, 0], [], []>} : vector<48x32xf32>, vector<48x32xf32>, vector<48x48xf32> -> vector<48x48xf32>
    %cst_80 = arith.constant 0.176776692 : f32
    %240 = vector.broadcast %cst_80 : f32 to vector<48x48xf32>
    %241 = arith.mulf %239, %240 : vector<48x48xf32>
    %242 = arith.addf %241, %10 : vector<48x48xf32>
    %cst_81 = arith.constant dense<0xFF800000> : vector<48xf32>
    %243 = vector.multi_reduction <maximumf>, %242, %cst_81 [1] : vector<48x48xf32> to vector<48xf32>
    %244 = vector.shape_cast %243 : vector<48xf32> to vector<48x1xf32>
    %245 = vector.broadcast %244 : vector<48x1xf32> to vector<48x48xf32>
    %246 = arith.subf %242, %245 : vector<48x48xf32>
    %247 = math.exp %246 : vector<48x48xf32>
    %cst_82 = arith.constant dense<0.000000e+00> : vector<48xf32>
    %248 = vector.multi_reduction <add>, %247, %cst_82 [1] : vector<48x48xf32> to vector<48xf32>
    %249 = vector.shape_cast %248 : vector<48xf32> to vector<48x1xf32>
    %250 = vector.broadcast %249 : vector<48x1xf32> to vector<48x48xf32>
    %251 = arith.divf %247, %250 : vector<48x48xf32>
    %cst_83 = arith.constant dense<0.000000e+00> : vector<48x32xf32>
    %252 = tpu.matmul %251, %238, %cst_83 {dimension_numbers = #tpu.dot_dimension_numbers<[1], [0], [0], [1], [0, 0, 1, 1], [], []>} : vector<48x48xf32>, vector<48x32xf32>, vector<48x32xf32> -> vector<48x32xf32>
    %253 = vector.extract_strided_slice %201 {offsets = [0, 96], sizes = [48, 32], strides = [1, 1]} : vector<48x384xf32> to vector<48x32xf32>
    %254 = vector.extract_strided_slice %201 {offsets = [0, 224], sizes = [48, 32], strides = [1, 1]} : vector<48x384xf32> to vector<48x32xf32>
    %255 = vector.extract_strided_slice %201 {offsets = [0, 352], sizes = [48, 32], strides = [1, 1]} : vector<48x384xf32> to vector<48x32xf32>
    %cst_84 = arith.constant dense<0.000000e+00> : vector<48x48xf32>
    %256 = tpu.matmul %253, %254, %cst_84 {dimension_numbers = #tpu.dot_dimension_numbers<[1], [1], [0], [0], [0, 0, 1, 0], [], []>} : vector<48x32xf32>, vector<48x32xf32>, vector<48x48xf32> -> vector<48x48xf32>
    %cst_85 = arith.constant 0.176776692 : f32
    %257 = vector.broadcast %cst_85 : f32 to vector<48x48xf32>
    %258 = arith.mulf %256, %257 : vector<48x48xf32>
    %259 = arith.addf %258, %10 : vector<48x48xf32>
    %cst_86 = arith.constant dense<0xFF800000> : vector<48xf32>
    %260 = vector.multi_reduction <maximumf>, %259, %cst_86 [1] : vector<48x48xf32> to vector<48xf32>
    %261 = vector.shape_cast %260 : vector<48xf32> to vector<48x1xf32>
    %262 = vector.broadcast %261 : vector<48x1xf32> to vector<48x48xf32>
    %263 = arith.subf %259, %262 : vector<48x48xf32>
    %264 = math.exp %263 : vector<48x48xf32>
    %cst_87 = arith.constant dense<0.000000e+00> : vector<48xf32>
    %265 = vector.multi_reduction <add>, %264, %cst_87 [1] : vector<48x48xf32> to vector<48xf32>
    %266 = vector.shape_cast %265 : vector<48xf32> to vector<48x1xf32>
    %267 = vector.broadcast %266 : vector<48x1xf32> to vector<48x48xf32>
    %268 = arith.divf %264, %267 : vector<48x48xf32>
    %cst_88 = arith.constant dense<0.000000e+00> : vector<48x32xf32>
    %269 = tpu.matmul %268, %255, %cst_88 {dimension_numbers = #tpu.dot_dimension_numbers<[1], [0], [0], [1], [0, 0, 1, 1], [], []>} : vector<48x48xf32>, vector<48x32xf32>, vector<48x32xf32> -> vector<48x32xf32>
    %270 = tpu.concatenate %218, %235, %252, %269 in 1 : vector<48x32xf32>, vector<48x32xf32>, vector<48x32xf32>, vector<48x32xf32> -> vector<48x128xf32>
    %c0_89 = arith.constant 0 : index
    %c128_90 = arith.constant 128 : index
    %c384_91 = arith.constant 384 : index
    %271 = vector.load %arg5[%c0_89, %c128_90, %c384_91] : memref<1x256x1024xf32, #tpu.memory_space<vmem>>, vector<1x128x128xf32>
    %272 = vector.shape_cast %271 : vector<1x128x128xf32> to vector<128x128xf32>
    %cst_92 = arith.constant dense<0.000000e+00> : vector<48x128xf32>
    %273 = tpu.matmul %270, %272, %cst_92 {dimension_numbers = #tpu.dot_dimension_numbers<[1], [0], [0], [1], [0, 0, 1, 1], [], []>} : vector<48x128xf32>, vector<128x128xf32>, vector<48x128xf32> -> vector<48x128xf32>
    %274 = vector.broadcast %170 : vector<1x128xf32> to vector<48x128xf32>
    %275 = arith.addf %273, %274 : vector<48x128xf32>
    %276 = arith.addf %166, %275 : vector<48x128xf32>
    %cst_93 = arith.constant dense<0.000000e+00> : vector<48xf32>
    %277 = vector.multi_reduction <add>, %276, %cst_93 [1] : vector<48x128xf32> to vector<48xf32>
    %278 = vector.shape_cast %277 : vector<48xf32> to vector<48x1xf32>
    %cst_94 = arith.constant 1.280000e+02 : f32
    %279 = vector.broadcast %cst_94 : f32 to vector<48x1xf32>
    %280 = arith.divf %278, %279 : vector<48x1xf32>
    %281 = vector.broadcast %280 : vector<48x1xf32> to vector<48x128xf32>
    %282 = arith.subf %276, %281 : vector<48x128xf32>
    %283 = arith.mulf %282, %282 : vector<48x128xf32>
    %cst_95 = arith.constant dense<0.000000e+00> : vector<48xf32>
    %284 = vector.multi_reduction <add>, %283, %cst_95 [1] : vector<48x128xf32> to vector<48xf32>
    %285 = vector.shape_cast %284 : vector<48xf32> to vector<48x1xf32>
    %cst_96 = arith.constant 1.280000e+02 : f32
    %286 = vector.broadcast %cst_96 : f32 to vector<48x1xf32>
    %287 = arith.divf %285, %286 : vector<48x1xf32>
    %288 = vector.broadcast %280 : vector<48x1xf32> to vector<48x128xf32>
    %289 = arith.subf %276, %288 : vector<48x128xf32>
    %cst_97 = arith.constant 9.99999997E-7 : f32
    %290 = vector.broadcast %cst_97 : f32 to vector<48x1xf32>
    %291 = arith.addf %287, %290 : vector<48x1xf32>
    %292 = math.rsqrt %291 : vector<48x1xf32>
    %293 = vector.broadcast %292 : vector<48x1xf32> to vector<48x128xf32>
    %294 = arith.mulf %289, %293 : vector<48x128xf32>
    %295 = vector.broadcast %171 : vector<1x128xf32> to vector<48x128xf32>
    %296 = arith.mulf %294, %295 : vector<48x128xf32>
    %297 = vector.broadcast %172 : vector<1x128xf32> to vector<48x128xf32>
    %298 = arith.addf %296, %297 : vector<48x128xf32>
    %c0_98 = arith.constant 0 : index
    %c128_99 = arith.constant 128 : index
    %c512_100 = arith.constant 512 : index
    %299 = vector.load %arg5[%c0_98, %c128_99, %c512_100] : memref<1x256x1024xf32, #tpu.memory_space<vmem>>, vector<1x128x512xf32>
    %300 = vector.shape_cast %299 : vector<1x128x512xf32> to vector<128x512xf32>
    %cst_101 = arith.constant dense<0.000000e+00> : vector<48x512xf32>
    %301 = tpu.matmul %298, %300, %cst_101 {dimension_numbers = #tpu.dot_dimension_numbers<[1], [0], [0], [1], [0, 0, 1, 1], [], []>} : vector<48x128xf32>, vector<128x512xf32>, vector<48x512xf32> -> vector<48x512xf32>
    %302 = vector.broadcast %173 : vector<1x512xf32> to vector<48x512xf32>
    %303 = arith.addf %301, %302 : vector<48x512xf32>
    %cst_102 = arith.constant 5.000000e-01 : f32
    %304 = vector.broadcast %cst_102 : f32 to vector<48x512xf32>
    %305 = arith.mulf %304, %303 : vector<48x512xf32>
    %cst_103 = arith.constant 4.471500e-02 : f32
    %306 = vector.broadcast %cst_103 : f32 to vector<48x512xf32>
    %307 = arith.mulf %306, %303 : vector<48x512xf32>
    %308 = arith.mulf %307, %303 : vector<48x512xf32>
    %309 = arith.mulf %308, %303 : vector<48x512xf32>
    %310 = arith.addf %303, %309 : vector<48x512xf32>
    %cst_104 = arith.constant 0.797884583 : f32
    %311 = vector.broadcast %cst_104 : f32 to vector<48x512xf32>
    %312 = arith.mulf %311, %310 : vector<48x512xf32>
    %313 = math.tanh %312 : vector<48x512xf32>
    %cst_105 = arith.constant 1.000000e+00 : f32
    %314 = vector.broadcast %cst_105 : f32 to vector<48x512xf32>
    %315 = arith.addf %314, %313 : vector<48x512xf32>
    %316 = arith.mulf %305, %315 : vector<48x512xf32>
    %c0_106 = arith.constant 0 : index
    %c512_107 = arith.constant 512 : index
    %c0_108 = arith.constant 0 : index
    %317 = vector.load %arg6[%c0_106, %c512_107, %c0_108] : memref<1x1024x128xf32, #tpu.memory_space<vmem>>, vector<1x512x128xf32>
    %318 = vector.shape_cast %317 : vector<1x512x128xf32> to vector<512x128xf32>
    %cst_109 = arith.constant dense<0.000000e+00> : vector<48x128xf32>
    %319 = tpu.matmul %316, %318, %cst_109 {dimension_numbers = #tpu.dot_dimension_numbers<[1], [0], [0], [1], [0, 0, 1, 1], [], []>} : vector<48x512xf32>, vector<512x128xf32>, vector<48x128xf32> -> vector<48x128xf32>
    %320 = arith.addf %276, %319 : vector<48x128xf32>
    %321 = vector.broadcast %174 : vector<1x128xf32> to vector<48x128xf32>
    %322 = arith.addf %320, %321 : vector<48x128xf32>
    %c0_110 = arith.constant 0 : index
    %c0_111 = arith.constant 0 : index
    %323 = vector.load %arg11[%c0_110, %c0_111] : memref<2x48xf32, #tpu.memory_space<vmem>>, vector<2x48xf32>
    %cst_112 = arith.constant dense<0.000000e+00> : vector<2x128xf32>
    %324 = tpu.matmul %323, %322, %cst_112 {dimension_numbers = #tpu.dot_dimension_numbers<[1], [0], [0], [1], [0, 0, 1, 1], [], []>} : vector<2x48xf32>, vector<48x128xf32>, vector<2x128xf32> -> vector<2x128xf32>
    %325 = vector.extract_strided_slice %9 {offsets = [16, 0], sizes = [1, 128], strides = [1, 1]} : vector<24x512xf32> to vector<1x128xf32>
    %cst_113 = arith.constant 9.99999997E-7 : f32
    %326 = vector.broadcast %cst_113 : f32 to vector<48x128xf32>
    %327 = arith.maximumf %322, %326 : vector<48x128xf32>
    %328 = math.log %327 : vector<48x128xf32>
    %329 = vector.broadcast %325 : vector<1x128xf32> to vector<48x128xf32>
    %330 = arith.mulf %329, %328 : vector<48x128xf32>
    %331 = math.exp %330 : vector<48x128xf32>
    %c0_114 = arith.constant 0 : index
    %c0_115 = arith.constant 0 : index
    %332 = vector.load %arg12[%c0_114, %c0_115] : memref<2x48xf32, #tpu.memory_space<vmem>>, vector<2x48xf32>
    %cst_116 = arith.constant dense<0.000000e+00> : vector<2x128xf32>
    %333 = tpu.matmul %332, %331, %cst_116 {dimension_numbers = #tpu.dot_dimension_numbers<[1], [0], [0], [1], [0, 0, 1, 1], [], []>} : vector<2x48xf32>, vector<48x128xf32>, vector<2x128xf32> -> vector<2x128xf32>
    %334 = math.log %333 : vector<2x128xf32>
    %335 = vector.broadcast %325 : vector<1x128xf32> to vector<2x128xf32>
    %336 = arith.divf %334, %335 : vector<2x128xf32>
    %337 = math.exp %336 : vector<2x128xf32>
    %c0_117 = arith.constant 0 : index
    %c0_118 = arith.constant 0 : index
    %338 = vector.load %arg13[%c0_117, %c0_118] : memref<28x48xf32, #tpu.memory_space<vmem>>, vector<28x48xf32>
    %cst_119 = arith.constant dense<0.000000e+00> : vector<28x128xf32>
    %339 = tpu.matmul %338, %322, %cst_119 {dimension_numbers = #tpu.dot_dimension_numbers<[1], [0], [0], [1], [0, 0, 1, 1], [], []>} : vector<28x48xf32>, vector<48x128xf32>, vector<28x128xf32> -> vector<28x128xf32>
    %340 = vector.extract_strided_slice %339 {offsets = [0, 0], sizes = [2, 128], strides = [1, 1]} : vector<28x128xf32> to vector<2x128xf32>
    %341 = vector.extract_strided_slice %339 {offsets = [2, 0], sizes = [2, 128], strides = [1, 1]} : vector<28x128xf32> to vector<2x128xf32>
    %342 = vector.extract_strided_slice %339 {offsets = [4, 0], sizes = [2, 128], strides = [1, 1]} : vector<28x128xf32> to vector<2x128xf32>
    %343 = vector.extract_strided_slice %339 {offsets = [6, 0], sizes = [2, 128], strides = [1, 1]} : vector<28x128xf32> to vector<2x128xf32>
    %344 = vector.extract_strided_slice %339 {offsets = [8, 0], sizes = [2, 128], strides = [1, 1]} : vector<28x128xf32> to vector<2x128xf32>
    %345 = vector.extract_strided_slice %339 {offsets = [10, 0], sizes = [2, 128], strides = [1, 1]} : vector<28x128xf32> to vector<2x128xf32>
    %346 = vector.extract_strided_slice %339 {offsets = [12, 0], sizes = [2, 128], strides = [1, 1]} : vector<28x128xf32> to vector<2x128xf32>
    %347 = vector.extract_strided_slice %339 {offsets = [14, 0], sizes = [2, 128], strides = [1, 1]} : vector<28x128xf32> to vector<2x128xf32>
    %348 = vector.extract_strided_slice %339 {offsets = [16, 0], sizes = [2, 128], strides = [1, 1]} : vector<28x128xf32> to vector<2x128xf32>
    %349 = vector.extract_strided_slice %339 {offsets = [18, 0], sizes = [2, 128], strides = [1, 1]} : vector<28x128xf32> to vector<2x128xf32>
    %350 = vector.extract_strided_slice %339 {offsets = [20, 0], sizes = [2, 128], strides = [1, 1]} : vector<28x128xf32> to vector<2x128xf32>
    %351 = vector.extract_strided_slice %339 {offsets = [22, 0], sizes = [2, 128], strides = [1, 1]} : vector<28x128xf32> to vector<2x128xf32>
    %352 = vector.extract_strided_slice %339 {offsets = [24, 0], sizes = [2, 128], strides = [1, 1]} : vector<28x128xf32> to vector<2x128xf32>
    %353 = vector.extract_strided_slice %339 {offsets = [26, 0], sizes = [2, 128], strides = [1, 1]} : vector<28x128xf32> to vector<2x128xf32>
    %354 = tpu.concatenate %340, %341, %342, %343, %344, %345, %346, %347, %348, %349, %350, %351, %352, %353 in 1 : vector<2x128xf32>, vector<2x128xf32>, vector<2x128xf32>, vector<2x128xf32>, vector<2x128xf32>, vector<2x128xf32>, vector<2x128xf32>, vector<2x128xf32>, vector<2x128xf32>, vector<2x128xf32>, vector<2x128xf32>, vector<2x128xf32>, vector<2x128xf32>, vector<2x128xf32> -> vector<2x1792xf32>
    %355 = arith.mulf %354, %354 : vector<2x1792xf32>
    %cst_120 = arith.constant dense<0.000000e+00> : vector<2xf32>
    %356 = vector.multi_reduction <add>, %355, %cst_120 [1] : vector<2x1792xf32> to vector<2xf32>
    %357 = vector.shape_cast %356 : vector<2xf32> to vector<2x1xf32>
    %cst_121 = arith.constant 1.000000e-24 : f32
    %358 = vector.broadcast %cst_121 : f32 to vector<2x1xf32>
    %359 = arith.maximumf %357, %358 : vector<2x1xf32>
    %360 = math.rsqrt %359 : vector<2x1xf32>
    %361 = vector.extract_strided_slice %9 {offsets = [17, 0], sizes = [1, 128], strides = [1, 1]} : vector<24x512xf32> to vector<1x128xf32>
    %c0_122 = arith.constant 0 : index
    %c0_123 = arith.constant 0 : index
    %c0_124 = arith.constant 0 : index
    %362 = vector.load %arg8[%c0_122, %c0_123, %c0_124] : memref<1x1792x128xf32, #tpu.memory_space<vmem>>, vector<1x1792x128xf32>
    %363 = vector.shape_cast %362 : vector<1x1792x128xf32> to vector<1792x128xf32>
    %cst_125 = arith.constant dense<0.000000e+00> : vector<2x128xf32>
    %364 = tpu.matmul %354, %363, %cst_125 {dimension_numbers = #tpu.dot_dimension_numbers<[1], [0], [0], [1], [0, 0, 1, 1], [], []>} : vector<2x1792xf32>, vector<1792x128xf32>, vector<2x128xf32> -> vector<2x128xf32>
    %365 = vector.broadcast %360 : vector<2x1xf32> to vector<2x128xf32>
    %366 = arith.mulf %364, %365 : vector<2x128xf32>
    %367 = vector.broadcast %361 : vector<1x128xf32> to vector<2x128xf32>
    %368 = arith.addf %366, %367 : vector<2x128xf32>
    %369 = tpu.concatenate %324, %337, %368 in 1 : vector<2x128xf32>, vector<2x128xf32>, vector<2x128xf32> -> vector<2x384xf32>
    %370 = vector.extract_strided_slice %9 {offsets = [18, 0], sizes = [1, 128], strides = [1, 1]} : vector<24x512xf32> to vector<1x128xf32>
    %c0_126 = arith.constant 0 : index
    %c0_127 = arith.constant 0 : index
    %c0_128 = arith.constant 0 : index
    %371 = vector.load %arg9[%c0_126, %c0_127, %c0_128] : memref<1x384x128xf32, #tpu.memory_space<vmem>>, vector<1x384x128xf32>
    %372 = vector.shape_cast %371 : vector<1x384x128xf32> to vector<384x128xf32>
    %cst_129 = arith.constant dense<0.000000e+00> : vector<2x128xf32>
    %373 = tpu.matmul %369, %372, %cst_129 {dimension_numbers = #tpu.dot_dimension_numbers<[1], [0], [0], [1], [0, 0, 1, 1], [], []>} : vector<2x384xf32>, vector<384x128xf32>, vector<2x128xf32> -> vector<2x128xf32>
    %374 = vector.broadcast %370 : vector<1x128xf32> to vector<2x128xf32>
    %375 = arith.addf %373, %374 : vector<2x128xf32>
    %cst_130 = arith.constant 0.000000e+00 : f32
    %376 = vector.broadcast %cst_130 : f32 to vector<2x128xf32>
    %377 = arith.maximumf %375, %376 : vector<2x128xf32>
    %378 = vector.extract_strided_slice %9 {offsets = [20, 0], sizes = [3, 128], strides = [1, 1]} : vector<24x512xf32> to vector<3x128xf32>
    %379 = vector.extract_strided_slice %9 {offsets = [19, 0], sizes = [1, 3], strides = [1, 1]} : vector<24x512xf32> to vector<1x3xf32>
    %cst_131 = arith.constant dense<0.000000e+00> : vector<2x3xf32>
    %380 = tpu.matmul %377, %378, %cst_131 {dimension_numbers = #tpu.dot_dimension_numbers<[1], [1], [0], [0], [0, 0, 1, 0], [], []>} : vector<2x128xf32>, vector<3x128xf32>, vector<2x3xf32> -> vector<2x3xf32>
    %381 = vector.broadcast %379 : vector<1x3xf32> to vector<2x3xf32>
    %382 = arith.addf %380, %381 : vector<2x3xf32>
    %cst_132 = arith.constant dense<0xFF800000> : vector<2xf32>
    %383 = vector.multi_reduction <maximumf>, %382, %cst_132 [1] : vector<2x3xf32> to vector<2xf32>
    %384 = vector.shape_cast %383 : vector<2xf32> to vector<2x1xf32>
    %385 = vector.broadcast %384 : vector<2x1xf32> to vector<2x3xf32>
    %386 = arith.subf %382, %385 : vector<2x3xf32>
    %387 = math.exp %386 : vector<2x3xf32>
    %cst_133 = arith.constant dense<0.000000e+00> : vector<2xf32>
    %388 = vector.multi_reduction <add>, %387, %cst_133 [1] : vector<2x3xf32> to vector<2xf32>
    %389 = vector.shape_cast %388 : vector<2xf32> to vector<2x1xf32>
    %390 = vector.broadcast %389 : vector<2x1xf32> to vector<2x3xf32>
    %391 = arith.divf %387, %390 : vector<2x3xf32>
    %392 = vector.extract_strided_slice %391 {offsets = [0, 0], sizes = [2, 1], strides = [1, 1]} : vector<2x3xf32> to vector<2x1xf32>
    %393 = vector.broadcast %392 : vector<2x1xf32> to vector<2x128xf32>
    %394 = arith.mulf %393, %324 : vector<2x128xf32>
    %395 = vector.extract_strided_slice %391 {offsets = [0, 1], sizes = [2, 1], strides = [1, 1]} : vector<2x3xf32> to vector<2x1xf32>
    %396 = vector.broadcast %395 : vector<2x1xf32> to vector<2x128xf32>
    %397 = arith.mulf %396, %337 : vector<2x128xf32>
    %398 = arith.addf %394, %397 : vector<2x128xf32>
    %399 = vector.extract_strided_slice %391 {offsets = [0, 2], sizes = [2, 1], strides = [1, 1]} : vector<2x3xf32> to vector<2x1xf32>
    %400 = vector.broadcast %399 : vector<2x1xf32> to vector<2x128xf32>
    %401 = arith.mulf %400, %368 : vector<2x128xf32>
    %402 = arith.addf %398, %401 : vector<2x128xf32>
    %403 = arith.mulf %402, %402 : vector<2x128xf32>
    %cst_134 = arith.constant dense<0.000000e+00> : vector<2xf32>
    %404 = vector.multi_reduction <add>, %403, %cst_134 [1] : vector<2x128xf32> to vector<2xf32>
    %405 = vector.shape_cast %404 : vector<2xf32> to vector<2x1xf32>
    %cst_135 = arith.constant 1.000000e-24 : f32
    %406 = vector.broadcast %cst_135 : f32 to vector<2x1xf32>
    %407 = arith.maximumf %405, %406 : vector<2x1xf32>
    %408 = math.rsqrt %407 : vector<2x1xf32>
    %409 = vector.broadcast %408 : vector<2x1xf32> to vector<2x128xf32>
    %410 = arith.mulf %402, %409 : vector<2x128xf32>
    %c0_136 = arith.constant 0 : index
    %c0_137 = arith.constant 0 : index
    %411 = vector.load %arg16[%c0_136, %c0_137] : memref<8x128xf32, #tpu.memory_space<vmem>>, vector<8x128xf32>
    %c0_138 = arith.constant 0 : index
    %c0_139 = arith.constant 0 : index
    %412 = vector.load %arg14[%c0_138, %c0_139] : memref<128x128xf32, #tpu.memory_space<vmem>>, vector<128x128xf32>
    %cst_140 = arith.constant dense<0.000000e+00> : vector<2x128xf32>
    %413 = tpu.matmul %410, %412, %cst_140 {dimension_numbers = #tpu.dot_dimension_numbers<[1], [0], [0], [1], [0, 0, 1, 1], [], []>} : vector<2x128xf32>, vector<128x128xf32>, vector<2x128xf32> -> vector<2x128xf32>
    %414 = vector.extract_strided_slice %411 {offsets = [0, 0], sizes = [1, 128], strides = [1, 1]} : vector<8x128xf32> to vector<1x128xf32>
    %415 = vector.broadcast %414 : vector<1x128xf32> to vector<2x128xf32>
    %416 = arith.addf %413, %415 : vector<2x128xf32>
    %417 = vector.extract_strided_slice %411 {offsets = [1, 0], sizes = [1, 128], strides = [1, 1]} : vector<8x128xf32> to vector<1x128xf32>
    %418 = vector.broadcast %417 : vector<1x128xf32> to vector<2x128xf32>
    %419 = arith.mulf %416, %418 : vector<2x128xf32>
    %420 = vector.extract_strided_slice %411 {offsets = [2, 0], sizes = [1, 128], strides = [1, 1]} : vector<8x128xf32> to vector<1x128xf32>
    %421 = vector.broadcast %420 : vector<1x128xf32> to vector<2x128xf32>
    %422 = arith.addf %419, %421 : vector<2x128xf32>
    %cst_141 = arith.constant 0.000000e+00 : f32
    %423 = vector.broadcast %cst_141 : f32 to vector<2x128xf32>
    %424 = arith.maximumf %422, %423 : vector<2x128xf32>
    %425 = arith.mulf %424, %424 : vector<2x128xf32>
    %cst_142 = arith.constant dense<0.000000e+00> : vector<2xf32>
    %426 = vector.multi_reduction <add>, %425, %cst_142 [1] : vector<2x128xf32> to vector<2xf32>
    %427 = vector.shape_cast %426 : vector<2xf32> to vector<2x1xf32>
    %cst_143 = arith.constant 1.000000e-24 : f32
    %428 = vector.broadcast %cst_143 : f32 to vector<2x1xf32>
    %429 = arith.maximumf %427, %428 : vector<2x1xf32>
    %430 = math.rsqrt %429 : vector<2x1xf32>
    %431 = vector.broadcast %430 : vector<2x1xf32> to vector<2x128xf32>
    %432 = arith.mulf %424, %431 : vector<2x128xf32>
    %c0_144 = arith.constant 0 : index
    %c0_145 = arith.constant 0 : index
    %433 = vector.load %arg15[%c0_144, %c0_145] : memref<128x128xf32, #tpu.memory_space<vmem>>, vector<128x128xf32>
    %cst_146 = arith.constant dense<0.000000e+00> : vector<2x128xf32>
    %434 = tpu.matmul %432, %433, %cst_146 {dimension_numbers = #tpu.dot_dimension_numbers<[1], [0], [0], [1], [0, 0, 1, 1], [], []>} : vector<2x128xf32>, vector<128x128xf32>, vector<2x128xf32> -> vector<2x128xf32>
    %435 = arith.mulf %434, %434 : vector<2x128xf32>
    %cst_147 = arith.constant 0.000000e+00 : f32
    %cst_148 = arith.constant 1.000000e+00 : f32
    %436 = vector.broadcast %cst_147 : f32 to vector<2x128xf32>
    %437 = arith.maximumf %436, %435 : vector<2x128xf32>
    %438 = vector.broadcast %cst_148 : f32 to vector<2x128xf32>
    %439 = arith.minimumf %438, %437 : vector<2x128xf32>
    %cst_149 = arith.constant 1.000000e+00 : f32
    %440 = vector.broadcast %cst_149 : f32 to vector<2x128xf32>
    %441 = arith.subf %440, %439 : vector<2x128xf32>
    %442 = math.sqrt %441 : vector<2x128xf32>
    %443 = vector.extract_strided_slice %411 {offsets = [3, 0], sizes = [1, 128], strides = [1, 1]} : vector<8x128xf32> to vector<1x128xf32>
    %444 = vector.broadcast %443 : vector<1x128xf32> to vector<2x128xf32>
    %445 = arith.mulf %434, %444 : vector<2x128xf32>
    %446 = vector.extract_strided_slice %411 {offsets = [4, 0], sizes = [1, 128], strides = [1, 1]} : vector<8x128xf32> to vector<1x128xf32>
    %447 = vector.broadcast %446 : vector<1x128xf32> to vector<2x128xf32>
    %448 = arith.mulf %442, %447 : vector<2x128xf32>
    %449 = arith.subf %445, %448 : vector<2x128xf32>
    %c0_150 = arith.constant 0 : index
    %c0_151 = arith.constant 0 : index
    %c0_152 = arith.constant 0 : index
    %450 = vector.load %arg2[%c0_150, %c0_151, %c0_152] : memref<1x2x128xf32, #tpu.memory_space<vmem>>, vector<1x2x128xf32>
    %451 = vector.shape_cast %450 : vector<1x2x128xf32> to vector<2x128xf32>
    %452 = arith.mulf %451, %449 : vector<2x128xf32>
    %cst_153 = arith.constant 1.000000e+00 : f32
    %453 = vector.broadcast %cst_153 : f32 to vector<2x128xf32>
    %454 = arith.subf %453, %451 : vector<2x128xf32>
    %455 = arith.mulf %454, %434 : vector<2x128xf32>
    %456 = arith.addf %452, %455 : vector<2x128xf32>
    %cst_154 = arith.constant 6.400000e+01 : f32
    %457 = vector.broadcast %cst_154 : f32 to vector<2x128xf32>
    %458 = arith.mulf %457, %456 : vector<2x128xf32>
    %cst_155 = arith.constant 0.000000e+00 : f32
    %459 = vector.broadcast %cst_155 : f32 to vector<6x128xf32>
    %460 = tpu.concatenate %458, %459 in 0 : vector<2x128xf32>, vector<6x128xf32> -> vector<8x128xf32>
    %c0_156 = arith.constant 0 : index
    %c0_157 = arith.constant 0 : index
    %c0_158 = arith.constant 0 : index
    %461 = vector.load %arg17[%c0_156, %c0_157, %c0_158] : memref<1x8x128xf32, #tpu.memory_space<vmem>>, vector<1x8x128xf32>
    %462 = vector.shape_cast %461 : vector<1x8x128xf32> to vector<8x128xf32>
    %463 = vector.shape_cast %460 : vector<8x128xf32> to vector<1x8x128xf32>
    tpu.vector_store %arg17[%c0_156, %c0_157, %c0_158], %463 {strides = array<i32>} : memref<1x8x128xf32, #tpu.memory_space<vmem>>, vector<1x8x128xf32>,
    return
  }
  func.func @transform_0(%arg0: i32) -> (i32, i32, i32) {
    %c0_i32 = arith.constant 0 : i32
    %c0_i32_0 = arith.constant 0 : i32
    %c0_i32_1 = arith.constant 0 : i32
    return %arg0, %c0_i32, %c0_i32_0 : i32, i32, i32
  }
  func.func @transform_1(%arg0: i32) -> (i32, i32, i32) {
    %c0_i32 = arith.constant 0 : i32
    %c0_i32_0 = arith.constant 0 : i32
    %c0_i32_1 = arith.constant 0 : i32
    return %arg0, %c0_i32, %c0_i32_0 : i32, i32, i32
  }
  func.func @transform_2(%arg0: i32) -> (i32, i32, i32) {
    %c0_i32 = arith.constant 0 : i32
    %c0_i32_0 = arith.constant 0 : i32
    %c0_i32_1 = arith.constant 0 : i32
    return %arg0, %c0_i32, %c0_i32_0 : i32, i32, i32
  }
  func.func @transform_3(%arg0: i32) -> (i32, i32, i32) {
    %c0_i32 = arith.constant 0 : i32
    %c0_i32_0 = arith.constant 0 : i32
    %c0_i32_1 = arith.constant 0 : i32
    return %arg0, %c0_i32, %c0_i32_0 : i32, i32, i32
  }
  func.func @transform_4(%arg0: i32) -> (i32, i32, i32) {
    %c0_i32 = arith.constant 0 : i32
    %c0_i32_0 = arith.constant 0 : i32
    %c0_i32_1 = arith.constant 0 : i32
    return %arg0, %c0_i32, %c0_i32_0 : i32, i32, i32
  }
  func.func @transform_5(%arg0: i32) -> (i32, i32, i32) {
    %c0_i32 = arith.constant 0 : i32
    %c0_i32_0 = arith.constant 0 : i32
    %c0_i32_1 = arith.constant 0 : i32
    return %arg0, %c0_i32, %c0_i32_0 : i32, i32, i32
  }
  func.func @transform_6(%arg0: i32) -> (i32, i32, i32) {
    %c0_i32 = arith.constant 0 : i32
    %c0_i32_0 = arith.constant 0 : i32
    %c0_i32_1 = arith.constant 0 : i32
    return %arg0, %c0_i32, %c0_i32_0 : i32, i32, i32
  }
  func.func @transform_7(%arg0: i32) -> (i32, i32, i32) {
    %c0_i32 = arith.constant 0 : i32
    %c0_i32_0 = arith.constant 0 : i32
    %c0_i32_1 = arith.constant 0 : i32
    return %arg0, %c0_i32, %c0_i32_0 : i32, i32, i32
  }
  func.func @transform_8(%arg0: i32) -> (i32, i32, i32) {
    %c0_i32 = arith.constant 0 : i32
    %c0_i32_0 = arith.constant 0 : i32
    %c0_i32_1 = arith.constant 0 : i32
    return %arg0, %c0_i32, %c0_i32_0 : i32, i32, i32
  }
  func.func @transform_9(%arg0: i32) -> (i32, i32) {
    %c0_i32 = arith.constant 0 : i32
    %c0_i32_0 = arith.constant 0 : i32
    %c0_i32_1 = arith.constant 0 : i32
    return %c0_i32, %c0_i32_0 : i32, i32
  }
  func.func @transform_10(%arg0: i32) -> (i32, i32) {
    %c0_i32 = arith.constant 0 : i32
    %c0_i32_0 = arith.constant 0 : i32
    %c0_i32_1 = arith.constant 0 : i32
    return %c0_i32, %c0_i32_0 : i32, i32
  }
  func.func @transform_11(%arg0: i32) -> (i32, i32) {
    %c0_i32 = arith.constant 0 : i32
    %c0_i32_0 = arith.constant 0 : i32
    %c0_i32_1 = arith.constant 0 : i32
    return %c0_i32, %c0_i32_0 : i32, i32
  }
  func.func @transform_12(%arg0: i32) -> (i32, i32) {
    %c0_i32 = arith.constant 0 : i32
    %c0_i32_0 = arith.constant 0 : i32
    %c0_i32_1 = arith.constant 0 : i32
    return %c0_i32, %c0_i32_0 : i32, i32
  }
  func.func @transform_13(%arg0: i32) -> (i32, i32) {
    %c0_i32 = arith.constant 0 : i32
    %c0_i32_0 = arith.constant 0 : i32
    %c0_i32_1 = arith.constant 0 : i32
    return %c0_i32, %c0_i32_0 : i32, i32
  }
  func.func @transform_14(%arg0: i32) -> (i32, i32) {
    %c0_i32 = arith.constant 0 : i32
    %c0_i32_0 = arith.constant 0 : i32
    %c0_i32_1 = arith.constant 0 : i32
    return %c0_i32, %c0_i32_0 : i32, i32
  }
  func.func @transform_15(%arg0: i32) -> (i32, i32) {
    %c0_i32 = arith.constant 0 : i32
    %c0_i32_0 = arith.constant 0 : i32
    %c0_i32_1 = arith.constant 0 : i32
    return %c0_i32, %c0_i32_0 : i32, i32
  }
  func.func @transform_16(%arg0: i32) -> (i32, i32, i32) {
    %c0_i32 = arith.constant 0 : i32
    %c0_i32_0 = arith.constant 0 : i32
    %c0_i32_1 = arith.constant 0 : i32
    return %arg0, %c0_i32, %c0_i32_0 : i32, i32, i32
  }
}

</mosaic_0001>

<bundles_post_ra>
// kernel: run.1
= control target key start
LH: loop header
LB: loop body
LE: loop exit
PB: predicated region body
PF: predicated region fallthrough
CT: control target
= control target key end

     0   :  { %s11627_s0 = inlined_call_operand.vmem [shape: f32[2,48,48], index: 0, kind: input, shape index: {}]   ;;  %s11628_s1 = inlined_call_operand.vmem [shape: f32[2,2,128], index: 1, kind: input, shape index: {}]   ;;  %s11629_s2 = inlined_call_operand.hbm [shape: f32[2,48,128], index: 2, kind: input, shape index: {}]   ;;  %s11630_s3 = inlined_call_operand.hbm [shape: f32[2,48,128], index: 3, kind: input, shape index: {}]   ;;  %s11631_s4 = inlined_call_operand.hbm [shape: f32[2,256,1024], index: 4, kind: input, shape index: {}]   ;;  %s11632_s5 = inlined_call_operand.hbm [shape: f32[2,1024,128], index: 5, kind: input, shape index: {}]   ;;  %s11633_s6 = inlined_call_operand.hbm [shape: f32[2,24,512], index: 6, kind: input, shape index: {}]   ;;  %s11634_s7 = inlined_call_operand.hbm [shape: f32[2,1792,128], index: 7, kind: input, shape index: {}]   ;;  %s11635_s8 = inlined_call_operand.hbm [shape: f32[2,384,128], index: 8, kind: input, shape index: {}]   ;;  %s11636_s9 = inlined_call_operand.hbm [shape: f32[48,48], index: 9, kind: input, shape index: {}]   ;;  %s11637_s10 = inlined_call_operand.hbm [shape: f32[2,48], index: 10, kind: input, shape index: {}]   ;;  %s11638_s11 = inlined_call_operand.hbm [shape: f32[2,48], index: 11, kind: input, shape index: {}]   ;;  %s11639_s12 = inlined_call_operand.hbm [shape: f32[28,48], index: 12, kind: input, shape index: {}]   ;;  %s11640_s13 = inlined_call_operand.hbm [shape: f32[128,128], index: 13, kind: input, shape index: {}]   ;;  %s11641_s14 = inlined_call_operand.hbm [shape: f32[128,128], index: 14, kind: input, shape index: {}]   ;;  %s11642_s15 = inlined_call_operand.hbm [shape: f32[8,128], index: 15, kind: input, shape index: {}]   ;;  %s11643_s16 = inlined_call_operand.vmem [shape: f32[2,8,128], index: 16, kind: output, shape index: {}]  }
   0x1   :  { %11663 = sst [smem:[#allocation39_spill]] %s11627_s0 }
   0x2   :  { %11664 = sst [smem:[#allocation40_spill]] %s11628_s1 }
   0x3   :  { %11665 = sst [smem:[#allocation41_spill]] %s11629_s2 }
   0x4   :  { %11666 = sst [smem:[#allocation42_spill]] %s11630_s3 }
   0x5   :  { %11667 = sst [smem:[#allocation43_spill]] %s11632_s5 }
   0x6   :  { %11668 = sst [smem:[#allocation44_spill]] %s11633_s6 }
   0x7   :  { %11669 = sst [smem:[#allocation45_spill]] %s11635_s8 }
   0x8   :  { %11670 = sst [smem:[#allocation46_spill]] %s11636_s9 }
   0x9   :  { %11671 = sst [smem:[#allocation47_spill]] %s11638_s11 }
   0xa   :  { %11672 = sst [smem:[#allocation48_spill]] %s11640_s13 }
   0xb   :  { %11673 = sst [smem:[#allocation49_spill]] %s11643_s16 }
   0xc   :  { %21 = vsyncpa [#allocation3], 0 }
   0xd   :  { %23 = vsyncpa [#allocation3 + $0x1], 0 }
   0xe   :  { %24 = vsyncpa [#allocation5], 0 }
   0xf   :  { %26 = vsyncpa [#allocation5 + $0x1], 0 }
  0x10   :  { %27 = vsyncpa [#allocation8], 0 }
  0x11   :  { %29 = vsyncpa [#allocation8 + $0x1], 0 }
  0x12   :  { %30 = vsyncpa [#allocation11], 0 }
  0x13   :  { %32 = vsyncpa [#allocation11 + $0x1], 0 }
  0x14   :  { %33 = vsyncpa [#allocation14], 0 }
  0x15   :  { %34 = vsyncpa [#allocation17], 0 }
  0x16   :  { %35 = vsyncpa [#allocation20], 0 }
  0x17   :  { %36 = vsyncpa [#allocation23], 0  ;;  %s8693_s21 = smov 0   ;;  %s8695_s22 = smov 0  }
  0x18   :  { %s8697_s23 = smov 0   ;;  %s8699_s24 = smov 0  }
  0x19 LB: > { %11674 = sst [smem:[#allocation32_spill]] %s8578_s22  ;;  %s8717_s28 = sadd.s32 4294967295, %s8586_s24   ;;  %s8586_s24 = sphi %s8699_s24, %s11719_s24   ;;  %s8582_s23 = sphi %s8697_s23, %s11722_s23   ;;  %s8578_s22 = sphi %s8695_s22, %s11721_s22   ;;  %s8574_s21 = sphi %s8693_s21, %s11720_s21  }
  0x1a   : > { %11675 = sst [smem:[#allocation33_spill]] %s8582_s23  ;;  %p7225_p0 = scmp.ge.s32.totalorder %s8586_s24, 1 }
  0x1b   : > { %s11676_s9 = sld [smem:[#allocation46_spill]]  ;;  %p115_p1 = scmp.eq.s32.totalorder %s8717_s28, 0 }
  0x1c   : > { %11677 = sst [smem:[#allocation34_spill]] %s8717_s28  ;;  %p454_p2 = scmp.lt.s32.totalorder %s8586_s24, 3 }
  0x1d   : > { %s8588_s30 = smov [#allocation13]   ;;  %s11680_s11 = sld [smem:[#allocation47_spill]] }
  0x1e   : > { %p8722_p3 = pnand %p7225_p0, %p454_p2  ;;  %s467_s0 = sshll.u32 %s8588_s30, 4  ;;  %s468_s0 = int_to_ptr.vmem [resolvable:$true] %s467_s0 }
  0x1f   : > { %s11682_s13 = sld [smem:[#allocation48_spill]]  ;;  %s11644_s18 = smov 128  }
  0x20   : > { %s11678_s29 = scalar_select %p8722_p3, 1, 0 }
  0x21   : > { %s465_s27 = sshll.u32 %s11676_s9, 4  ;;  %p7475_p4 = pneg %p8722_p3  ;;  %s466_s27 = int_to_ptr.hbm [resolvable:$true] %s465_s27 }
  0x22   : > { %11679 = sst [smem:[#allocation35_spill]] %s11678_s29  ;;  %s8589_s9 = smov [#allocation16]  }
  0x23   : > { %s492_s19 = sshll.u32 %s11680_s11, 4  ;;  %p8733_p5 = pnand %p7475_p4, %p115_p1  ;;  %s493_s19 = int_to_ptr.hbm [resolvable:$true] %s492_s19 }
  0x24   : > { %s494_s17 = sshll.u32 %s8589_s9, 4  ;;  %s11646_s11 = smov 8   ;;  %s495_s17 = int_to_ptr.vmem [resolvable:$true] %s494_s17 }
  0x25   : > { %s517_s30 = sshll.u32 %s11682_s13, 4  ;;  %s8592_s25 = smov [#allocation19]   ;;  %s518_s30 = int_to_ptr.hbm [resolvable:$true] %s517_s30 }
  0x26   : > { %7478 = dma.hbm_to_vmem [thread:$0]  (!%p8733_p5), %s466_s27, 768, %s468_s0, [#allocation14], %s11644_s18, %s11644_s18, %s11646_s11  }
  0x27   : > { %7484 = dma.hbm_to_vmem [thread:$0]  (!%p8733_p5), %s493_s19, 32, %s495_s17, [#allocation17]  }
  0x28   : > { %s519_s9 = sshll.u32 %s8592_s25, 4  ;;  %s8753_s26 = sadd.s32 1, %s8586_s24   ;;  %s520_s9 = int_to_ptr.vmem [resolvable:$true] %s519_s9 }
  0x29   : > { %7490 = dma.hbm_to_vmem [thread:$0]  (!%p8733_p5), %s518_s30, 2048, %s520_s9, [#allocation20], %s11644_s18, %s11644_s18, %s11646_s11  }
  0x2a   : > { %11683 = sst [smem:[#allocation36_spill]] %s8753_s26  ;;  %s98_s27 = ssub.s32 %s8586_s24, %s8753_s26 }
  0x2b   : > { %s101_s0 = sadd.s32 1, %s8582_s23  ;;  %p99_p6 = scmp.eq.s32.totalorder %s98_s27, 0 }
  0x2c   : > { %p108_p7 = scmp.ne.s32.totalorder %s8582_s23, %s8578_s22  ;;  %p109_p8 = scmp.eq.s32.totalorder %s8586_s24, 0 }
  0x2d   : > { %p114_p9 = scmp.ne.s32.totalorder %s8578_s22, %s8574_s21  ;;  %p7526_p12 = scmp.lt.s32.totalorder %s8586_s24, 2 }
  0x2e   : > { %s8764_s19 = scalar_select %p99_p6, %s8582_s23, %s101_s0  }
  0x2f   : > { %p110_p10 = por %p109_p8, %p108_p7  ;;  %p8768_p11 = por %p115_p1, %p114_p9 }
  0x30   : > { %11684 = sst [smem:[#allocation37_spill]] %s8764_s19  ;;  %s8774_s30 = sand.u32 1, %s8582_s23  }
  0x31   : > { %s11685_s17 = scalar_select %p8768_p11, 1, 0 }
  0x32   : > { %s11653_s25 = smul.u32 48, %s8774_s30  ;;  %s8778_s9 = sand.u32 1, %s8586_s24  }
  0x33   : > { %11686 = sst [smem:[#allocation38_spill]] %s11685_s17  ;;  %s11654_s27 = smul.u32 48, %s8586_s24 }
  0x34   : > { %p8781_p13 = pnand %p7526_p12, %p110_p10  ;;  %s11688_s3 = sld [smem:[#allocation42_spill]] }
  0x35   : > { %s600_s19 = scalar_lea.vmem [#allocation4], %s11653_s25 }
  0x36   : > { %s608_s23 = sshll.u32 %s600_s19, 4  ;;  %p8795_p2 = pneg %p8781_p13  ;;  %s609_s23 = int_to_ptr.vmem [resolvable:$true] %s608_s23 }
  0x3a   : > { %s605_s11 = scalar_lea.hbm %s11688_s3, %s11654_s27  ;;  %s8201_s19 = scalar_lea.hbm %s11688_s3, 96 }
  0x3b   : > { %s606_s13 = sshll.u32 %s605_s11, 4  ;;  %s607_s13 = int_to_ptr.hbm [resolvable:$true] %s606_s13 }
  0x3c   : > { %s8194_s16 = sshra.s32 %s607_s13, 4  ;;  %s8195_s16 = int_to_ptr.hbm [resolvable:$true] %s8194_s16 }
  0x3d   : > { %s8196_s1 = scalar_lea.hbm %s8195_s16, 48  ;;  %p8202_p7 = scmp.lt.s32.totalorder %s8195_s16, %s11688_s3 }
  0x3e   : > { %p8197_p0 = scmp.ne.s32.totalorder %s8195_s16, %s8196_s1  ;;  %p8203_p8 = scmp.lt.s32.totalorder %s8201_s19, %s8196_s1 }
  0x40   : > { %p8199_p4 = pnand %p8795_p2, %p8197_p0  ;;  %p8204_p9 = por %p8203_p8, %p8202_p7 }
  0x42   : > { %p8200_p6 = pneg %p8199_p4 }
  0x44   : > { %p8205_p10 = pnand %p8204_p9, %p8200_p6 }
  0x46   : > { %8208 = shalt.err (!%p8205_p10)
}
  0x47   : > { %s11690_s27 = smov 8   ;;  %s11691_s26 = smov 128  }
  0x48   : > { %s11692_s17 = scalar_lea.sflag [#allocation5], %s8778_s9  ;;  %s7239_s11 = sshll.u32 %s8774_s30, 10 }
  0x49   : > { %7503 = dma.hbm_to_vmem [thread:$0]  (!%p8781_p13), %s607_s13, 768, %s609_s23, %s11692_s17, %s11691_s26, %s11691_s26, %s11690_s27  }
  0x4a   : > { %s7417_s18 = sshll.u32 %s8586_s24, 10  ;;  %s11693_s5 = sld [smem:[#allocation43_spill]] }
  0x4b   : > { %s644_s19 = scalar_lea.vmem [#allocation7], %s7239_s11  ;;  %s11661_s22 = scalar_lea.sflag [#allocation8], %s8778_s9 }
  0x4c   : > { %s652_s0 = sshll.u32 %s644_s19, 4  ;;  %s653_s0 = int_to_ptr.vmem [resolvable:$true] %s652_s0 }
  0x50   : > { %s649_s1 = scalar_lea.hbm %s11693_s5, %s7417_s18  ;;  %s8231_s17 = scalar_lea.hbm %s11693_s5, 2048 }
  0x51   : > { %s650_s3 = sshll.u32 %s649_s1, 4  ;;  %s651_s3 = int_to_ptr.hbm [resolvable:$true] %s650_s3 }
  0x52   : > { %s8224_s29 = sshra.s32 %s651_s3, 4  ;;  %s8225_s29 = int_to_ptr.hbm [resolvable:$true] %s8224_s29 }
  0x53   : > { %s8226_s8 = scalar_lea.hbm %s8225_s29, 1024  ;;  %p8232_p6 = scmp.lt.s32.totalorder %s8225_s29, %s11693_s5 }
  0x54   : > { %p8227_p12 = scmp.ne.s32.totalorder %s8225_s29, %s8226_s8  ;;  %p8233_p7 = scmp.lt.s32.totalorder %s8231_s17, %s8226_s8 }
  0x56   : > { %p8229_p0 = pnand %p8227_p12, %p8795_p2  ;;  %p8234_p8 = por %p8233_p7, %p8232_p6 }
  0x58   : > { %p8230_p4 = pneg %p8229_p0 }
  0x5a   : > { %p8235_p9 = pnand %p8234_p8, %p8230_p4 }
  0x5c   : > { %8238 = shalt.err (!%p8235_p9)
}
  0x5d   : > { %7509 = dma.hbm_to_vmem [thread:$0]  (!%p8781_p13), %s651_s3, 16384, %s653_s0, %s11661_s22, %s11691_s26, %s11691_s26, %s11690_s27  }
  0x5e   : > { %s7424_s11 = smul.u32 1792, %s8774_s30  ;;  %s480_s6 = sshll.u32 %s11637_s10, 4  ;;  %s481_s6 = int_to_ptr.hbm [resolvable:$true] %s480_s6 }
  0x5f   : > { %s7425_s8 = smul.u32 1792, %s8586_s24  ;;  %s8593_s25 = smov [#allocation15]  }
  0x60   : > { %s688_s13 = scalar_lea.vmem [#allocation10], %s7424_s11  ;;  %s482_s5 = sshll.u32 %s8593_s25, 4  ;;  %s483_s5 = int_to_ptr.vmem [resolvable:$true] %s482_s5 }
  0x61   : > { %s693_s19 = scalar_lea.hbm %s11634_s7, %s7425_s8  ;;  %s696_s23 = sshll.u32 %s688_s13, 4  ;;  %s697_s23 = int_to_ptr.vmem [resolvable:$true] %s696_s23 }
  0x62   : > { %s694_s17 = sshll.u32 %s693_s19, 4  ;;  %s11662_s3 = scalar_lea.sflag [#allocation11], %s8778_s9  ;;  %s695_s17 = int_to_ptr.hbm [resolvable:$true] %s694_s17 }
  0x63   : > { %s8254_s0 = sshra.s32 %s695_s17, 4  ;;  %s8261_s29 = scalar_lea.hbm %s11634_s7, 3584  ;;  %s8255_s0 = int_to_ptr.hbm [resolvable:$true] %s8254_s0 }
  0x64   : > { %s8256_s22 = scalar_lea.hbm %s8255_s0, 1792  ;;  %p8262_p4 = scmp.lt.s32.totalorder %s8255_s0, %s11634_s7 }
  0x65   : > { %p8257_p10 = scmp.ne.s32.totalorder %s8255_s0, %s8256_s22  ;;  %p8263_p6 = scmp.lt.s32.totalorder %s8261_s29, %s8256_s22 }
  0x67   : > { %p8259_p12 = pnand %p8257_p10, %p8795_p2  ;;  %p8264_p7 = por %p8263_p6, %p8262_p4 }
  0x69   : > { %p8260_p0 = pneg %p8259_p12 }
  0x6b   : > { %p8265_p8 = pnand %p8264_p7, %p8260_p0 }
  0x6d   : > { %8268 = shalt.err (!%p8265_p8)
}
  0x6e   : > { %7515 = dma.hbm_to_vmem [thread:$0]  (!%p8781_p13), %s695_s17, 28672, %s697_s23, %s11662_s3, %s11691_s26, %s11691_s26, %s11690_s27  }
  0x6f   : > { %s503_s13 = sshll.u32 %s11639_s12, 4  ;;  %s8594_s22 = smov [#allocation18]   ;;  %s504_s13 = int_to_ptr.hbm [resolvable:$true] %s503_s13 }
  0x70   : > { %7481 = dma.hbm_to_vmem [thread:$0]  (!%p8733_p5), %s481_s6, 32, %s483_s5, [#allocation14]  }
  0x71   : > { %s505_s25 = sshll.u32 %s8594_s22, 4  ;;  %s531_s16 = sshll.u32 %s11641_s14, 4  ;;  %s506_s25 = int_to_ptr.vmem [resolvable:$true] %s505_s25  ;;  %s532_s16 = int_to_ptr.hbm [resolvable:$true] %s531_s16 }
  0x72   : > { %7487 = dma.hbm_to_vmem [thread:$0]  (!%p8733_p5), %s504_s13, 512, %s506_s25, [#allocation17], %s11691_s26, %s11691_s26, %s11690_s27  }
  0x73   : > { %s546_s5 = sshll.u32 %s11642_s15, 4  ;;  %s8595_s6 = smov [#allocation21]   ;;  %s547_s5 = int_to_ptr.hbm [resolvable:$true] %s546_s5 }
  0x74   : > { %s533_s29 = sshll.u32 %s8595_s6, 4  ;;  %s8596_s8 = smov [#allocation22]   ;;  %s534_s29 = int_to_ptr.vmem [resolvable:$true] %s533_s29 }
  0x75   : > { %7493 = dma.hbm_to_vmem [thread:$0]  (!%p8733_p5), %s532_s16, 2048, %s534_s29, [#allocation20], %s11691_s26, %s11691_s26, %s11690_s27  }
  0x76   : > { %s548_s11 = sshll.u32 %s8596_s8, 4  ;;  %s11694_s1 = smul.u32 48, %s8586_s24  ;;  %s549_s11 = int_to_ptr.vmem [resolvable:$true] %s548_s11 }
  0x77   : > { %7496 = dma.hbm_to_vmem [thread:$0]  (!%p8733_p5), %s547_s5, 128, %s549_s11, [#allocation23]  }
  0x78   : > { %s11695_s2 = sld [smem:[#allocation41_spill]]  ;;  %s11696_s25 = smul.u32 48, %s8774_s30 }
  0x79   : > { %s7236_s17 = sshll.u32 %s8774_s30, 11  ;;  %s575_s6 = scalar_lea.sflag [#allocation3], %s8774_s30 }
  0x7a   : > { %s578_s0 = scalar_lea.vmem [#allocation2], %s11696_s25 }
  0x7b   : > { %s586_s18 = sshll.u32 %s578_s0, 4  ;;  %s587_s18 = int_to_ptr.vmem [resolvable:$true] %s586_s18 }
  0x7e   : > { %s583_s22 = scalar_lea.hbm %s11695_s2, %s11694_s1  ;;  %s8411_s8 = scalar_lea.hbm %s11695_s2, 96 }
  0x7f   : > { %s584_s23 = sshll.u32 %s583_s22, 4  ;;  %s585_s23 = int_to_ptr.hbm [resolvable:$true] %s584_s23 }
  0x80   : > { %s8404_s16 = sshra.s32 %s585_s23, 4  ;;  %s8405_s16 = int_to_ptr.hbm [resolvable:$true] %s8404_s16 }
  0x81   : > { %s8406_s29 = scalar_lea.hbm %s8405_s16, 48  ;;  %p8412_p12 = scmp.lt.s32.totalorder %s8405_s16, %s11695_s2 }
  0x82   : > { %p8407_p9 = scmp.ne.s32.totalorder %s8405_s16, %s8406_s29  ;;  %p8413_p0 = scmp.lt.s32.totalorder %s8411_s8, %s8406_s29 }
  0x84   : > { %p8409_p10 = pnand %p8407_p9, %p8795_p2  ;;  %p8414_p4 = por %p8413_p0, %p8412_p12 }
  0x86   : > { %p8410_p5 = pneg %p8409_p10 }
  0x88   : > { %p8415_p6 = pnand %p8414_p4, %p8410_p5 }
  0x8a   : > { %8418 = shalt.err (!%p8415_p6)
}
  0x8b   : > { %7500 = dma.hbm_to_vmem [thread:$0]  (!%p8781_p13), %s585_s23, 768, %s587_s18, %s575_s6, %s11691_s26, %s11691_s26, %s11690_s27  }
  0x8c   : > { %s7416_s19 = sshll.u32 %s8586_s24, 11  ;;  %s622_s0 = scalar_lea.vmem [#allocation6], %s7236_s17 }
  0x8d   : > { %s627_s25 = scalar_lea.hbm %s11631_s4, %s7416_s19  ;;  %s630_s16 = sshll.u32 %s622_s0, 4  ;;  %s631_s16 = int_to_ptr.vmem [resolvable:$true] %s630_s16 }
  0x8e   : > { %s628_s29 = sshll.u32 %s627_s25, 4  ;;  %s7422_s20 = smul.u32 96, %s8774_s30  ;;  %s629_s29 = int_to_ptr.hbm [resolvable:$true] %s628_s29 }
  0x8f   : > { %s8434_s5 = sshra.s32 %s629_s29, 4  ;;  %s8441_s23 = scalar_lea.hbm %s11631_s4, 4096  ;;  %s8435_s5 = int_to_ptr.hbm [resolvable:$true] %s8434_s5 }
  0x90   : > { %s8436_s8 = scalar_lea.hbm %s8435_s5, 2048  ;;  %p8442_p10 = scmp.lt.s32.totalorder %s8435_s5, %s11631_s4 }
  0x91   : > { %p8437_p7 = scmp.ne.s32.totalorder %s8435_s5, %s8436_s8  ;;  %p8443_p5 = scmp.lt.s32.totalorder %s8441_s23, %s8436_s8 }
  0x93   : > { %p8439_p8 = pnand %p8437_p7, %p8795_p2  ;;  %p8444_p12 = por %p8443_p5, %p8442_p10 }
  0x95   : > { %p8440_p9 = pneg %p8439_p8 }
  0x97   : > { %p8445_p0 = pnand %p8444_p12, %p8440_p9 }
  0x99   : > { %8448 = shalt.err (!%p8445_p0)
}
  0x9a   : > { %s8597_s17 = smov 1024   ;;  %s8598_s19 = smov 64  }
  0x9b   : > { %s11697_s13 = scalar_lea.sflag [#allocation5], %s8778_s9  ;;  %s7423_s22 = smul.u32 96, %s8586_s24 }
  0x9c   : > { %7506 = dma.hbm_to_vmem [thread:$0]  (!%p8781_p13), %s629_s29, 32768, %s631_s16, %s11697_s13, %s8597_s17, %s8597_s17, %s8598_s19  }
  0x9d   : > { %s666_s25 = scalar_lea.vmem [#allocation9], %s7422_s20  ;;  %s11698_s5 = sld [smem:[#allocation44_spill]] }
  0x9e   : > { %s674_s0 = sshll.u32 %s666_s25, 4  ;;  %s7426_s6 = smul.u32 384, %s8774_s30  ;;  %s675_s0 = int_to_ptr.vmem [resolvable:$true] %s674_s0 }
  0xa3   : > { %s671_s8 = scalar_lea.hbm %s11698_s5, %s7423_s22  ;;  %s8471_s29 = scalar_lea.hbm %s11698_s5, 192 }
  0xa4   : > { %s672_s23 = sshll.u32 %s671_s8, 4  ;;  %s673_s23 = int_to_ptr.hbm [resolvable:$true] %s672_s23 }
  0xa5   : > { %s8464_s1 = sshra.s32 %s673_s23, 4  ;;  %s8465_s1 = int_to_ptr.hbm [resolvable:$true] %s8464_s1 }
  0xa6   : > { %s8466_s3 = scalar_lea.hbm %s8465_s1, 96  ;;  %p8472_p8 = scmp.lt.s32.totalorder %s8465_s1, %s11698_s5 }
  0xa7   : > { %p8467_p4 = scmp.ne.s32.totalorder %s8465_s1, %s8466_s3  ;;  %p8473_p9 = scmp.lt.s32.totalorder %s8471_s29, %s8466_s3 }
  0xa9   : > { %p8469_p6 = pnand %p8467_p4, %p8795_p2  ;;  %p8474_p10 = por %p8473_p9, %p8472_p8 }
  0xab   : > { %p8470_p7 = pneg %p8469_p6 }
  0xad   : > { %p8475_p5 = pnand %p8474_p10, %p8470_p7 }
  0xaf   : > { %8478 = shalt.err (!%p8475_p5)
}
  0xb0   : > { %s8599_s30 = smov 512   ;;  %s8600_s19 = smov 32  }
  0xb1   : > { %s11699_s13 = scalar_lea.sflag [#allocation8], %s8778_s9  ;;  %s7427_s22 = smul.u32 384, %s8586_s24 }
  0xb2   : > { %7512 = dma.hbm_to_vmem [thread:$0]  (!%p8781_p13), %s673_s23, 1536, %s675_s0, %s11699_s13, %s8599_s30, %s8599_s30, %s8600_s19  }
  0xb3   : > { %s710_s2 = scalar_lea.vmem [#allocation12], %s7426_s6  ;;  %s11700_s8 = sld [smem:[#allocation45_spill]] }
  0xb4   : > { %s718_s25 = sshll.u32 %s710_s2, 4  ;;  %s719_s25 = int_to_ptr.vmem [resolvable:$true] %s718_s25 }
  0xb9   : > { %s715_s1 = scalar_lea.hbm %s11700_s8, %s7427_s22  ;;  %s8501_s24 = scalar_lea.hbm %s11700_s8, 768 }
  0xba   : > { %s716_s3 = sshll.u32 %s715_s1, 4  ;;  %s717_s3 = int_to_ptr.hbm [resolvable:$true] %s716_s3 }
  0xbb   : > { %s8494_s16 = sshra.s32 %s717_s3, 4  ;;  %s8495_s16 = int_to_ptr.hbm [resolvable:$true] %s8494_s16 }
  0xbc   : > { %s8496_s29 = scalar_lea.hbm %s8495_s16, 384  ;;  %p8502_p6 = scmp.lt.s32.totalorder %s8495_s16, %s11700_s8 }
  0xbd   : > { %p8497_p12 = scmp.ne.s32.totalorder %s8495_s16, %s8496_s29  ;;  %p8503_p7 = scmp.lt.s32.totalorder %s8501_s24, %s8496_s29 }
  0xbf   : > { %p8499_p0 = pnand %p8497_p12, %p8795_p2  ;;  %p8504_p8 = por %p8503_p7, %p8502_p6 }
  0xc1   : > { %p8500_p4 = pneg %p8499_p0 }
  0xc3   : > { %p8505_p9 = pnand %p8504_p8, %p8500_p4 }
  0xc5   : > { %8508 = shalt.err (!%p8505_p9)
}
  0xc6   : > { %s11701_s28 = scalar_lea.sflag [#allocation11], %s8778_s9  ;;  %730 = sbr.rel (%p8722_p3) target bundleno = 6222 (0x184e), region = 84 }
  0xc7   : > { %7518 = dma.hbm_to_vmem [thread:$0]  (!%p8781_p13), %s717_s3, 6144, %s719_s25, %s11701_s28, %s11691_s26, %s11691_s26, %s11690_s27  }
  0xc8   : > { %s11703_s30 = sld [smem:[#allocation32_spill]] (!%p8722_p3) }
  0xce   : > { %s732_s13 = sand.u32 1, %s11703_s30  }
  0xcf   : > { %s7428_s22 = smul.u32 48, %s732_s13  ;;  %s733_s2 = scalar_lea.sflag [#allocation3], %s732_s13 }
  0xd1   : > { %s8960_s11 = scalar_lea.vmem [#allocation2], %s7428_s22 }
  0xd2   : > { %8541 = dma.done.wait (%p8768_p11), %s733_s2, 768  }
  0xd3   : > { %8543 = vsyncadd (%p8768_p11), %s733_s2, 4294966528  ;;  %s11705_s21 = sld [smem:[#allocation34_spill]]  ;;  %s8967_s26 = scalar_lea.vmem [#allocation4], %s7428_s22 }
  0xd9   : > { %s742_s18 = sand.u32 1, %s11705_s21  }
  0xda   : > { %s743_s9 = scalar_lea.sflag [#allocation5], %s742_s18 }
  0xdb   : > { %8545 = dma.done.wait (%p8768_p11), %s743_s9, 33536  }
  0xdc   : > { %8547 = vsyncadd (%p8768_p11), %s743_s9, 4294933760  ;;  %s7246_s27 = sshll.u32 %s732_s13, 11  ;;  %s7247_s25 = sshll.u32 %s732_s13, 10 }
  0xdd   : > { %s8973_s1 = scalar_lea.vmem [#allocation6], %s7246_s27  ;;  %s763_s3 = scalar_lea.sflag [#allocation8], %s742_s18 }
  0xde   : > { %s8975_s16 = scalar_lea.vmem [#allocation7], %s7247_s25 }
  0xdf   : > { %8549 = dma.done.wait (%p8768_p11), %s763_s3, 17920  }
  0xe0   : > { %8551 = vsyncadd (%p8768_p11), %s763_s3, 4294949376  ;;  %s7429_s29 = smul.u32 96, %s732_s13  ;;  %s783_s24 = scalar_lea.sflag [#allocation11], %s742_s18 }
  0xe1   : > { %s7430_s20 = smul.u32 1792, %s732_s13 }
  0xe2   : > { %s8981_s17 = scalar_lea.vmem [#allocation9], %s7429_s29 }
  0xe3   : > { %s8983_s0 = scalar_lea.vmem [#allocation10], %s7430_s20 }
  0xe4   : > { %8553 = dma.done.wait (%p8768_p11), %s783_s24, 34816  }
  0xe5   : > { %8555 = vsyncadd (%p8768_p11), %s783_s24, 4294932480  ;;  %s7431_s23 = smul.u32 384, %s732_s13 }
  0xe7   : > { %s8989_s28 = scalar_lea.vmem [#allocation12], %s7431_s23 }
  0xe8   : > { %8557 = dma.done.wait (%p115_p1), [#allocation14], 800  }
  0xe9   : > { %8559 = vsyncadd (%p115_p1), [#allocation14], 4294966496 }
  0xea   : > { %8561 = dma.done.wait (%p115_p1), [#allocation17], 544  }
  0xeb   : > { %8563 = vsyncadd (%p115_p1), [#allocation17], 4294966752 }
  0xec   : > { %8565 = dma.done.wait (%p115_p1), [#allocation20], 4096  }
  0xed   : > { %8567 = vsyncadd (%p115_p1), [#allocation20], 4294963200 }
  0xee   : > { %8569 = dma.done.wait (%p115_p1), [#allocation23], 128  }
  0xef   : > { %8571 = vsyncadd (%p115_p1), [#allocation23], 4294967168  ;;  %p919_p3 = scmp.lt.s32.totalorder %s11705_s21, 1  ;;  %v943_v0 = vld [vmem:[%s8967_s26 + $0x28] sm:$0xff]  ;;  %v942_v1 = vld [vmem:[%s8967_s26 + $0x20] sm:$0xff]  ;;  %s11706_s13 = sld [smem:[#allocation39_spill]] }
  0xf0   : > { %979 = vmatpush.msra.mxu0 %v943_v0  ;;  %v941_v2 = vld [vmem:[%s8967_s26 + $0x18] sm:$0xff]  ;;  %v940_v3 = vld [vmem:[%s8967_s26 + $0x10] sm:$0xff]  ;;  %v939_v4 = vld [vmem:[%s8967_s26 + $0x8] sm:$0xff]  ;;  %vm950_vm0 = vcmask 392192   ;;  %v8601_v30 = vmov 128.0   ;;  %s8602_s2 = smov 96  }
  0xf1   : > { %s11724_s21 = smov (!%p919_p3, %s11705_s21), 1  ;;  %v938_v5 = vld [vmem:[%s8967_s26] sm:$0xff]  ;;  %v945_v15 = vld [vmem:[%s8960_s11 + $0x8] sm:$0xff]  ;;  %v946_v18 = vld [vmem:[%s8960_s11 + $0x10] sm:$0xff]  ;;  %7709 = vrcp.f32 %v8601_v30  ;;  %s8604_s18 = smov 64  }
  0xf2   : > { %s7432_s6 = smul.u32 48, %s11724_s21  ;;  %980 = vmatpush.msra.mxu0 %v942_v1  ;;  %v944_v12 = vld [vmem:[%s8960_s11] sm:$0xff]  ;;  %v947_v21 = vld [vmem:[%s8960_s11 + $0x18] sm:$0xff]  ;;  %v949_v27 = vld [vmem:[%s8960_s11 + $0x28] sm:$0xff]  ;;  %s7256_s9 = sshll.u32 %s11724_s21, 1 }
  0xf3   : > { %v948_v24 = vld [vmem:[%s8960_s11 + $0x20] sm:$0xff]  ;;  %v1206_v46 = vld [vmem:[%s8973_s1 + $0x3c8] sm:$0xff]  ;;  %s8603_s11 = smov 32   ;;  %s11717_s25 = sld [smem:[#allocation40_spill]] }
  0xf4   : > { %981 = vmatpush.msra.mxu0 %v941_v2  ;;  %v1205_v45 = vld [vmem:[%s8973_s1 + $0x3c0] sm:$0xff]  ;;  %v1207_v47 = vld [vmem:[%s8973_s1 + $0x3d0] sm:$0xff]  ;;  %1246 = vmatpush.msra.mxu2 %v1206_v46  ;;  %v1203_v50 = vld [vmem:[%s8973_s1 + $0x388] sm:$0xff]  ;;  %s7257_s3 = sshll.u32 %s11724_s21, 3  ;;  %s11718_s20 = sld [smem:[#allocation49_spill]] }
  0xf5   : > { %s923_s22 = scalar_lea.vmem %s11706_s13, %s7432_s6  ;;  %1211 = vmatpush.msra.mxu1 %v1205_v45  ;;  %v1202_v49 = vld [vmem:[%s8973_s1 + $0x380] sm:$0xff]  ;;  %v1204_v51 = vld [vmem:[%s8973_s1 + $0x390] sm:$0xff]  ;;  %1281 = vmatpush.msra.mxu3 %v1207_v47  ;;  %v1167_v46 = vld [vmem:[%s8973_s1 + $0x88] sm:$0xff] }
  0xf6   : > { %982 = vmatpush.msra.mxu0 %v940_v3  ;;  %v932_v6 = vld [vmem:[%s923_s22] sm:$0xff]  ;;  %v933_v7 = vld [vmem:[%s923_s22 + $0x8] sm:$0xff]  ;;  %v934_v8 = vld [vmem:[%s923_s22 + $0x10] sm:$0xff]  ;;  %1247 = vmatpush.msra.mxu2 %v1203_v50 }
  0xf7   : > { %v935_v9 = vld [vmem:[%s923_s22 + $0x18] sm:$0xff]  ;;  %v936_v10 = vld [vmem:[%s923_s22 + $0x20] sm:$0xff]  ;;  %v937_v11 = vld [vmem:[%s923_s22 + $0x28] sm:$0xff]  ;;  %v7710_v31 = vpop.eup %7709  ;;  %1212 = vmatpush.msra.mxu1 %v1202_v49  ;;  %1282 = vmatpush.msra.mxu3 %v1204_v51 }
  0xf8   : > { %983 = vmatpush.msra.mxu0 %v939_v4  ;;  %v1032_v32 = vmul.f32 128.0, %v7710_v31  ;;  %vm1036_vm1 = vweird.f32 %v7710_v31  ;;  %v1199_v3 = vld [vmem:[%s8973_s1 + $0x340] sm:$0xff]  ;;  %v1200_v4 = vld [vmem:[%s8973_s1 + $0x348] sm:$0xff]  ;;  %v1168_v47 = vld [vmem:[%s8973_s1 + $0x90] sm:$0xff] }
  0xf9   : > { %1213 = vmatpush.msra.mxu1 %v1199_v3  ;;  %1248 = vmatpush.msra.mxu2 %v1200_v4  ;;  %v1178_v30 = vld [vmem:[%s8973_s1 + $0x180] sm:$0xff]  ;;  %v1164_v49 = vld [vmem:[%s8973_s1 + $0x48] sm:$0xff]  ;;  %v1165_v50 = vld [vmem:[%s8973_s1 + $0x50] sm:$0xff] }
  0xfa   : > { %984 = vmatpush.msra.mxu0 %v938_v5  ;;  %v1033_v33 = vsub.f32 1.0, %v1032_v32  ;;  %v1201_v5 = vld [vmem:[%s8973_s1 + $0x350] sm:$0xff]  ;;  %v1166_v45 = vld [vmem:[%s8973_s1 + $0x80] sm:$0xff] }
  0xfb   : > { %7258 = vmatmul.msk.f32.vlgmr.msra.gmra.mxu0 %vm950_vm0, %v932_v6  ;;  %1283 = vmatpush.msra.mxu3 %v1201_v5  ;;  %v1196_v6 = vld [vmem:[%s8973_s1 + $0x300] sm:$0xff]  ;;  %v1180_v32 = vld [vmem:[%s8973_s1 + $0x190] sm:$0xff] }
  0xfc   : > { %v1034_v34 = vmul.f32 %v7710_v31, %v1033_v33  ;;  %1214 = vmatpush.msra.mxu1 %v1196_v6  ;;  %v1175_v33 = vld [vmem:[%s8973_s1 + $0x140] sm:$0xff] }
  0xfd   : > { %v1160_v51 = vld [vmem:[%s8973_s1] sm:$0xff] }
  0xfe   : > { %v1035_v35 = vadd.f32 %v7710_v31, %v1034_v34  ;;  %v1176_v34 = vld [vmem:[%s8973_s1 + $0x148] sm:$0xff] }
 0x100   : > { %v9051_v36 = vsel %vm1036_vm1, %v7710_v31, %v1035_v35  ;;  %v1179_v31 = vld [vmem:[%s8973_s1 + $0x188] sm:$0xff]  ;;  %v1177_v35 = vld [vmem:[%s8973_s1 + $0x150] sm:$0xff] }
 0x103   : > { %7259 = vmatmul.msk.f32.gmra.mxu0 %vm950_vm0, %v933_v7  ;;  %v1197_v7 = vld [vmem:[%s8973_s1 + $0x308] sm:$0xff] }
 0x104   : > { %1249 = vmatpush.msra.mxu2 %v1197_v7  ;;  %v9141_v7 = vld [vmem:[%s8981_s17] sm:$0xff] }
 0x10b   : > { %7260 = vmatmul.msk.f32.gmra.mxu0 %vm950_vm0, %v934_v8  ;;  %v1198_v8 = vld [vmem:[%s8973_s1 + $0x310] sm:$0xff] }
 0x10c   : > { %1284 = vmatpush.msra.mxu3 %v1198_v8 }
 0x113   : > { %7261 = vmatmul.msk.f32.gmra.mxu0 %vm950_vm0, %v935_v9  ;;  %v1193_v9 = vld [vmem:[%s8973_s1 + $0x2c0] sm:$0xff] }
 0x114   : > { %1215 = vmatpush.msra.mxu1 %v1193_v9 }
 0x11b   : > { %7262 = vmatmul.msk.f32.gmra.mxu0 %vm950_vm0, %v936_v10  ;;  %v1194_v10 = vld [vmem:[%s8973_s1 + $0x2c8] sm:$0xff] }
 0x11c   : > { %1250 = vmatpush.msra.mxu2 %v1194_v10 }
 0x123   : > { %7263 = vmatmul.msk.f32.gmra.mxu0 %vm950_vm0, %v937_v11  ;;  %v1195_v11 = vld [vmem:[%s8973_s1 + $0x2d0] sm:$0xff] }
 0x124   : > { %1285 = vmatpush.msra.mxu3 %v1195_v11 }
 0x178   : > { %v986_v13 = vpop.f32.mrf.mxu0 }
 0x179   : > { %v9028_v14 = vadd.f32 %v986_v13, %v944_v12  ;;  %v1190_v12 = vld [vmem:[%s8973_s1 + $0x280] sm:$0xff]  ;;  %v1191_v13 = vld [vmem:[%s8973_s1 + $0x288] sm:$0xff] }
 0x17a   : > { %1216 = vmatpush.msra.mxu1 %v1190_v12  ;;  %1251 = vmatpush.msra.mxu2 %v1191_v13  ;;  %v9144_v12 = vperm.slane %v9141_v7, 0 }
 0x17b   : > { %1019 = vadd.xlane.f32.xlu0 %v9028_v14 }
 0x180   : > { %v989_v16 = vpop.f32.mrf.mxu0 }
 0x181   : > { %v9032_v17 = vadd.f32 %v989_v16, %v945_v15  ;;  %v1192_v15 = vld [vmem:[%s8973_s1 + $0x290] sm:$0xff]  ;;  %v1187_v16 = vld [vmem:[%s8973_s1 + $0x240] sm:$0xff] }
 0x182   : > { %1286 = vmatpush.msra.mxu3 %v1192_v15  ;;  %1217 = vmatpush.msra.mxu1 %v1187_v16 }
 0x183   : > { %1021 = vadd.xlane.f32.xlu0 %v9032_v17 }
 0x188   : > { %v992_v19 = vpop.f32.mrf.mxu0 }
 0x189   : > { %v9036_v20 = vadd.f32 %v992_v19, %v946_v18  ;;  %v1188_v18 = vld [vmem:[%s8973_s1 + $0x248] sm:$0xff]  ;;  %v1189_v19 = vld [vmem:[%s8973_s1 + $0x250] sm:$0xff] }
 0x18a   : > { %1252 = vmatpush.msra.mxu2 %v1188_v18  ;;  %1287 = vmatpush.msra.mxu3 %v1189_v19  ;;  %v9148_v18 = vperm.slane %v9141_v7, 1 }
 0x18b   : > { %1023 = vadd.xlane.f32.xlu1 %v9036_v20 }
 0x190   : > { %v995_v22 = vpop.f32.mrf.mxu0 }
 0x191   : > { %v9040_v23 = vadd.f32 %v995_v22, %v947_v21  ;;  %v1184_v21 = vld [vmem:[%s8973_s1 + $0x200] sm:$0xff]  ;;  %v1185_v22 = vld [vmem:[%s8973_s1 + $0x208] sm:$0xff] }
 0x192   : > { %1218 = vmatpush.msra.mxu1 %v1184_v21  ;;  %1253 = vmatpush.msra.mxu2 %v1185_v22 }
 0x193   : > { %1025 = vadd.xlane.f32.xlu1 %v9040_v23 }
 0x198   : > { %v998_v25 = vpop.f32.mrf.mxu0 }
 0x199   : > { %v9044_v26 = vadd.f32 %v998_v25, %v948_v24  ;;  %v1186_v24 = vld [vmem:[%s8973_s1 + $0x210] sm:$0xff]  ;;  %v1181_v25 = vld [vmem:[%s8973_s1 + $0x1c0] sm:$0xff] }
 0x19a   : > { %1288 = vmatpush.msra.mxu3 %v1186_v24  ;;  %1219 = vmatpush.msra.mxu1 %v1181_v25 }
 0x19b   : > { %1027 = vadd.xlane.f32.xlu2 %v9044_v26 }
 0x19c   : > { %1220 = vmatpush.msra.mxu1 %v1178_v30 }
 0x19e   : > { %1221 = vmatpush.msra.mxu1 %v1175_v33 }
 0x1a0   : > { %v1001_v28 = vpop.f32.mrf.mxu0 }
 0x1a1   : > { %v9048_v29 = vadd.f32 %v1001_v28, %v949_v27  ;;  %v1182_v27 = vld [vmem:[%s8973_s1 + $0x1c8] sm:$0xff]  ;;  %v1183_v28 = vld [vmem:[%s8973_s1 + $0x1d0] sm:$0xff] }
 0x1a2   : > { %1254 = vmatpush.msra.mxu2 %v1182_v27  ;;  %1289 = vmatpush.msra.mxu3 %v1183_v28 }
 0x1a3   : > { %1029 = vadd.xlane.f32.xlu2 %v9048_v29 }
 0x1a4   : > { %1255 = vmatpush.msra.mxu2 %v1179_v31  ;;  %1290 = vmatpush.msra.mxu3 %v1180_v32 }
 0x1a6   : > { %1256 = vmatpush.msra.mxu2 %v1176_v34  ;;  %1291 = vmatpush.msra.mxu3 %v1177_v35 }
 0x1ee   : > { %v1020_v37 = vpop.xlane.xlu0 %1019 }
 0x1ef   : > { %v1038_v38 = vmul.f32 %v9051_v36, %v1020_v37  ;;  %v1172_v37 = vld [vmem:[%s8973_s1 + $0x100] sm:$0xff] }
 0x1f0   : > { %1222 = vmatpush.msra.mxu1 %v1172_v37 }
 0x1f1   : > { %v9055_v39 = vsub.f32 %v9028_v14, %v1038_v38  ;;  %v1173_v38 = vld [vmem:[%s8973_s1 + $0x108] sm:$0xff] }
 0x1f2   : > { %1257 = vmatpush.msra.mxu2 %v1173_v38 }
 0x1f3   : > { %v1050_v40 = vmul.f32 %v9055_v39, %v9055_v39 }
 0x1f5   : > { %1056 = vadd.xlane.f32.xlu0 %v1050_v40  ;;  %v1174_v40 = vld [vmem:[%s8973_s1 + $0x110] sm:$0xff] }
 0x1f6   : > { %v1022_v41 = vpop.xlane.xlu0 %1021  ;;  %1292 = vmatpush.msra.mxu3 %v1174_v40 }
 0x1f7   : > { %v1039_v42 = vmul.f32 %v9051_v36, %v1022_v41  ;;  %v1169_v41 = vld [vmem:[%s8973_s1 + $0xc0] sm:$0xff] }
 0x1f8   : > { %1223 = vmatpush.msra.mxu1 %v1169_v41 }
 0x1f9   : > { %v9061_v43 = vsub.f32 %v9032_v17, %v1039_v42  ;;  %v1170_v42 = vld [vmem:[%s8973_s1 + $0xc8] sm:$0xff] }
 0x1fa   : > { %1258 = vmatpush.msra.mxu2 %v1170_v42  ;;  %1224 = vmatpush.msra.mxu1 %v1166_v45 }
 0x1fb   : > { %v1051_v44 = vmul.f32 %v9061_v43, %v9061_v43 }
 0x1fc   : > { %1259 = vmatpush.msra.mxu2 %v1167_v46 }
 0x1fd   : > { %1058 = vadd.xlane.f32.xlu1 %v1051_v44  ;;  %v1171_v44 = vld [vmem:[%s8973_s1 + $0xd0] sm:$0xff] }
 0x1fe   : > { %v1024_v48 = vpop.xlane.xlu1 %1023  ;;  %1293 = vmatpush.msra.mxu3 %v1171_v44  ;;  %1260 = vmatpush.msra.mxu2 %v1164_v49 }
 0x1ff   : > { %v1040_v52 = vmul.f32 %v9051_v36, %v1024_v48  ;;  %v1163_v48 = vld [vmem:[%s8973_s1 + $0x40] sm:$0xff] }
 0x200   : > { %1294 = vmatpush.msra.mxu3 %v1168_v47  ;;  %1225 = vmatpush.msra.mxu1 %v1163_v48 }
 0x201   : > { %v9073_v53 = vsub.f32 %v9036_v20, %v1040_v52  ;;  %v1161_v52 = vld [vmem:[%s8973_s1 + $0x8] sm:$0xff] }
 0x202   : > { %1295 = vmatpush.msra.mxu3 %v1165_v50  ;;  %1226 = vmatpush.msra.mxu1 %v1160_v51 }
 0x203   : > { %v1052_v54 = vmul.f32 %v9073_v53, %v9073_v53  ;;  %1261 = vmatpush.msra.mxu2 %v1161_v52 }
 0x205   : > { %1060 = vadd.xlane.f32.xlu2 %v1052_v54  ;;  %v1162_v54 = vld [vmem:[%s8973_s1 + $0x10] sm:$0xff] }
 0x206   : > { %v1026_v55 = vpop.xlane.xlu1 %1025  ;;  %1296 = vmatpush.msra.mxu3 %v1162_v54 }
 0x207   : > { %v1041_v56 = vmul.f32 %v9051_v36, %v1026_v55 }
 0x209   : > { %v9079_v57 = vsub.f32 %v9040_v23, %v1041_v56 }
 0x20b   : > { %v1053_v58 = vmul.f32 %v9079_v57, %v9079_v57 }
 0x20d   : > { %1062 = vadd.xlane.f32.xlu0 %v1053_v58 }
 0x20e   : > { %v1028_v59 = vpop.xlane.xlu2 %1027 }
 0x20f   : > { %v1042_v60 = vmul.f32 %v9051_v36, %v1028_v59 }
 0x211   : > { %v9085_v61 = vsub.f32 %v9044_v26, %v1042_v60 }
 0x213   : > { %v1054_v62 = vmul.f32 %v9085_v61, %v9085_v61 }
 0x215   : > { %1064 = vadd.xlane.f32.xlu1 %v1054_v62 }
 0x216   : > { %v1030_v63 = vpop.xlane.xlu2 %1029 }
 0x217   : > { %v1043_v0 = vmul.f32 %v9051_v36, %v1030_v63 }
 0x219   : > { %v9091_v1 = vsub.f32 %v9048_v29, %v1043_v0 }
 0x21b   : > { %v1055_v2 = vmul.f32 %v9091_v1, %v9091_v1 }
 0x21d   : > { %1066 = vadd.xlane.f32.xlu2 %v1055_v2 }
 0x268   : > { %v1057_v55 = vpop.xlane.xlu0 %1056 }
 0x269   : > { %v1068_v56 = vmul.f32 %v1057_v55, %v9051_v36 }
 0x26b   : > { %v1074_v58 = vadd.f32 1e-06, %v1068_v56 }
 0x26d   : > { %7711 = vrsqrt.f32 %v1074_v58  ;;  %vm1086_vm3 = vweird.f32 %v1074_v58 }
 0x270   : > { %v1059_v59 = vpop.xlane.xlu1 %1058 }
 0x271   : > { %v1069_v60 = vmul.f32 %v1059_v59, %v9051_v36 }
 0x273   : > { %v7712_v62 = vpop.eup %7711  ;;  %v1075_v63 = vadd.f32 1e-06, %v1069_v60 }
 0x274   : > { %v1081_v0 = vmul.f32 %v7712_v62, %v1074_v58  ;;  %vm1087_vm2 = vweird.f32 %v7712_v62 }
 0x275   : > { %7713 = vrsqrt.f32 %v1075_v63  ;;  %vm1088_vm4 = vmor %vm1086_vm3, %vm1087_vm2  ;;  %vm1096_vm6 = vweird.f32 %v1075_v63 }
 0x276   : > { %v1082_v2 = vmul.f32 %v7712_v62, %v1081_v0 }
 0x278   : > { %v1083_v3 = vmul.f32 0.5, %v1082_v2  ;;  %v1061_v4 = vpop.xlane.xlu2 %1060 }
 0x279   : > { %v1070_v5 = vmul.f32 %v1061_v4, %v9051_v36 }
 0x27a   : > { %v1084_v6 = vsub.f32 1.5, %v1083_v3 }
 0x27b   : > { %v7714_v8 = vpop.eup %7713  ;;  %v1076_v9 = vadd.f32 1e-06, %v1070_v5 }
 0x27c   : > { %v1085_v10 = vmul.f32 %v7712_v62, %v1084_v6  ;;  %v1091_v11 = vmul.f32 %v7714_v8, %v1075_v63  ;;  %vm1097_vm5 = vweird.f32 %v7714_v8 }
 0x27d   : > { %7715 = vrsqrt.f32 %v1076_v9  ;;  %vm1098_vm7 = vmor %vm1096_vm6, %vm1097_vm5  ;;  %vm1106_vm9 = vweird.f32 %v1076_v9  ;;  %vm1316_vm5 = vcmask 261120  }
 0x27e   : > { %v1092_v13 = vmul.f32 %v7714_v8, %v1091_v11  ;;  %v1089_v15 = vsel %vm1088_vm4, %v7712_v62, %v1085_v10 }
 0x27f   : > { %v1140_v16 = vmul.f32 %v1089_v15, %v9055_v39 }
 0x280   : > { %v1093_v19 = vmul.f32 0.5, %v1092_v13  ;;  %v1063_v21 = vpop.xlane.xlu0 %1062 }
 0x281   : > { %v1071_v22 = vmul.f32 %v1063_v21, %v9051_v36  ;;  %v1147_v24 = vmul.f32 %v9144_v12, %v1140_v16 }
 0x282   : > { %v1094_v25 = vsub.f32 1.5, %v1093_v19 }
 0x283   : > { %v7716_v27 = vpop.eup %7715  ;;  %v1077_v28 = vadd.f32 1e-06, %v1071_v22  ;;  %v1154_v30 = vadd.f32 %v9148_v18, %v1147_v24 }
 0x284   : > { %v1095_v31 = vmul.f32 %v7714_v8, %v1094_v25  ;;  %v1101_v32 = vmul.f32 %v7716_v27, %v1076_v9  ;;  %vm1107_vm8 = vweird.f32 %v7716_v27 }
 0x285   : > { %7717 = vrsqrt.f32 %v1077_v28  ;;  %1227 = vmatmul.f32.vlgmr.msra.gmra.mxu1 %v1154_v30  ;;  %1262 = vmatmul.f32.vlgmr.msra.gmra.mxu2 %v1154_v30  ;;  %vm1108_vm10 = vmor %vm1106_vm9, %vm1107_vm8  ;;  %vm1116_vm12 = vweird.f32 %v1077_v28 }
 0x286   : > { %v1102_v39 = vmul.f32 %v7716_v27, %v1101_v32  ;;  %1297 = vmatmul.f32.vlgmr.msra.gmra.mxu3 %v1154_v30  ;;  %v1099_v33 = vsel %vm1098_vm7, %v7714_v8, %v1095_v31  ;;  %v1006_v30 = vld [vmem:[%s8981_s17 + $0x10] sm:$0xff] }
 0x287   : > { %v1141_v34 = vmul.f32 %v1099_v33, %v9061_v43  ;;  %v1210_v32 = vperm.slane %v1006_v30, 2 }
 0x288   : > { %v1103_v35 = vmul.f32 0.5, %v1102_v39  ;;  %v1065_v37 = vpop.xlane.xlu1 %1064 }
 0x289   : > { %v1072_v38 = vmul.f32 %v1065_v37, %v9051_v36  ;;  %v1148_v40 = vmul.f32 %v9144_v12, %v1141_v34  ;;  %v1005_v37 = vld [vmem:[%s8981_s17 + $0x8] sm:$0xff] }
 0x28a   : > { %v1104_v41 = vsub.f32 1.5, %v1103_v35 }
 0x28b   : > { %v7718_v42 = vpop.eup %7717  ;;  %v1078_v44 = vadd.f32 1e-06, %v1072_v38  ;;  %v1155_v45 = vadd.f32 %v9148_v18, %v1148_v40 }
 0x28c   : > { %v1105_v46 = vmul.f32 %v7716_v27, %v1104_v41  ;;  %v1111_v47 = vmul.f32 %v7718_v42, %v1077_v28  ;;  %vm1117_vm11 = vweird.f32 %v7718_v42 }
 0x28d   : > { %7719 = vrsqrt.f32 %v1078_v44  ;;  %1230 = vmatmul.f32.gmra.mxu1 %v1155_v45  ;;  %1265 = vmatmul.f32.gmra.mxu2 %v1155_v45  ;;  %vm1118_vm13 = vmor %vm1116_vm12, %vm1117_vm11  ;;  %vm1126_vm15 = vweird.f32 %v1078_v44 }
 0x28e   : > { %v1112_v43 = vmul.f32 %v7718_v42, %v1111_v47  ;;  %1300 = vmatmul.f32.gmra.mxu3 %v1155_v45  ;;  %v1109_v48 = vsel %vm1108_vm10, %v7716_v27, %v1105_v46 }
 0x28f   : > { %v1142_v49 = vmul.f32 %v1109_v48, %v9073_v53 }
 0x290   : > { %v1113_v50 = vmul.f32 0.5, %v1112_v43  ;;  %v1067_v51 = vpop.xlane.xlu2 %1066 }
 0x291   : > { %v1073_v52 = vmul.f32 %v1067_v51, %v9051_v36  ;;  %v1149_v54 = vmul.f32 %v9144_v12, %v1142_v49 }
 0x292   : > { %v1114_v55 = vsub.f32 1.5, %v1113_v50 }
 0x293   : > { %v7720_v56 = vpop.eup %7719  ;;  %v1079_v58 = vadd.f32 1e-06, %v1073_v52  ;;  %v1156_v59 = vadd.f32 %v9148_v18, %v1149_v54 }
 0x294   : > { %v1115_v60 = vmul.f32 %v7718_v42, %v1114_v55  ;;  %v1121_v62 = vmul.f32 %v7720_v56, %v1078_v44  ;;  %vm1127_vm14 = vweird.f32 %v7720_v56 }
 0x295   : > { %7721 = vrsqrt.f32 %v1079_v58  ;;  %1233 = vmatmul.f32.gmra.mxu1 %v1156_v59  ;;  %1268 = vmatmul.f32.gmra.mxu2 %v1156_v59  ;;  %vm1128_vm1 = vmor %vm1126_vm15, %vm1127_vm14  ;;  %vm1136_vm3 = vweird.f32 %v1079_v58 }
 0x296   : > { %v1122_v53 = vmul.f32 %v7720_v56, %v1121_v62  ;;  %1303 = vmatmul.f32.gmra.mxu3 %v1156_v59  ;;  %v1119_v63 = vsel %vm1118_vm13, %v7718_v42, %v1115_v60 }
 0x297   : > { %v1143_v0 = vmul.f32 %v1119_v63, %v9079_v57 }
 0x298   : > { %v1123_v2 = vmul.f32 0.5, %v1122_v53 }
 0x299   : > { %v1150_v3 = vmul.f32 %v9144_v12, %v1143_v0 }
 0x29a   : > { %v1124_v4 = vsub.f32 1.5, %v1123_v2 }
 0x29b   : > { %v7722_v5 = vpop.eup %7721  ;;  %v1157_v6 = vadd.f32 %v9148_v18, %v1150_v3 }
 0x29c   : > { %v1125_v8 = vmul.f32 %v7720_v56, %v1124_v4  ;;  %v1131_v9 = vmul.f32 %v7722_v5, %v1079_v58  ;;  %vm1137_vm2 = vweird.f32 %v7722_v5 }
 0x29d   : > { %1236 = vmatmul.f32.gmra.mxu1 %v1157_v6  ;;  %1271 = vmatmul.f32.gmra.mxu2 %v1157_v6  ;;  %vm1138_vm4 = vmor %vm1136_vm3, %vm1137_vm2 }
 0x29e   : > { %v1132_v10 = vmul.f32 %v7722_v5, %v1131_v9  ;;  %1306 = vmatmul.f32.gmra.mxu3 %v1157_v6  ;;  %v1129_v11 = vsel %vm1128_vm1, %v7720_v56, %v1125_v8  ;;  %v1208_v56 = vperm.slane %v9141_v7, 2 }
 0x29f   : > { %v1144_v13 = vmul.f32 %v1129_v11, %v9085_v61 }
 0x2a0   : > { %v1133_v57 = vmul.f32 0.5, %v1132_v10 }
 0x2a1   : > { %v1151_v15 = vmul.f32 %v9144_v12, %v1144_v13 }
 0x2a2   : > { %v1134_v16 = vsub.f32 1.5, %v1133_v57 }
 0x2a3   : > { %v1158_v19 = vadd.f32 %v9148_v18, %v1151_v15 }
 0x2a4   : > { %v1135_v21 = vmul.f32 %v7722_v5, %v1134_v16 }
 0x2a5   : > { %1239 = vmatmul.f32.gmra.mxu1 %v1158_v19  ;;  %1274 = vmatmul.f32.gmra.mxu2 %v1158_v19 }
 0x2a6   : > { %1309 = vmatmul.f32.gmra.mxu3 %v1158_v19  ;;  %v1139_v22 = vsel %vm1138_vm4, %v7722_v5, %v1135_v21 }
 0x2a7   : > { %v1145_v24 = vmul.f32 %v1139_v22, %v9091_v1  ;;  %v1209_v1 = vperm.slane %v1005_v37, 2 }
 0x2a9   : > { %v1152_v61 = vmul.f32 %v9144_v12, %v1145_v24 }
 0x2ab   : > { %v1159_v25 = vadd.f32 %v9148_v18, %v1152_v61 }
 0x2ad   : > { %1242 = vmatmul.f32.gmra.mxu1 %v1159_v25  ;;  %1277 = vmatmul.f32.gmra.mxu2 %v1159_v25 }
 0x2ae   : > { %1312 = vmatmul.f32.gmra.mxu3 %v1159_v25 }
 0x302   : > { %v1228_v31 = vpop.f32.mrf.mxu1 }
 0x303   : > { %v1229_v7 = vadd.f32 %v1228_v31, %v1208_v56 }
 0x308   : > { %v1263_v27 = vpop.f32.mrf.mxu2 }
 0x309   : > { %v1298_v28 = vpop.f32.mrf.mxu3  ;;  %v1264_v60 = vadd.f32 %v1263_v27, %v1209_v1 }
 0x30a   : > { %v1299_v34 = vadd.f32 %v1298_v28, %v1210_v32  ;;  %v1231_v40 = vpop.f32.mrf.mxu1 }
 0x30b   : > { %v1232_v63 = vadd.f32 %v1231_v40, %v1208_v56 }
 0x310   : > { %v1266_v39 = vpop.f32.mrf.mxu2 }
 0x311   : > { %v1301_v33 = vpop.f32.mrf.mxu3  ;;  %v1267_v50 = vadd.f32 %v1266_v39, %v1209_v1 }
 0x312   : > { %v1302_v35 = vadd.f32 %v1301_v33, %v1210_v32  ;;  %v1234_v46 = vpop.f32.mrf.mxu1 }
 0x313   : > { %v1235_v3 = vadd.f32 %v1234_v46, %v1208_v56 }
 0x314   : > { %v9172_v38 = vpack.i.bf16 %v1299_v34, %v1302_v35 }
 0x318   : > { %v1269_v12 = vpop.f32.mrf.mxu2 }
 0x319   : > { %v9174_v41 = vadd.f32 %v1269_v12, %v1209_v1  ;;  %v1304_v18 = vpop.f32.mrf.mxu3 }
 0x31a   : > { %v1305_v47 = vadd.f32 %v1304_v18, %v1210_v32  ;;  %v1237_v54 = vpop.f32.mrf.mxu1  ;;  %v9265_v18 = vld [vmem:[#allocation13 + $0x8] sm:$0xff] }
 0x31b   : > { %1613 = vrot.lane.b32.xlu0 %v9174_v41, %s8602_s2  ;;  %v1238_v5 = vadd.f32 %v1237_v54, %v1208_v56 }
 0x320   : > { %v1272_v42 = vpop.f32.mrf.mxu2 }
 0x321   : > { %v1273_v44 = vadd.f32 %v1272_v42, %v1209_v1  ;;  %v1307_v45 = vpop.f32.mrf.mxu3 }
 0x322   : > { %v1308_v43 = vadd.f32 %v1307_v45, %v1210_v32  ;;  %v1240_v2 = vpop.f32.mrf.mxu1 }
 0x323   : > { %1615 = vrot.lane.b32.xlu2 %v1273_v44, %s8602_s2  ;;  %v1241_v8 = vadd.f32 %v1240_v2, %v1208_v56 }
 0x324   : > { %v9179_v48 = vpack.i.bf16 %v1305_v47, %v1308_v43 }
 0x328   : > { %v1275_v49 = vpop.f32.mrf.mxu2 }
 0x329   : > { %v1276_v51 = vadd.f32 %v1275_v49, %v1209_v1  ;;  %v1310_v52 = vpop.f32.mrf.mxu3 }
 0x32a   : > { %v1311_v62 = vadd.f32 %v1310_v52, %v1210_v32  ;;  %v1243_v4 = vpop.f32.mrf.mxu1 }
 0x32b   : > { %1617 = vrot.lane.b32.xlu1 %v1276_v51, %s8602_s2  ;;  %1611 = vrot.lane.b32.xlu2 %v1267_v50, %s8602_s2  ;;  %v1244_v6 = vadd.f32 %v1243_v4, %v1208_v56 }
 0x330   : > { %v1278_v55 = vpop.f32.mrf.mxu2 }
 0x331   : > { %v1279_v58 = vadd.f32 %v1278_v55, %v1209_v1  ;;  %v1313_v59 = vpop.f32.mrf.mxu3 }
 0x332   : > { %v1314_v53 = vadd.f32 %v1313_v59, %v1210_v32 }
 0x333   : > { %1619 = vrot.lane.b32.xlu0 %v1279_v58, %s8602_s2  ;;  %7264 = vmatpush.xpose.msk.msrb.mxu0 %vm1316_vm5, %v1279_v58 }
 0x334   : > { %1572 = vmatpush.msrb.mxu1 %v1314_v53  ;;  %1609 = vrot.lane.b32.xlu1 %v1264_v60, %s8602_s2  ;;  %v9187_v0 = vpack.i.bf16 %v1311_v62, %v1314_v53 }
 0x335   : > { %1599 = vrot.lane.b32.xlu2 %v1232_v63, %s8602_s2 }
 0x336   : > { %1573 = vmatpush.msrb.mxu1 %v1311_v62 }
 0x337   : > { %7265 = vmatpush.xpose.msk.msrb.mxu0 %vm1316_vm5, %v1276_v51 }
 0x338   : > { %1574 = vmatpush.msrb.mxu1 %v1308_v43 }
 0x33a   : > { %1575 = vmatpush.msrb.mxu1 %v1305_v47 }
 0x33b   : > { %1597 = vrot.lane.b32.xlu0 %v1229_v7, %s8602_s2  ;;  %7266 = vmatpush.xpose.msk.msrb.mxu0 %vm1316_vm5, %v1273_v44 }
 0x33c   : > { %1576 = vmatpush.msrb.mxu1 %v1302_v35  ;;  %1601 = vrot.lane.b32.xlu1 %v1235_v3, %s8602_s2 }
 0x33d   : > { %2241 = vrot.lane.b32.xlu2 %v1273_v44, %s8603_s11 }
 0x33e   : > { %1577 = vmatpush.msrb.mxu1 %v1299_v34  ;;  %v9254_v34 = vld [vmem:[#allocation13] sm:$0xff] }
 0x33f   : > { %7267 = vmatpush.xpose.msk.msrb.mxu0 %vm1316_vm5, %v9174_v41 }
 0x343   : > { %7268 = vmatpush.xpose.msk.msrb.mxu0 %vm1316_vm5, %v1267_v50  ;;  %1603 = vrot.lane.b32.xlu0 %v1238_v5, %s8602_s2 }
 0x344   : > { %2243 = vrot.lane.b32.xlu1 %v1276_v51, %s8603_s11 }
 0x345   : > { %1607 = vrot.lane.b32.xlu2 %v1244_v6, %s8602_s2 }
 0x347   : > { %7269 = vmatpush.xpose.msk.msrb.mxu0 %vm1316_vm5, %v1264_v60 }
 0x34a   : > { %7270 = vmatmul.msk.f32.vlgmr.msrb.gmra.mxu0 %vm1316_vm5, %v1229_v7 }
 0x34b   : > { %1605 = vrot.lane.b32.xlu0 %v1241_v8, %s8602_s2 }
 0x34c   : > { %1933 = vrot.lane.b32.xlu1 %v1276_v51, %s8604_s18 }
 0x34d   : > { %1931 = vrot.lane.b32.xlu2 %v1273_v44, %s8604_s18 }
 0x352   : > { %7271 = vmatmul.msk.f32.gmra.mxu0 %vm1316_vm5, %v1232_v63 }
 0x353   : > { %2239 = vrot.lane.b32.xlu0 %v9174_v41, %s8603_s11 }
 0x354   : > { %1935 = vrot.lane.b32.xlu1 %v1279_v58, %s8604_s18 }
 0x355   : > { %2245 = vrot.lane.b32.xlu2 %v1279_v58, %s8603_s11 }
 0x35a   : > { %7272 = vmatmul.msk.f32.gmra.mxu0 %vm1316_vm5, %v1235_v3 }
 0x35b   : > { %2237 = vrot.lane.b32.xlu0 %v1267_v50, %s8603_s11 }
 0x35c   : > { %2235 = vrot.lane.b32.xlu1 %v1264_v60, %s8603_s11 }
 0x35d   : > { %2223 = vrot.lane.b32.xlu2 %v1229_v7, %s8603_s11 }
 0x362   : > { %7273 = vmatmul.msk.f32.gmra.mxu0 %vm1316_vm5, %v1238_v5 }
 0x363   : > { %1929 = vrot.lane.b32.xlu0 %v9174_v41, %s8604_s18 }
 0x364   : > { %1927 = vrot.lane.b32.xlu1 %v1267_v50, %s8604_s18  ;;  %v9275_v50 = vld [vmem:[#allocation13 + $0x10] sm:$0xff] }
 0x365   : > { %2225 = vrot.lane.b32.xlu2 %v1232_v63, %s8603_s11 }
 0x36a   : > { %7274 = vmatmul.msk.f32.gmra.mxu0 %vm1316_vm5, %v1241_v8 }
 0x36b   : > { %1925 = vrot.lane.b32.xlu0 %v1264_v60, %s8604_s18  ;;  %v9285_v60 = vld [vmem:[#allocation13 + $0x18] sm:$0xff] }
 0x36c   : > { %1913 = vrot.lane.b32.xlu1 %v1229_v7, %s8604_s18 }
 0x36d   : > { %1915 = vrot.lane.b32.xlu2 %v1232_v63, %s8604_s18 }
 0x372   : > { %7275 = vmatmul.msk.f32.gmra.mxu0 %vm1316_vm5, %v1244_v6 }
 0x373   : > { %2227 = vrot.lane.b32.xlu0 %v1235_v3, %s8603_s11 }
 0x374   : > { %2229 = vrot.lane.b32.xlu1 %v1238_v5, %s8603_s11 }
 0x375   : > { %2231 = vrot.lane.b32.xlu2 %v1241_v8, %s8603_s11 }
 0x37b   : > { %1917 = vrot.lane.b32.xlu0 %v1235_v3, %s8604_s18  ;;  %v9295_v3 = vld [vmem:[#allocation13 + $0x20] sm:$0xff] }
 0x37c   : > { %1919 = vrot.lane.b32.xlu1 %v1238_v5, %s8604_s18 }
 0x37d   : > { %1921 = vrot.lane.b32.xlu2 %v1241_v8, %s8604_s18  ;;  %v1616_v9 = vpop.permute.xlu2 %1615 }
 0x383   : > { %2233 = vrot.lane.b32.xlu0 %v1244_v6, %s8603_s11 }
 0x384   : > { %1923 = vrot.lane.b32.xlu1 %v1244_v6, %s8604_s18 }
 0x385   : > { %v1612_v10 = vpop.permute.xlu2 %1611 }
 0x38b   : > { %7592 = vrot.lane.b32.xlu0 %v9172_v38, %s8602_s2 }
 0x38c   : > { %7587 = vrot.lane.b32.xlu1 %v9179_v48, %s8602_s2 }
 0x38d   : > { %v1614_v57 = vpop.permute.xlu0 %1613 }
 0x38f   : > { %v1600_v11 = vpop.permute.xlu2 %1599 }
 0x393   : > { %7597 = vrot.lane.b32.xlu0 %v9187_v0, %s8602_s2 }
 0x397   : > { %v2242_v13 = vpop.permute.xlu2 %2241 }
 0x39d   : > { %v1618_v15 = vpop.permute.xlu1 %1617 }
 0x39f   : > { %v9239_v19 = vpop.permute.xlu2 %1607 }
 0x3a5   : > { %v1620_v16 = vpop.permute.xlu0 %1619 }
 0x3a6   : > { %v1610_v21 = vpop.permute.xlu1 %1609  ;;  %7282 = vmatpush.xpose.msk.msrb.mxu2 %vm1316_vm5, %v1620_v16 }
 0x3a7   : > { %v1932_v61 = vpop.permute.xlu2 %1931 }
 0x3aa   : > { %7283 = vmatpush.xpose.msk.msrb.mxu2 %vm1316_vm5, %v1618_v15 }
 0x3ad   : > { %v1598_v22 = vpop.permute.xlu0 %1597 }
 0x3ae   : > { %v1602_v24 = vpop.permute.xlu1 %1601  ;;  %7284 = vmatpush.xpose.msk.msrb.mxu2 %vm1316_vm5, %v1616_v9 }
 0x3af   : > { %v2246_v28 = vpop.permute.xlu2 %2245 }
 0x3b2   : > { %7285 = vmatpush.xpose.msk.msrb.mxu2 %vm1316_vm5, %v1614_v57 }
 0x3b5   : > { %v1604_v25 = vpop.permute.xlu0 %1603 }
 0x3b6   : > { %v2244_v27 = vpop.permute.xlu1 %2243  ;;  %7286 = vmatpush.xpose.msk.msrb.mxu2 %vm1316_vm5, %v1612_v10 }
 0x3b7   : > { %v2224_v45 = vpop.permute.xlu2 %2223 }
 0x3ba   : > { %7287 = vmatpush.xpose.msk.msrb.mxu2 %vm1316_vm5, %v1610_v21 }
 0x3bd   : > { %7288 = vmatmul.msk.f32.vlgmr.msrb.gmra.mxu2 %vm1316_vm5, %v1598_v22  ;;  %v1606_v30 = vpop.permute.xlu0 %1605 }
 0x3be   : > { %7318 = vmatpush.xpose.msk.msra.mxu2 %vm1316_vm5, %v2246_v28  ;;  %v1934_v31 = vpop.permute.xlu1 %1933 }
 0x3bf   : > { %v2226_v56 = vpop.permute.xlu2 %2225 }
 0x3c2   : > { %7319 = vmatpush.xpose.msk.msra.mxu2 %vm1316_vm5, %v2244_v27 }
 0x3c5   : > { %7289 = vmatmul.msk.f32.gmra.mxu2 %vm1316_vm5, %v1600_v11  ;;  %v2240_v32 = vpop.permute.xlu0 %2239 }
 0x3c6   : > { %7320 = vmatpush.xpose.msk.msra.mxu2 %vm1316_vm5, %v2242_v13  ;;  %v1936_v39 = vpop.permute.xlu1 %1935  ;;  %v9304_v13 = vld [vmem:[#allocation13 + $0x28] sm:$0xff] }
 0x3c7   : > { %7300 = vmatpush.xpose.msk.msra.mxu0 %vm1316_vm5, %v1936_v39  ;;  %v1370_v33 = vpop.f32.mrf.mxu0  ;;  %v1916_v4 = vpop.permute.xlu2 %1915 }
 0x3c8   : > { %v1388_v35 = vmul.f32 0.17677669, %v1370_v33 }
 0x3ca   : > { %7321 = vmatpush.xpose.msk.msra.mxu2 %vm1316_vm5, %v2240_v32  ;;  %v9257_v37 = vadd.f32 %v1388_v35, %v9254_v34 }
 0x3cb   : > { %7301 = vmatpush.xpose.msk.msra.mxu0 %vm1316_vm5, %v1934_v31 }
 0x3cc   : > { %v1400_v1 = vsel %vm950_vm0, %v9257_v37, -inf }
 0x3cd   : > { %1401 = vmax.xlane.f32.xlu2 %v1400_v1  ;;  %7290 = vmatmul.msk.f32.gmra.mxu2 %vm1316_vm5, %v1602_v24  ;;  %v2238_v40 = vpop.permute.xlu0 %2237 }
 0x3ce   : > { %v2236_v12 = vpop.permute.xlu1 %2235  ;;  %7322 = vmatpush.xpose.msk.msra.mxu2 %vm1316_vm5, %v2238_v40 }
 0x3cf   : > { %7302 = vmatpush.xpose.msk.msra.mxu0 %vm1316_vm5, %v1932_v61  ;;  %v1373_v41 = vpop.f32.mrf.mxu0  ;;  %v2232_v22 = vpop.permute.xlu2 %2231 }
 0x3d0   : > { %v1389_v42 = vmul.f32 0.17677669, %v1373_v41 }
 0x3d2   : > { %7323 = vmatpush.xpose.msk.msra.mxu2 %vm1316_vm5, %v2236_v12  ;;  %v9269_v44 = vadd.f32 %v1389_v42, %v9265_v18 }
 0x3d4   : > { %v1403_v46 = vsel %vm950_vm0, %v9269_v44, -inf }
 0x3d5   : > { %1404 = vmax.xlane.f32.xlu0 %v1403_v46  ;;  %7291 = vmatmul.msk.f32.gmra.mxu2 %vm1316_vm5, %v1604_v25  ;;  %v1930_v47 = vpop.permute.xlu0 %1929 }
 0x3d6   : > { %v1928_v43 = vpop.permute.xlu1 %1927  ;;  %7303 = vmatpush.xpose.msk.msra.mxu0 %vm1316_vm5, %v1930_v47 }
 0x3d7   : > { %v1376_v49 = vpop.f32.mrf.mxu0  ;;  %v1922_v25 = vpop.permute.xlu2 %1921 }
 0x3d8   : > { %v1390_v51 = vmul.f32 0.17677669, %v1376_v49 }
 0x3da   : > { %7304 = vmatpush.xpose.msk.msra.mxu0 %vm1316_vm5, %v1928_v43  ;;  %v9279_v52 = vadd.f32 %v1390_v51, %v9275_v50 }
 0x3dc   : > { %v1406_v54 = vsel %vm950_vm0, %v9279_v52, -inf }
 0x3dd   : > { %1407 = vmax.xlane.f32.xlu1 %v1406_v54  ;;  %7292 = vmatmul.msk.f32.gmra.mxu2 %vm1316_vm5, %v1606_v30  ;;  %v1926_v55 = vpop.permute.xlu0 %1925 }
 0x3de   : > { %7305 = vmatpush.xpose.msk.msra.mxu0 %vm1316_vm5, %v1926_v55  ;;  %v1914_v58 = vpop.permute.xlu1 %1913 }
 0x3df   : > { %v1379_v59 = vpop.f32.mrf.mxu0 }
 0x3e0   : > { %v1391_v62 = vmul.f32 0.17677669, %v1379_v59 }
 0x3e1   : > { %7306 = vmatmul.msk.f32.vlgmr.msra.gmra.mxu0 %vm1316_vm5, %v1914_v58 }
 0x3e2   : > { %v9289_v53 = vadd.f32 %v1391_v62, %v9285_v60 }
 0x3e4   : > { %v1409_v63 = vsel %vm950_vm0, %v9289_v53, -inf }
 0x3e5   : > { %1410 = vmax.xlane.f32.xlu2 %v1409_v63  ;;  %7293 = vmatmul.msk.f32.gmra.mxu2 %vm1316_vm5, %v9239_v19  ;;  %v2228_v2 = vpop.permute.xlu0 %2227 }
 0x3e6   : > { %v2230_v6 = vpop.permute.xlu1 %2229 }
 0x3e7   : > { %v1382_v7 = vpop.f32.mrf.mxu0 }
 0x3e8   : > { %v1392_v5 = vmul.f32 0.17677669, %v1382_v7 }
 0x3e9   : > { %7307 = vmatmul.msk.f32.gmra.mxu0 %vm1316_vm5, %v1916_v4 }
 0x3ea   : > { %v9299_v8 = vadd.f32 %v1392_v5, %v9295_v3 }
 0x3ec   : > { %v1412_v9 = vsel %vm950_vm0, %v9299_v8, -inf }
 0x3ed   : > { %1413 = vmax.xlane.f32.xlu0 %v1412_v9  ;;  %7324 = vmatmul.msk.f32.vlgmr.msra.gmra.mxu2 %vm1316_vm5, %v2224_v45  ;;  %v1918_v10 = vpop.permute.xlu0 %1917 }
 0x3ee   : > { %v1920_v16 = vpop.permute.xlu1 %1919 }
 0x3ef   : > { %v1385_v11 = vpop.f32.mrf.mxu0 }
 0x3f0   : > { %v1393_v57 = vmul.f32 0.17677669, %v1385_v11 }
 0x3f1   : > { %7308 = vmatmul.msk.f32.gmra.mxu0 %vm1316_vm5, %v1918_v10 }
 0x3f2   : > { %v9308_v15 = vadd.f32 %v1393_v57, %v9304_v13 }
 0x3f4   : > { %v1415_v19 = vsel %vm950_vm0, %v9308_v15, -inf }
 0x3f5   : > { %1416 = vmax.xlane.f32.xlu1 %v1415_v19  ;;  %7325 = vmatmul.msk.f32.gmra.mxu2 %vm1316_vm5, %v2226_v56  ;;  %v2234_v21 = vpop.permute.xlu0 %2233 }
 0x3f6   : > { %v1924_v24 = vpop.permute.xlu1 %1923 }
 0x3f9   : > { %7309 = vmatmul.msk.f32.gmra.mxu0 %vm1316_vm5, %v1920_v16 }
 0x3fd   : > { %7326 = vmatmul.msk.f32.gmra.mxu2 %vm1316_vm5, %v2228_v2  ;;  %v7593_v61 = vpop.permute.xlu0 %7592 }
 0x3fe   : > { %v7588_v30 = vpop.permute.xlu1 %7587  ;;  %v7594_v33 = vunpack.i.l.bf16 %v7593_v61  ;;  %v7595_v35 = vunpack.i.h.bf16 %v7593_v61 }
 0x3ff   : > { %v7589_v32 = vunpack.i.l.bf16 %v7588_v30  ;;  %v7590_v39 = vunpack.i.h.bf16 %v7588_v30 }
 0x401   : > { %7310 = vmatmul.msk.f32.gmra.mxu0 %vm1316_vm5, %v1922_v25 }
 0x405   : > { %7327 = vmatmul.msk.f32.gmra.mxu2 %vm1316_vm5, %v2230_v6  ;;  %v7598_v27 = vpop.permute.xlu0 %7597 }
 0x406   : > { %v7599_v28 = vunpack.i.l.bf16 %v7598_v27  ;;  %v7600_v31 = vunpack.i.h.bf16 %v7598_v27 }
 0x408   : > { %1888 = vmatpush.msrb.mxu3 %v7599_v28 }
 0x409   : > { %7311 = vmatmul.msk.f32.gmra.mxu0 %vm1316_vm5, %v1924_v24 }
 0x40a   : > { %1889 = vmatpush.msrb.mxu3 %v7600_v31 }
 0x40c   : > { %1890 = vmatpush.msrb.mxu3 %v7589_v32 }
 0x40d   : > { %7328 = vmatmul.msk.f32.gmra.mxu2 %vm1316_vm5, %v2232_v22 }
 0x40e   : > { %1891 = vmatpush.msrb.mxu3 %v7590_v39 }
 0x410   : > { %1892 = vmatpush.msrb.mxu3 %v7594_v33 }
 0x412   : > { %1893 = vmatpush.msrb.mxu3 %v7595_v35 }
 0x415   : > { %7329 = vmatmul.msk.f32.gmra.mxu2 %vm1316_vm5, %v2234_v21 }
 0x440   : > { %v1662_v1 = vpop.f32.mrf.mxu2  ;;  %v1402_v54 = vpop.xlane.xlu2 %1401 }
 0x441   : > { %v1680_v40 = vmul.f32 0.17677669, %v1662_v1  ;;  %v1418_v59 = vsub.f32 %v9257_v37, %v1402_v54 }
 0x443   : > { %v9321_v12 = vadd.f32 %v1680_v40, %v9254_v34  ;;  %v1424_v2 = vmul.f32 1.442695, %v1418_v59 }
 0x445   : > { %v1692_v41 = vsel %vm950_vm0, %v9321_v12, -inf  ;;  %7723 = vpow2.f32 %v1424_v2 }
 0x446   : > { %1693 = vmax.xlane.f32.xlu0 %v1692_v41 }
 0x448   : > { %v1665_v42 = vpop.f32.mrf.mxu2  ;;  %v1405_v16 = vpop.xlane.xlu0 %1404 }
 0x449   : > { %v1681_v62 = vmul.f32 0.17677669, %v1665_v42  ;;  %v1419_v24 = vsub.f32 %v9269_v44, %v1405_v16 }
 0x44b   : > { %v9337_v5 = vadd.f32 %v1681_v62, %v9265_v18  ;;  %v9351_v21 = vpop.eup %7723  ;;  %v1426_v28 = vmul.f32 1.442695, %v1419_v24 }
 0x44c   : > { %v1436_v27 = vsel %vm950_vm0, %v9351_v21, 0.0 }
 0x44d   : > { %v1695_v37 = vsel %vm950_vm0, %v9337_v5, -inf  ;;  %7725 = vpow2.f32 %v1426_v28 }
 0x450   : > { %v1668_v45 = vpop.f32.mrf.mxu2  ;;  %v1408_v31 = vpop.xlane.xlu1 %1407 }
 0x458   : > { %v1671_v46 = vpop.f32.mrf.mxu2 }
 0x459   : > { %v1683_v47 = vmul.f32 0.17677669, %v1671_v46  ;;  %v9364_v46 = vpop.eup %7725 }
 0x45b   : > { %v9326_v43 = vadd.f32 %v1683_v47, %v9285_v60 }
 0x45d   : > { %v1701_v49 = vsel %vm950_vm0, %v9326_v43, -inf }
 0x45e   : > { %1702 = vmax.xlane.f32.xlu0 %v1701_v49  ;;  %v1978_v51 = vpop.f32.mrf.mxu0 }
 0x45f   : > { %v1996_v55 = vmul.f32 0.17677669, %v1978_v51 }
 0x460   : > { %v1674_v56 = vpop.f32.mrf.mxu2  ;;  %v1414_v32 = vpop.xlane.xlu0 %1413 }
 0x461   : > { %v9331_v58 = vadd.f32 %v1996_v55, %v9254_v34  ;;  %v1684_v10 = vmul.f32 0.17677669, %v1674_v56  ;;  %v1422_v44 = vsub.f32 %v9299_v8, %v1414_v32  ;;  %v1682_v55 = vmul.f32 0.17677669, %v1668_v45 }
 0x462   : > { %v1439_v56 = vsel %vm950_vm0, %v9364_v46, 0.0  ;;  %v1420_v45 = vsub.f32 %v9279_v52, %v1408_v31 }
 0x463   : > { %v2008_v63 = vsel %vm950_vm0, %v9331_v58, -inf  ;;  %v9349_v19 = vadd.f32 %v1684_v10, %v9295_v3  ;;  %v1432_v1 = vmul.f32 1.442695, %v1422_v44  ;;  %v9380_v2 = vadd.f32 %v1682_v55, %v9275_v50 }
 0x464   : > { %2009 = vmax.xlane.f32.xlu1 %v2008_v63 }
 0x465   : > { %v1704_v25 = vsel %vm950_vm0, %v9349_v19, -inf  ;;  %7727 = vpow2.f32 %v1432_v1 }
 0x466   : > { %v1981_v7 = vpop.f32.mrf.mxu0 }
 0x467   : > { %v1997_v4 = vmul.f32 0.17677669, %v1981_v7 }
 0x468   : > { %v9339_v6 = vpop.f32.mrf.mxu2  ;;  %v1417_v41 = vpop.xlane.xlu1 %1416 }
 0x469   : > { %v9342_v9 = vadd.f32 %v1997_v4, %v9265_v18  ;;  %v1423_v54 = vsub.f32 %v9308_v15, %v1417_v41  ;;  %v1698_v4 = vsel %vm950_vm0, %v9380_v2, -inf }
 0x46b   : > { %v2011_v11 = vsel %vm950_vm0, %v9342_v9, -inf  ;;  %v1434_v63 = vmul.f32 1.442695, %v1423_v54  ;;  %v9382_v15 = vpop.eup %7727 }
 0x46c   : > { %1696 = vmax.xlane.f32.xlu1 %v1695_v37  ;;  %2012 = vmax.xlane.f32.xlu2 %v2011_v11  ;;  %v1448_v10 = vsel %vm950_vm0, %v9382_v15, 0.0  ;;  %v1428_v37 = vmul.f32 1.442695, %v1420_v45  ;;  %v1411_v11 = vpop.xlane.xlu2 %1410 }
 0x46d   : > { %7729 = vpow2.f32 %v1434_v63  ;;  %v1421_v52 = vsub.f32 %v9289_v53, %v1411_v11 }
 0x46e   : > { %v1984_v57 = vpop.f32.mrf.mxu0  ;;  %7731 = vpow2.f32 %v1428_v37 }
 0x46f   : > { %v1998_v61 = vmul.f32 0.17677669, %v1984_v57 }
 0x470   : > { %v2288_v22 = vpop.f32.mrf.mxu2 }
 0x471   : > { %v9359_v39 = vadd.f32 %v1998_v61, %v9275_v50  ;;  %v2306_v16 = vmul.f32 0.17677669, %v2288_v22 }
 0x473   : > { %v2014_v35 = vsel %vm950_vm0, %v9359_v39, -inf }
 0x474   : > { %1705 = vmax.xlane.f32.xlu1 %v1704_v25  ;;  %1437 = vadd.xlane.f32.xlu2 %v1436_v27  ;;  %v1430_v25 = vmul.f32 1.442695, %v1421_v52  ;;  %v9400_v27 = vadd.f32 %v2306_v16, %v9254_v34 }
 0x476   : > { %v1987_v30 = vpop.f32.mrf.mxu0  ;;  %7733 = vpow2.f32 %v1430_v25  ;;  %v2318_v22 = vsel %vm950_vm0, %v9400_v27, -inf }
 0x477   : > { %v1999_v7 = vmul.f32 0.17677669, %v1987_v30 }
 0x478   : > { %v2291_v33 = vpop.f32.mrf.mxu2 }
 0x479   : > { %v9390_v57 = vadd.f32 %v1999_v7, %v9285_v60  ;;  %v2307_v30 = vmul.f32 0.17677669, %v2291_v33 }
 0x47b   : > { %v2017_v24 = vsel %vm950_vm0, %v9390_v57, -inf  ;;  %v9409_v31 = vadd.f32 %v2307_v30, %v9265_v18 }
 0x47c   : > { %2015 = vmax.xlane.f32.xlu2 %v2014_v35 }
 0x47e   : > { %v1990_v40 = vpop.f32.mrf.mxu0 }
 0x47f   : > { %v2000_v42 = vmul.f32 0.17677669, %v1990_v40  ;;  %v2321_v40 = vsel %vm950_vm0, %v9409_v31, -inf }
 0x480   : > { %v2294_v47 = vpop.f32.mrf.mxu2 }
 0x481   : > { %v2308_v49 = vmul.f32 0.17677669, %v2294_v47  ;;  %v9367_v51 = vadd.f32 %v2000_v42, %v9295_v3  ;;  %v1685_v42 = vmul.f32 0.17677669, %v9339_v6 }
 0x483   : > { %v2020_v8 = vsel %vm950_vm0, %v9367_v51, -inf  ;;  %v9375_v59 = vadd.f32 %v2308_v49, %v9275_v50  ;;  %v9392_v50 = vpop.eup %7729  ;;  %v9429_v55 = vadd.f32 %v1685_v42, %v9304_v13 }
 0x484   : > { %2021 = vmax.xlane.f32.xlu0 %v2020_v8  ;;  %1440 = vadd.xlane.f32.xlu2 %v1439_v56  ;;  %v1451_v61 = vsel %vm950_vm0, %v9392_v50, 0.0  ;;  %v9402_v28 = vpop.eup %7731 }
 0x485   : > { %v2324_v62 = vsel %vm950_vm0, %v9375_v59, -inf  ;;  %v1442_v53 = vsel %vm950_vm0, %v9402_v28, 0.0  ;;  %v9411_v32 = vpop.eup %7733  ;;  %v1707_v56 = vsel %vm950_vm0, %v9429_v55, -inf }
 0x486   : > { %2325 = vmax.xlane.f32.xlu1 %v2324_v62  ;;  %v1993_v44 = vpop.f32.mrf.mxu0  ;;  %v1445_v33 = vsel %vm950_vm0, %v9411_v32, 0.0 }
 0x487   : > { %v2001_v35 = vmul.f32 0.17677669, %v1993_v44 }
 0x488   : > { %v2297_v34 = vpop.f32.mrf.mxu2 }
 0x489   : > { %v2309_v1 = vmul.f32 0.17677669, %v2297_v34  ;;  %v9418_v41 = vadd.f32 %v2001_v35, %v9304_v13 }
 0x48b   : > { %v9421_v18 = vadd.f32 %v2309_v1, %v9285_v60  ;;  %v2023_v47 = vsel %vm950_vm0, %v9418_v41, -inf }
 0x48c   : > { %1699 = vmax.xlane.f32.xlu2 %v1698_v4  ;;  %1449 = vadd.xlane.f32.xlu0 %v1448_v10 }
 0x48d   : > { %v2327_v49 = vsel %vm950_vm0, %v9421_v18, -inf }
 0x490   : > { %v2300_v54 = vpop.f32.mrf.mxu2 }
 0x491   : > { %v2310_v8 = vmul.f32 0.17677669, %v2300_v54 }
 0x493   : > { %v9434_v60 = vadd.f32 %v2310_v8, %v9295_v3 }
 0x494   : > { %2018 = vmax.xlane.f32.xlu2 %v2017_v24  ;;  %1452 = vadd.xlane.f32.xlu0 %v1451_v61 }
 0x495   : > { %v2330_v63 = vsel %vm950_vm0, %v9434_v60, -inf }
 0x498   : > { %v2303_v6 = vpop.f32.mrf.mxu2 }
 0x499   : > { %v2311_v62 = vmul.f32 0.17677669, %v2303_v6 }
 0x49b   : > { %v9439_v45 = vadd.f32 %v2311_v62, %v9304_v13 }
 0x49c   : > { %1443 = vadd.xlane.f32.xlu2 %v1442_v53  ;;  %2319 = vmax.xlane.f32.xlu0 %v2318_v22 }
 0x49d   : > { %v2333_v7 = vsel %vm950_vm0, %v9439_v45, -inf }
 0x4a4   : > { %1446 = vadd.xlane.f32.xlu2 %v1445_v33  ;;  %2322 = vmax.xlane.f32.xlu0 %v2321_v40 }
 0x4ac   : > { %2024 = vmax.xlane.f32.xlu2 %v2023_v47  ;;  %2328 = vmax.xlane.f32.xlu0 %v2327_v49 }
 0x4b4   : > { %1708 = vmax.xlane.f32.xlu2 %v1707_v56 }
 0x4b9   : > { %v1694_v3 = vpop.xlane.xlu0 %1693 }
 0x4ba   : > { %v1710_v13 = vsub.f32 %v9321_v12, %v1694_v3 }
 0x4bc   : > { %2331 = vmax.xlane.f32.xlu2 %v2330_v63  ;;  %v1716_v11 = vmul.f32 1.442695, %v1710_v13 }
 0x4c0   : > { %7607 = vrot.lane.b32.xlu0 %v9179_v48, %s8603_s11 }
 0x4c4   : > { %2334 = vmax.xlane.f32.xlu2 %v2333_v7 }
 0x4c8   : > { %7617 = vrot.lane.b32.xlu0 %v9172_v38, %s8603_s11 }
 0x4d0   : > { %7622 = vrot.lane.b32.xlu0 %v9179_v48, %s8604_s18 }
 0x4d1   : > { %v1703_v52 = vpop.xlane.xlu0 %1702 }
 0x4d2   : > { %v1713_v48 = vsub.f32 %v9326_v43, %v1703_v52 }
 0x4d4   : > { %v1722_v12 = vmul.f32 1.442695, %v1713_v48 }
 0x4d7   : > { %v2010_v4 = vpop.xlane.xlu1 %2009 }
 0x4d8   : > { %v2026_v10 = vsub.f32 %v9331_v58, %v2010_v4 }
 0x4da   : > { %v2032_v37 = vmul.f32 1.442695, %v2026_v10 }
 0x4dc   : > { %7735 = vpow2.f32 %v2032_v37 }
 0x4dd   : > { %7737 = vpow2.f32 %v1716_v11 }
 0x4df   : > { %v1697_v16 = vpop.xlane.xlu1 %1696  ;;  %v9451_v24 = vpop.xlane.xlu2 %2012 }
 0x4e0   : > { %v1711_v61 = vsub.f32 %v9337_v5, %v1697_v16 }
 0x4e2   : > { %v9454_v25 = vpop.eup %7735  ;;  %v1718_v30 = vmul.f32 1.442695, %v1711_v61 }
 0x4e3   : > { %v2044_v58 = vsel %vm950_vm0, %v9454_v25, 0.0  ;;  %v9459_v22 = vpop.eup %7737 }
 0x4e4   : > { %7739 = vpow2.f32 %v1718_v30  ;;  %2045 = vadd.xlane.f32.xlu2 %v2044_v58  ;;  %v1728_v43 = vsel %vm950_vm0, %v9459_v22, 0.0 }
 0x4e7   : > { %v1438_v53 = vpop.xlane.xlu2 %1437  ;;  %v1706_v10 = vpop.xlane.xlu1 %1705 }
 0x4e8   : > { %7741 = vrcp.f32 %v1438_v53  ;;  %v1465_v42 = vand.u32 2147483648, %v1438_v53  ;;  %v1463_v54 = vand.u32 2147483647, %v1438_v53  ;;  %vm1459_vm7 = vweird.f32 %v1438_v53 }
 0x4e9   : > { %7743 = vpow2.f32 %v1722_v12  ;;  %v1714_v61 = vsub.f32 %v9349_v19, %v1706_v10 }
 0x4ea   : > { %v9461_v44 = vpop.eup %7739  ;;  %v1466_v56 = vor.u32 1.1754944e-38, %v1465_v42  ;;  %vm1464_vm9 = vcmp.eq.f32.partialorder %v1463_v54, 8.507059e+37  ;;  %v2027_v42 = vsub.f32 %v9342_v9, %v9451_v24 }
 0x4eb   : > { %v1731_v5 = vsel %vm950_vm0, %v9461_v44, 0.0 }
 0x4ec   : > { %1732 = vadd.xlane.f32.xlu1 %v1731_v5  ;;  %1729 = vadd.xlane.f32.xlu2 %v1728_v43 }
 0x4ee   : > { %v7742_v34 = vpop.eup %7741 }
 0x4ef   : > { %v1455_v35 = vmul.f32 %v7742_v34, %v1438_v53  ;;  %v9467_v1 = vpop.xlane.xlu2 %2015  ;;  %v9469_v33 = vpop.eup %7743  ;;  %vm1460_vm6 = vweird.f32 %v7742_v34  ;;  %v1724_v53 = vmul.f32 1.442695, %v1714_v61 }
 0x4f0   : > { %v1737_v49 = vsel %vm950_vm0, %v9469_v33, 0.0  ;;  %vm1461_vm8 = vmor %vm1459_vm7, %vm1460_vm6 }
 0x4f1   : > { %v1456_v40 = vsub.f32 1.0, %v1455_v35 }
 0x4f3   : > { %v1457_v47 = vmul.f32 %v7742_v34, %v1456_v40 }
 0x4f4   : > { %1738 = vadd.xlane.f32.xlu1 %v1737_v49  ;;  %v2034_v49 = vmul.f32 1.442695, %v2027_v42 }
 0x4f5   : > { %v1458_v8 = vadd.f32 %v7742_v34, %v1457_v47 }
 0x4f7   : > { %v1441_v6 = vpop.xlane.xlu2 %1440  ;;  %v9473_v62 = vpop.xlane.xlu0 %2021  ;;  %v1462_v63 = vsel %vm1461_vm8, %v7742_v34, %v1458_v8 }
 0x4f8   : > { %7745 = vrcp.f32 %v1441_v6  ;;  %v1467_v7 = vsel %vm1464_vm9, %v1466_v56, %v1462_v63  ;;  %v1480_v30 = vand.u32 2147483648, %v1441_v6  ;;  %v1478_v12 = vand.u32 2147483647, %v1441_v6 }
 0x4f9   : > { %v1468_v3 = vmul.f32 %v9351_v21, %v1467_v7  ;;  %vm1474_vm11 = vweird.f32 %v1441_v6 }
 0x4fa   : > { %v1481_v5 = vor.u32 1.1754944e-38, %v1480_v30  ;;  %vm1479_vm13 = vcmp.eq.f32.partialorder %v1478_v12, 8.507059e+37 }
 0x4fb   : > { %7276 = vmatmul.msk.f32.vlgmr.msrb.gmra.mxu1 %vm950_vm0, %v1468_v3 }
 0x4fe   : > { %v7746_v4 = vpop.eup %7745 }
 0x4ff   : > { %v1470_v13 = vmul.f32 %v7746_v4, %v1441_v6  ;;  %v1700_v37 = vpop.xlane.xlu2 %1699  ;;  %v9477_v11 = vpop.xlane.xlu0 %1449  ;;  %vm1475_vm10 = vweird.f32 %v7746_v4 }
 0x500   : > { %v1712_v52 = vsub.f32 %v9380_v2, %v1700_v37  ;;  %vm1476_vm12 = vmor %vm1474_vm11, %vm1475_vm10  ;;  %vm1519_vm9 = vweird.f32 %v9477_v11 }
 0x501   : > { %v1471_v16 = vsub.f32 1.0, %v1470_v13 }
 0x502   : > { %v1720_v48 = vmul.f32 1.442695, %v1712_v52 }
 0x503   : > { %v1472_v58 = vmul.f32 %v7746_v4, %v1471_v16 }
 0x504   : > { %7747 = vpow2.f32 %v1720_v48 }
 0x505   : > { %v1473_v21 = vadd.f32 %v7746_v4, %v1472_v58  ;;  %7749 = vpow2.f32 %v1724_v53 }
 0x507   : > { %v9481_v43 = vpop.xlane.xlu2 %2018  ;;  %v9483_v34 = vpop.xlane.xlu0 %1452  ;;  %v1477_v35 = vsel %vm1476_vm12, %v7746_v4, %v1473_v21 }
 0x508   : > { %v1482_v2 = vsel %vm1479_vm13, %v1481_v5, %v1477_v35  ;;  %vm1534_vm13 = vweird.f32 %v9483_v34 }
 0x509   : > { %v1483_v19 = vmul.f32 %v9364_v46, %v1482_v2 }
 0x50a   : > { %v9486_v40 = vpop.eup %7747 }
 0x50b   : > { %7277 = vmatmul.msk.f32.gmra.mxu1 %vm950_vm0, %v1483_v19  ;;  %v1734_v47 = vsel %vm950_vm0, %v9486_v40, 0.0  ;;  %v9495_v56 = vpop.eup %7749 }
 0x50c   : > { %1735 = vadd.xlane.f32.xlu2 %v1734_v47  ;;  %v1740_v9 = vsel %vm950_vm0, %v9495_v56, 0.0 }
 0x50f   : > { %v1444_v54 = vpop.xlane.xlu2 %1443  ;;  %v9493_v8 = vpop.xlane.xlu0 %2319 }
 0x510   : > { %7751 = vrcp.f32 %v1444_v54  ;;  %v1495_v52 = vand.u32 2147483648, %v1444_v54  ;;  %v1493_v48 = vand.u32 2147483647, %v1444_v54  ;;  %vm1489_vm15 = vweird.f32 %v1444_v54 }
 0x511   : > { %7753 = vrcp.f32 %v9477_v11 }
 0x512   : > { %7755 = vpow2.f32 %v2034_v49  ;;  %v1496_v12 = vor.u32 1.1754944e-38, %v1495_v52  ;;  %vm1494_vm2 = vcmp.eq.f32.partialorder %v1493_v48, 8.507059e+37  ;;  %v1525_v48 = vand.u32 2147483648, %v9477_v11 }
 0x514   : > { %1741 = vadd.xlane.f32.xlu2 %v1740_v9 }
 0x516   : > { %v7752_v46 = vpop.eup %7751 }
 0x517   : > { %v9500_v24 = vpop.eup %7753  ;;  %v1485_v6 = vmul.f32 %v7752_v46, %v1444_v54  ;;  %v1447_v63 = vpop.xlane.xlu2 %1446  ;;  %vm1490_vm14 = vweird.f32 %v7752_v46 }
 0x518   : > { %v2323_v7 = vpop.xlane.xlu0 %2322  ;;  %v9502_v3 = vpop.eup %7755  ;;  %7757 = vrcp.f32 %v1447_v63  ;;  %v1515_v13 = vmul.f32 %v9500_v24, %v9477_v11  ;;  %vm1491_vm1 = vmor %vm1489_vm15, %vm1490_vm14  ;;  %v1510_v54 = vand.u32 2147483648, %v1447_v63  ;;  %vm1504_vm4 = vweird.f32 %v1447_v63 }
 0x519   : > { %v2337_v4 = vsub.f32 %v9409_v31, %v2323_v7  ;;  %7759 = vrcp.f32 %v9483_v34  ;;  %v1486_v10 = vsub.f32 1.0, %v1485_v6  ;;  %v2047_v16 = vsel %vm950_vm0, %v9502_v3, 0.0 }
 0x51a   : > { %v1516_v31 = vsub.f32 1.0, %v1515_v13  ;;  %vm1520_vm7 = vweird.f32 %v9500_v24 }
 0x51b   : > { %v2344_v37 = vmul.f32 1.442695, %v2337_v4  ;;  %v1487_v61 = vmul.f32 %v7752_v46, %v1486_v10  ;;  %vm1521_vm10 = vmor %vm1519_vm9, %vm1520_vm7 }
 0x51c   : > { %2048 = vadd.xlane.f32.xlu2 %v2047_v16  ;;  %v1517_v9 = vmul.f32 %v9500_v24, %v1516_v31  ;;  %v2336_v31 = vsub.f32 %v9400_v27, %v9493_v8  ;;  %v1538_v8 = vand.u32 2147483647, %v9483_v34 }
 0x51d   : > { %7761 = vpow2.f32 %v2344_v37  ;;  %v1488_v30 = vadd.f32 %v7752_v46, %v1487_v61 }
 0x51e   : > { %v7758_v58 = vpop.eup %7757  ;;  %v1518_v52 = vadd.f32 %v9500_v24, %v1517_v9  ;;  %vm1539_vm15 = vcmp.eq.f32.partialorder %v1538_v8, 8.507059e+37 }
 0x51f   : > { %v9510_v21 = vpop.eup %7759  ;;  %v1500_v53 = vmul.f32 %v7758_v58, %v1447_v63  ;;  %v9512_v5 = vpop.xlane.xlu2 %2024  ;;  %v1492_v35 = vsel %vm1491_vm1, %v7752_v46, %v1488_v30  ;;  %vm1505_vm3 = vweird.f32 %v7758_v58  ;;  %v1508_v46 = vand.u32 2147483647, %v1447_v63 }
 0x520   : > { %v1497_v2 = vsel %vm1494_vm2, %v1496_v12, %v1492_v35  ;;  %v1530_v49 = vmul.f32 %v9510_v21, %v9483_v34  ;;  %vm1506_vm6 = vmor %vm1504_vm4, %vm1505_vm3  ;;  %v1523_v63 = vand.u32 2147483647, %v9477_v11  ;;  %v2342_v35 = vmul.f32 1.442695, %v2336_v31 }
 0x521   : > { %v1501_v19 = vsub.f32 1.0, %v1500_v53  ;;  %v1498_v42 = vmul.f32 %v9402_v28, %v1497_v2  ;;  %v1511_v28 = vor.u32 1.1754944e-38, %v1510_v54  ;;  %vm1509_vm8 = vcmp.eq.f32.partialorder %v1508_v46, 8.507059e+37 }
 0x522   : > { %v1531_v10 = vsub.f32 1.0, %v1530_v49  ;;  %v1526_v53 = vor.u32 1.1754944e-38, %v1525_v48  ;;  %vm1524_vm11 = vcmp.eq.f32.partialorder %v1523_v63, 8.507059e+37  ;;  %vm1535_vm12 = vweird.f32 %v9510_v21 }
 0x523   : > { %v9515_v47 = vpop.eup %7761  ;;  %7278 = vmatmul.msk.f32.gmra.mxu1 %vm950_vm0, %v1498_v42  ;;  %v1502_v7 = vmul.f32 %v7758_v58, %v1501_v19  ;;  %v1540_v11 = vand.u32 2147483648, %v9483_v34  ;;  %vm1536_vm14 = vmor %vm1534_vm13, %vm1535_vm12 }
 0x524   : > { %v2357_v6 = vsel %vm950_vm0, %v9515_v47, 0.0 }
 0x525   : > { %2358 = vadd.xlane.f32.xlu0 %v2357_v6  ;;  %v1503_v4 = vadd.f32 %v7758_v58, %v1502_v7  ;;  %v2028_v6 = vsub.f32 %v9359_v39, %v9467_v1  ;;  %v2329_v7 = vpop.xlane.xlu0 %2328  ;;  %v2031_v1 = vsub.f32 %v9418_v41, %v9512_v5 }
 0x527   : > { %v1709_v13 = vpop.xlane.xlu2 %1708  ;;  %v1507_v37 = vsel %vm1506_vm6, %v7758_v58, %v1503_v4  ;;  %v1522_v58 = vsel %vm1521_vm10, %v9500_v24, %v1518_v52  ;;  %v2036_v46 = vmul.f32 1.442695, %v2028_v6 }
 0x528   : > { %v1715_v16 = vsub.f32 %v9429_v55, %v1709_v13  ;;  %v1512_v61 = vsel %vm1509_vm8, %v1511_v28, %v1507_v37  ;;  %v1532_v55 = vmul.f32 %v9510_v21, %v1531_v10  ;;  %v2339_v28 = vsub.f32 %v9421_v18, %v2329_v7  ;;  %v2326_v13 = vpop.xlane.xlu1 %2325 }
 0x529   : > { %v1513_v30 = vmul.f32 %v9411_v32, %v1512_v61  ;;  %v1527_v32 = vsel %vm1524_vm11, %v1526_v53, %v1522_v58  ;;  %v2029_v7 = vsub.f32 %v9390_v57, %v9481_v43 }
 0x52a   : > { %v1726_v12 = vmul.f32 1.442695, %v1715_v16  ;;  %v1533_v2 = vadd.f32 %v9510_v21, %v1532_v55  ;;  %v1528_v27 = vmul.f32 %v9382_v15, %v1527_v32  ;;  %v1541_v15 = vor.u32 1.1754944e-38, %v1540_v11 }
 0x52b   : > { %7279 = vmatmul.msk.f32.gmra.mxu1 %vm950_vm0, %v1513_v30  ;;  %v2338_v11 = vsub.f32 %v9375_v59, %v2326_v13 }
 0x52c   : > { %7763 = vpow2.f32 %v1726_v12  ;;  %v1537_v42 = vsel %vm1536_vm14, %v9510_v21, %v1533_v2 }
 0x52d   : > { %7765 = vpow2.f32 %v2342_v35  ;;  %v1542_v49 = vsel %vm1539_vm15, %v1541_v15, %v1537_v42  ;;  %v2346_v15 = vmul.f32 1.442695, %v2338_v11 }
 0x52e   : > { %v1543_v34 = vmul.f32 %v9392_v50, %v1542_v49  ;;  %7767 = vpow2.f32 %v2036_v46  ;;  %v2348_v50 = vmul.f32 1.442695, %v2339_v28 }
 0x52f   : > { %v9557_v21 = vpop.xlane.xlu2 %2331 }
 0x530   : > { %7769 = vpow2.f32 %v2348_v50  ;;  %v2038_v50 = vmul.f32 1.442695, %v2029_v7  ;;  %v2340_v13 = vsub.f32 %v9434_v60, %v9557_v21 }
 0x532   : > { %v9541_v24 = vpop.eup %7763 }
 0x533   : > { %7280 = vmatmul.msk.f32.gmra.mxu1 %vm950_vm0, %v1528_v27  ;;  %v1743_v19 = vsel %vm950_vm0, %v9541_v24, 0.0  ;;  %v9549_v54 = vpop.eup %7765 }
 0x534   : > { %7612 = vrot.lane.b32.xlu2 %v9187_v0, %s8604_s18  ;;  %1744 = vadd.xlane.f32.xlu1 %v1743_v19  ;;  %v2354_v9 = vsel %vm950_vm0, %v9549_v54, 0.0  ;;  %v9570_v39 = vpop.eup %7767 }
 0x535   : > { %v2050_v18 = vsel %vm950_vm0, %v9570_v39, 0.0 }
 0x537   : > { %v9561_v4 = vpop.xlane.xlu2 %2334 }
 0x539   : > { %7627 = vrot.lane.b32.xlu0 %v9172_v38, %s8604_s18  ;;  %v2030_v38 = vsub.f32 %v9367_v51, %v9473_v62  ;;  %v9576_v51 = vpop.eup %7769  ;;  %v2042_v62 = vmul.f32 1.442695, %v2031_v1 }
 0x53a   : > { %v2363_v61 = vsel %vm950_vm0, %v9576_v51, 0.0 }
 0x53b   : > { %7281 = vmatmul.msk.f32.gmra.mxu1 %vm950_vm0, %v1543_v34  ;;  %v2040_v10 = vmul.f32 1.442695, %v2030_v38 }
 0x53c   : > { %2355 = vadd.xlane.f32.xlu1 %v2354_v9 }
 0x53d   : > { %7771 = vpow2.f32 %v2040_v10 }
 0x543   : > { %v9578_v16 = vpop.eup %7771 }
 0x544   : > { %v2056_v41 = vsel %vm950_vm0, %v9578_v16, 0.0 }
 0x555   : > { %7602 = vrot.lane.b32.xlu1 %v9187_v0, %s8603_s11 }
 0x557   : > { %v9568_v37 = vpop.xlane.xlu2 %2045 }
 0x55d   : > { %2051 = vadd.xlane.f32.xlu2 %v2050_v18  ;;  %v2350_v18 = vmul.f32 1.442695, %v2340_v13 }
 0x55f   : > { %v1733_v52 = vpop.xlane.xlu1 %1732  ;;  %v1730_v0 = vpop.xlane.xlu2 %1729 }
 0x560   : > { %7773 = vrcp.f32 %v1733_v52  ;;  %v1757_v55 = vand.u32 2147483648, %v1730_v0  ;;  %v1755_v32 = vand.u32 2147483647, %v1730_v0  ;;  %vm1751_vm2 = vweird.f32 %v1730_v0 }
 0x561   : > { %7775 = vrcp.f32 %v1730_v0  ;;  %v1772_v34 = vand.u32 2147483648, %v1733_v52  ;;  %vm1766_vm7 = vweird.f32 %v1733_v52  ;;  %v1770_v6 = vand.u32 2147483647, %v1733_v52 }
 0x562   : > { %7777 = vpow2.f32 %v2042_v62  ;;  %v1758_v8 = vor.u32 1.1754944e-38, %v1757_v55  ;;  %vm1756_vm4 = vcmp.eq.f32.partialorder %v1755_v32, 8.507059e+37 }
 0x563   : > { %2364 = vadd.xlane.f32.xlu0 %v2363_v61  ;;  %7779 = vpow2.f32 %v2346_v15  ;;  %v1773_v46 = vor.u32 1.1754944e-38, %v1772_v34  ;;  %vm1771_vm9 = vcmp.eq.f32.partialorder %v1770_v6, 8.507059e+37 }
 0x565   : > { %2057 = vadd.xlane.f32.xlu2 %v2056_v41 }
 0x566   : > { %v7774_v5 = vpop.eup %7773 }
 0x567   : > { %v7776_v48 = vpop.eup %7775  ;;  %v1762_v30 = vmul.f32 %v7774_v5, %v1733_v52  ;;  %vm1767_vm6 = vweird.f32 %v7774_v5  ;;  %v9593_v28 = vpop.xlane.xlu1 %1738 }
 0x568   : > { %v9584_v63 = vpop.eup %7777  ;;  %v1747_v31 = vmul.f32 %v7776_v48, %v1730_v0  ;;  %vm1752_vm1 = vweird.f32 %v7776_v48  ;;  %vm1768_vm8 = vmor %vm1766_vm7, %vm1767_vm6  ;;  %7781 = vrcp.f32 %v9593_v28  ;;  %v9607_v52 = vpop.permute.xlu0 %7607  ;;  %v2341_v0 = vsub.f32 %v9439_v45, %v9561_v4 }
 0x569   : > { %v1763_v12 = vsub.f32 1.0, %v1762_v30  ;;  %v2059_v53 = vsel %vm950_vm0, %v9584_v63, 0.0  ;;  %vm1753_vm3 = vmor %vm1751_vm2, %vm1752_vm1  ;;  %v9597_v10 = vpop.eup %7779  ;;  %7783 = vpow2.f32 %v2038_v50  ;;  %v1802_v15 = vand.u32 2147483648, %v9593_v28 }
 0x56a   : > { %v1748_v58 = vsub.f32 1.0, %v1747_v31  ;;  %v2360_v57 = vsel %vm950_vm0, %v9597_v10, 0.0  ;;  %vm1796_vm15 = vweird.f32 %v9593_v28 }
 0x56b   : > { %v1764_v2 = vmul.f32 %v7774_v5, %v1763_v12 }
 0x56c   : > { %v1749_v35 = vmul.f32 %v7776_v48, %v1748_v58 }
 0x56d   : > { %2060 = vadd.xlane.f32.xlu2 %v2059_v53  ;;  %v1765_v42 = vadd.f32 %v7774_v5, %v1764_v2 }
 0x56e   : > { %v1750_v27 = vadd.f32 %v7776_v48, %v1749_v35  ;;  %v7782_v1 = vpop.eup %7781 }
 0x56f   : > { %v1769_v59 = vsel %vm1768_vm8, %v7774_v5, %v1765_v42  ;;  %v9604_v62 = vpop.eup %7783  ;;  %vm1797_vm13 = vweird.f32 %v7782_v1 }
 0x570   : > { %v1754_v19 = vsel %vm1753_vm3, %v7776_v48, %v1750_v27  ;;  %v1774_v38 = vsel %vm1771_vm9, %v1773_v46, %v1769_v59  ;;  %v2053_v60 = vsel %vm950_vm0, %v9604_v62, 0.0  ;;  %v2352_v48 = vmul.f32 1.442695, %v2341_v0  ;;  %v9621_v2 = vpop.permute.xlu0 %7617  ;;  %vm1798_vm1 = vmor %vm1796_vm15, %vm1797_vm13 }
 0x571   : > { %v1759_v49 = vsel %vm1756_vm4, %v1758_v8, %v1754_v19  ;;  %vm2067_vm9 = vweird.f32 %v9568_v37 }
 0x572   : > { %v1760_v9 = vmul.f32 %v9459_v22, %v1759_v49  ;;  %v1775_v22 = vmul.f32 %v9461_v44, %v1774_v38  ;;  %v1792_v44 = vmul.f32 %v7782_v1, %v9593_v28  ;;  %v1803_v38 = vor.u32 1.1754944e-38, %v1802_v15 }
 0x574   : > { %7294 = vmatmul.msk.f32.vlgmr.msrb.gmra.mxu3 %vm950_vm0, %v1760_v9  ;;  %v1793_v21 = vsub.f32 1.0, %v1792_v44  ;;  %v1800_v9 = vand.u32 2147483647, %v9593_v28 }
 0x576   : > { %v1794_v45 = vmul.f32 %v7782_v1, %v1793_v21  ;;  %vm1801_vm2 = vcmp.eq.f32.partialorder %v1800_v9, 8.507059e+37 }
 0x578   : > { %v1795_v19 = vadd.f32 %v7782_v1, %v1794_v45 }
 0x57a   : > { %v1799_v59 = vsel %vm1798_vm1, %v7782_v1, %v1795_v19  ;;  %v7623_v1 = vpop.permute.xlu0 %7622 }
 0x57c   : > { %7295 = vmatmul.msk.f32.gmra.mxu3 %vm950_vm0, %v1775_v22  ;;  %v1804_v22 = vsel %vm1801_vm2, %v1803_v38, %v1799_v59 }
 0x57f   : > { %v1736_v43 = vpop.xlane.xlu2 %1735  ;;  %2361 = vadd.xlane.f32.xlu1 %v2360_v57 }
 0x580   : > { %7785 = vrcp.f32 %v1736_v43  ;;  %v1787_v31 = vand.u32 2147483648, %v1736_v43  ;;  %v1785_v55 = vand.u32 2147483647, %v1736_v43  ;;  %vm1781_vm11 = vweird.f32 %v1736_v43 }
 0x581   : > { %7787 = vpow2.f32 %v2350_v18  ;;  %v1805_v18 = vmul.f32 %v9469_v33, %v1804_v22 }
 0x582   : > { %v1788_v32 = vor.u32 1.1754944e-38, %v1787_v31  ;;  %vm1786_vm14 = vcmp.eq.f32.partialorder %v1785_v55, 8.507059e+37 }
 0x586   : > { %v7786_v61 = vpop.eup %7785 }
 0x587   : > { %v1777_v41 = vmul.f32 %v7786_v61, %v1736_v43  ;;  %v9613_v5 = vpop.xlane.xlu2 %1741  ;;  %2054 = vadd.xlane.f32.xlu1 %v2053_v60  ;;  %v9616_v12 = vpop.eup %7787  ;;  %vm1782_vm10 = vweird.f32 %v7786_v61  ;;  %v7624_v60 = vunpack.i.l.bf16 %v7623_v1 }
 0x588   : > { %7789 = vrcp.f32 %v9613_v5  ;;  %v2366_v35 = vsel %vm950_vm0, %v9616_v12, 0.0  ;;  %vm1783_vm12 = vmor %vm1781_vm11, %vm1782_vm10  ;;  %v1817_v43 = vand.u32 2147483648, %v9613_v5  ;;  %vm1811_vm4 = vweird.f32 %v9613_v5 }
 0x589   : > { %v1778_v30 = vsub.f32 1.0, %v1777_v41  ;;  %7791 = vpow2.f32 %v2352_v48  ;;  %v1815_v44 = vand.u32 2147483647, %v9613_v5 }
 0x58a   : > { %7793 = vrcp.f32 %v9568_v37  ;;  %v1818_v41 = vor.u32 1.1754944e-38, %v1817_v43 }
 0x58b   : > { %v1779_v58 = vmul.f32 %v7786_v61, %v1778_v30  ;;  %vm1816_vm7 = vcmp.eq.f32.partialorder %v1815_v44, 8.507059e+37  ;;  %v7625_v30 = vunpack.i.h.bf16 %v7623_v1 }
 0x58d   : > { %v1780_v4 = vadd.f32 %v7786_v61, %v1779_v58 }
 0x58e   : > { %v7790_v53 = vpop.eup %7789 }
 0x58f   : > { %v1807_v11 = vmul.f32 %v7790_v53, %v9613_v5  ;;  %v9624_v27 = vpop.xlane.xlu2 %2048  ;;  %2367 = vadd.xlane.f32.xlu1 %v2366_v35  ;;  %v1784_v8 = vsel %vm1783_vm12, %v7786_v61, %v1780_v4  ;;  %v9630_v6 = vpop.eup %7791  ;;  %vm1812_vm3 = vweird.f32 %v7790_v53  ;;  %v2071_v35 = vand.u32 2147483647, %v9568_v37 }
 0x590   : > { %v1789_v42 = vsel %vm1786_vm14, %v1788_v32, %v1784_v8  ;;  %v7794_v46 = vpop.eup %7793  ;;  %v2369_v50 = vsel %vm950_vm0, %v9630_v6, 0.0  ;;  %7795 = vrcp.f32 %v9624_v27  ;;  %vm1813_vm6 = vmor %vm1811_vm4, %vm1812_vm3  ;;  %v2088_v9 = vand.u32 2147483648, %v9624_v27 }
 0x591   : > { %v1808_v49 = vsub.f32 1.0, %v1807_v11  ;;  %v1790_v34 = vmul.f32 %v9486_v40, %v1789_v42  ;;  %v2063_v28 = vmul.f32 %v7794_v46, %v9568_v37  ;;  %vm2068_vm8 = vweird.f32 %v7794_v46 }
 0x592   : > { %vm2069_vm10 = vmor %vm2067_vm9, %vm2068_vm8  ;;  %vm2072_vm11 = vcmp.eq.f32.partialorder %v2071_v35, 8.507059e+37  ;;  %vm2082_vm13 = vweird.f32 %v9624_v27 }
 0x593   : > { %7296 = vmatmul.msk.f32.gmra.mxu3 %vm950_vm0, %v1790_v34  ;;  %v1809_v7 = vmul.f32 %v7790_v53, %v1808_v49  ;;  %v2064_v21 = vsub.f32 1.0, %v2063_v28 }
 0x595   : > { %v1810_v13 = vadd.f32 %v7790_v53, %v1809_v7  ;;  %v2065_v33 = vmul.f32 %v7794_v46, %v2064_v21 }
 0x596   : > { %v7796_v48 = vpop.eup %7795 }
 0x597   : > { %v7613_v40 = vpop.permute.xlu2 %7612  ;;  %2370 = vadd.xlane.f32.xlu1 %v2369_v50  ;;  %v1814_v61 = vsel %vm1813_vm6, %v7790_v53, %v1810_v13  ;;  %v2078_v58 = vmul.f32 %v7796_v48, %v9624_v27  ;;  %v2066_v45 = vadd.f32 %v7794_v46, %v2065_v33  ;;  %v2073_v53 = vand.u32 2147483648, %v9568_v37 }
 0x598   : > { %v7614_v57 = vunpack.i.l.bf16 %v7613_v40  ;;  %v7615_v0 = vunpack.i.h.bf16 %v7613_v40  ;;  %v1819_v31 = vsel %vm1816_vm7, %v1818_v41, %v1814_v61  ;;  %v9644_v55 = vpop.xlane.xlu0 %2358  ;;  %vm2083_vm12 = vweird.f32 %v7796_v48 }
 0x599   : > { %v1820_v5 = vmul.f32 %v9495_v56, %v1819_v31  ;;  %v2079_v4 = vsub.f32 1.0, %v2078_v58  ;;  %v2070_v11 = vsel %vm2069_vm10, %v7794_v46, %v2066_v45  ;;  %v2074_v19 = vor.u32 1.1754944e-38, %v2073_v53  ;;  %vm2084_vm14 = vmor %vm2082_vm13, %vm2083_vm12 }
 0x59a   : > { %2198 = vmatpush.msra.mxu1 %v7614_v57  ;;  %v2086_v37 = vand.u32 2147483647, %v9624_v27  ;;  %v2089_v40 = vor.u32 1.1754944e-38, %v2088_v9 }
 0x59b   : > { %7297 = vmatmul.msk.f32.gmra.mxu3 %vm950_vm0, %v1805_v18  ;;  %v2080_v8 = vmul.f32 %v7796_v48, %v2079_v4  ;;  %v2075_v15 = vsel %vm2072_vm11, %v2074_v19, %v2070_v11  ;;  %v7609_v4 = vunpack.i.l.bf16 %v9607_v52  ;;  %vm2392_vm11 = vweird.f32 %v9644_v55 }
 0x59c   : > { %2199 = vmatpush.msra.mxu1 %v7615_v0  ;;  %v2076_v7 = vmul.f32 %v9454_v25, %v2075_v15  ;;  %vm2087_vm15 = vcmp.eq.f32.partialorder %v2086_v37, 8.507059e+37  ;;  %v7620_v15 = vunpack.i.h.bf16 %v9621_v2 }
 0x59d   : > { %v2081_v49 = vadd.f32 %v7796_v48, %v2080_v8  ;;  %v7619_v8 = vunpack.i.l.bf16 %v9621_v2 }
 0x59e   : > { %2200 = vmatpush.msra.mxu1 %v7624_v60 }
 0x59f   : > { %v2085_v38 = vsel %vm2084_vm14, %v7796_v48, %v2081_v49  ;;  %v2398_v49 = vand.u32 2147483648, %v9644_v55 }
 0x5a0   : > { %2201 = vmatpush.msra.mxu1 %v7625_v30  ;;  %v2090_v28 = vsel %vm2087_vm15, %v2089_v40, %v2085_v38 }
 0x5a1   : > { %v2091_v27 = vmul.f32 %v9502_v3, %v2090_v28 }
 0x5a3   : > { %7298 = vmatmul.msk.f32.gmra.mxu3 %vm950_vm0, %v1820_v5 }
 0x5a7   : > { %v1745_v32 = vpop.xlane.xlu1 %1744 }
 0x5a8   : > { %7797 = vrcp.f32 %v1745_v32  ;;  %v1832_v13 = vand.u32 2147483648, %v1745_v32  ;;  %v1830_v43 = vand.u32 2147483647, %v1745_v32  ;;  %vm1826_vm2 = vweird.f32 %v1745_v32 }
 0x5aa   : > { %v1833_v1 = vor.u32 1.1754944e-38, %v1832_v13  ;;  %vm1831_vm4 = vcmp.eq.f32.partialorder %v1830_v43, 8.507059e+37 }
 0x5ab   : > { %v7628_v56 = vpop.permute.xlu0 %7627 }
 0x5ac   : > { %v7629_v42 = vunpack.i.l.bf16 %v7628_v56  ;;  %v7630_v34 = vunpack.i.h.bf16 %v7628_v56 }
 0x5ae   : > { %2202 = vmatpush.msra.mxu1 %v7629_v42  ;;  %v7798_v59 = vpop.eup %7797 }
 0x5af   : > { %v1822_v46 = vmul.f32 %v7798_v59, %v1745_v32  ;;  %v2356_v22 = vpop.xlane.xlu1 %2355  ;;  %vm1827_vm1 = vweird.f32 %v7798_v59  ;;  %v7610_v32 = vunpack.i.h.bf16 %v9607_v52  ;;  %v2396_v52 = vand.u32 2147483647, %v9644_v55 }
 0x5b0   : > { %2203 = vmatpush.msra.mxu1 %v7630_v34  ;;  %7799 = vrcp.f32 %v2356_v22  ;;  %vm1828_vm3 = vmor %vm1826_vm2, %vm1827_vm1  ;;  %v2383_v5 = vand.u32 2147483648, %v2356_v22  ;;  %vm2377_vm7 = vweird.f32 %v2356_v22 }
 0x5b1   : > { %7312 = vmatmul.msk.f32.vlgmr.msra.gmra.mxu1 %vm950_vm0, %v2076_v7  ;;  %v1823_v50 = vsub.f32 1.0, %v1822_v46  ;;  %7801 = vrcp.f32 %v9644_v55  ;;  %vm2397_vm13 = vcmp.eq.f32.partialorder %v2396_v52, 8.507059e+37 }
 0x5b2   : > { %v2384_v11 = vor.u32 1.1754944e-38, %v2383_v5 }
 0x5b3   : > { %v1824_v57 = vmul.f32 %v7798_v59, %v1823_v50 }
 0x5b5   : > { %v1825_v25 = vadd.f32 %v7798_v59, %v1824_v57 }
 0x5b6   : > { %v7800_v61 = vpop.eup %7799 }
 0x5b7   : > { %v1829_v18 = vsel %vm1828_vm3, %v7798_v59, %v1825_v25  ;;  %v2373_v60 = vmul.f32 %v7800_v61, %v2356_v22  ;;  %v7802_v41 = vpop.eup %7801  ;;  %vm2378_vm6 = vweird.f32 %v7800_v61  ;;  %v2399_v59 = vor.u32 1.1754944e-38, %v2398_v49 }
 0x5b8   : > { %v1834_v44 = vsel %vm1831_vm4, %v1833_v1, %v1829_v18  ;;  %v2388_v48 = vmul.f32 %v7802_v41, %v9644_v55  ;;  %vm2379_vm8 = vmor %vm2377_vm7, %vm2378_vm6  ;;  %vm2393_vm10 = vweird.f32 %v7802_v41  ;;  %v9680_v18 = vpop.f32.mrf.mxu1 }
 0x5b9   : > { %7313 = vmatmul.msk.f32.gmra.mxu1 %vm950_vm0, %v2091_v27  ;;  %v1835_v0 = vmul.f32 %v9541_v24, %v1834_v44  ;;  %v2374_v21 = vsub.f32 1.0, %v2373_v60  ;;  %v2381_v24 = vand.u32 2147483647, %v2356_v22  ;;  %vm2394_vm12 = vmor %vm2392_vm11, %vm2393_vm10 }
 0x5ba   : > { %v2389_v33 = vsub.f32 1.0, %v2388_v48 }
 0x5bb   : > { %7299 = vmatmul.msk.f32.gmra.mxu3 %vm950_vm0, %v1835_v0  ;;  %v2375_v3 = vmul.f32 %v7800_v61, %v2374_v21  ;;  %vm2382_vm9 = vcmp.eq.f32.partialorder %v2381_v24, 8.507059e+37 }
 0x5bc   : > { %v2390_v35 = vmul.f32 %v7802_v41, %v2389_v33 }
 0x5bd   : > { %v2376_v58 = vadd.f32 %v7800_v61, %v2375_v3 }
 0x5be   : > { %v2391_v42 = vadd.f32 %v7802_v41, %v2390_v35 }
 0x5bf   : > { %v2380_v53 = vsel %vm2379_vm8, %v7800_v61, %v2376_v58 }
 0x5c0   : > { %v2385_v56 = vsel %vm2382_vm9, %v2384_v11, %v2380_v53  ;;  %v2395_v9 = vsel %vm2394_vm12, %v7802_v41, %v2391_v42  ;;  %v9690_v5 = vpop.f32.mrf.mxu1 }
 0x5c1   : > { %v2386_v34 = vmul.f32 %v9549_v54, %v2385_v56  ;;  %v2400_v46 = vsel %vm2397_vm13, %v2399_v59, %v2395_v9 }
 0x5c2   : > { %v2401_v38 = vmul.f32 %v9515_v47, %v2400_v46 }
 0x5c7   : > { %v7603_v30 = vpop.permute.xlu1 %7602 }
 0x5c8   : > { %v7604_v31 = vunpack.i.l.bf16 %v7603_v30  ;;  %v7605_v45 = vunpack.i.h.bf16 %v7603_v30 }
 0x5ca   : > { %2508 = vmatpush.msra.mxu3 %v7604_v31 }
 0x5cc   : > { %2509 = vmatpush.msra.mxu3 %v7605_v45 }
 0x5ce   : > { %2510 = vmatpush.msra.mxu3 %v7609_v4 }
 0x5d0   : > { %v2052_v19 = vpop.xlane.xlu2 %2051  ;;  %2511 = vmatpush.msra.mxu3 %v7610_v32 }
 0x5d1   : > { %7803 = vrcp.f32 %v2052_v19  ;;  %v2103_v50 = vand.u32 2147483648, %v2052_v19  ;;  %v2101_v54 = vand.u32 2147483647, %v2052_v19  ;;  %vm2097_vm15 = vweird.f32 %v2052_v19 }
 0x5d2   : > { %2512 = vmatpush.msra.mxu3 %v7619_v8 }
 0x5d3   : > { %v2104_v40 = vor.u32 1.1754944e-38, %v2103_v50  ;;  %vm2102_vm2 = vcmp.eq.f32.partialorder %v2101_v54, 8.507059e+37  ;;  %v9712_v50 = vpop.f32.mrf.mxu1 }
 0x5d4   : > { %2513 = vmatpush.msra.mxu3 %v7620_v15 }
 0x5d5   : > { %7330 = vmatmul.msk.f32.vlgmr.msra.gmra.mxu3 %vm950_vm0, %v2386_v34 }
 0x5d6   : > { %v2365_v43 = vpop.xlane.xlu0 %2364 }
 0x5d7   : > { %v7804_v7 = vpop.eup %7803  ;;  %7805 = vrcp.f32 %v2365_v43  ;;  %vm2422_vm9 = vweird.f32 %v2365_v43  ;;  %v2428_v49 = vand.u32 2147483648, %v2365_v43  ;;  %v2426_v59 = vand.u32 2147483647, %v2365_v43 }
 0x5d8   : > { %v2093_v37 = vmul.f32 %v7804_v7, %v2052_v19  ;;  %vm2098_vm14 = vweird.f32 %v7804_v7  ;;  %v9674_v47 = vpop.xlane.xlu2 %2057 }
 0x5d9   : > { %vm2099_vm1 = vmor %vm2097_vm15, %vm2098_vm14  ;;  %vm2427_vm13 = vcmp.eq.f32.partialorder %v2426_v59, 8.507059e+37 }
 0x5da   : > { %v2094_v2 = vsub.f32 1.0, %v2093_v37 }
 0x5dc   : > { %v2095_v22 = vmul.f32 %v7804_v7, %v2094_v2 }
 0x5dd   : > { %7331 = vmatmul.msk.f32.gmra.mxu3 %vm950_vm0, %v2401_v38  ;;  %v9676_v25 = vpop.eup %7805 }
 0x5de   : > { %v2096_v55 = vadd.f32 %v7804_v7, %v2095_v22  ;;  %v2418_v1 = vmul.f32 %v9676_v25, %v2365_v43  ;;  %vm2423_vm7 = vweird.f32 %v9676_v25  ;;  %v2429_v22 = vor.u32 1.1754944e-38, %v2428_v49 }
 0x5df   : > { %vm9701_vm10 = vmor %vm2422_vm9, %vm2423_vm7 }
 0x5e0   : > { %v2100_v13 = vsel %vm2099_vm1, %v7804_v7, %v2096_v55  ;;  %v2419_v61 = vsub.f32 1.0, %v2418_v1  ;;  %v9684_v60 = vpop.xlane.xlu2 %2060 }
 0x5e1   : > { %v2105_v28 = vsel %vm2102_vm2, %v2104_v40, %v2100_v13  ;;  %vm2127_vm2 = vweird.f32 %v9674_v47 }
 0x5e2   : > { %v2106_v57 = vmul.f32 %v9570_v39, %v2105_v28  ;;  %v2420_v31 = vmul.f32 %v9676_v25, %v2419_v61 }
 0x5e4   : > { %7314 = vmatmul.msk.f32.gmra.mxu1 %vm950_vm0, %v2106_v57  ;;  %v2421_v11 = vadd.f32 %v9676_v25, %v2420_v31 }
 0x5e6   : > { %v2425_v37 = vsel %vm9701_vm10, %v9676_v25, %v2421_v11  ;;  %v2148_v11 = vand.u32 2147483648, %v9684_v60 }
 0x5e7   : > { %v2430_v13 = vsel %vm2427_vm13, %v2429_v22, %v2425_v37 }
 0x5f2   : > { %v2362_v27 = vpop.xlane.xlu1 %2361 }
 0x5f3   : > { %7807 = vrcp.f32 %v2362_v27  ;;  %v2413_v30 = vand.u32 2147483648, %v2362_v27  ;;  %v2411_v58 = vand.u32 2147483647, %v2362_v27  ;;  %vm2407_vm4 = vweird.f32 %v2362_v27 }
 0x5f4   : > { %7809 = vrcp.f32 %v9674_v47 }
 0x5f5   : > { %v2414_v32 = vor.u32 1.1754944e-38, %v2413_v30  ;;  %vm2412_vm8 = vcmp.eq.f32.partialorder %v2411_v58, 8.507059e+37 }
 0x5f7   : > { %v1895_v44 = vpop.f32.mrf.mxu3 }
 0x5f9   : > { %v7808_v0 = vpop.eup %7807 }
 0x5fa   : > { %v9682_v39 = vpop.eup %7809  ;;  %v2403_v21 = vmul.f32 %v7808_v0, %v2362_v27  ;;  %v2055_v41 = vpop.xlane.xlu1 %2054  ;;  %vm2408_vm3 = vweird.f32 %v7808_v0 }
 0x5fb   : > { %7811 = vrcp.f32 %v2055_v41  ;;  %v2123_v3 = vmul.f32 %v9682_v39, %v9674_v47  ;;  %vm2409_vm6 = vmor %vm2407_vm4, %vm2408_vm3  ;;  %v2118_v7 = vand.u32 2147483648, %v2055_v41  ;;  %vm2112_vm12 = vweird.f32 %v2055_v41 }
 0x5fc   : > { %v2404_v48 = vsub.f32 1.0, %v2403_v21  ;;  %7813 = vrcp.f32 %v9684_v60  ;;  %vm2128_vm15 = vweird.f32 %v9682_v39  ;;  %v2431_v21 = vmul.f32 %v9576_v51, %v2430_v13 }
 0x5fd   : > { %v2124_v35 = vsub.f32 1.0, %v2123_v3  ;;  %v2119_v40 = vor.u32 1.1754944e-38, %v2118_v7  ;;  %vm9721_vm3 = vmor %vm2127_vm2, %vm2128_vm15  ;;  %v2149_v7 = vor.u32 1.1754944e-38, %v2148_v11 }
 0x5fe   : > { %v2405_v33 = vmul.f32 %v7808_v0, %v2404_v48  ;;  %v2131_v48 = vand.u32 2147483647, %v9674_v47 }
 0x5ff   : > { %v1898_v45 = vpop.f32.mrf.mxu3  ;;  %v2125_v46 = vmul.f32 %v9682_v39, %v2124_v35 }
 0x600   : > { %v7631_v24 = vpack.i.bf16 %v1898_v45, %v1895_v44  ;;  %v2406_v4 = vadd.f32 %v7808_v0, %v2405_v33  ;;  %v2133_v44 = vand.u32 2147483648, %v9674_v47  ;;  %v9735_v45 = vpop.f32.mrf.mxu1 }
 0x601   : > { %v7812_v53 = vpop.eup %7811  ;;  %v2126_v28 = vadd.f32 %v9682_v39, %v2125_v46 }
 0x602   : > { %v2108_v8 = vmul.f32 %v7812_v53, %v2055_v41  ;;  %7632 = vrot.lane.b32.xlu1 %v7631_v24, %s8603_s11  ;;  %v9695_v19 = vpop.xlane.xlu1 %2367  ;;  %v2410_v56 = vsel %vm2409_vm6, %v7808_v0, %v2406_v4  ;;  %v9697_v42 = vpop.eup %7813  ;;  %vm2113_vm11 = vweird.f32 %v7812_v53  ;;  %v2134_v33 = vor.u32 1.1754944e-38, %v2133_v44  ;;  %v2637_v44 = vld [vmem:[%s8973_s1 + $0x318] sm:$0xff] }
 0x603   : > { %7815 = vrcp.f32 %v9695_v19  ;;  %v2415_v15 = vsel %vm2412_vm8, %v2414_v32, %v2410_v56  ;;  %v2138_v2 = vmul.f32 %v9697_v42, %v9684_v60  ;;  %vm2114_vm14 = vmor %vm2112_vm12, %vm2113_vm11  ;;  %v2130_v3 = vsel %vm9721_vm3, %v9682_v39, %v2126_v28 }
 0x604   : > { %v2109_v34 = vsub.f32 1.0, %v2108_v8  ;;  %v2416_v52 = vmul.f32 %v9597_v10, %v2415_v15  ;;  %v2116_v10 = vand.u32 2147483647, %v2055_v41  ;;  %v2443_v30 = vand.u32 2147483648, %v9695_v19  ;;  %v2633_v41 = vld [vmem:[%s8973_s1 + $0x218] sm:$0xff] }
 0x605   : > { %v2139_v57 = vsub.f32 1.0, %v2138_v2  ;;  %v2441_v51 = vand.u32 2147483647, %v9695_v19  ;;  %vm2132_vm6 = vcmp.eq.f32.partialorder %v2131_v48, 8.507059e+37  ;;  %vm2437_vm7 = vweird.f32 %v9695_v19  ;;  %v2632_v48 = vld [vmem:[%s8973_s1 + $0x1d8] sm:$0xff] }
 0x606   : > { %7332 = vmatmul.msk.f32.gmra.mxu3 %vm950_vm0, %v2416_v52  ;;  %v2110_v38 = vmul.f32 %v7812_v53, %v2109_v34  ;;  %vm2117_vm1 = vcmp.eq.f32.partialorder %v2116_v10, 8.507059e+37  ;;  %v2135_v39 = vsel %vm2132_vm6, %v2134_v33, %v2130_v3  ;;  %v2444_v24 = vor.u32 1.1754944e-38, %v2443_v30  ;;  %v2631_v3 = vld [vmem:[%s8973_s1 + $0x198] sm:$0xff] }
 0x607   : > { %vm2143_vm9 = vweird.f32 %v9697_v42  ;;  %vm2442_vm10 = vcmp.eq.f32.partialorder %v2441_v51, 8.507059e+37  ;;  %vm2142_vm11 = vweird.f32 %v9684_v60  ;;  %v2146_v15 = vand.u32 2147483647, %v9684_v60  ;;  %v2630_v30 = vld [vmem:[%s8973_s1 + $0x158] sm:$0xff] }
 0x608   : > { %v2111_v54 = vadd.f32 %v7812_v53, %v2110_v38  ;;  %vm2144_vm12 = vmor %vm2142_vm11, %vm2143_vm9  ;;  %v9747_v46 = vpop.f32.mrf.mxu1  ;;  %v2628_v33 = vld [vmem:[%s8973_s1 + $0xd8] sm:$0xff]  ;;  %vm2611_vm3 = vcmask 523264  }
 0x609   : > { %v7816_v55 = vpop.eup %7815 }
 0x60a   : > { %v2433_v43 = vmul.f32 %v7816_v55, %v9695_v19  ;;  %v2371_v25 = vpop.xlane.xlu1 %2370  ;;  %v2115_v27 = vsel %vm2114_vm14, %v7812_v53, %v2111_v54  ;;  %vm2438_vm4 = vweird.f32 %v7816_v55  ;;  %v2136_v19 = vmul.f32 %v9578_v16, %v2135_v39 }
 0x60b   : > { %7817 = vrcp.f32 %v2371_v25  ;;  %v2120_v1 = vsel %vm2117_vm1, %v2119_v40, %v2115_v27  ;;  %vm2439_vm8 = vmor %vm2437_vm7, %vm2438_vm4  ;;  %v2458_v49 = vand.u32 2147483648, %v2371_v25  ;;  %v2456_v59 = vand.u32 2147483647, %v2371_v25  ;;  %v2639_v27 = vld [vmem:[%s8973_s1 + $0x398] sm:$0xff] }
 0x60c   : > { %v2434_v0 = vsub.f32 1.0, %v2433_v43  ;;  %v2121_v61 = vmul.f32 %v9604_v62, %v2120_v1  ;;  %v2140_v62 = vmul.f32 %v9697_v42, %v2139_v57  ;;  %vm2147_vm14 = vcmp.eq.f32.partialorder %v2146_v15, 8.507059e+37  ;;  %v2638_v1 = vld [vmem:[%s8973_s1 + $0x358] sm:$0xff] }
 0x60d   : > { %vm2452_vm15 = vweird.f32 %v2371_v25  ;;  %vm2457_vm2 = vcmp.eq.f32.partialorder %v2456_v59, 8.507059e+37  ;;  %vm2618_vm4 = vcmask 785408  }
 0x60e   : > { %7315 = vmatmul.msk.f32.gmra.mxu1 %vm950_vm0, %v2121_v61  ;;  %7333 = vmatmul.msk.f32.gmra.mxu3 %vm950_vm0, %v2431_v21  ;;  %v2435_v31 = vmul.f32 %v7816_v55, %v2434_v0  ;;  %v2141_v35 = vadd.f32 %v9697_v42, %v2140_v62  ;;  %v2636_v0 = vld [vmem:[%s8973_s1 + $0x2d8] sm:$0xff] }
 0x60f   : > { %v2635_v61 = vld [vmem:[%s8973_s1 + $0x298] sm:$0xff] }
 0x610   : > { %v2436_v58 = vadd.f32 %v7816_v55, %v2435_v31  ;;  %v2145_v52 = vsel %vm2144_vm12, %v9697_v42, %v2141_v35  ;;  %v9754_v54 = vpop.f32.mrf.mxu1  ;;  %v2634_v21 = vld [vmem:[%s8973_s1 + $0x258] sm:$0xff] }
 0x611   : > { %v7818_v47 = vpop.eup %7817  ;;  %v2150_v16 = vsel %vm2147_vm14, %v2149_v7, %v2145_v52  ;;  %v2629_v62 = vld [vmem:[%s8973_s1 + $0x118] sm:$0xff] }
 0x612   : > { %v2448_v4 = vmul.f32 %v7818_v47, %v2371_v25  ;;  %v2440_v53 = vsel %vm2439_vm8, %v7816_v55, %v2436_v58  ;;  %vm2453_vm13 = vweird.f32 %v7818_v47  ;;  %v2151_v38 = vmul.f32 %v9584_v63, %v2150_v16  ;;  %v2640_v25 = vld [vmem:[%s8973_s1 + $0x3d8] sm:$0xff] }
 0x613   : > { %v2445_v32 = vsel %vm2442_vm10, %v2444_v24, %v2440_v53  ;;  %vm2454_vm1 = vmor %vm2452_vm15, %vm2453_vm13  ;;  %2642 = vmatpush.msrb.mxu0 %v2640_v25  ;;  %v2627_v58 = vld [vmem:[%s8973_s1 + $0x98] sm:$0xff] }
 0x614   : > { %v2449_v8 = vsub.f32 1.0, %v2448_v4  ;;  %v2446_v56 = vmul.f32 %v9616_v12, %v2445_v32  ;;  %v2459_v12 = vor.u32 1.1754944e-38, %v2458_v49  ;;  %v2625_v4 = vld [vmem:[%s8973_s1 + $0x18] sm:$0xff] }
 0x615   : > { %2643 = vmatpush.msrb.mxu0 %v2639_v27 }
 0x616   : > { %v1901_v34 = vpop.f32.mrf.mxu3  ;;  %7316 = vmatmul.msk.f32.gmra.mxu1 %vm950_vm0, %v2136_v19  ;;  %7334 = vmatmul.msk.f32.gmra.mxu3 %vm950_vm0, %v2446_v56  ;;  %v2450_v9 = vmul.f32 %v7818_v47, %v2449_v8 }
 0x617   : > { %2644 = vmatpush.msrb.mxu0 %v2638_v1 }
 0x618   : > { %v2451_v37 = vadd.f32 %v7818_v47, %v2450_v9 }
 0x619   : > { %2645 = vmatpush.msrb.mxu0 %v2637_v44 }
 0x61a   : > { %v2455_v60 = vsel %vm2454_vm1, %v7818_v47, %v2451_v37  ;;  %v2626_v47 = vld [vmem:[%s8973_s1 + $0x58] sm:$0xff] }
 0x61b   : > { %v2460_v2 = vsel %vm2457_vm2, %v2459_v12, %v2455_v60  ;;  %2646 = vmatpush.msrb.mxu0 %v2636_v0 }
 0x61c   : > { %v2461_v10 = vmul.f32 %v9630_v6, %v2460_v2 }
 0x61d   : > { %2647 = vmatpush.msrb.mxu0 %v2635_v61 }
 0x61e   : > { %v1904_v42 = vpop.f32.mrf.mxu3  ;;  %7317 = vmatmul.msk.f32.gmra.mxu1 %vm950_vm0, %v2151_v38  ;;  %7335 = vmatmul.msk.f32.gmra.mxu3 %vm950_vm0, %v2461_v10 }
 0x61f   : > { %v7641_v22 = vpack.i.bf16 %v1904_v42, %v1901_v34  ;;  %2648 = vmatpush.msrb.mxu0 %v2634_v21 }
 0x621   : > { %7642 = vrot.lane.b32.xlu1 %v7641_v22, %s8603_s11  ;;  %2649 = vmatpush.msrb.mxu0 %v2633_v41  ;;  %v9810_v41 = vld [vmem:[%s8981_s17] sm:$0xff] }
 0x623   : > { %2650 = vmatpush.msrb.mxu0 %v2632_v48 }
 0x625   : > { %2651 = vmatpush.msrb.mxu0 %v2631_v3 }
 0x626   : > { %v1907_v63 = vpop.f32.mrf.mxu3 }
 0x627   : > { %2652 = vmatpush.msrb.mxu0 %v2630_v30 }
 0x629   : > { %2653 = vmatpush.msrb.mxu0 %v2629_v62 }
 0x62b   : > { %2654 = vmatpush.msrb.mxu0 %v2628_v33 }
 0x62d   : > { %2655 = vmatpush.msrb.mxu0 %v2627_v58 }
 0x62e   : > { %v2205_v55 = vpop.f32.mrf.mxu1 }
 0x62f   : > { %2656 = vmatpush.msrb.mxu0 %v2626_v47 }
 0x631   : > { %2657 = vmatpush.msrb.mxu0 %v2625_v4 }
 0x636   : > { %v2208_v40 = vpop.f32.mrf.mxu1 }
 0x637   : > { %v7636_v13 = vpack.i.bf16 %v2208_v40, %v2205_v55 }
 0x639   : > { %7637 = vrot.lane.b32.xlu0 %v7636_v13, %s8604_s18 }
 0x63e   : > { %v1910_v6 = vpop.f32.mrf.mxu3 }
 0x658   : > { %v2515_v28 = vpop.f32.mrf.mxu3 }
 0x659   : > { %2587 = vrot.lane.b32.xlu2 %v2515_v28, %s8602_s2 }
 0x660   : > { %v2518_v57 = vpop.f32.mrf.mxu3 }
 0x661   : > { %v2211_v43 = vpop.f32.mrf.mxu1  ;;  %2589 = vrot.lane.b32.xlu0 %v2518_v57, %s8602_s2 }
 0x662   : > { %2567 = vrot.lane.b32.xlu2 %v2211_v43, %s8604_s18 }
 0x674   : > { %v7633_v11 = vpop.permute.xlu1 %7632 }
 0x675   : > { %v7634_v19 = vunpack.i.l.bf16 %v7633_v11  ;;  %v7635_v9 = vunpack.i.h.bf16 %v7633_v11 }
 0x677   : > { %v2605_v15 = vsel %vm1316_vm5, %v9680_v18, %v7634_v19  ;;  %v2606_v7 = vsel %vm1316_vm5, %v9690_v5, %v7635_v9  ;;  %v2880_v9 = vld [vmem:[%s8973_s1 + $0x3f8] sm:$0xff] }
 0x678   : > { %2990 = vmatpush.msra.mxu0 %v2880_v9  ;;  %v2839_v9 = vld [vmem:[%s8973_s1 + $0x170] sm:$0xff] }
 0x689   : > { %v2521_v31 = vpop.f32.mrf.mxu3 }
 0x68a   : > { %2591 = vrot.lane.b32.xlu0 %v2521_v31, %s8602_s2 }
 0x68b   : > { %v2214_v51 = vpop.f32.mrf.mxu1 }
 0x68c   : > { %2569 = vrot.lane.b32.xlu1 %v2214_v51, %s8604_s18 }
 0x691   : > { %v2524_v39 = vpop.f32.mrf.mxu3 }
 0x692   : > { %2547 = vrot.lane.b32.xlu0 %v1907_v63, %s8603_s11  ;;  %2593 = vrot.lane.b32.xlu2 %v2524_v39, %s8602_s2 }
 0x693   : > { %v2217_v24 = vpop.f32.mrf.mxu1  ;;  %v7643_v60 = vpop.permute.xlu1 %7642 }
 0x694   : > { %2571 = vrot.lane.b32.xlu1 %v2217_v24, %s8604_s18  ;;  %v7644_v2 = vunpack.i.l.bf16 %v7643_v60  ;;  %v7645_v22 = vunpack.i.h.bf16 %v7643_v60 }
 0x696   : > { %v2607_v38 = vsel %vm1316_vm5, %v9712_v50, %v7644_v2  ;;  %v2608_v13 = vsel %vm1316_vm5, %v9735_v45, %v7645_v22 }
 0x699   : > { %v2527_v53 = vpop.f32.mrf.mxu3 }
 0x69a   : > { %2549 = vrot.lane.b32.xlu0 %v1910_v6, %s8603_s11  ;;  %2595 = vrot.lane.b32.xlu2 %v2527_v53, %s8602_s2 }
 0x69b   : > { %v2220_v35 = vpop.f32.mrf.mxu1 }
 0x69c   : > { %2573 = vrot.lane.b32.xlu1 %v2220_v35, %s8604_s18 }
 0x6a1   : > { %v2530_v32 = vpop.f32.mrf.mxu3 }
 0x6a2   : > { %2597 = vrot.lane.b32.xlu2 %v2530_v32, %s8602_s2 }
 0x6ab   : > { %v7638_v8 = vpop.permute.xlu0 %7637 }
 0x6ac   : > { %v7639_v56 = vunpack.i.l.bf16 %v7638_v8  ;;  %v7640_v59 = vunpack.i.h.bf16 %v7638_v8 }
 0x6ae   : > { %v2612_v49 = vsel %vm2611_vm3, %v2605_v15, %v7639_v56  ;;  %v2613_v16 = vsel %vm2611_vm3, %v2606_v7, %v7640_v59  ;;  %v2877_v15 = vld [vmem:[%s8973_s1 + $0x3e0] sm:$0xff]  ;;  %v2874_v7 = vld [vmem:[%s8973_s1 + $0x3a8] sm:$0xff] }
 0x6af   : > { %2885 = vmatpush.msrb.mxu1 %v2877_v15  ;;  %v2873_v59 = vld [vmem:[%s8973_s1 + $0x3a0] sm:$0xff]  ;;  %v2843_v15 = vld [vmem:[%s8973_s1 + $0x1b0] sm:$0xff] }
 0x6b1   : > { %2886 = vmatpush.msrb.mxu1 %v2873_v59  ;;  %v2840_v59 = vld [vmem:[%s8973_s1 + $0x178] sm:$0xff] }
 0x6b3   : > { %v2588_v34 = vpop.permute.xlu2 %2587 }
 0x6b4   : > { %v2619_v52 = vsel %vm2618_vm4, %v2612_v49, %v2588_v34  ;;  %v2878_v49 = vld [vmem:[%s8973_s1 + $0x3e8] sm:$0xff]  ;;  %v2879_v34 = vld [vmem:[%s8973_s1 + $0x3f0] sm:$0xff] }
 0x6b5   : > { %2658 = vmatmul.f32.vlgmr.msrb.gmra.mxu0 %v2619_v52  ;;  %2920 = vmatpush.msrb.mxu2 %v2878_v49  ;;  %v2844_v49 = vld [vmem:[%s8973_s1 + $0x1b8] sm:$0xff] }
 0x6b6   : > { %2955 = vmatpush.msrb.mxu3 %v2879_v34  ;;  %v2837_v34 = vld [vmem:[%s8973_s1 + $0x160] sm:$0xff] }
 0x6b7   : > { %2921 = vmatpush.msrb.mxu2 %v2874_v7  ;;  %v2833_v7 = vld [vmem:[%s8973_s1 + $0x120] sm:$0xff] }
 0x6bc   : > { %v2568_v18 = vpop.permute.xlu2 %2567 }
 0x6bd   : > { %v2614_v10 = vsel %vm2611_vm3, %v2607_v38, %v2568_v18 }
 0x6d3   : > { %v2590_v37 = vpop.permute.xlu0 %2589 }
 0x6d4   : > { %v2620_v12 = vsel %vm2618_vm4, %v2613_v16, %v2590_v37  ;;  %v2875_v16 = vld [vmem:[%s8973_s1 + $0x3b0] sm:$0xff] }
 0x6d5   : > { %2661 = vmatmul.f32.gmra.mxu0 %v2620_v12  ;;  %v2876_v12 = vld [vmem:[%s8973_s1 + $0x3b8] sm:$0xff]  ;;  %2956 = vmatpush.msrb.mxu3 %v2875_v16  ;;  %v2835_v16 = vld [vmem:[%s8973_s1 + $0x130] sm:$0xff] }
 0x6d6   : > { %2991 = vmatpush.msra.mxu0 %v2876_v12  ;;  %v2836_v12 = vld [vmem:[%s8973_s1 + $0x138] sm:$0xff] }
 0x6ec   : > { %v2594_v5 = vpop.permute.xlu2 %2593 }
 0x6f4   : > { %v2596_v43 = vpop.permute.xlu2 %2595 }
 0x6fc   : > { %v2592_v42 = vpop.permute.xlu0 %2591  ;;  %v2598_v61 = vpop.permute.xlu2 %2597 }
 0x6fd   : > { %v2621_v55 = vsel %vm2618_vm4, %v2614_v10, %v2592_v42 }
 0x6fe   : > { %v2570_v40 = vpop.permute.xlu1 %2569  ;;  %2664 = vmatmul.f32.gmra.mxu0 %v2621_v55 }
 0x6ff   : > { %v2615_v63 = vsel %vm2611_vm3, %v2608_v13, %v2570_v40  ;;  %v2870_v13 = vld [vmem:[%s8973_s1 + $0x368] sm:$0xff] }
 0x700   : > { %v2622_v28 = vsel %vm2618_vm4, %v2615_v63, %v2594_v5  ;;  %v2869_v5 = vld [vmem:[%s8973_s1 + $0x360] sm:$0xff]  ;;  %v2871_v63 = vld [vmem:[%s8973_s1 + $0x370] sm:$0xff]  ;;  %2922 = vmatpush.msrb.mxu2 %v2870_v13  ;;  %v2828_v13 = vld [vmem:[%s8973_s1 + $0xb8] sm:$0xff] }
 0x701   : > { %2887 = vmatpush.msrb.mxu1 %v2869_v5  ;;  %2957 = vmatpush.msrb.mxu3 %v2871_v63  ;;  %v2827_v5 = vld [vmem:[%s8973_s1 + $0xb0] sm:$0xff]  ;;  %v2821_v63 = vld [vmem:[%s8973_s1 + $0x60] sm:$0xff] }
 0x704   : > { %v2548_v6 = vpop.permute.xlu0 %2547 }
 0x705   : > { %v2609_v50 = vsel %vm1316_vm5, %v9747_v46, %v2548_v6  ;;  %v2641_v46 = vperm.slane %v9810_v41, 3 }
 0x706   : > { %v2572_v57 = vpop.permute.xlu1 %2571  ;;  %2667 = vmatmul.f32.gmra.mxu0 %v2622_v28  ;;  %v2872_v28 = vld [vmem:[%s8973_s1 + $0x378] sm:$0xff] }
 0x707   : > { %v2616_v25 = vsel %vm2611_vm3, %v2609_v50, %v2572_v57  ;;  %2992 = vmatpush.msra.mxu0 %v2872_v28  ;;  %v2865_v57 = vld [vmem:[%s8973_s1 + $0x320] sm:$0xff]  ;;  %v2866_v50 = vld [vmem:[%s8973_s1 + $0x328] sm:$0xff]  ;;  %v2823_v28 = vld [vmem:[%s8973_s1 + $0x70] sm:$0xff] }
 0x708   : > { %v2623_v1 = vsel %vm2618_vm4, %v2616_v25, %v2596_v43  ;;  %v2867_v43 = vld [vmem:[%s8973_s1 + $0x330] sm:$0xff]  ;;  %2888 = vmatpush.msrb.mxu1 %v2865_v57  ;;  %v2868_v25 = vld [vmem:[%s8973_s1 + $0x338] sm:$0xff]  ;;  %2923 = vmatpush.msrb.mxu2 %v2866_v50  ;;  %v2817_v50 = vld [vmem:[%s8973_s1 + $0x20] sm:$0xff] }
 0x709   : > { %2958 = vmatpush.msrb.mxu3 %v2867_v43  ;;  %2993 = vmatpush.msra.mxu0 %v2868_v25  ;;  %v2824_v57 = vld [vmem:[%s8973_s1 + $0x78] sm:$0xff]  ;;  %v2818_v43 = vld [vmem:[%s8973_s1 + $0x28] sm:$0xff]  ;;  %v2819_v25 = vld [vmem:[%s8973_s1 + $0x30] sm:$0xff] }
 0x70c   : > { %v2550_v27 = vpop.permute.xlu0 %2549 }
 0x70d   : > { %v2610_v45 = vsel %vm1316_vm5, %v9754_v54, %v2550_v27 }
 0x70e   : > { %2670 = vmatmul.f32.gmra.mxu0 %v2623_v1  ;;  %v2574_v44 = vpop.permute.xlu1 %2573  ;;  %v2861_v1 = vld [vmem:[%s8973_s1 + $0x2e0] sm:$0xff] }
 0x70f   : > { %v2617_v0 = vsel %vm2611_vm3, %v2610_v45, %v2574_v44  ;;  %v2862_v45 = vld [vmem:[%s8973_s1 + $0x2e8] sm:$0xff]  ;;  %v2863_v44 = vld [vmem:[%s8973_s1 + $0x2f0] sm:$0xff]  ;;  %2889 = vmatpush.msrb.mxu1 %v2861_v1 }
 0x710   : > { %v2624_v21 = vsel %vm2618_vm4, %v2617_v0, %v2598_v61  ;;  %v2864_v61 = vld [vmem:[%s8973_s1 + $0x2f8] sm:$0xff]  ;;  %2924 = vmatpush.msrb.mxu2 %v2862_v45  ;;  %2959 = vmatpush.msrb.mxu3 %v2863_v44 }
 0x711   : > { %2994 = vmatpush.msra.mxu0 %v2864_v61 }
 0x716   : > { %2673 = vmatmul.f32.gmra.mxu0 %v2624_v21  ;;  %v2857_v21 = vld [vmem:[%s8973_s1 + $0x2a0] sm:$0xff] }
 0x717   : > { %2890 = vmatpush.msrb.mxu1 %v2857_v21 }
 0x732   : > { %v2659_v48 = vpop.f32.mrf.mxu0 }
 0x733   : > { %v2660_v3 = vadd.f32 %v2659_v48, %v2641_v46  ;;  %v2859_v48 = vld [vmem:[%s8973_s1 + $0x2b0] sm:$0xff] }
 0x734   : > { %2960 = vmatpush.msrb.mxu3 %v2859_v48 }
 0x735   : > { %v9814_v30 = vadd.f32 %v2660_v3, %v9028_v14 }
 0x737   : > { %2683 = vadd.xlane.f32.xlu0 %v9814_v30 }
 0x752   : > { %v2662_v31 = vpop.f32.mrf.mxu0 }
 0x753   : > { %v2663_v54 = vadd.f32 %v2662_v31, %v2641_v46  ;;  %v2860_v31 = vld [vmem:[%s8973_s1 + $0x2b8] sm:$0xff] }
 0x754   : > { %2995 = vmatpush.msra.mxu0 %v2860_v31 }
 0x755   : > { %v9818_v51 = vadd.f32 %v2663_v54, %v9032_v17  ;;  %v2853_v54 = vld [vmem:[%s8973_s1 + $0x260] sm:$0xff] }
 0x756   : > { %2891 = vmatpush.msrb.mxu1 %v2853_v54  ;;  %v9939_v54 = vperm.slane %v9810_v41, 4 }
 0x757   : > { %2685 = vadd.xlane.f32.xlu1 %v9818_v51 }
 0x77b   : > { %v2665_v62 = vpop.f32.mrf.mxu0 }
 0x77c   : > { %v2666_v33 = vadd.f32 %v2665_v62, %v2641_v46  ;;  %v2854_v62 = vld [vmem:[%s8973_s1 + $0x268] sm:$0xff] }
 0x77e   : > { %v9822_v58 = vadd.f32 %v2666_v33, %v9036_v20  ;;  %v2855_v33 = vld [vmem:[%s8973_s1 + $0x270] sm:$0xff] }
 0x77f   : > { %2961 = vmatpush.msrb.mxu3 %v2855_v33 }
 0x780   : > { %2687 = vadd.xlane.f32.xlu2 %v9822_v58 }
 0x783   : > { %v2668_v47 = vpop.f32.mrf.mxu0 }
 0x784   : > { %v2669_v39 = vadd.f32 %v2668_v47, %v2641_v46 }
 0x786   : > { %v9826_v14 = vadd.f32 %v2669_v39, %v9040_v23  ;;  %v2856_v39 = vld [vmem:[%s8973_s1 + $0x278] sm:$0xff] }
 0x787   : > { %2996 = vmatpush.msra.mxu0 %v2856_v39 }
 0x788   : > { %2689 = vadd.xlane.f32.xlu0 %v9826_v14 }
 0x78b   : > { %v2671_v24 = vpop.f32.mrf.mxu0 }
 0x78c   : > { %v2672_v4 = vadd.f32 %v2671_v24, %v2641_v46  ;;  %v2849_v24 = vld [vmem:[%s8973_s1 + $0x220] sm:$0xff] }
 0x78d   : > { %2892 = vmatpush.msrb.mxu1 %v2849_v24 }
 0x78e   : > { %v9830_v17 = vadd.f32 %v2672_v4, %v9044_v26  ;;  %v2850_v4 = vld [vmem:[%s8973_s1 + $0x228] sm:$0xff] }
 0x790   : > { %2691 = vadd.xlane.f32.xlu2 %v9830_v17 }
 0x793   : > { %v2674_v20 = vpop.f32.mrf.mxu0 }
 0x794   : > { %v2675_v53 = vadd.f32 %v2674_v20, %v2641_v46  ;;  %v2858_v46 = vld [vmem:[%s8973_s1 + $0x2a8] sm:$0xff]  ;;  %v2851_v20 = vld [vmem:[%s8973_s1 + $0x230] sm:$0xff] }
 0x795   : > { %2925 = vmatpush.msrb.mxu2 %v2858_v46  ;;  %2962 = vmatpush.msrb.mxu3 %v2851_v20 }
 0x796   : > { %v9834_v35 = vadd.f32 %v2675_v53, %v9048_v29  ;;  %v2852_v53 = vld [vmem:[%s8973_s1 + $0x238] sm:$0xff] }
 0x797   : > { %2926 = vmatpush.msrb.mxu2 %v2854_v62  ;;  %2997 = vmatpush.msra.mxu0 %v2852_v53 }
 0x798   : > { %2693 = vadd.xlane.f32.xlu1 %v9834_v35 }
 0x799   : > { %2927 = vmatpush.msrb.mxu2 %v2850_v4 }
 0x7aa   : > { %v2684_v23 = vpop.xlane.xlu0 %2683 }
 0x7ab   : > { %v2695_v32 = vmul.f32 %v2684_v23, %v9051_v36  ;;  %v2845_v23 = vld [vmem:[%s8973_s1 + $0x1e0] sm:$0xff] }
 0x7ac   : > { %2893 = vmatpush.msrb.mxu1 %v2845_v23 }
 0x7ad   : > { %v9839_v26 = vsub.f32 %v9814_v30, %v2695_v32  ;;  %v2846_v32 = vld [vmem:[%s8973_s1 + $0x1e8] sm:$0xff] }
 0x7ae   : > { %2928 = vmatpush.msrb.mxu2 %v2846_v32 }
 0x7af   : > { %v2707_v11 = vmul.f32 %v9839_v26, %v9839_v26 }
 0x7b1   : > { %2713 = vadd.xlane.f32.xlu0 %v2707_v11  ;;  %v2847_v11 = vld [vmem:[%s8973_s1 + $0x1f0] sm:$0xff] }
 0x7b2   : > { %2963 = vmatpush.msrb.mxu3 %v2847_v11 }
 0x7b4   : > { %2964 = vmatpush.msrb.mxu3 %v2843_v15 }
 0x7b6   : > { %2965 = vmatpush.msrb.mxu3 %v2839_v9 }
 0x7b8   : > { %2966 = vmatpush.msrb.mxu3 %v2835_v16 }
 0x7ca   : > { %v2686_v8 = vpop.xlane.xlu1 %2685 }
 0x7cb   : > { %v2696_v19 = vmul.f32 %v2686_v8, %v9051_v36  ;;  %v2848_v8 = vld [vmem:[%s8973_s1 + $0x1f8] sm:$0xff] }
 0x7cc   : > { %2998 = vmatpush.msra.mxu0 %v2848_v8 }
 0x7cd   : > { %v9845_v29 = vsub.f32 %v9818_v51, %v2696_v19  ;;  %v2841_v19 = vld [vmem:[%s8973_s1 + $0x1a0] sm:$0xff] }
 0x7ce   : > { %2894 = vmatpush.msrb.mxu1 %v2841_v19  ;;  %2999 = vmatpush.msra.mxu0 %v2844_v49 }
 0x7cf   : > { %v2708_v56 = vmul.f32 %v9845_v29, %v9845_v29 }
 0x7d0   : > { %2895 = vmatpush.msrb.mxu1 %v2837_v34  ;;  %3000 = vmatpush.msra.mxu0 %v2840_v59 }
 0x7d1   : > { %2715 = vadd.xlane.f32.xlu2 %v2708_v56  ;;  %v2842_v56 = vld [vmem:[%s8973_s1 + $0x1a8] sm:$0xff] }
 0x7d2   : > { %2929 = vmatpush.msrb.mxu2 %v2842_v56  ;;  %2896 = vmatpush.msrb.mxu1 %v2833_v7 }
 0x7d3   : > { %3001 = vmatpush.msra.mxu0 %v2836_v12 }
 0x7f3   : > { %v2688_v52 = vpop.xlane.xlu2 %2687 }
 0x7f4   : > { %v2697_v37 = vmul.f32 %v2688_v52, %v9051_v36  ;;  %v2838_v52 = vld [vmem:[%s8973_s1 + $0x168] sm:$0xff] }
 0x7f5   : > { %2930 = vmatpush.msrb.mxu2 %v2838_v52 }
 0x7f6   : > { %v9859_v60 = vsub.f32 %v9822_v58, %v2697_v37  ;;  %v2834_v37 = vld [vmem:[%s8973_s1 + $0x128] sm:$0xff] }
 0x7f7   : > { %2931 = vmatpush.msrb.mxu2 %v2834_v37 }
 0x7f8   : > { %v2709_v2 = vmul.f32 %v9859_v60, %v9859_v60 }
 0x7fa   : > { %2717 = vadd.xlane.f32.xlu1 %v2709_v2  ;;  %v2829_v2 = vld [vmem:[%s8973_s1 + $0xe0] sm:$0xff] }
 0x7fb   : > { %v2690_v18 = vpop.xlane.xlu0 %2689  ;;  %2897 = vmatpush.msrb.mxu1 %v2829_v2 }
 0x7fc   : > { %v2698_v38 = vmul.f32 %v2690_v18, %v9051_v36  ;;  %v2830_v18 = vld [vmem:[%s8973_s1 + $0xe8] sm:$0xff] }
 0x7fd   : > { %2932 = vmatpush.msrb.mxu2 %v2830_v18 }
 0x7fe   : > { %v9865_v10 = vsub.f32 %v9826_v14, %v2698_v38  ;;  %v2831_v38 = vld [vmem:[%s8973_s1 + $0xf0] sm:$0xff] }
 0x7ff   : > { %2967 = vmatpush.msrb.mxu3 %v2831_v38 }
 0x800   : > { %v2710_v42 = vmul.f32 %v9865_v10, %v9865_v10 }
 0x801   : > { %2968 = vmatpush.msrb.mxu3 %v2827_v5 }
 0x802   : > { %2719 = vadd.xlane.f32.xlu0 %v2710_v42  ;;  %v2832_v42 = vld [vmem:[%s8973_s1 + $0xf8] sm:$0xff] }
 0x803   : > { %v2692_v22 = vpop.xlane.xlu2 %2691  ;;  %3002 = vmatpush.msra.mxu0 %v2832_v42  ;;  %2969 = vmatpush.msrb.mxu3 %v2823_v28 }
 0x804   : > { %v2699_v55 = vmul.f32 %v2692_v22, %v9051_v36  ;;  %v2825_v22 = vld [vmem:[%s8973_s1 + $0xa0] sm:$0xff] }
 0x805   : > { %2898 = vmatpush.msrb.mxu1 %v2825_v22  ;;  %3003 = vmatpush.msra.mxu0 %v2828_v13 }
 0x806   : > { %v9871_v40 = vsub.f32 %v9830_v17, %v2699_v55  ;;  %v2826_v55 = vld [vmem:[%s8973_s1 + $0xa8] sm:$0xff]  ;;  %2970 = vmatpush.msrb.mxu3 %v2819_v25 }
 0x807   : > { %2933 = vmatpush.msrb.mxu2 %v2826_v55  ;;  %2899 = vmatpush.msrb.mxu1 %v2821_v63 }
 0x808   : > { %v2711_v6 = vmul.f32 %v9871_v40, %v9871_v40  ;;  %3004 = vmatpush.msra.mxu0 %v2824_v57  ;;  %v3256_v57 = vld [vmem:[%s8975_s16 + $0x78] sm:$0xff] }
 0x809   : > { %2900 = vmatpush.msrb.mxu1 %v2817_v50  ;;  %v3304_v50 = vld [vmem:[%s8975_s16 + $0x1f8] sm:$0xff] }
 0x80a   : > { %2721 = vadd.xlane.f32.xlu2 %v2711_v6  ;;  %v2822_v6 = vld [vmem:[%s8973_s1 + $0x68] sm:$0xff] }
 0x80b   : > { %v2694_v27 = vpop.xlane.xlu1 %2693  ;;  %2934 = vmatpush.msrb.mxu2 %v2822_v6  ;;  %3305 = vmatpush.msra.mxu1 %v3256_v57  ;;  %v3268_v57 = vld [vmem:[%s8975_s16 + $0xd8] sm:$0xff] }
 0x80c   : > { %v2700_v0 = vmul.f32 %v2694_v27, %v9051_v36  ;;  %v2820_v27 = vld [vmem:[%s8973_s1 + $0x38] sm:$0xff] }
 0x80d   : > { %2935 = vmatpush.msrb.mxu2 %v2818_v43  ;;  %3005 = vmatpush.msra.mxu0 %v2820_v27  ;;  %v3255_v43 = vld [vmem:[%s8975_s16 + $0x70] sm:$0xff] }
 0x80e   : > { %v9892_v3 = vsub.f32 %v9834_v35, %v2700_v0  ;;  %v3303_v27 = vld [vmem:[%s8975_s16 + $0x1f0] sm:$0xff]  ;;  %3306 = vmatpush.msra.mxu1 %v3255_v43  ;;  %v3297_v43 = vld [vmem:[%s8975_s16 + $0x1c0] sm:$0xff] }
 0x80f   : > { %3410 = vmatpush.msrb.mxu0 %v3304_v50  ;;  %v3284_v50 = vld [vmem:[%s8975_s16 + $0x158] sm:$0xff] }
 0x810   : > { %v2712_v47 = vmul.f32 %v9892_v3, %v9892_v3 }
 0x811   : > { %3411 = vmatpush.msrb.mxu0 %v3303_v27  ;;  %v3267_v27 = vld [vmem:[%s8975_s16 + $0xd0] sm:$0xff] }
 0x812   : > { %2723 = vadd.xlane.f32.xlu1 %v2712_v47  ;;  %v9943_v47 = vperm.slane %v9810_v41, 5 }
 0x824   : > { %v2714_v1 = vpop.xlane.xlu0 %2713 }
 0x825   : > { %v2725_v45 = vmul.f32 %v2714_v1, %v9051_v36  ;;  %v3254_v1 = vld [vmem:[%s8975_s16 + $0x68] sm:$0xff] }
 0x826   : > { %3307 = vmatpush.msra.mxu1 %v3254_v1  ;;  %v3283_v1 = vld [vmem:[%s8975_s16 + $0x150] sm:$0xff] }
 0x827   : > { %v2731_v44 = vadd.f32 1e-06, %v2725_v45 }
 0x829   : > { %7819 = vrsqrt.f32 %v2731_v44  ;;  %vm2743_vm7 = vweird.f32 %v2731_v44 }
 0x82f   : > { %v7820_v0 = vpop.eup %7819 }
 0x830   : > { %v2738_v61 = vmul.f32 %v7820_v0, %v2731_v44  ;;  %vm2744_vm6 = vweird.f32 %v7820_v0 }
 0x831   : > { %vm2745_vm8 = vmor %vm2743_vm7, %vm2744_vm6 }
 0x832   : > { %v2739_v21 = vmul.f32 %v7820_v0, %v2738_v61  ;;  %v3272_v61 = vld [vmem:[%s8975_s16 + $0xf8] sm:$0xff] }
 0x833   : > { %3340 = vmatpush.msra.mxu2 %v3272_v61  ;;  %v3282_v61 = vld [vmem:[%s8975_s16 + $0x148] sm:$0xff] }
 0x834   : > { %v2740_v46 = vmul.f32 0.5, %v2739_v21  ;;  %v3288_v21 = vld [vmem:[%s8975_s16 + $0x178] sm:$0xff] }
 0x835   : > { %3375 = vmatpush.msra.mxu3 %v3288_v21  ;;  %v3295_v21 = vld [vmem:[%s8975_s16 + $0x1b0] sm:$0xff] }
 0x836   : > { %v2741_v48 = vsub.f32 1.5, %v2740_v46 }
 0x838   : > { %v2742_v31 = vmul.f32 %v7820_v0, %v2741_v48 }
 0x83a   : > { %v2746_v62 = vsel %vm2745_vm8, %v7820_v0, %v2742_v31  ;;  %v3302_v0 = vld [vmem:[%s8975_s16 + $0x1e8] sm:$0xff] }
 0x83b   : > { %v2797_v33 = vmul.f32 %v2746_v62, %v9839_v26  ;;  %3412 = vmatpush.msrb.mxu0 %v3302_v0  ;;  %v3266_v0 = vld [vmem:[%s8975_s16 + $0xc8] sm:$0xff] }
 0x83d   : > { %v2804_v39 = vmul.f32 %v9939_v54, %v2797_v33 }
 0x83f   : > { %v2811_v24 = vadd.f32 %v9943_v47, %v2804_v39 }
 0x841   : > { %2901 = vmatmul.f32.vlgmr.msrb.gmra.mxu1 %v2811_v24  ;;  %2936 = vmatmul.f32.vlgmr.msrb.gmra.mxu2 %v2811_v24 }
 0x842   : > { %2971 = vmatmul.f32.vlgmr.msrb.gmra.mxu3 %v2811_v24  ;;  %3006 = vmatmul.f32.vlgmr.msra.gmra.mxu0 %v2811_v24 }
 0x844   : > { %v2716_v4 = vpop.xlane.xlu2 %2715 }
 0x845   : > { %v2726_v20 = vmul.f32 %v2716_v4, %v9051_v36  ;;  %v3253_v4 = vld [vmem:[%s8975_s16 + $0x60] sm:$0xff] }
 0x846   : > { %3308 = vmatpush.msra.mxu1 %v3253_v4  ;;  %v3244_v4 = vld [vmem:[%s8975_s16 + $0x18] sm:$0xff] }
 0x847   : > { %v2732_v53 = vadd.f32 1e-06, %v2726_v20  ;;  %v3301_v20 = vld [vmem:[%s8975_s16 + $0x1e0] sm:$0xff] }
 0x848   : > { %3413 = vmatpush.msrb.mxu0 %v3301_v20  ;;  %v3263_v20 = vld [vmem:[%s8975_s16 + $0xb0] sm:$0xff] }
 0x849   : > { %7821 = vrsqrt.f32 %v2732_v53  ;;  %vm2753_vm10 = vweird.f32 %v2732_v53 }
 0x84f   : > { %v7822_v23 = vpop.eup %7821 }
 0x850   : > { %v2748_v32 = vmul.f32 %v7822_v23, %v2732_v53  ;;  %vm2754_vm9 = vweird.f32 %v7822_v23 }
 0x851   : > { %vm2755_vm11 = vmor %vm2753_vm10, %vm2754_vm9 }
 0x852   : > { %v2749_v11 = vmul.f32 %v7822_v23, %v2748_v32 }
 0x854   : > { %v2750_v26 = vmul.f32 0.5, %v2749_v11 }
 0x856   : > { %v2751_v8 = vsub.f32 1.5, %v2750_v26 }
 0x858   : > { %v2752_v19 = vmul.f32 %v7822_v23, %v2751_v8 }
 0x85a   : > { %v2756_v56 = vsel %vm2755_vm11, %v7822_v23, %v2752_v19 }
 0x85b   : > { %v2798_v15 = vmul.f32 %v2756_v56, %v9845_v29 }
 0x85d   : > { %v2805_v49 = vmul.f32 %v9939_v54, %v2798_v15 }
 0x85f   : > { %v2812_v34 = vadd.f32 %v9943_v47, %v2805_v49 }
 0x861   : > { %2904 = vmatmul.f32.gmra.mxu1 %v2812_v34  ;;  %2939 = vmatmul.f32.gmra.mxu2 %v2812_v34 }
 0x862   : > { %2974 = vmatmul.f32.gmra.mxu3 %v2812_v34  ;;  %3009 = vmatmul.f32.gmra.mxu0 %v2812_v34 }
 0x86d   : > { %v2718_v52 = vpop.xlane.xlu1 %2717 }
 0x86e   : > { %v2727_v9 = vmul.f32 %v2718_v52, %v9051_v36 }
 0x870   : > { %v2733_v59 = vadd.f32 1e-06, %v2727_v9 }
 0x872   : > { %7823 = vrsqrt.f32 %v2733_v59  ;;  %vm2763_vm13 = vweird.f32 %v2733_v59 }
 0x875   : > { %v2720_v7 = vpop.xlane.xlu0 %2719 }
 0x876   : > { %v2728_v37 = vmul.f32 %v2720_v7, %v9051_v36 }
 0x878   : > { %v7824_v16 = vpop.eup %7823  ;;  %v2734_v12 = vadd.f32 1e-06, %v2728_v37 }
 0x879   : > { %v2758_v2 = vmul.f32 %v7824_v16, %v2733_v59  ;;  %vm2764_vm12 = vweird.f32 %v7824_v16 }
 0x87a   : > { %7825 = vrsqrt.f32 %v2734_v12  ;;  %vm2765_vm14 = vmor %vm2763_vm13, %vm2764_vm12  ;;  %vm2773_vm1 = vweird.f32 %v2734_v12 }
 0x87b   : > { %v2759_v29 = vmul.f32 %v7824_v16, %v2758_v2 }
 0x87d   : > { %v2760_v18 = vmul.f32 0.5, %v2759_v29  ;;  %v2722_v38 = vpop.xlane.xlu2 %2721 }
 0x87e   : > { %v2729_v42 = vmul.f32 %v2722_v38, %v9051_v36  ;;  %v3271_v38 = vld [vmem:[%s8975_s16 + $0xf0] sm:$0xff] }
 0x87f   : > { %v2761_v22 = vsub.f32 1.5, %v2760_v18  ;;  %v3252_v18 = vld [vmem:[%s8975_s16 + $0x58] sm:$0xff]  ;;  %3341 = vmatpush.msra.mxu2 %v3271_v38 }
 0x880   : > { %v7826_v55 = vpop.eup %7825  ;;  %v2735_v5 = vadd.f32 1e-06, %v2729_v42  ;;  %3309 = vmatpush.msra.mxu1 %v3252_v18  ;;  %v3287_v42 = vld [vmem:[%s8975_s16 + $0x170] sm:$0xff]  ;;  %v3273_v18 = vld [vmem:[%s8975_s16 + $0x100] sm:$0xff] }
 0x881   : > { %v2762_v13 = vmul.f32 %v7824_v16, %v2761_v22  ;;  %v2768_v63 = vmul.f32 %v7826_v55, %v2734_v12  ;;  %vm2774_vm15 = vweird.f32 %v7826_v55  ;;  %v3300_v22 = vld [vmem:[%s8975_s16 + $0x1d8] sm:$0xff]  ;;  %3376 = vmatpush.msra.mxu3 %v3287_v42 }
 0x882   : > { %7827 = vrsqrt.f32 %v2735_v5  ;;  %vm2775_vm2 = vmor %vm2773_vm1, %vm2774_vm15  ;;  %vm2783_vm7 = vweird.f32 %v2735_v5  ;;  %3414 = vmatpush.msrb.mxu0 %v3300_v22 }
 0x883   : > { %v2766_v6 = vsel %vm2765_vm14, %v7824_v16, %v2762_v13  ;;  %v2769_v28 = vmul.f32 %v7826_v55, %v2768_v63  ;;  %v3269_v13 = vld [vmem:[%s8975_s16 + $0xe0] sm:$0xff] }
 0x884   : > { %v2799_v25 = vmul.f32 %v2766_v6, %v9859_v60  ;;  %v3285_v63 = vld [vmem:[%s8975_s16 + $0x160] sm:$0xff]  ;;  %v3298_v6 = vld [vmem:[%s8975_s16 + $0x1c8] sm:$0xff] }
 0x885   : > { %v2770_v45 = vmul.f32 0.5, %v2769_v28  ;;  %v2724_v44 = vpop.xlane.xlu1 %2723  ;;  %v3249_v28 = vld [vmem:[%s8975_s16 + $0x40] sm:$0xff] }
 0x886   : > { %v2730_v46 = vmul.f32 %v2724_v44, %v9051_v36  ;;  %v2806_v48 = vmul.f32 %v9939_v54, %v2799_v25  ;;  %v3248_v25 = vld [vmem:[%s8975_s16 + $0x38] sm:$0xff]  ;;  %v3247_v44 = vld [vmem:[%s8975_s16 + $0x30] sm:$0xff] }
 0x887   : > { %v2771_v31 = vsub.f32 1.5, %v2770_v45  ;;  %v3296_v45 = vld [vmem:[%s8975_s16 + $0x1b8] sm:$0xff] }
 0x888   : > { %v7828_v60 = vpop.eup %7827  ;;  %v2736_v62 = vadd.f32 1e-06, %v2730_v46  ;;  %v2813_v33 = vadd.f32 %v9943_v47, %v2806_v48  ;;  %v3246_v46 = vld [vmem:[%s8975_s16 + $0x28] sm:$0xff]  ;;  %v3265_v48 = vld [vmem:[%s8975_s16 + $0xc0] sm:$0xff] }
 0x889   : > { %v2772_v39 = vmul.f32 %v7826_v55, %v2771_v31  ;;  %v2778_v24 = vmul.f32 %v7828_v60, %v2735_v5  ;;  %vm2784_vm6 = vweird.f32 %v7828_v60  ;;  %v3250_v5 = vld [vmem:[%s8975_s16 + $0x48] sm:$0xff]  ;;  %v3281_v31 = vld [vmem:[%s8975_s16 + $0x140] sm:$0xff] }
 0x88a   : > { %7829 = vrsqrt.f32 %v2736_v62  ;;  %2907 = vmatmul.f32.gmra.mxu1 %v2813_v33  ;;  %2942 = vmatmul.f32.gmra.mxu2 %v2813_v33  ;;  %vm2785_vm8 = vmor %vm2783_vm7, %vm2784_vm6  ;;  %vm2793_vm10 = vweird.f32 %v2736_v62 }
 0x88b   : > { %v2776_v53 = vsel %vm2775_vm2, %v7826_v55, %v2772_v39  ;;  %v2779_v23 = vmul.f32 %v7828_v60, %v2778_v24  ;;  %2977 = vmatmul.f32.gmra.mxu3 %v2813_v33  ;;  %3012 = vmatmul.f32.gmra.mxu0 %v2813_v33  ;;  %v3251_v55 = vld [vmem:[%s8975_s16 + $0x50] sm:$0xff]  ;;  %v3264_v33 = vld [vmem:[%s8975_s16 + $0xb8] sm:$0xff]  ;;  %v3293_v24 = vld [vmem:[%s8975_s16 + $0x1a0] sm:$0xff] }
 0x88c   : > { %v2800_v32 = vmul.f32 %v2776_v53, %v9865_v10  ;;  %3310 = vmatpush.msra.mxu1 %v3251_v55  ;;  %v3280_v39 = vld [vmem:[%s8975_s16 + $0x138] sm:$0xff]  ;;  %v3279_v53 = vld [vmem:[%s8975_s16 + $0x130] sm:$0xff] }
 0x88d   : > { %v2780_v11 = vmul.f32 0.5, %v2779_v23  ;;  %v3292_v23 = vld [vmem:[%s8975_s16 + $0x198] sm:$0xff] }
 0x88e   : > { %v2807_v26 = vmul.f32 %v9939_v54, %v2800_v32  ;;  %3311 = vmatpush.msra.mxu1 %v3250_v5  ;;  %v3243_v32 = vld [vmem:[%s8975_s16 + $0x10] sm:$0xff] }
 0x88f   : > { %v2781_v8 = vsub.f32 1.5, %v2780_v11  ;;  %v3262_v11 = vld [vmem:[%s8975_s16 + $0xa8] sm:$0xff]  ;;  %v8091_v5 = vld [vmem:[%s8981_s17 + $0x10] sm:$0xff] }
 0x890   : > { %v7830_v19 = vpop.eup %7829  ;;  %v2814_v56 = vadd.f32 %v9943_v47, %v2807_v26  ;;  %3312 = vmatpush.msra.mxu1 %v3249_v28  ;;  %v3278_v26 = vld [vmem:[%s8975_s16 + $0x128] sm:$0xff] }
 0x891   : > { %v2782_v15 = vmul.f32 %v7828_v60, %v2781_v8  ;;  %v2788_v49 = vmul.f32 %v7830_v19, %v2736_v62  ;;  %vm2794_vm9 = vweird.f32 %v7830_v19  ;;  %v3245_v62 = vld [vmem:[%s8975_s16 + $0x20] sm:$0xff]  ;;  %v3291_v8 = vld [vmem:[%s8975_s16 + $0x190] sm:$0xff] }
 0x892   : > { %2910 = vmatmul.f32.gmra.mxu1 %v2814_v56  ;;  %2945 = vmatmul.f32.gmra.mxu2 %v2814_v56  ;;  %vm2795_vm11 = vmor %vm2793_vm10, %vm2794_vm9 }
 0x893   : > { %v2786_v34 = vsel %vm2785_vm8, %v7828_v60, %v2782_v15  ;;  %v2789_v52 = vmul.f32 %v7830_v19, %v2788_v49  ;;  %2980 = vmatmul.f32.gmra.mxu3 %v2814_v56  ;;  %3015 = vmatmul.f32.gmra.mxu0 %v2814_v56  ;;  %v3294_v60 = vld [vmem:[%s8975_s16 + $0x1a8] sm:$0xff]  ;;  %v3261_v56 = vld [vmem:[%s8975_s16 + $0xa0] sm:$0xff] }
 0x894   : > { %v2801_v10 = vmul.f32 %v2786_v34, %v9871_v40  ;;  %3313 = vmatpush.msra.mxu1 %v3248_v25  ;;  %v3277_v15 = vld [vmem:[%s8975_s16 + $0x120] sm:$0xff]  ;;  %v3290_v49 = vld [vmem:[%s8975_s16 + $0x188] sm:$0xff] }
 0x895   : > { %v2790_v9 = vmul.f32 0.5, %v2789_v52  ;;  %v3241_v34 = vld [vmem:[%s8975_s16] sm:$0xff]  ;;  %v3260_v52 = vld [vmem:[%s8975_s16 + $0x98] sm:$0xff] }
 0x896   : > { %v2808_v59 = vmul.f32 %v9939_v54, %v2801_v10  ;;  %3314 = vmatpush.msra.mxu1 %v3247_v44  ;;  %v3276_v10 = vld [vmem:[%s8975_s16 + $0x118] sm:$0xff] }
 0x897   : > { %v2791_v7 = vsub.f32 1.5, %v2790_v9  ;;  %v3289_v9 = vld [vmem:[%s8975_s16 + $0x180] sm:$0xff] }
 0x898   : > { %v2815_v37 = vadd.f32 %v9943_v47, %v2808_v59  ;;  %3315 = vmatpush.msra.mxu1 %v3246_v46  ;;  %v3259_v59 = vld [vmem:[%s8975_s16 + $0x90] sm:$0xff] }
 0x899   : > { %v2792_v16 = vmul.f32 %v7830_v19, %v2791_v7  ;;  %v1007_v7 = vld [vmem:[%s8981_s17 + $0x18] sm:$0xff] }
 0x89a   : > { %2913 = vmatmul.f32.gmra.mxu1 %v2815_v37  ;;  %2948 = vmatmul.f32.gmra.mxu2 %v2815_v37 }
 0x89b   : > { %v2796_v12 = vsel %vm2795_vm11, %v7830_v19, %v2792_v16  ;;  %2983 = vmatmul.f32.gmra.mxu3 %v2815_v37  ;;  %3018 = vmatmul.f32.gmra.mxu0 %v2815_v37  ;;  %v3242_v19 = vld [vmem:[%s8975_s16 + $0x8] sm:$0xff]  ;;  %v3275_v37 = vld [vmem:[%s8975_s16 + $0x110] sm:$0xff] }
 0x89c   : > { %v2802_v40 = vmul.f32 %v2796_v12, %v9892_v3  ;;  %v3270_v3 = vld [vmem:[%s8975_s16 + $0xe8] sm:$0xff]  ;;  %3316 = vmatpush.msra.mxu1 %v3245_v62  ;;  %v10030_v12 = vperm.slane %v9810_v41, 6 }
 0x89d   : > { %3342 = vmatpush.msra.mxu2 %v3270_v3  ;;  %v3258_v16 = vld [vmem:[%s8975_s16 + $0x88] sm:$0xff] }
 0x89e   : > { %v2809_v2 = vmul.f32 %v9939_v54, %v2802_v40  ;;  %v3286_v54 = vld [vmem:[%s8975_s16 + $0x168] sm:$0xff]  ;;  %3317 = vmatpush.msra.mxu1 %v3244_v4 }
 0x89f   : > { %3377 = vmatpush.msra.mxu3 %v3286_v54  ;;  %3343 = vmatpush.msra.mxu2 %v3269_v13  ;;  %v3274_v40 = vld [vmem:[%s8975_s16 + $0x108] sm:$0xff]  ;;  %v10043_v13 = vperm.slane %v8091_v5, 6 }
 0x8a0   : > { %v2816_v29 = vadd.f32 %v9943_v47, %v2809_v2  ;;  %v3299_v47 = vld [vmem:[%s8975_s16 + $0x1d0] sm:$0xff]  ;;  %3318 = vmatpush.msra.mxu1 %v3243_v32  ;;  %v10033_v2 = vperm.slane %v1007_v7, 6  ;;  %v8090_v3 = vld [vmem:[%s8981_s17 + $0x8] sm:$0xff] }
 0x8a1   : > { %3415 = vmatpush.msrb.mxu0 %v3299_v47  ;;  %3378 = vmatpush.msra.mxu3 %v3285_v63  ;;  %v10040_v54 = vperm.slane %v8090_v3, 6 }
 0x8a2   : > { %2916 = vmatmul.f32.gmra.mxu1 %v2816_v29  ;;  %2951 = vmatmul.f32.gmra.mxu2 %v2816_v29 }
 0x8a3   : > { %2986 = vmatmul.f32.gmra.mxu3 %v2816_v29  ;;  %3021 = vmatmul.f32.gmra.mxu0 %v2816_v29  ;;  %v3257_v29 = vld [vmem:[%s8975_s16 + $0x80] sm:$0xff] }
 0x8a4   : > { %3416 = vmatpush.msrb.mxu0 %v3298_v6  ;;  %3344 = vmatpush.msra.mxu2 %v3268_v57 }
 0x8a5   : > { %3379 = vmatpush.msra.mxu3 %v3284_v50  ;;  %3319 = vmatpush.msra.mxu1 %v3242_v19 }
 0x8a6   : > { %3417 = vmatpush.msrb.mxu0 %v3297_v43  ;;  %3345 = vmatpush.msra.mxu2 %v3267_v27 }
 0x8a7   : > { %3380 = vmatpush.msra.mxu3 %v3283_v1  ;;  %3320 = vmatpush.msra.mxu1 %v3241_v34 }
 0x8a8   : > { %3418 = vmatpush.msrb.mxu0 %v3296_v45  ;;  %3346 = vmatpush.msra.mxu2 %v3266_v0 }
 0x8a9   : > { %3381 = vmatpush.msra.mxu3 %v3282_v61 }
 0x8aa   : > { %3419 = vmatpush.msrb.mxu0 %v3295_v21  ;;  %3347 = vmatpush.msra.mxu2 %v3265_v48 }
 0x8ab   : > { %3382 = vmatpush.msra.mxu3 %v3281_v31 }
 0x8ac   : > { %3420 = vmatpush.msrb.mxu0 %v3294_v60  ;;  %3348 = vmatpush.msra.mxu2 %v3264_v33 }
 0x8ad   : > { %3383 = vmatpush.msra.mxu3 %v3280_v39 }
 0x8ae   : > { %3421 = vmatpush.msrb.mxu0 %v3293_v24  ;;  %3349 = vmatpush.msra.mxu2 %v3263_v20 }
 0x8af   : > { %3384 = vmatpush.msra.mxu3 %v3279_v53 }
 0x8b0   : > { %3422 = vmatpush.msrb.mxu0 %v3292_v23  ;;  %3350 = vmatpush.msra.mxu2 %v3262_v11 }
 0x8b1   : > { %3385 = vmatpush.msra.mxu3 %v3278_v26 }
 0x8b2   : > { %3423 = vmatpush.msrb.mxu0 %v3291_v8  ;;  %3351 = vmatpush.msra.mxu2 %v3261_v56 }
 0x8b3   : > { %3386 = vmatpush.msra.mxu3 %v3277_v15 }
 0x8b4   : > { %3424 = vmatpush.msrb.mxu0 %v3290_v49  ;;  %3352 = vmatpush.msra.mxu2 %v3260_v52 }
 0x8b5   : > { %3387 = vmatpush.msra.mxu3 %v3276_v10 }
 0x8b6   : > { %3425 = vmatpush.msrb.mxu0 %v3289_v9  ;;  %3353 = vmatpush.msra.mxu2 %v3259_v59 }
 0x8b7   : > { %3388 = vmatpush.msra.mxu3 %v3275_v37 }
 0x8b8   : > { %3354 = vmatpush.msra.mxu2 %v3258_v16 }
 0x8b9   : > { %3389 = vmatpush.msra.mxu3 %v3274_v40 }
 0x8ba   : > { %3355 = vmatpush.msra.mxu2 %v3257_v29 }
 0x8bb   : > { %3390 = vmatpush.msra.mxu3 %v3273_v18 }
 0x8be   : > { %v2902_v38 = vpop.f32.mrf.mxu1 }
 0x8bf   : > { %v2903_v42 = vadd.f32 %v2902_v38, %v10030_v12  ;;  %v3007_v22 = vpop.f32.mrf.mxu0 }
 0x8c0   : > { %v3008_v55 = vadd.f32 %v3007_v22, %v10033_v2 }
 0x8c1   : > { %v3049_v41 = vmul.f32 0.044715, %v2903_v42  ;;  %v3025_v53 = vmul.f32 0.5, %v2903_v42 }
 0x8c2   : > { %v3052_v47 = vmul.f32 0.044715, %v3008_v55  ;;  %v3028_v32 = vmul.f32 0.5, %v3008_v55 }
 0x8c3   : > { %v3073_v63 = vmul.f32 %v3049_v41, %v2903_v42 }
 0x8c4   : > { %v3076_v6 = vmul.f32 %v3052_v47, %v3008_v55  ;;  %v2937_v28 = vpop.f32.mrf.mxu2 }
 0x8c5   : > { %v3097_v57 = vmul.f32 %v3073_v63, %v2903_v42  ;;  %v2938_v50 = vadd.f32 %v2937_v28, %v10040_v54  ;;  %v2972_v43 = vpop.f32.mrf.mxu3 }
 0x8c6   : > { %v3100_v25 = vmul.f32 %v3076_v6, %v3008_v55  ;;  %v2973_v27 = vadd.f32 %v2972_v43, %v10043_v13 }
 0x8c7   : > { %v3121_v1 = vadd.f32 %v3097_v57, %v2903_v42  ;;  %v3050_v45 = vmul.f32 0.044715, %v2938_v50  ;;  %v3026_v15 = vmul.f32 0.5, %v2938_v50 }
 0x8c8   : > { %v3124_v44 = vadd.f32 %v3100_v25, %v3008_v55  ;;  %v3051_v0 = vmul.f32 0.044715, %v2973_v27  ;;  %v3027_v34 = vmul.f32 0.5, %v2973_v27 }
 0x8c9   : > { %v3145_v61 = vmul.f32 0.7978846, %v3121_v1  ;;  %v3074_v21 = vmul.f32 %v3050_v45, %v2938_v50 }
 0x8ca   : > { %v3148_v46 = vmul.f32 0.7978846, %v3124_v44  ;;  %v3075_v48 = vmul.f32 %v3051_v0, %v2973_v27 }
 0x8cb   : > { %7831 = vtanh.f32 %v3145_v61  ;;  %v3098_v31 = vmul.f32 %v3074_v21, %v2938_v50 }
 0x8cc   : > { %7833 = vtanh.f32 %v3148_v46  ;;  %v3099_v60 = vmul.f32 %v3075_v48, %v2973_v27 }
 0x8cd   : > { %v3122_v62 = vadd.f32 %v3098_v31, %v2938_v50 }
 0x8ce   : > { %v3123_v33 = vadd.f32 %v3099_v60, %v2973_v27 }
 0x8cf   : > { %v3146_v39 = vmul.f32 0.7978846, %v3122_v62 }
 0x8d0   : > { %v3147_v24 = vmul.f32 0.7978846, %v3123_v33 }
 0x8d1   : > { %v7832_v4 = vpop.eup %7831  ;;  %7835 = vtanh.f32 %v3146_v39 }
 0x8d2   : > { %v7834_v20 = vpop.eup %7833  ;;  %7837 = vtanh.f32 %v3147_v24  ;;  %v3193_v23 = vadd.f32 1.0, %v7832_v4 }
 0x8d3   : > { %v3196_v11 = vadd.f32 1.0, %v7834_v20 }
 0x8d4   : > { %v3217_v26 = vmul.f32 %v3193_v23, %v3025_v53 }
 0x8d5   : > { %v3220_v8 = vmul.f32 %v3196_v11, %v3028_v32 }
 0x8d6   : > { %3321 = vmatmul.f32.vlgmr.msra.gmra.mxu1 %v3217_v26 }
 0x8d7   : > { %v7836_v19 = vpop.eup %7835  ;;  %3426 = vmatmul.f32.vlgmr.msrb.gmra.mxu0 %v3220_v8 }
 0x8d8   : > { %v7838_v56 = vpop.eup %7837  ;;  %v3194_v49 = vadd.f32 1.0, %v7836_v19 }
 0x8d9   : > { %v3195_v52 = vadd.f32 1.0, %v7838_v56 }
 0x8da   : > { %v3218_v10 = vmul.f32 %v3194_v49, %v3026_v15 }
 0x8db   : > { %v3219_v9 = vmul.f32 %v3195_v52, %v3027_v34 }
 0x8dc   : > { %3356 = vmatmul.f32.vlgmr.msra.gmra.mxu2 %v3218_v10 }
 0x8dd   : > { %3391 = vmatmul.f32.vlgmr.msra.gmra.mxu3 %v3219_v9 }
 0x8de   : > { %v2905_v59 = vpop.f32.mrf.mxu1 }
 0x8df   : > { %v2906_v7 = vadd.f32 %v2905_v59, %v10030_v12  ;;  %v3010_v37 = vpop.f32.mrf.mxu0 }
 0x8e0   : > { %v3011_v16 = vadd.f32 %v3010_v37, %v10033_v2 }
 0x8e1   : > { %v3053_v40 = vmul.f32 0.044715, %v2906_v7  ;;  %v3029_v48 = vmul.f32 0.5, %v2906_v7 }
 0x8e2   : > { %v3056_v29 = vmul.f32 0.044715, %v3011_v16  ;;  %v3032_v60 = vmul.f32 0.5, %v3011_v16 }
 0x8e3   : > { %v3077_v18 = vmul.f32 %v3053_v40, %v2906_v7 }
 0x8e4   : > { %v2940_v38 = vpop.f32.mrf.mxu2  ;;  %v3080_v42 = vmul.f32 %v3056_v29, %v3011_v16 }
 0x8e5   : > { %v2941_v22 = vadd.f32 %v2940_v38, %v10040_v54  ;;  %v2975_v55 = vpop.f32.mrf.mxu3  ;;  %v3101_v41 = vmul.f32 %v3077_v18, %v2906_v7 }
 0x8e6   : > { %v2976_v3 = vadd.f32 %v2975_v55, %v10043_v13  ;;  %v3104_v47 = vmul.f32 %v3080_v42, %v3011_v16 }
 0x8e7   : > { %v3054_v5 = vmul.f32 0.044715, %v2941_v22  ;;  %v3125_v63 = vadd.f32 %v3101_v41, %v2906_v7  ;;  %v3030_v20 = vmul.f32 0.5, %v2941_v22 }
 0x8e8   : > { %v3055_v6 = vmul.f32 0.044715, %v2976_v3  ;;  %v3128_v28 = vadd.f32 %v3104_v47, %v3011_v16  ;;  %v3031_v23 = vmul.f32 0.5, %v2976_v3 }
 0x8e9   : > { %v3149_v57 = vmul.f32 0.7978846, %v3125_v63  ;;  %v3078_v50 = vmul.f32 %v3054_v5, %v2941_v22 }
 0x8ea   : > { %v3152_v43 = vmul.f32 0.7978846, %v3128_v28  ;;  %v3079_v25 = vmul.f32 %v3055_v6, %v2976_v3 }
 0x8eb   : > { %7839 = vtanh.f32 %v3149_v57  ;;  %v3102_v27 = vmul.f32 %v3078_v50, %v2941_v22 }
 0x8ec   : > { %7841 = vtanh.f32 %v3152_v43  ;;  %v3103_v1 = vmul.f32 %v3079_v25, %v2976_v3 }
 0x8ed   : > { %v3126_v45 = vadd.f32 %v3102_v27, %v2941_v22 }
 0x8ee   : > { %v3127_v44 = vadd.f32 %v3103_v1, %v2976_v3 }
 0x8ef   : > { %v3150_v0 = vmul.f32 0.7978846, %v3126_v45 }
 0x8f0   : > { %v3151_v61 = vmul.f32 0.7978846, %v3127_v44 }
 0x8f1   : > { %v7840_v21 = vpop.eup %7839  ;;  %7843 = vtanh.f32 %v3150_v0 }
 0x8f2   : > { %v7842_v46 = vpop.eup %7841  ;;  %v3197_v31 = vadd.f32 1.0, %v7840_v21  ;;  %7845 = vtanh.f32 %v3151_v61 }
 0x8f3   : > { %v3200_v62 = vadd.f32 1.0, %v7842_v46 }
 0x8f4   : > { %v3221_v33 = vmul.f32 %v3197_v31, %v3029_v48 }
 0x8f5   : > { %v3224_v39 = vmul.f32 %v3200_v62, %v3032_v60 }
 0x8f6   : > { %3324 = vmatmul.f32.gmra.mxu1 %v3221_v33 }
 0x8f7   : > { %v7844_v24 = vpop.eup %7843  ;;  %3429 = vmatmul.f32.gmra.mxu0 %v3224_v39 }
 0x8f8   : > { %v7846_v4 = vpop.eup %7845  ;;  %v3198_v53 = vadd.f32 1.0, %v7844_v24 }
 0x8f9   : > { %v3199_v32 = vadd.f32 1.0, %v7846_v4 }
 0x8fa   : > { %v3222_v11 = vmul.f32 %v3198_v53, %v3030_v20 }
 0x8fb   : > { %v3223_v26 = vmul.f32 %v3199_v32, %v3031_v23 }
 0x8fc   : > { %3359 = vmatmul.f32.gmra.mxu2 %v3222_v11 }
 0x8fd   : > { %3394 = vmatmul.f32.gmra.mxu3 %v3223_v26 }
 0x907   : > { %v2908_v8 = vpop.f32.mrf.mxu1 }
 0x908   : > { %v2909_v19 = vadd.f32 %v2908_v8, %v10030_v12  ;;  %v3013_v56 = vpop.f32.mrf.mxu0 }
 0x909   : > { %v3014_v15 = vadd.f32 %v3013_v56, %v10033_v2 }
 0x90a   : > { %v3057_v49 = vmul.f32 0.044715, %v2909_v19  ;;  %v3033_v48 = vmul.f32 0.5, %v2909_v19 }
 0x90b   : > { %v3060_v34 = vmul.f32 0.044715, %v3014_v15  ;;  %v3036_v8 = vmul.f32 0.5, %v3014_v15 }
 0x90c   : > { %v3081_v52 = vmul.f32 %v3057_v49, %v2909_v19 }
 0x90d   : > { %v2943_v10 = vpop.f32.mrf.mxu2  ;;  %v3084_v9 = vmul.f32 %v3060_v34, %v3014_v15 }
 0x90e   : > { %v2944_v59 = vadd.f32 %v2943_v10, %v10040_v54  ;;  %v2978_v7 = vpop.f32.mrf.mxu3  ;;  %v3105_v37 = vmul.f32 %v3081_v52, %v2909_v19 }
 0x90f   : > { %v2979_v16 = vadd.f32 %v2978_v7, %v10043_v13  ;;  %v2911_v40 = vpop.f32.mrf.mxu1  ;;  %v3108_v29 = vmul.f32 %v3084_v9, %v3014_v15 }
 0x910   : > { %v3058_v18 = vmul.f32 0.044715, %v2944_v59  ;;  %v10056_v38 = vadd.f32 %v2911_v40, %v10030_v12  ;;  %v3016_v42 = vpop.f32.mrf.mxu0  ;;  %v3129_v22 = vadd.f32 %v3105_v37, %v2909_v19  ;;  %v3034_v34 = vmul.f32 0.5, %v2944_v59 }
 0x911   : > { %v3059_v55 = vmul.f32 0.044715, %v2979_v16  ;;  %v3017_v41 = vadd.f32 %v3016_v42, %v10033_v2  ;;  %v3132_v3 = vadd.f32 %v3108_v29, %v3014_v15  ;;  %v3035_v29 = vmul.f32 0.5, %v2979_v16 }
 0x912   : > { %v3061_v47 = vmul.f32 0.044715, %v10056_v38  ;;  %v3153_v5 = vmul.f32 0.7978846, %v3129_v22  ;;  %v3082_v63 = vmul.f32 %v3058_v18, %v2944_v59 }
 0x913   : > { %v3064_v6 = vmul.f32 0.044715, %v3017_v41  ;;  %v3156_v28 = vmul.f32 0.7978846, %v3132_v3  ;;  %v3083_v57 = vmul.f32 %v3059_v55, %v2979_v16 }
 0x914   : > { %7847 = vtanh.f32 %v3153_v5  ;;  %v3106_v50 = vmul.f32 %v3082_v63, %v2944_v59  ;;  %v3085_v43 = vmul.f32 %v3061_v47, %v10056_v38  ;;  %v3037_v5 = vmul.f32 0.5, %v10056_v38 }
 0x915   : > { %v2946_v25 = vpop.f32.mrf.mxu2  ;;  %7849 = vtanh.f32 %v3156_v28  ;;  %v3107_v27 = vmul.f32 %v3083_v57, %v2979_v16  ;;  %v3088_v1 = vmul.f32 %v3064_v6, %v3017_v41 }
 0x916   : > { %v10062_v45 = vadd.f32 %v2946_v25, %v10040_v54  ;;  %v2981_v44 = vpop.f32.mrf.mxu3  ;;  %v3130_v0 = vadd.f32 %v3106_v50, %v2944_v59  ;;  %v3109_v61 = vmul.f32 %v3085_v43, %v10056_v38 }
 0x917   : > { %v10066_v21 = vadd.f32 %v2981_v44, %v10043_v13  ;;  %v2914_v46 = vpop.f32.mrf.mxu1  ;;  %v3131_v31 = vadd.f32 %v3107_v27, %v2979_v16  ;;  %v3112_v60 = vmul.f32 %v3088_v1, %v3017_v41  ;;  %v3040_v16 = vmul.f32 0.5, %v3017_v41 }
 0x918   : > { %v3062_v62 = vmul.f32 0.044715, %v10062_v45  ;;  %v10070_v33 = vadd.f32 %v2914_v46, %v10030_v12  ;;  %v3019_v39 = vpop.f32.mrf.mxu0  ;;  %v3154_v24 = vmul.f32 0.7978846, %v3130_v0  ;;  %v3133_v4 = vadd.f32 %v3109_v61, %v10056_v38 }
 0x919   : > { %v3063_v20 = vmul.f32 0.044715, %v10066_v21  ;;  %v10075_v53 = vadd.f32 %v3019_v39, %v10033_v2  ;;  %v3155_v23 = vmul.f32 0.7978846, %v3131_v31  ;;  %v3136_v32 = vadd.f32 %v3112_v60, %v3017_v41 }
 0x91a   : > { %v7848_v11 = vpop.eup %7847  ;;  %v3065_v26 = vmul.f32 0.044715, %v10070_v33  ;;  %7851 = vtanh.f32 %v3154_v24  ;;  %v3157_v19 = vmul.f32 0.7978846, %v3133_v4  ;;  %v3086_v7 = vmul.f32 %v3062_v62, %v10062_v45 }
 0x91b   : > { %v7850_v56 = vpop.eup %7849  ;;  %v3201_v49 = vadd.f32 1.0, %v7848_v11  ;;  %7853 = vtanh.f32 %v3155_v23  ;;  %v3160_v52 = vmul.f32 0.7978846, %v3136_v32  ;;  %v3068_v10 = vmul.f32 0.044715, %v10075_v53 }
 0x91c   : > { %v3204_v9 = vadd.f32 1.0, %v7850_v56  ;;  %7855 = vtanh.f32 %v3157_v19  ;;  %v3087_v18 = vmul.f32 %v3063_v20, %v10066_v21  ;;  %v3110_v59 = vmul.f32 %v3086_v7, %v10062_v45 }
 0x91d   : > { %v2949_v37 = vpop.f32.mrf.mxu2  ;;  %v3225_v40 = vmul.f32 %v3201_v49, %v3033_v48  ;;  %7857 = vtanh.f32 %v3160_v52  ;;  %v3089_v55 = vmul.f32 %v3065_v26, %v10070_v33  ;;  %v3092_v25 = vmul.f32 %v3068_v10, %v10075_v53 }
 0x91e   : > { %v10082_v15 = vadd.f32 %v2949_v37, %v10040_v54  ;;  %v2984_v42 = vpop.f32.mrf.mxu3  ;;  %v3228_v22 = vmul.f32 %v3204_v9, %v3036_v8  ;;  %v3111_v63 = vmul.f32 %v3087_v18, %v10066_v21  ;;  %v3134_v50 = vadd.f32 %v3110_v59, %v10062_v45 }
 0x91f   : > { %v10087_v3 = vadd.f32 %v2984_v42, %v10043_v13  ;;  %v2917_v47 = vpop.f32.mrf.mxu1  ;;  %3327 = vmatmul.f32.gmra.mxu1 %v3225_v40  ;;  %v3113_v43 = vmul.f32 %v3089_v55, %v10070_v33  ;;  %v3116_v26 = vmul.f32 %v3092_v25, %v10075_v53  ;;  %v3039_v40 = vmul.f32 0.5, %v10066_v21 }
 0x920   : > { %v7852_v6 = vpop.eup %7851  ;;  %v10092_v28 = vadd.f32 %v2917_v47, %v10030_v12  ;;  %v3022_v57 = vpop.f32.mrf.mxu0  ;;  %3432 = vmatmul.f32.gmra.mxu0 %v3228_v22  ;;  %v3066_v1 = vmul.f32 0.044715, %v10082_v15  ;;  %v3135_v44 = vadd.f32 %v3111_v63, %v10066_v21  ;;  %v3158_v46 = vmul.f32 0.7978846, %v3134_v50 }
 0x921   : > { %v7854_v27 = vpop.eup %7853  ;;  %v10099_v38 = vadd.f32 %v3022_v57, %v10033_v2  ;;  %v3202_v41 = vadd.f32 1.0, %v7852_v6  ;;  %v3067_v12 = vmul.f32 0.044715, %v10087_v3  ;;  %v3137_v48 = vadd.f32 %v3113_v43, %v10070_v33 }
 0x922   : > { %v7856_v0 = vpop.eup %7855  ;;  %v3203_v61 = vadd.f32 1.0, %v7854_v27  ;;  %v3069_v60 = vmul.f32 0.044715, %v10092_v28  ;;  %v3159_v24 = vmul.f32 0.7978846, %v3135_v44  ;;  %7859 = vtanh.f32 %v3158_v46 }
 0x923   : > { %v7858_v31 = vpop.eup %7857  ;;  %v3226_v62 = vmul.f32 %v3202_v41, %v3034_v34  ;;  %v3205_v39 = vadd.f32 1.0, %v7856_v0  ;;  %v3161_v2 = vmul.f32 0.7978846, %v3137_v48  ;;  %v3072_v23 = vmul.f32 0.044715, %v10099_v38 }
 0x924   : > { %v3227_v4 = vmul.f32 %v3203_v61, %v3035_v29  ;;  %v3208_v20 = vadd.f32 1.0, %v7858_v31  ;;  %7861 = vtanh.f32 %v3159_v24  ;;  %v3090_v49 = vmul.f32 %v3066_v1, %v10082_v15 }
 0x925   : > { %v2952_v32 = vpop.f32.mrf.mxu2  ;;  %3362 = vmatmul.f32.gmra.mxu2 %v3226_v62  ;;  %v3229_v11 = vmul.f32 %v3205_v39, %v3037_v5  ;;  %7863 = vtanh.f32 %v3161_v2  ;;  %v3140_v52 = vadd.f32 %v3116_v26, %v10075_v53  ;;  %v3091_v10 = vmul.f32 %v3067_v12, %v10087_v3 }
 0x926   : > { %v10108_v8 = vadd.f32 %v2952_v32, %v10040_v54  ;;  %v2987_v19 = vpop.f32.mrf.mxu3  ;;  %3397 = vmatmul.f32.gmra.mxu3 %v3227_v4  ;;  %v3232_v56 = vmul.f32 %v3208_v20, %v3040_v16  ;;  %v3038_v54 = vmul.f32 0.5, %v10062_v45  ;;  %v3114_v7 = vmul.f32 %v3090_v49, %v10082_v15 }
 0x927   : > { %v10112_v34 = vadd.f32 %v2987_v19, %v10043_v13  ;;  %3330 = vmatmul.f32.gmra.mxu1 %v3229_v11  ;;  %v3093_v37 = vmul.f32 %v3069_v60, %v10092_v28  ;;  %v3041_v29 = vmul.f32 0.5, %v10070_v33  ;;  %v3164_v13 = vmul.f32 0.7978846, %v3140_v52 }
 0x928   : > { %v3070_v9 = vmul.f32 0.044715, %v10108_v8  ;;  %3435 = vmatmul.f32.gmra.mxu0 %v3232_v56  ;;  %v3115_v18 = vmul.f32 %v3091_v10, %v10087_v3  ;;  %v7860_v42 = vpop.eup %7859  ;;  %v3138_v59 = vadd.f32 %v3114_v7, %v10082_v15  ;;  %v3096_v45 = vmul.f32 %v3072_v23, %v10099_v38 }
 0x929   : > { %v3071_v22 = vmul.f32 0.044715, %v10112_v34  ;;  %v3117_v55 = vmul.f32 %v3093_v37, %v10092_v28  ;;  %v3206_v5 = vadd.f32 1.0, %v7860_v42  ;;  %7865 = vtanh.f32 %v3164_v13 }
 0x92a   : > { %v7862_v47 = vpop.eup %7861  ;;  %v3139_v16 = vadd.f32 %v3115_v18, %v10087_v3  ;;  %v3094_v21 = vmul.f32 %v3070_v9, %v10108_v8  ;;  %v3162_v6 = vmul.f32 0.7978846, %v3138_v59  ;;  %v3120_v50 = vmul.f32 %v3096_v45, %v10099_v38 }
 0x92b   : > { %v7864_v33 = vpop.eup %7863  ;;  %v3207_v63 = vadd.f32 1.0, %v7862_v47  ;;  %v3141_v57 = vadd.f32 %v3117_v55, %v10092_v28  ;;  %v3230_v43 = vmul.f32 %v3206_v5, %v3038_v54  ;;  %v3095_v48 = vmul.f32 %v3071_v22, %v10112_v34 }
 0x92c   : > { %v3209_v25 = vadd.f32 1.0, %v7864_v33  ;;  %v3163_v27 = vmul.f32 0.7978846, %v3139_v16  ;;  %v3118_v1 = vmul.f32 %v3094_v21, %v10108_v8  ;;  %7867 = vtanh.f32 %v3162_v6  ;;  %v8092_v33 = vld [vmem:[%s8981_s17] sm:$0xff] }
 0x92d   : > { %v3231_v41 = vmul.f32 %v3207_v63, %v3039_v40  ;;  %v3165_v44 = vmul.f32 0.7978846, %v3141_v57  ;;  %v3144_v0 = vadd.f32 %v3120_v50, %v10099_v38  ;;  %3365 = vmatmul.f32.gmra.mxu2 %v3230_v43  ;;  %v3044_v62 = vmul.f32 0.5, %v10075_v53 }
 0x92e   : > { %v3233_v12 = vmul.f32 %v3209_v25, %v3041_v29  ;;  %7869 = vtanh.f32 %v3163_v27  ;;  %v3142_v61 = vadd.f32 %v3118_v1, %v10108_v8  ;;  %v3119_v24 = vmul.f32 %v3095_v48, %v10112_v34 }
 0x92f   : > { %3400 = vmatmul.f32.gmra.mxu3 %v3231_v41  ;;  %7871 = vtanh.f32 %v3165_v44  ;;  %v3168_v46 = vmul.f32 0.7978846, %v3144_v0  ;;  %v7866_v31 = vpop.eup %7865  ;;  %v3042_v32 = vmul.f32 0.5, %v10082_v15  ;;  %v3043_v19 = vmul.f32 0.5, %v10087_v3 }
 0x930   : > { %3333 = vmatmul.f32.gmra.mxu1 %v3233_v12  ;;  %v3166_v60 = vmul.f32 0.7978846, %v3142_v61  ;;  %v3212_v39 = vadd.f32 1.0, %v7866_v31  ;;  %v3143_v2 = vadd.f32 %v3119_v24, %v10112_v34  ;;  %v3045_v52 = vmul.f32 0.5, %v10092_v28 }
 0x931   : > { %7873 = vtanh.f32 %v3168_v46  ;;  %v3048_v40 = vmul.f32 0.5, %v10099_v38  ;;  %v3046_v3 = vmul.f32 0.5, %v10108_v8  ;;  %v3047_v28 = vmul.f32 0.5, %v10112_v34 }
 0x932   : > { %7875 = vtanh.f32 %v3166_v60  ;;  %v7868_v4 = vpop.eup %7867  ;;  %v3236_v20 = vmul.f32 %v3212_v39, %v3044_v62  ;;  %v3167_v49 = vmul.f32 0.7978846, %v3143_v2  ;;  %v3451_v63 = vperm.slane %v8092_v33, 7  ;;  %v3634_v33 = vld [vmem:[%s8973_s1 + $0x780] sm:$0xff] }
 0x933   : > { %v3210_v11 = vadd.f32 1.0, %v7868_v4 }
 0x934   : > { %v7870_v23 = vpop.eup %7869  ;;  %3438 = vmatmul.f32.gmra.mxu0 %v3236_v20  ;;  %7877 = vtanh.f32 %v3167_v49 }
 0x935   : > { %v7872_v26 = vpop.eup %7871  ;;  %v3211_v56 = vadd.f32 1.0, %v7870_v23  ;;  %v3234_v53 = vmul.f32 %v3210_v11, %v3042_v32 }
 0x936   : > { %v3213_v10 = vadd.f32 1.0, %v7872_v26 }
 0x937   : > { %v7874_v9 = vpop.eup %7873  ;;  %v3235_v54 = vmul.f32 %v3211_v56, %v3043_v19  ;;  %3368 = vmatmul.f32.gmra.mxu2 %v3234_v53 }
 0x938   : > { %v7876_v7 = vpop.eup %7875  ;;  %v3237_v37 = vmul.f32 %v3213_v10, %v3045_v52  ;;  %v3216_v15 = vadd.f32 1.0, %v7874_v9 }
 0x939   : > { %3403 = vmatmul.f32.gmra.mxu3 %v3235_v54  ;;  %v3214_v29 = vadd.f32 1.0, %v7876_v7 }
 0x93a   : > { %3336 = vmatmul.f32.gmra.mxu1 %v3237_v37  ;;  %v3240_v13 = vmul.f32 %v3216_v15, %v3048_v40  ;;  %v7878_v42 = vpop.eup %7877 }
 0x93b   : > { %v3238_v18 = vmul.f32 %v3214_v29, %v3046_v3  ;;  %v3215_v22 = vadd.f32 1.0, %v7878_v42 }
 0x93c   : > { %3441 = vmatmul.f32.gmra.mxu0 %v3240_v13 }
 0x93d   : > { %v3239_v59 = vmul.f32 %v3215_v22, %v3047_v28 }
 0x93f   : > { %3371 = vmatmul.f32.gmra.mxu2 %v3238_v18 }
 0x941   : > { %3406 = vmatmul.f32.gmra.mxu3 %v3239_v59 }
 0x953   : > { %v3322_v55 = vpop.f32.mrf.mxu1 }
 0x954   : > { %v3427_v16 = vpop.f32.mrf.mxu0 }
 0x95f   : > { %v3357_v45 = vpop.f32.mrf.mxu2 }
 0x960   : > { %v3358_v38 = vadd.f32 %v3357_v45, %v3322_v55  ;;  %v3392_v47 = vpop.f32.mrf.mxu3 }
 0x962   : > { %v3393_v5 = vadd.f32 %v3392_v47, %v3358_v38 }
 0x964   : > { %v3428_v21 = vadd.f32 %v3427_v16, %v3393_v5  ;;  %v3637_v5 = vld [vmem:[%s8973_s1 + $0x7c0] sm:$0xff]  ;;  %v3638_v16 = vld [vmem:[%s8973_s1 + $0x7c8] sm:$0xff] }
 0x965   : > { %3643 = vmatpush.msrb.mxu1 %v3637_v5  ;;  %3678 = vmatpush.msrb.mxu2 %v3638_v16  ;;  %v3600_v5 = vld [vmem:[%s8973_s1 + $0x490] sm:$0xff]  ;;  %v3595_v16 = vld [vmem:[%s8973_s1 + $0x440] sm:$0xff] }
 0x966   : > { %v3445_v8 = vadd.f32 %v3428_v21, %v9814_v30  ;;  %v3639_v21 = vld [vmem:[%s8973_s1 + $0x7d0] sm:$0xff] }
 0x967   : > { %3713 = vmatpush.msrb.mxu3 %v3639_v21  ;;  %3644 = vmatpush.msrb.mxu1 %v3634_v33  ;;  %v3596_v21 = vld [vmem:[%s8973_s1 + $0x448] sm:$0xff]  ;;  %v3597_v33 = vld [vmem:[%s8973_s1 + $0x450] sm:$0xff] }
 0x968   : > { %v10146_v6 = vadd.f32 %v3451_v63, %v3445_v8  ;;  %v3636_v8 = vld [vmem:[%s8973_s1 + $0x790] sm:$0xff] }
 0x969   : > { %3714 = vmatpush.msrb.mxu3 %v3636_v8  ;;  %v3592_v8 = vld [vmem:[%s8973_s1 + $0x400] sm:$0xff] }
 0x96a   : > { %3458 = vadd.xlane.f32.xlu0 %v10146_v6 }
 0x973   : > { %v3325_v34 = vpop.f32.mrf.mxu1 }
 0x974   : > { %v3430_v27 = vpop.f32.mrf.mxu0 }
 0x97f   : > { %v3360_v57 = vpop.f32.mrf.mxu2 }
 0x980   : > { %v3361_v50 = vadd.f32 %v3360_v57, %v3325_v34  ;;  %v3395_v43 = vpop.f32.mrf.mxu3 }
 0x982   : > { %v3396_v25 = vadd.f32 %v3395_v43, %v3361_v50 }
 0x984   : > { %v3431_v1 = vadd.f32 %v3430_v27, %v3396_v25 }
 0x986   : > { %v3446_v41 = vadd.f32 %v3431_v1, %v9818_v51 }
 0x988   : > { %v10150_v44 = vadd.f32 %v3451_v63, %v3446_v41 }
 0x98a   : > { %3460 = vadd.xlane.f32.xlu2 %v10150_v44 }
 0x99c   : > { %v3328_v0 = vpop.f32.mrf.mxu1 }
 0x99d   : > { %v3433_v46 = vpop.f32.mrf.mxu0 }
 0x9a4   : > { %v3331_v62 = vpop.f32.mrf.mxu1 }
 0x9a5   : > { %v3436_v51 = vpop.f32.mrf.mxu0 }
 0x9a8   : > { %v3363_v12 = vpop.f32.mrf.mxu2 }
 0x9a9   : > { %v3364_v30 = vadd.f32 %v3363_v12, %v3328_v0  ;;  %v3398_v61 = vpop.f32.mrf.mxu3  ;;  %v3631_v12 = vld [vmem:[%s8973_s1 + $0x740] sm:$0xff] }
 0x9aa   : > { %3645 = vmatpush.msrb.mxu1 %v3631_v12 }
 0x9ab   : > { %v3399_v48 = vadd.f32 %v3398_v61, %v3364_v30  ;;  %v3632_v30 = vld [vmem:[%s8973_s1 + $0x748] sm:$0xff]  ;;  %v3633_v61 = vld [vmem:[%s8973_s1 + $0x750] sm:$0xff] }
 0x9ac   : > { %3715 = vmatpush.msrb.mxu3 %v3633_v61 }
 0x9ad   : > { %v3434_v31 = vadd.f32 %v3433_v46, %v3399_v48  ;;  %v3334_v11 = vpop.f32.mrf.mxu1  ;;  %v3628_v46 = vld [vmem:[%s8973_s1 + $0x700] sm:$0xff]  ;;  %v3629_v48 = vld [vmem:[%s8973_s1 + $0x708] sm:$0xff] }
 0x9ae   : > { %3646 = vmatpush.msrb.mxu1 %v3628_v46 }
 0x9af   : > { %v3447_v60 = vadd.f32 %v3434_v31, %v9822_v58  ;;  %v3630_v31 = vld [vmem:[%s8973_s1 + $0x710] sm:$0xff] }
 0x9b0   : > { %v3366_v24 = vpop.f32.mrf.mxu2  ;;  %3716 = vmatpush.msrb.mxu3 %v3630_v31 }
 0x9b1   : > { %v10154_v39 = vadd.f32 %v3451_v63, %v3447_v60  ;;  %v3367_v4 = vadd.f32 %v3366_v24, %v3331_v62  ;;  %v3439_v58 = vpop.f32.mrf.mxu0  ;;  %v3625_v24 = vld [vmem:[%s8973_s1 + $0x6c0] sm:$0xff] }
 0x9b2   : > { %v3401_v20 = vpop.f32.mrf.mxu3  ;;  %3647 = vmatpush.msrb.mxu1 %v3625_v24 }
 0x9b3   : > { %3462 = vadd.xlane.f32.xlu1 %v10154_v39  ;;  %v3402_v2 = vadd.f32 %v3401_v20, %v3367_v4  ;;  %v3626_v4 = vld [vmem:[%s8973_s1 + $0x6c8] sm:$0xff]  ;;  %v3627_v20 = vld [vmem:[%s8973_s1 + $0x6d0] sm:$0xff] }
 0x9b4   : > { %3717 = vmatpush.msrb.mxu3 %v3627_v20 }
 0x9b5   : > { %v3437_v23 = vadd.f32 %v3436_v51, %v3402_v2  ;;  %v3622_v2 = vld [vmem:[%s8973_s1 + $0x680] sm:$0xff] }
 0x9b6   : > { %3648 = vmatpush.msrb.mxu1 %v3622_v2 }
 0x9b7   : > { %v3448_v32 = vadd.f32 %v3437_v23, %v9826_v14  ;;  %v3337_v9 = vpop.f32.mrf.mxu1  ;;  %v3623_v23 = vld [vmem:[%s8973_s1 + $0x688] sm:$0xff] }
 0x9b9   : > { %v10158_v26 = vadd.f32 %v3451_v63, %v3448_v32  ;;  %v3442_v15 = vpop.f32.mrf.mxu0  ;;  %v3624_v32 = vld [vmem:[%s8973_s1 + $0x690] sm:$0xff] }
 0x9ba   : > { %v3369_v19 = vpop.f32.mrf.mxu2  ;;  %3718 = vmatpush.msrb.mxu3 %v3624_v32 }
 0x9bb   : > { %v3370_v56 = vadd.f32 %v3369_v19, %v3334_v11  ;;  %3464 = vadd.xlane.f32.xlu0 %v10158_v26  ;;  %v3619_v19 = vld [vmem:[%s8973_s1 + $0x640] sm:$0xff] }
 0x9bc   : > { %v3404_v49 = vpop.f32.mrf.mxu3  ;;  %3649 = vmatpush.msrb.mxu1 %v3619_v19 }
 0x9bd   : > { %v3405_v53 = vadd.f32 %v3404_v49, %v3370_v56  ;;  %v3620_v56 = vld [vmem:[%s8973_s1 + $0x648] sm:$0xff]  ;;  %v3621_v49 = vld [vmem:[%s8973_s1 + $0x650] sm:$0xff] }
 0x9be   : > { %3719 = vmatpush.msrb.mxu3 %v3621_v49 }
 0x9bf   : > { %v3440_v52 = vadd.f32 %v3439_v58, %v3405_v53  ;;  %v3616_v58 = vld [vmem:[%s8973_s1 + $0x600] sm:$0xff]  ;;  %v3617_v53 = vld [vmem:[%s8973_s1 + $0x608] sm:$0xff] }
 0x9c0   : > { %3650 = vmatpush.msrb.mxu1 %v3616_v58 }
 0x9c1   : > { %v3449_v10 = vadd.f32 %v3440_v52, %v9830_v17  ;;  %v3618_v52 = vld [vmem:[%s8973_s1 + $0x610] sm:$0xff] }
 0x9c2   : > { %v3372_v54 = vpop.f32.mrf.mxu2  ;;  %3720 = vmatpush.msrb.mxu3 %v3618_v52 }
 0x9c3   : > { %v3373_v7 = vadd.f32 %v3372_v54, %v3337_v9  ;;  %v10162_v37 = vadd.f32 %v3451_v63, %v3449_v10  ;;  %v3613_v10 = vld [vmem:[%s8973_s1 + $0x5c0] sm:$0xff]  ;;  %v3614_v9 = vld [vmem:[%s8973_s1 + $0x5c8] sm:$0xff]  ;;  %v3615_v54 = vld [vmem:[%s8973_s1 + $0x5d0] sm:$0xff] }
 0x9c4   : > { %v3407_v40 = vpop.f32.mrf.mxu3  ;;  %3651 = vmatpush.msrb.mxu1 %v3613_v10  ;;  %3721 = vmatpush.msrb.mxu3 %v3615_v54 }
 0x9c5   : > { %v3408_v14 = vadd.f32 %v3407_v40, %v3373_v7  ;;  %3466 = vadd.xlane.f32.xlu2 %v10162_v37  ;;  %v3610_v7 = vld [vmem:[%s8973_s1 + $0x580] sm:$0xff]  ;;  %v3611_v40 = vld [vmem:[%s8973_s1 + $0x588] sm:$0xff] }
 0x9c6   : > { %3652 = vmatpush.msrb.mxu1 %v3610_v7 }
 0x9c7   : > { %v3443_v29 = vadd.f32 %v3442_v15, %v3408_v14  ;;  %v3612_v14 = vld [vmem:[%s8973_s1 + $0x590] sm:$0xff]  ;;  %v3607_v15 = vld [vmem:[%s8973_s1 + $0x540] sm:$0xff] }
 0x9c8   : > { %3722 = vmatpush.msrb.mxu3 %v3612_v14  ;;  %3653 = vmatpush.msrb.mxu1 %v3607_v15 }
 0x9c9   : > { %v3450_v13 = vadd.f32 %v3443_v29, %v9834_v35  ;;  %v3608_v29 = vld [vmem:[%s8973_s1 + $0x548] sm:$0xff] }
 0x9cb   : > { %v10166_v3 = vadd.f32 %v3451_v63, %v3450_v13  ;;  %v3635_v63 = vld [vmem:[%s8973_s1 + $0x788] sm:$0xff]  ;;  %v3609_v13 = vld [vmem:[%s8973_s1 + $0x550] sm:$0xff] }
 0x9cc   : > { %3679 = vmatpush.msrb.mxu2 %v3635_v63  ;;  %3723 = vmatpush.msrb.mxu3 %v3609_v13 }
 0x9cd   : > { %3468 = vadd.xlane.f32.xlu1 %v10166_v3 }
 0x9ce   : > { %3680 = vmatpush.msrb.mxu2 %v3632_v30  ;;  %v10255_v30 = vld [vmem:[%s8981_s17 + $0x20] sm:$0xff] }
 0x9d0   : > { %3681 = vmatpush.msrb.mxu2 %v3629_v48  ;;  %v10258_v48 = vperm.slane %v10255_v30, 0 }
 0x9d2   : > { %3682 = vmatpush.msrb.mxu2 %v3626_v4 }
 0x9d4   : > { %3683 = vmatpush.msrb.mxu2 %v3623_v23 }
 0x9d6   : > { %3684 = vmatpush.msrb.mxu2 %v3620_v56 }
 0x9d8   : > { %3685 = vmatpush.msrb.mxu2 %v3617_v53 }
 0x9da   : > { %3686 = vmatpush.msrb.mxu2 %v3614_v9 }
 0x9dc   : > { %3687 = vmatpush.msrb.mxu2 %v3611_v40 }
 0x9dd   : > { %v3459_v17 = vpop.xlane.xlu0 %3458 }
 0x9de   : > { %v3470_v18 = vmul.f32 %v3459_v17, %v9051_v36  ;;  %3688 = vmatpush.msrb.mxu2 %v3608_v29  ;;  %v3604_v17 = vld [vmem:[%s8973_s1 + $0x500] sm:$0xff] }
 0x9df   : > { %3654 = vmatpush.msrb.mxu1 %v3604_v17 }
 0x9e0   : > { %v10171_v42 = vsub.f32 %v10146_v6, %v3470_v18  ;;  %v3605_v18 = vld [vmem:[%s8973_s1 + $0x508] sm:$0xff] }
 0x9e1   : > { %3689 = vmatpush.msrb.mxu2 %v3605_v18 }
 0x9e2   : > { %v3482_v28 = vmul.f32 %v10171_v42, %v10171_v42 }
 0x9e4   : > { %3488 = vadd.xlane.f32.xlu0 %v3482_v28  ;;  %v3606_v28 = vld [vmem:[%s8973_s1 + $0x510] sm:$0xff] }
 0x9e5   : > { %3724 = vmatpush.msrb.mxu3 %v3606_v28 }
 0x9fd   : > { %v3461_v35 = vpop.xlane.xlu2 %3460 }
 0x9fe   : > { %v3471_v22 = vmul.f32 %v3461_v35, %v9051_v36  ;;  %v3601_v35 = vld [vmem:[%s8973_s1 + $0x4c0] sm:$0xff] }
 0x9ff   : > { %3655 = vmatpush.msrb.mxu1 %v3601_v35 }
 0xa00   : > { %v10177_v59 = vsub.f32 %v10150_v44, %v3471_v22  ;;  %v3602_v22 = vld [vmem:[%s8973_s1 + $0x4c8] sm:$0xff] }
 0xa01   : > { %3690 = vmatpush.msrb.mxu2 %v3602_v22 }
 0xa02   : > { %v3483_v55 = vmul.f32 %v10177_v59, %v10177_v59 }
 0xa04   : > { %3490 = vadd.xlane.f32.xlu2 %v3483_v55  ;;  %v3603_v55 = vld [vmem:[%s8973_s1 + $0x4d0] sm:$0xff] }
 0xa05   : > { %3725 = vmatpush.msrb.mxu3 %v3603_v55 }
 0xa07   : > { %3726 = vmatpush.msrb.mxu3 %v3600_v5 }
 0xa09   : > { %3727 = vmatpush.msrb.mxu3 %v3597_v33 }
 0xa26   : > { %v3463_v45 = vpop.xlane.xlu1 %3462 }
 0xa27   : > { %v3472_v38 = vmul.f32 %v3463_v45, %v9051_v36  ;;  %v3598_v45 = vld [vmem:[%s8973_s1 + $0x480] sm:$0xff] }
 0xa28   : > { %3656 = vmatpush.msrb.mxu1 %v3598_v45 }
 0xa29   : > { %v10183_v47 = vsub.f32 %v10154_v39, %v3472_v38  ;;  %v3599_v38 = vld [vmem:[%s8973_s1 + $0x488] sm:$0xff] }
 0xa2a   : > { %3691 = vmatpush.msrb.mxu2 %v3599_v38  ;;  %3657 = vmatpush.msrb.mxu1 %v3595_v16 }
 0xa2b   : > { %v3484_v34 = vmul.f32 %v10183_v47, %v10183_v47 }
 0xa2c   : > { %3692 = vmatpush.msrb.mxu2 %v3596_v21  ;;  %3658 = vmatpush.msrb.mxu1 %v3592_v8 }
 0xa2d   : > { %3492 = vadd.xlane.f32.xlu1 %v3484_v34  ;;  %v3593_v34 = vld [vmem:[%s8973_s1 + $0x408] sm:$0xff] }
 0xa2e   : > { %v3465_v57 = vpop.xlane.xlu0 %3464  ;;  %3693 = vmatpush.msrb.mxu2 %v3593_v34 }
 0xa2f   : > { %v3473_v50 = vmul.f32 %v3465_v57, %v9051_v36 }
 0xa31   : > { %v10195_v43 = vsub.f32 %v10158_v26, %v3473_v50  ;;  %v3594_v50 = vld [vmem:[%s8973_s1 + $0x410] sm:$0xff] }
 0xa32   : > { %3728 = vmatpush.msrb.mxu3 %v3594_v50 }
 0xa33   : > { %v3485_v25 = vmul.f32 %v10195_v43, %v10195_v43 }
 0xa35   : > { %3494 = vadd.xlane.f32.xlu0 %v3485_v25 }
 0xa38   : > { %v3467_v27 = vpop.xlane.xlu2 %3466 }
 0xa39   : > { %v3474_v1 = vmul.f32 %v3467_v27, %v9051_v36 }
 0xa3b   : > { %v10201_v41 = vsub.f32 %v10162_v37, %v3474_v1 }
 0xa3d   : > { %v3486_v0 = vmul.f32 %v10201_v41, %v10201_v41 }
 0xa3f   : > { %3496 = vadd.xlane.f32.xlu2 %v3486_v0 }
 0xa40   : > { %v3469_v60 = vpop.xlane.xlu1 %3468 }
 0xa41   : > { %v3475_v62 = vmul.f32 %v3469_v60, %v9051_v36 }
 0xa43   : > { %v10216_v51 = vsub.f32 %v10166_v3, %v3475_v62  ;;  %v10262_v62 = vperm.slane %v10255_v30, 1 }
 0xa45   : > { %v3487_v11 = vmul.f32 %v10216_v51, %v10216_v51 }
 0xa47   : > { %3498 = vadd.xlane.f32.xlu1 %v3487_v11 }
 0xa57   : > { %v3489_v63 = vpop.xlane.xlu0 %3488 }
 0xa58   : > { %v3500_v57 = vmul.f32 %v3489_v63, %v9051_v36 }
 0xa5a   : > { %v3506_v25 = vadd.f32 1e-06, %v3500_v57 }
 0xa5c   : > { %7879 = vrsqrt.f32 %v3506_v25  ;;  %vm3518_vm13 = vweird.f32 %v3506_v25 }
 0xa62   : > { %v7880_v27 = vpop.eup %7879 }
 0xa63   : > { %v3513_v1 = vmul.f32 %v7880_v27, %v3506_v25  ;;  %vm3519_vm12 = vweird.f32 %v7880_v27 }
 0xa64   : > { %vm3520_vm14 = vmor %vm3518_vm13, %vm3519_vm12 }
 0xa65   : > { %v3514_v0 = vmul.f32 %v7880_v27, %v3513_v1 }
 0xa67   : > { %v3515_v12 = vmul.f32 0.5, %v3514_v0 }
 0xa69   : > { %v3516_v61 = vsub.f32 1.5, %v3515_v12 }
 0xa6b   : > { %v3517_v46 = vmul.f32 %v7880_v27, %v3516_v61 }
 0xa6d   : > { %v3521_v31 = vsel %vm3520_vm14, %v7880_v27, %v3517_v46 }
 0xa6e   : > { %v3572_v60 = vmul.f32 %v3521_v31, %v10171_v42 }
 0xa70   : > { %v3579_v24 = vmul.f32 %v10258_v48, %v3572_v60 }
 0xa72   : > { %v3586_v4 = vadd.f32 %v10262_v62, %v3579_v24 }
 0xa74   : > { %3659 = vmatmul.f32.vlgmr.msrb.gmra.mxu1 %v3586_v4  ;;  %3694 = vmatmul.f32.vlgmr.msrb.gmra.mxu2 %v3586_v4 }
 0xa75   : > { %3729 = vmatmul.f32.vlgmr.msrb.gmra.mxu3 %v3586_v4 }
 0xa77   : > { %v3491_v20 = vpop.xlane.xlu2 %3490 }
 0xa78   : > { %v3501_v2 = vmul.f32 %v3491_v20, %v9051_v36 }
 0xa7a   : > { %v3507_v23 = vadd.f32 1e-06, %v3501_v2 }
 0xa7c   : > { %7881 = vrsqrt.f32 %v3507_v23  ;;  %vm3528_vm1 = vweird.f32 %v3507_v23 }
 0xa82   : > { %v7882_v32 = vpop.eup %7881 }
 0xa83   : > { %v3523_v11 = vmul.f32 %v7882_v32, %v3507_v23  ;;  %vm3529_vm15 = vweird.f32 %v7882_v32 }
 0xa84   : > { %vm3530_vm2 = vmor %vm3528_vm1, %vm3529_vm15 }
 0xa85   : > { %v3524_v19 = vmul.f32 %v7882_v32, %v3523_v11 }
 0xa87   : > { %v3525_v56 = vmul.f32 0.5, %v3524_v19 }
 0xa89   : > { %v3526_v42 = vsub.f32 1.5, %v3525_v56 }
 0xa8b   : > { %v3527_v49 = vmul.f32 %v7882_v32, %v3526_v42 }
 0xa8d   : > { %v3531_v58 = vsel %vm3530_vm2, %v7882_v32, %v3527_v49 }
 0xa8e   : > { %v3573_v53 = vmul.f32 %v3531_v58, %v10177_v59 }
 0xa90   : > { %v3580_v52 = vmul.f32 %v10258_v48, %v3573_v53 }
 0xa92   : > { %v3587_v10 = vadd.f32 %v10262_v62, %v3580_v52 }
 0xa94   : > { %3662 = vmatmul.f32.gmra.mxu1 %v3587_v10  ;;  %3697 = vmatmul.f32.gmra.mxu2 %v3587_v10 }
 0xa95   : > { %3732 = vmatmul.f32.gmra.mxu3 %v3587_v10 }
 0xaa0   : > { %v3493_v9 = vpop.xlane.xlu1 %3492 }
 0xaa1   : > { %v3502_v54 = vmul.f32 %v3493_v9, %v9051_v36 }
 0xaa3   : > { %v3508_v7 = vadd.f32 1e-06, %v3502_v54 }
 0xaa5   : > { %7883 = vrsqrt.f32 %v3508_v7  ;;  %vm3538_vm7 = vweird.f32 %v3508_v7 }
 0xaa8   : > { %v3495_v40 = vpop.xlane.xlu0 %3494 }
 0xaa9   : > { %v3503_v15 = vmul.f32 %v3495_v40, %v9051_v36 }
 0xaab   : > { %v7884_v14 = vpop.eup %7883  ;;  %v3509_v13 = vadd.f32 1e-06, %v3503_v15 }
 0xaac   : > { %v3533_v29 = vmul.f32 %v7884_v14, %v3508_v7  ;;  %vm3539_vm6 = vweird.f32 %v7884_v14 }
 0xaad   : > { %7885 = vrsqrt.f32 %v3509_v13  ;;  %vm3540_vm8 = vmor %vm3538_vm7, %vm3539_vm6  ;;  %vm3548_vm10 = vweird.f32 %v3509_v13 }
 0xaae   : > { %v3534_v17 = vmul.f32 %v7884_v14, %v3533_v29 }
 0xab0   : > { %v3535_v59 = vmul.f32 0.5, %v3534_v17  ;;  %v1010_v17 = vld [vmem:[%s8981_s17 + $0x30] sm:$0xff] }
 0xab2   : > { %v3536_v18 = vsub.f32 1.5, %v3535_v59  ;;  %v3497_v35 = vpop.xlane.xlu2 %3496 }
 0xab3   : > { %v7886_v22 = vpop.eup %7885  ;;  %v3504_v55 = vmul.f32 %v3497_v35, %v9051_v36 }
 0xab4   : > { %v3537_v28 = vmul.f32 %v7884_v14, %v3536_v18  ;;  %v3543_v38 = vmul.f32 %v7886_v22, %v3509_v13  ;;  %vm3549_vm9 = vweird.f32 %v7886_v22  ;;  %v1009_v13 = vld [vmem:[%s8981_s17 + $0x28] sm:$0xff]  ;;  %v3642_v18 = vperm.slane %v1010_v17, 2 }
 0xab5   : > { %v3510_v5 = vadd.f32 1e-06, %v3504_v55  ;;  %vm3550_vm11 = vmor %vm3548_vm10, %vm3549_vm9  ;;  %v3641_v59 = vperm.slane %v1009_v13, 2  ;;  %v10374_v13 = vld [vmem:[#allocation13] sm:$0xff] }
 0xab6   : > { %v3541_v45 = vsel %vm3540_vm8, %v7884_v14, %v3537_v28  ;;  %v3544_v21 = vmul.f32 %v7886_v22, %v3543_v38 }
 0xab7   : > { %v3574_v16 = vmul.f32 %v3541_v45, %v10183_v47  ;;  %7887 = vrsqrt.f32 %v3510_v5  ;;  %vm3558_vm13 = vweird.f32 %v3510_v5  ;;  %v3640_v45 = vperm.slane %v10255_v30, 2 }
 0xab8   : > { %v3545_v63 = vmul.f32 0.5, %v3544_v21 }
 0xab9   : > { %v3581_v33 = vmul.f32 %v10258_v48, %v3574_v16 }
 0xaba   : > { %v3546_v34 = vsub.f32 1.5, %v3545_v63  ;;  %v3499_v57 = vpop.xlane.xlu1 %3498 }
 0xabb   : > { %v3588_v8 = vadd.f32 %v10262_v62, %v3581_v33  ;;  %v3505_v50 = vmul.f32 %v3499_v57, %v9051_v36 }
 0xabc   : > { %v3547_v25 = vmul.f32 %v7886_v22, %v3546_v34 }
 0xabd   : > { %3665 = vmatmul.f32.gmra.mxu1 %v3588_v8  ;;  %3700 = vmatmul.f32.gmra.mxu2 %v3588_v8  ;;  %v7888_v27 = vpop.eup %7887  ;;  %v3511_v47 = vadd.f32 1e-06, %v3505_v50 }
 0xabe   : > { %3735 = vmatmul.f32.gmra.mxu3 %v3588_v8  ;;  %v3551_v1 = vsel %vm3550_vm11, %v7886_v22, %v3547_v25  ;;  %v3553_v0 = vmul.f32 %v7888_v27, %v3510_v5  ;;  %vm3559_vm12 = vweird.f32 %v7888_v27 }
 0xabf   : > { %7889 = vrsqrt.f32 %v3511_v47  ;;  %v3575_v12 = vmul.f32 %v3551_v1, %v10195_v43  ;;  %vm3560_vm14 = vmor %vm3558_vm13, %vm3559_vm12  ;;  %vm3568_vm1 = vweird.f32 %v3511_v47 }
 0xac0   : > { %v3554_v61 = vmul.f32 %v7888_v27, %v3553_v0 }
 0xac1   : > { %v3582_v46 = vmul.f32 %v10258_v48, %v3575_v12 }
 0xac2   : > { %v3555_v31 = vmul.f32 0.5, %v3554_v61 }
 0xac3   : > { %v3589_v60 = vadd.f32 %v10262_v62, %v3582_v46 }
 0xac4   : > { %v3556_v24 = vsub.f32 1.5, %v3555_v31 }
 0xac5   : > { %v7890_v4 = vpop.eup %7889  ;;  %3668 = vmatmul.f32.gmra.mxu1 %v3589_v60  ;;  %3703 = vmatmul.f32.gmra.mxu2 %v3589_v60 }
 0xac6   : > { %v3557_v20 = vmul.f32 %v7888_v27, %v3556_v24  ;;  %v3563_v2 = vmul.f32 %v7890_v4, %v3511_v47  ;;  %3738 = vmatmul.f32.gmra.mxu3 %v3589_v60  ;;  %vm3569_vm15 = vweird.f32 %v7890_v4 }
 0xac7   : > { %vm3570_vm2 = vmor %vm3568_vm1, %vm3569_vm15 }
 0xac8   : > { %v3561_v23 = vsel %vm3560_vm14, %v7888_v27, %v3557_v20  ;;  %v3564_v32 = vmul.f32 %v7890_v4, %v3563_v2 }
 0xac9   : > { %v3576_v43 = vmul.f32 %v3561_v23, %v10201_v41 }
 0xaca   : > { %v3565_v11 = vmul.f32 0.5, %v3564_v32 }
 0xacb   : > { %v3583_v19 = vmul.f32 %v10258_v48, %v3576_v43 }
 0xacc   : > { %v3566_v56 = vsub.f32 1.5, %v3565_v11 }
 0xacd   : > { %v3590_v42 = vadd.f32 %v10262_v62, %v3583_v19 }
 0xace   : > { %v3567_v49 = vmul.f32 %v7890_v4, %v3566_v56 }
 0xacf   : > { %3671 = vmatmul.f32.gmra.mxu1 %v3590_v42  ;;  %3706 = vmatmul.f32.gmra.mxu2 %v3590_v42 }
 0xad0   : > { %v3571_v58 = vsel %vm3570_vm2, %v7890_v4, %v3567_v49  ;;  %3741 = vmatmul.f32.gmra.mxu3 %v3590_v42 }
 0xad1   : > { %v3577_v53 = vmul.f32 %v3571_v58, %v10216_v51 }
 0xad3   : > { %v3584_v41 = vmul.f32 %v10258_v48, %v3577_v53 }
 0xad5   : > { %v3591_v52 = vadd.f32 %v10262_v62, %v3584_v41 }
 0xad7   : > { %3674 = vmatmul.f32.gmra.mxu1 %v3591_v52  ;;  %3709 = vmatmul.f32.gmra.mxu2 %v3591_v52 }
 0xad8   : > { %3744 = vmatmul.f32.gmra.mxu3 %v3591_v52 }
 0xaf1   : > { %v3660_v40 = vpop.f32.mrf.mxu1 }
 0xaf2   : > { %v10292_v38 = vadd.f32 %v3660_v40, %v3640_v45 }
 0xaf7   : > { %v3695_v10 = vpop.f32.mrf.mxu2 }
 0xaf8   : > { %v3730_v9 = vpop.f32.mrf.mxu3  ;;  %v3696_v31 = vadd.f32 %v3695_v10, %v3641_v59 }
 0xaf9   : > { %v3731_v46 = vadd.f32 %v3730_v9, %v3642_v18 }
 0xb11   : > { %v3663_v29 = vpop.f32.mrf.mxu1 }
 0xb12   : > { %v3664_v12 = vadd.f32 %v3663_v29, %v3640_v45 }
 0xb17   : > { %v3698_v54 = vpop.f32.mrf.mxu2 }
 0xb18   : > { %v3733_v7 = vpop.f32.mrf.mxu3  ;;  %v3699_v30 = vadd.f32 %v3698_v54, %v3641_v59 }
 0xb19   : > { %v3734_v61 = vadd.f32 %v3733_v7, %v3642_v18 }
 0xb1b   : > { %v10344_v20 = vpack.i.bf16 %v3731_v46, %v3734_v61 }
 0xb3a   : > { %v3666_v35 = vpop.f32.mrf.mxu1 }
 0xb3b   : > { %v3667_v24 = vadd.f32 %v3666_v35, %v3640_v45  ;;  %v10384_v35 = vld [vmem:[#allocation13 + $0x8] sm:$0xff] }
 0xb40   : > { %v3701_v14 = vpop.f32.mrf.mxu2 }
 0xb41   : > { %v3736_v15 = vpop.f32.mrf.mxu3  ;;  %v3702_v0 = vadd.f32 %v3701_v14, %v3641_v59 }
 0xb42   : > { %v3737_v62 = vadd.f32 %v3736_v15, %v3642_v18  ;;  %v3669_v33 = vpop.f32.mrf.mxu1 }
 0xb43   : > { %v10297_v63 = vadd.f32 %v3669_v33, %v3640_v45 }
 0xb48   : > { %v3704_v51 = vpop.f32.mrf.mxu2 }
 0xb49   : > { %v3705_v28 = vadd.f32 %v3704_v51, %v3641_v59  ;;  %v3739_v48 = vpop.f32.mrf.mxu3 }
 0xb4a   : > { %v3740_v22 = vadd.f32 %v3739_v48, %v3642_v18 }
 0xb4b   : > { %4046 = vrot.lane.b32.xlu1 %v3705_v28, %s8602_s2 }
 0xb4c   : > { %v10289_v55 = vpack.i.bf16 %v3737_v62, %v3740_v22  ;;  %v3672_v27 = vpop.f32.mrf.mxu1 }
 0xb4d   : > { %v3673_v1 = vadd.f32 %v3672_v27, %v3640_v45 }
 0xb52   : > { %v3707_v5 = vpop.f32.mrf.mxu2 }
 0xb53   : > { %v3708_v16 = vadd.f32 %v3707_v5, %v3641_v59  ;;  %v3742_v21 = vpop.f32.mrf.mxu3  ;;  %4028 = vrot.lane.b32.xlu1 %v10292_v38, %s8602_s2 }
 0xb54   : > { %v3743_v50 = vadd.f32 %v3742_v21, %v3642_v18  ;;  %v3675_v60 = vpop.f32.mrf.mxu1  ;;  %v10394_v21 = vld [vmem:[#allocation13 + $0x10] sm:$0xff] }
 0xb55   : > { %4048 = vrot.lane.b32.xlu2 %v3708_v16, %s8602_s2  ;;  %v3676_v4 = vadd.f32 %v3675_v60, %v3640_v45 }
 0xb5a   : > { %v3710_v8 = vpop.f32.mrf.mxu2 }
 0xb5b   : > { %v3711_v34 = vadd.f32 %v3710_v8, %v3641_v59  ;;  %v3745_v57 = vpop.f32.mrf.mxu3  ;;  %4034 = vrot.lane.b32.xlu1 %v10297_v63, %s8602_s2 }
 0xb5c   : > { %v3746_v25 = vadd.f32 %v3745_v57, %v3642_v18 }
 0xb5d   : > { %4050 = vrot.lane.b32.xlu0 %v3711_v34, %s8602_s2  ;;  %7336 = vmatpush.xpose.msk.msra.mxu0 %vm1316_vm5, %v3711_v34 }
 0xb5e   : > { %4003 = vmatpush.msra.mxu1 %v3746_v25  ;;  %4042 = vrot.lane.b32.xlu2 %v3699_v30, %s8602_s2  ;;  %v10304_v47 = vpack.i.bf16 %v3743_v50, %v3746_v25  ;;  %v10405_v25 = vld [vmem:[#allocation13 + $0x18] sm:$0xff] }
 0xb60   : > { %4004 = vmatpush.msra.mxu1 %v3743_v50 }
 0xb61   : > { %7337 = vmatpush.xpose.msk.msra.mxu0 %vm1316_vm5, %v3708_v16 }
 0xb62   : > { %4005 = vmatpush.msra.mxu1 %v3740_v22 }
 0xb63   : > { %4036 = vrot.lane.b32.xlu1 %v3673_v1, %s8602_s2 }
 0xb64   : > { %4006 = vmatpush.msra.mxu1 %v3737_v62 }
 0xb65   : > { %4044 = vrot.lane.b32.xlu0 %v3702_v0, %s8602_s2  ;;  %7338 = vmatpush.xpose.msk.msra.mxu0 %vm1316_vm5, %v3705_v28 }
 0xb66   : > { %4007 = vmatpush.msra.mxu1 %v3734_v61  ;;  %4030 = vrot.lane.b32.xlu2 %v3664_v12, %s8602_s2 }
 0xb68   : > { %4008 = vmatpush.msra.mxu1 %v3731_v46 }
 0xb69   : > { %7339 = vmatpush.xpose.msk.msra.mxu0 %vm1316_vm5, %v3702_v0 }
 0xb6b   : > { %4670 = vrot.lane.b32.xlu1 %v3702_v0, %s8603_s11 }
 0xb6d   : > { %4040 = vrot.lane.b32.xlu0 %v3696_v31, %s8602_s2  ;;  %7340 = vmatpush.xpose.msk.msra.mxu0 %vm1316_vm5, %v3699_v30 }
 0xb6e   : > { %4672 = vrot.lane.b32.xlu2 %v3705_v28, %s8603_s11 }
 0xb71   : > { %7341 = vmatpush.xpose.msk.msra.mxu0 %vm1316_vm5, %v3696_v31 }
 0xb73   : > { %4668 = vrot.lane.b32.xlu1 %v3699_v30, %s8603_s11 }
 0xb74   : > { %7342 = vmatmul.msk.f32.vlgmr.msra.gmra.mxu0 %vm1316_vm5, %v10292_v38 }
 0xb75   : > { %4032 = vrot.lane.b32.xlu0 %v3667_v24, %s8602_s2 }
 0xb76   : > { %4038 = vrot.lane.b32.xlu2 %v3676_v4, %s8602_s2 }
 0xb7b   : > { %4360 = vrot.lane.b32.xlu1 %v3702_v0, %s8604_s18 }
 0xb7c   : > { %7343 = vmatmul.msk.f32.gmra.mxu0 %vm1316_vm5, %v3664_v12 }
 0xb7d   : > { %4674 = vrot.lane.b32.xlu0 %v3708_v16, %s8603_s11 }
 0xb7e   : > { %4362 = vrot.lane.b32.xlu2 %v3705_v28, %s8604_s18 }
 0xb83   : > { %4356 = vrot.lane.b32.xlu1 %v3696_v31, %s8604_s18 }
 0xb84   : > { %7344 = vmatmul.msk.f32.gmra.mxu0 %vm1316_vm5, %v3667_v24 }
 0xb85   : > { %4364 = vrot.lane.b32.xlu0 %v3708_v16, %s8604_s18 }
 0xb86   : > { %4676 = vrot.lane.b32.xlu2 %v3711_v34, %s8603_s11 }
 0xb8b   : > { %4658 = vrot.lane.b32.xlu1 %v3667_v24, %s8603_s11 }
 0xb8c   : > { %7345 = vmatmul.msk.f32.gmra.mxu0 %vm1316_vm5, %v10297_v63 }
 0xb8d   : > { %4366 = vrot.lane.b32.xlu0 %v3711_v34, %s8604_s18 }
 0xb8e   : > { %4654 = vrot.lane.b32.xlu2 %v10292_v38, %s8603_s11 }
 0xb93   : > { %4348 = vrot.lane.b32.xlu1 %v3667_v24, %s8604_s18 }
 0xb94   : > { %7346 = vmatmul.msk.f32.gmra.mxu0 %vm1316_vm5, %v3673_v1 }
 0xb95   : > { %4666 = vrot.lane.b32.xlu0 %v3696_v31, %s8603_s11  ;;  %v10416_v31 = vld [vmem:[#allocation13 + $0x20] sm:$0xff] }
 0xb96   : > { %4656 = vrot.lane.b32.xlu2 %v3664_v12, %s8603_s11 }
 0xb9b   : > { %4664 = vrot.lane.b32.xlu1 %v3676_v4, %s8603_s11 }
 0xb9c   : > { %7347 = vmatmul.msk.f32.gmra.mxu0 %vm1316_vm5, %v3676_v4 }
 0xb9d   : > { %4358 = vrot.lane.b32.xlu0 %v3699_v30, %s8604_s18 }
 0xb9e   : > { %4346 = vrot.lane.b32.xlu2 %v3664_v12, %s8604_s18 }
 0xba3   : > { %7652 = vrot.lane.b32.xlu1 %v10344_v20, %s8602_s2 }
 0xba5   : > { %4344 = vrot.lane.b32.xlu0 %v10292_v38, %s8604_s18 }
 0xba6   : > { %4662 = vrot.lane.b32.xlu2 %v3673_v1, %s8603_s11 }
 0xbab   : > { %7657 = vrot.lane.b32.xlu1 %v10304_v47, %s8602_s2 }
 0xbad   : > { %4660 = vrot.lane.b32.xlu0 %v10297_v63, %s8603_s11 }
 0xbae   : > { %4352 = vrot.lane.b32.xlu2 %v3673_v1, %s8604_s18 }
 0xbaf   : > { %v4049_v2 = vpop.permute.xlu2 %4048 }
 0xbb5   : > { %4350 = vrot.lane.b32.xlu0 %v10297_v63, %s8604_s18 }
 0xbb8   : > { %v4043_v23 = vpop.permute.xlu2 %4042 }
 0xbbd   : > { %4354 = vrot.lane.b32.xlu0 %v3676_v4, %s8604_s18  ;;  %v4047_v32 = vpop.permute.xlu1 %4046 }
 0xbc0   : > { %v4031_v43 = vpop.permute.xlu2 %4030 }
 0xbc5   : > { %7647 = vrot.lane.b32.xlu0 %v10289_v55, %s8602_s2  ;;  %v4029_v11 = vpop.permute.xlu1 %4028 }
 0xbc8   : > { %v4673_v19 = vpop.permute.xlu2 %4672 }
 0xbcd   : > { %v4035_v56 = vpop.permute.xlu1 %4034 }
 0xbcf   : > { %v4051_v42 = vpop.permute.xlu0 %4050 }
 0xbd0   : > { %v10361_v49 = vpop.permute.xlu2 %4038  ;;  %7354 = vmatpush.xpose.msk.msra.mxu2 %vm1316_vm5, %v4051_v42 }
 0xbd4   : > { %7355 = vmatpush.xpose.msk.msra.mxu2 %vm1316_vm5, %v4049_v2 }
 0xbd5   : > { %v4037_v58 = vpop.permute.xlu1 %4036 }
 0xbd7   : > { %v4045_v53 = vpop.permute.xlu0 %4044 }
 0xbd8   : > { %7356 = vmatpush.xpose.msk.msra.mxu2 %vm1316_vm5, %v4047_v32  ;;  %v4363_v41 = vpop.permute.xlu2 %4362 }
 0xbdc   : > { %7357 = vmatpush.xpose.msk.msra.mxu2 %vm1316_vm5, %v4045_v53 }
 0xbdd   : > { %v4671_v52 = vpop.permute.xlu1 %4670 }
 0xbdf   : > { %v4041_v10 = vpop.permute.xlu0 %4040 }
 0xbe0   : > { %7358 = vmatpush.xpose.msk.msra.mxu2 %vm1316_vm5, %v4043_v23  ;;  %v4677_v9 = vpop.permute.xlu2 %4676 }
 0xbe4   : > { %7359 = vmatpush.xpose.msk.msra.mxu2 %vm1316_vm5, %v4041_v10 }
 0xbe5   : > { %v4669_v54 = vpop.permute.xlu1 %4668 }
 0xbe7   : > { %v4033_v7 = vpop.permute.xlu0 %4032  ;;  %7360 = vmatmul.msk.f32.vlgmr.msra.gmra.mxu2 %vm1316_vm5, %v4029_v11  ;;  %v10425_v11 = vld [vmem:[#allocation13 + $0x28] sm:$0xff] }
 0xbe8   : > { %7390 = vmatpush.xpose.msk.msrb.mxu2 %vm1316_vm5, %v4677_v9  ;;  %v4655_v50 = vpop.permute.xlu2 %4654 }
 0xbed   : > { %v4361_v40 = vpop.permute.xlu1 %4360 }
 0xbef   : > { %v4675_v14 = vpop.permute.xlu0 %4674  ;;  %7361 = vmatmul.msk.f32.gmra.mxu2 %vm1316_vm5, %v4031_v43 }
 0xbf0   : > { %7391 = vmatpush.xpose.msk.msrb.mxu2 %vm1316_vm5, %v4675_v14  ;;  %v4657_v24 = vpop.permute.xlu2 %4656 }
 0xbf1   : > { %v3801_v15 = vpop.f32.mrf.mxu0 }
 0xbf2   : > { %v3819_v29 = vmul.f32 0.17677669, %v3801_v15 }
 0xbf4   : > { %7392 = vmatpush.xpose.msk.msrb.mxu2 %vm1316_vm5, %v4673_v19  ;;  %v10377_v17 = vadd.f32 %v10374_v13, %v3819_v29 }
 0xbf5   : > { %v4357_v59 = vpop.permute.xlu1 %4356 }
 0xbf6   : > { %v3831_v18 = vsel %vm950_vm0, %v10377_v17, -inf }
 0xbf7   : > { %v4365_v51 = vpop.permute.xlu0 %4364  ;;  %7362 = vmatmul.msk.f32.gmra.mxu2 %vm1316_vm5, %v4033_v7  ;;  %3832 = vmax.xlane.f32.xlu2 %v3831_v18 }
 0xbf8   : > { %7393 = vmatpush.xpose.msk.msrb.mxu2 %vm1316_vm5, %v4671_v52 }
 0xbf9   : > { %v3804_v28 = vpop.f32.mrf.mxu0 }
 0xbfa   : > { %v3820_v48 = vmul.f32 0.17677669, %v3804_v28 }
 0xbfc   : > { %7394 = vmatpush.xpose.msk.msrb.mxu2 %vm1316_vm5, %v4669_v54  ;;  %v10387_v62 = vadd.f32 %v10384_v35, %v3820_v48 }
 0xbfd   : > { %v4659_v22 = vpop.permute.xlu1 %4658 }
 0xbfe   : > { %v3834_v45 = vsel %vm950_vm0, %v10387_v62, -inf }
 0xbff   : > { %v4367_v38 = vpop.permute.xlu0 %4366  ;;  %3835 = vmax.xlane.f32.xlu1 %v3834_v45  ;;  %7363 = vmatmul.msk.f32.gmra.mxu2 %vm1316_vm5, %v4035_v56 }
 0xc00   : > { %7372 = vmatpush.xpose.msk.msrb.mxu0 %vm1316_vm5, %v4367_v38 }
 0xc01   : > { %v3807_v5 = vpop.f32.mrf.mxu0 }
 0xc02   : > { %v3821_v16 = vmul.f32 0.17677669, %v3807_v5 }
 0xc04   : > { %7373 = vmatpush.xpose.msk.msrb.mxu0 %vm1316_vm5, %v4365_v51  ;;  %v10397_v33 = vadd.f32 %v10394_v21, %v3821_v16 }
 0xc05   : > { %v4349_v63 = vpop.permute.xlu1 %4348 }
 0xc06   : > { %v3837_v8 = vsel %vm950_vm0, %v10397_v33, -inf }
 0xc07   : > { %v4667_v34 = vpop.permute.xlu0 %4666  ;;  %3838 = vmax.xlane.f32.xlu0 %v3837_v8  ;;  %7364 = vmatmul.msk.f32.gmra.mxu2 %vm1316_vm5, %v4037_v58  ;;  %v4347_v58 = vpop.permute.xlu2 %4346 }
 0xc08   : > { %7374 = vmatpush.xpose.msk.msrb.mxu0 %vm1316_vm5, %v4363_v41  ;;  %7395 = vmatpush.xpose.msk.msrb.mxu2 %vm1316_vm5, %v4667_v34 }
 0xc09   : > { %v3810_v57 = vpop.f32.mrf.mxu0 }
 0xc0a   : > { %v3822_v30 = vmul.f32 0.17677669, %v3810_v57 }
 0xc0c   : > { %7375 = vmatpush.xpose.msk.msrb.mxu0 %vm1316_vm5, %v4361_v40  ;;  %v10408_v27 = vadd.f32 %v10405_v25, %v3822_v30 }
 0xc0d   : > { %v4665_v1 = vpop.permute.xlu1 %4664 }
 0xc0e   : > { %v3840_v0 = vsel %vm950_vm0, %v10408_v27, -inf }
 0xc0f   : > { %v4359_v12 = vpop.permute.xlu0 %4358  ;;  %7365 = vmatmul.msk.f32.gmra.mxu2 %vm1316_vm5, %v10361_v49  ;;  %3841 = vmax.xlane.f32.xlu2 %v3840_v0  ;;  %v4663_v10 = vpop.permute.xlu2 %4662 }
 0xc10   : > { %7376 = vmatpush.xpose.msk.msrb.mxu0 %vm1316_vm5, %v4359_v12 }
 0xc11   : > { %v3813_v61 = vpop.f32.mrf.mxu0 }
 0xc12   : > { %v3823_v46 = vmul.f32 0.17677669, %v3813_v61 }
 0xc14   : > { %7377 = vmatpush.xpose.msk.msrb.mxu0 %vm1316_vm5, %v4357_v59  ;;  %v10419_v60 = vadd.f32 %v10416_v31, %v3823_v46 }
 0xc15   : > { %v7653_v4 = vpop.permute.xlu1 %7652 }
 0xc16   : > { %v3843_v2 = vsel %vm950_vm0, %v10419_v60, -inf  ;;  %v7654_v15 = vunpack.i.l.bf16 %v7653_v4  ;;  %v7655_v29 = vunpack.i.h.bf16 %v7653_v4 }
 0xc17   : > { %v4345_v23 = vpop.permute.xlu0 %4344  ;;  %7396 = vmatmul.msk.f32.vlgmr.msrb.gmra.mxu2 %vm1316_vm5, %v4655_v50  ;;  %3844 = vmax.xlane.f32.xlu1 %v3843_v2  ;;  %v4353_v54 = vpop.permute.xlu2 %4352 }
 0xc18   : > { %7378 = vmatmul.msk.f32.vlgmr.msrb.gmra.mxu0 %vm1316_vm5, %v4345_v23 }
 0xc19   : > { %v3816_v32 = vpop.f32.mrf.mxu0 }
 0xc1a   : > { %v3824_v43 = vmul.f32 0.17677669, %v3816_v32 }
 0xc1c   : > { %v10428_v19 = vadd.f32 %v10425_v11, %v3824_v43 }
 0xc1d   : > { %v7658_v56 = vpop.permute.xlu1 %7657 }
 0xc1e   : > { %v7659_v42 = vunpack.i.l.bf16 %v7658_v56  ;;  %v3846_v49 = vsel %vm950_vm0, %v10428_v19, -inf  ;;  %v7660_v41 = vunpack.i.h.bf16 %v7658_v56 }
 0xc1f   : > { %v4661_v53 = vpop.permute.xlu0 %4660  ;;  %7397 = vmatmul.msk.f32.gmra.mxu2 %vm1316_vm5, %v4657_v24  ;;  %3847 = vmax.xlane.f32.xlu0 %v3846_v49 }
 0xc20   : > { %7379 = vmatmul.msk.f32.gmra.mxu0 %vm1316_vm5, %v4347_v58  ;;  %4319 = vmatpush.msra.mxu3 %v7659_v42 }
 0xc22   : > { %4320 = vmatpush.msra.mxu3 %v7660_v41 }
 0xc27   : > { %v4351_v52 = vpop.permute.xlu0 %4350  ;;  %7398 = vmatmul.msk.f32.gmra.mxu2 %vm1316_vm5, %v4659_v22 }
 0xc28   : > { %7380 = vmatmul.msk.f32.gmra.mxu0 %vm1316_vm5, %v4349_v63 }
 0xc2f   : > { %v4355_v9 = vpop.permute.xlu0 %4354  ;;  %7399 = vmatmul.msk.f32.gmra.mxu2 %vm1316_vm5, %v4661_v53 }
 0xc30   : > { %7381 = vmatmul.msk.f32.gmra.mxu0 %vm1316_vm5, %v4351_v52 }
 0xc37   : > { %v7648_v7 = vpop.permute.xlu0 %7647  ;;  %7400 = vmatmul.msk.f32.gmra.mxu2 %vm1316_vm5, %v4663_v10 }
 0xc38   : > { %v7649_v40 = vunpack.i.l.bf16 %v7648_v7  ;;  %7382 = vmatmul.msk.f32.gmra.mxu0 %vm1316_vm5, %v4353_v54  ;;  %v7650_v14 = vunpack.i.h.bf16 %v7648_v7 }
 0xc3a   : > { %4321 = vmatpush.msra.mxu3 %v7649_v40 }
 0xc3c   : > { %4322 = vmatpush.msra.mxu3 %v7650_v14 }
 0xc3e   : > { %4323 = vmatpush.msra.mxu3 %v7654_v15 }
 0xc3f   : > { %7401 = vmatmul.msk.f32.gmra.mxu2 %vm1316_vm5, %v4665_v1 }
 0xc40   : > { %4324 = vmatpush.msra.mxu3 %v7655_v29  ;;  %7383 = vmatmul.msk.f32.gmra.mxu0 %vm1316_vm5, %v4355_v9 }
 0xc6a   : > { %v4093_v59 = vpop.f32.mrf.mxu2  ;;  %v3833_v34 = vpop.xlane.xlu2 %3832 }
 0xc6b   : > { %v4111_v18 = vmul.f32 0.17677669, %v4093_v59  ;;  %v3849_v1 = vsub.f32 %v10377_v17, %v3833_v34 }
 0xc6d   : > { %v10443_v51 = vadd.f32 %v10374_v13, %v4111_v18  ;;  %v3855_v4 = vmul.f32 1.442695, %v3849_v1 }
 0xc6f   : > { %v4123_v28 = vsel %vm950_vm0, %v10443_v51, -inf  ;;  %7891 = vpow2.f32 %v3855_v4 }
 0xc70   : > { %4124 = vmax.xlane.f32.xlu1 %v4123_v28 }
 0xc72   : > { %v4096_v48 = vpop.f32.mrf.mxu2  ;;  %v3836_v53 = vpop.xlane.xlu1 %3835 }
 0xc73   : > { %v4112_v61 = vmul.f32 0.17677669, %v4096_v48  ;;  %v3850_v52 = vsub.f32 %v10387_v62, %v3836_v53 }
 0xc75   : > { %v10462_v43 = vadd.f32 %v10384_v35, %v4112_v61  ;;  %v10471_v58 = vpop.eup %7891  ;;  %v3857_v14 = vmul.f32 1.442695, %v3850_v52 }
 0xc76   : > { %v3867_v7 = vsel %vm950_vm0, %v10471_v58, 0.0 }
 0xc77   : > { %v4126_v42 = vsel %vm950_vm0, %v10462_v43, -inf }
 0xc7a   : > { %v4099_v22 = vpop.f32.mrf.mxu2  ;;  %v3839_v30 = vpop.xlane.xlu0 %3838 }
 0xc7b   : > { %v3851_v12 = vsub.f32 %v10397_v33, %v3839_v30 }
 0xc7d   : > { %v3859_v2 = vmul.f32 1.442695, %v3851_v12 }
 0xc7f   : > { %7893 = vpow2.f32 %v3859_v2 }
 0xc80   : > { %7895 = vpow2.f32 %v3857_v14 }
 0xc82   : > { %v4102_v45 = vpop.f32.mrf.mxu2  ;;  %v3842_v12 = vpop.xlane.xlu2 %3841 }
 0xc83   : > { %v4114_v38 = vmul.f32 0.17677669, %v4102_v45 }
 0xc85   : > { %v10448_v5 = vadd.f32 %v10405_v25, %v4114_v38  ;;  %v10473_v41 = vpop.eup %7893 }
 0xc86   : > { %v3873_v40 = vsel %vm950_vm0, %v10473_v41, 0.0  ;;  %v10490_v38 = vpop.eup %7895 }
 0xc87   : > { %v4132_v16 = vsel %vm950_vm0, %v10448_v5, -inf }
 0xc88   : > { %4133 = vmax.xlane.f32.xlu1 %v4132_v16 }
 0xc8a   : > { %v4105_v63 = vpop.f32.mrf.mxu2  ;;  %v3845_v53 = vpop.xlane.xlu1 %3844 }
 0xc8b   : > { %v4115_v10 = vmul.f32 0.17677669, %v4105_v63  ;;  %v4113_v63 = vmul.f32 0.17677669, %v4099_v22 }
 0xc8d   : > { %v10484_v59 = vadd.f32 %v10416_v31, %v4115_v10  ;;  %v10500_v1 = vadd.f32 %v10394_v21, %v4113_v63 }
 0xc8f   : > { %v4135_v18 = vsel %vm950_vm0, %v10484_v59, -inf  ;;  %v4129_v2 = vsel %vm950_vm0, %v10500_v1, -inf }
 0xc92   : > { %v10452_v8 = vpop.f32.mrf.mxu2 }
 0xc95   : > { %v4409_v57 = vpop.f32.mrf.mxu0 }
 0xc96   : > { %v4427_v50 = vmul.f32 0.17677669, %v4409_v57  ;;  %v3870_v57 = vsel %vm950_vm0, %v10490_v38, 0.0 }
 0xc98   : > { %v10456_v0 = vadd.f32 %v10374_v13, %v4427_v50 }
 0xc9a   : > { %v4719_v46 = vpop.f32.mrf.mxu2  ;;  %v4439_v24 = vsel %vm950_vm0, %v10456_v0, -inf }
 0xc9b   : > { %4440 = vmax.xlane.f32.xlu0 %v4439_v24  ;;  %v4737_v34 = vmul.f32 0.17677669, %v4719_v46  ;;  %v3852_v46 = vsub.f32 %v10408_v27, %v3842_v12 }
 0xc9d   : > { %v4412_v23 = vpop.f32.mrf.mxu0  ;;  %v10503_v61 = vadd.f32 %v10374_v13, %v4737_v34  ;;  %v4116_v34 = vmul.f32 0.17677669, %v10452_v8 }
 0xc9e   : > { %v4428_v32 = vmul.f32 0.17677669, %v4412_v23 }
 0xca0   : > { %v10465_v17 = vadd.f32 %v10384_v35, %v4428_v32 }
 0xca2   : > { %v4722_v56 = vpop.f32.mrf.mxu2  ;;  %v4442_v33 = vsel %vm950_vm0, %v10465_v17, -inf }
 0xca3   : > { %4443 = vmax.xlane.f32.xlu2 %v4442_v33  ;;  %4127 = vmax.xlane.f32.xlu0 %v4126_v42  ;;  %v4738_v23 = vmul.f32 0.17677669, %v4722_v56  ;;  %v4749_v33 = vsel %vm950_vm0, %v10503_v61, -inf }
 0xca5   : > { %v4415_v49 = vpop.f32.mrf.mxu0  ;;  %v10516_v52 = vadd.f32 %v10384_v35, %v4738_v23 }
 0xca6   : > { %v4429_v9 = vmul.f32 0.17677669, %v4415_v49  ;;  %v3861_v49 = vmul.f32 1.442695, %v3852_v46 }
 0xca8   : > { %v10481_v29 = vadd.f32 %v10394_v21, %v4429_v9  ;;  %7897 = vpow2.f32 %v3861_v49  ;;  %v3853_v9 = vsub.f32 %v10419_v60, %v3845_v53 }
 0xcaa   : > { %v4725_v54 = vpop.f32.mrf.mxu2  ;;  %v4445_v62 = vsel %vm950_vm0, %v10481_v29, -inf }
 0xcab   : > { %3868 = vadd.xlane.f32.xlu2 %v3867_v7  ;;  %3874 = vadd.xlane.f32.xlu0 %v3873_v40  ;;  %v4739_v13 = vmul.f32 0.17677669, %v4725_v54  ;;  %v4752_v40 = vsel %vm950_vm0, %v10516_v52, -inf }
 0xcad   : > { %v4418_v15 = vpop.f32.mrf.mxu0  ;;  %v10522_v56 = vadd.f32 %v10394_v21, %v4739_v13  ;;  %v3863_v21 = vmul.f32 1.442695, %v3853_v9 }
 0xcae   : > { %v4430_v32 = vmul.f32 0.17677669, %v4418_v15 }
 0xcaf   : > { %v4755_v35 = vsel %vm950_vm0, %v10522_v56, -inf  ;;  %7899 = vpow2.f32 %v3863_v21 }
 0xcb0   : > { %v10519_v27 = vadd.f32 %v10405_v25, %v4430_v32 }
 0xcb2   : > { %v4728_v28 = vpop.f32.mrf.mxu2  ;;  %v4448_v54 = vsel %vm950_vm0, %v10519_v27, -inf }
 0xcb3   : > { %4446 = vmax.xlane.f32.xlu2 %v4445_v62  ;;  %4136 = vmax.xlane.f32.xlu0 %v4135_v18  ;;  %v4740_v7 = vmul.f32 0.17677669, %v4728_v28  ;;  %v10534_v62 = vpop.eup %7897 }
 0xcb4   : > { %v3876_v18 = vsel %vm950_vm0, %v10534_v62, 0.0 }
 0xcb5   : > { %v4421_v48 = vpop.f32.mrf.mxu0  ;;  %v10532_v15 = vadd.f32 %v10405_v25, %v4740_v7  ;;  %v3848_v25 = vpop.xlane.xlu0 %3847 }
 0xcb6   : > { %v4431_v45 = vmul.f32 0.17677669, %v4421_v48  ;;  %v3854_v63 = vsub.f32 %v10428_v19, %v3848_v25 }
 0xcb7   : > { %v4758_v28 = vsel %vm950_vm0, %v10532_v15, -inf }
 0xcb8   : > { %v10493_v16 = vadd.f32 %v10416_v31, %v4431_v45  ;;  %v10545_v45 = vpop.eup %7899 }
 0xcba   : > { %v4451_v30 = vsel %vm950_vm0, %v10493_v16, -inf  ;;  %v4731_v24 = vpop.f32.mrf.mxu2 }
 0xcbb   : > { %3871 = vadd.xlane.f32.xlu2 %v3870_v57  ;;  %4452 = vmax.xlane.f32.xlu1 %v4451_v30  ;;  %v3879_v57 = vsel %vm950_vm0, %v10545_v45, 0.0  ;;  %v3865_v30 = vmul.f32 1.442695, %v3854_v63 }
 0xcbd   : > { %v4424_v50 = vpop.f32.mrf.mxu0  ;;  %7901 = vpow2.f32 %v3865_v30 }
 0xcbe   : > { %v4432_v4 = vmul.f32 0.17677669, %v4424_v50  ;;  %v10552_v50 = vadd.f32 %v10425_v11, %v4116_v34 }
 0xcc0   : > { %v10506_v22 = vadd.f32 %v10425_v11, %v4432_v4  ;;  %v4138_v12 = vsel %vm950_vm0, %v10552_v50, -inf }
 0xcc2   : > { %v4454_v42 = vsel %vm950_vm0, %v10506_v22, -inf  ;;  %v4734_v10 = vpop.f32.mrf.mxu2 }
 0xcc3   : > { %4130 = vmax.xlane.f32.xlu2 %v4129_v2  ;;  %4750 = vmax.xlane.f32.xlu1 %v4749_v33  ;;  %v4742_v14 = vmul.f32 0.17677669, %v4734_v10  ;;  %v10556_v46 = vpop.eup %7901  ;;  %v4741_v2 = vmul.f32 0.17677669, %v4731_v24 }
 0xcc4   : > { %4455 = vmax.xlane.f32.xlu0 %v4454_v42  ;;  %v3882_v8 = vsel %vm950_vm0, %v10556_v46, 0.0 }
 0xcc5   : > { %v10537_v60 = vadd.f32 %v10425_v11, %v4742_v14  ;;  %v10562_v32 = vadd.f32 %v10416_v31, %v4741_v2 }
 0xcc7   : > { %v4764_v48 = vsel %vm950_vm0, %v10537_v60, -inf  ;;  %v4761_v11 = vsel %vm950_vm0, %v10562_v32, -inf }
 0xccb   : > { %4449 = vmax.xlane.f32.xlu2 %v4448_v54  ;;  %4753 = vmax.xlane.f32.xlu1 %v4752_v40 }
 0xccc   : > { %4756 = vmax.xlane.f32.xlu0 %v4755_v35 }
 0xcd3   : > { %3877 = vadd.xlane.f32.xlu2 %v3876_v18  ;;  %4759 = vmax.xlane.f32.xlu1 %v4758_v28 }
 0xcd4   : > { %4765 = vmax.xlane.f32.xlu0 %v4764_v48 }
 0xcdb   : > { %3880 = vadd.xlane.f32.xlu2 %v3879_v57 }
 0xce3   : > { %4139 = vmax.xlane.f32.xlu2 %v4138_v12  ;;  %v4125_v4 = vpop.xlane.xlu1 %4124 }
 0xce4   : > { %v4141_v19 = vsub.f32 %v10443_v51, %v4125_v4 }
 0xce6   : > { %v4147_v23 = vmul.f32 1.442695, %v4141_v19 }
 0xce8   : > { %7903 = vpow2.f32 %v4147_v23 }
 0xceb   : > { %3883 = vadd.xlane.f32.xlu2 %v3882_v8 }
 0xcee   : > { %v10566_v33 = vpop.eup %7903 }
 0xcef   : > { %v4159_v42 = vsel %vm950_vm0, %v10566_v33, 0.0 }
 0xcf3   : > { %4762 = vmax.xlane.f32.xlu2 %v4761_v11 }
 0xcfb   : > { %4160 = vadd.xlane.f32.xlu2 %v4159_v42 }
 0xd0e   : > { %v4441_v51 = vpop.xlane.xlu0 %4440 }
 0xd0f   : > { %v4457_v24 = vsub.f32 %v10456_v0, %v4441_v51  ;;  %v4134_v51 = vpop.xlane.xlu1 %4133 }
 0xd11   : > { %v4463_v13 = vmul.f32 1.442695, %v4457_v24 }
 0xd13   : > { %7905 = vpow2.f32 %v4463_v13 }
 0xd16   : > { %v4444_v49 = vpop.xlane.xlu2 %4443  ;;  %v4128_v53 = vpop.xlane.xlu0 %4127 }
 0xd17   : > { %v4142_v31 = vsub.f32 %v10462_v43, %v4128_v53  ;;  %v4458_v7 = vsub.f32 %v10465_v17, %v4444_v49 }
 0xd19   : > { %v10572_v10 = vpop.eup %7905  ;;  %v4149_v9 = vmul.f32 1.442695, %v4142_v31  ;;  %v4465_v40 = vmul.f32 1.442695, %v4458_v7 }
 0xd1a   : > { %v4475_v54 = vsel %vm950_vm0, %v10572_v10, 0.0 }
 0xd1b   : > { %4476 = vadd.xlane.f32.xlu0 %v4475_v54  ;;  %7907 = vpow2.f32 %v4149_v9  ;;  %v4144_v9 = vsub.f32 %v10448_v5, %v4134_v51 }
 0xd1e   : > { %v3869_v14 = vpop.xlane.xlu2 %3868  ;;  %v10581_v18 = vpop.xlane.xlu0 %3874 }
 0xd1f   : > { %7909 = vrcp.f32 %v3869_v14  ;;  %v3896_v25 = vand.u32 2147483648, %v3869_v14  ;;  %v3894_v34 = vand.u32 2147483647, %v3869_v14  ;;  %vm3890_vm7 = vweird.f32 %v3869_v14 }
 0xd20   : > { %7911 = vpow2.f32 %v4465_v40  ;;  %v3926_v5 = vand.u32 2147483648, %v10581_v18  ;;  %vm3920_vm15 = vweird.f32 %v10581_v18 }
 0xd21   : > { %v10577_v0 = vpop.eup %7907  ;;  %7913 = vrcp.f32 %v10581_v18  ;;  %v3897_v12 = vor.u32 1.1754944e-38, %v3896_v25  ;;  %vm3895_vm9 = vcmp.eq.f32.partialorder %v3894_v34, 8.507059e+37 }
 0xd22   : > { %v4162_v35 = vsel %vm950_vm0, %v10577_v0, 0.0 }
 0xd23   : > { %4163 = vadd.xlane.f32.xlu0 %v4162_v35 }
 0xd25   : > { %v7910_v43 = vpop.eup %7909 }
 0xd26   : > { %v3886_v21 = vmul.f32 %v7910_v43, %v3869_v14  ;;  %v10583_v17 = vpop.xlane.xlu2 %4446  ;;  %v10585_v28 = vpop.eup %7911  ;;  %vm3891_vm6 = vweird.f32 %v7910_v43 }
 0xd27   : > { %v4478_v57 = vsel %vm950_vm0, %v10585_v28, 0.0  ;;  %vm3892_vm8 = vmor %vm3890_vm7, %vm3891_vm6  ;;  %v7914_v2 = vpop.eup %7913  ;;  %v4137_v25 = vpop.xlane.xlu0 %4136 }
 0xd28   : > { %v3887_v48 = vsub.f32 1.0, %v3886_v21  ;;  %v3916_v11 = vmul.f32 %v7914_v2, %v10581_v18  ;;  %vm3921_vm13 = vweird.f32 %v7914_v2 }
 0xd29   : > { %vm3922_vm1 = vmor %vm3920_vm15, %vm3921_vm13 }
 0xd2a   : > { %v3888_v63 = vmul.f32 %v7910_v43, %v3887_v48  ;;  %v3917_v24 = vsub.f32 1.0, %v3916_v11 }
 0xd2b   : > { %4479 = vadd.xlane.f32.xlu0 %v4478_v57  ;;  %v3924_v57 = vand.u32 2147483647, %v10581_v18 }
 0xd2c   : > { %v3889_v30 = vadd.f32 %v7910_v43, %v3888_v63  ;;  %v3918_v40 = vmul.f32 %v7914_v2, %v3917_v24 }
 0xd2d   : > { %vm3925_vm2 = vcmp.eq.f32.partialorder %v3924_v57, 8.507059e+37 }
 0xd2e   : > { %v3893_v4 = vsel %vm3892_vm8, %v7910_v43, %v3889_v30  ;;  %v3872_v19 = vpop.xlane.xlu2 %3871  ;;  %v4153_v43 = vmul.f32 1.442695, %v4144_v9  ;;  %v3919_v48 = vadd.f32 %v7914_v2, %v3918_v40 }
 0xd2f   : > { %v3898_v8 = vsel %vm3895_vm9, %v3897_v12, %v3893_v4  ;;  %7915 = vrcp.f32 %v3872_v19  ;;  %v3911_v7 = vand.u32 2147483648, %v3872_v19  ;;  %vm3905_vm11 = vweird.f32 %v3872_v19 }
 0xd30   : > { %v3899_v23 = vmul.f32 %v10471_v58, %v3898_v8  ;;  %v3909_v58 = vand.u32 2147483647, %v3872_v19  ;;  %v4145_v4 = vsub.f32 %v10484_v59, %v4137_v25  ;;  %v3923_v8 = vsel %vm3922_vm1, %v7914_v2, %v3919_v48 }
 0xd31   : > { %v3912_v21 = vor.u32 1.1754944e-38, %v3911_v7 }
 0xd32   : > { %7348 = vmatmul.msk.f32.vlgmr.msra.gmra.mxu1 %vm950_vm0, %v3899_v23  ;;  %vm3910_vm14 = vcmp.eq.f32.partialorder %v3909_v58, 8.507059e+37  ;;  %v3927_v23 = vor.u32 1.1754944e-38, %v3926_v5  ;;  %v4155_v18 = vmul.f32 1.442695, %v4145_v4 }
 0xd34   : > { %v3928_v11 = vsel %vm3925_vm2, %v3927_v23, %v3923_v8 }
 0xd35   : > { %v7916_v42 = vpop.eup %7915  ;;  %v3929_v59 = vmul.f32 %v10473_v41, %v3928_v11 }
 0xd36   : > { %v3901_v13 = vmul.f32 %v7916_v42, %v3872_v19  ;;  %v4131_v49 = vpop.xlane.xlu2 %4130  ;;  %vm3906_vm10 = vweird.f32 %v7916_v42 }
 0xd37   : > { %v4143_v53 = vsub.f32 %v10500_v1, %v4131_v49  ;;  %vm3907_vm12 = vmor %vm3905_vm11, %vm3906_vm10 }
 0xd38   : > { %v3902_v31 = vsub.f32 1.0, %v3901_v13 }
 0xd39   : > { %v4151_v54 = vmul.f32 1.442695, %v4143_v53 }
 0xd3a   : > { %v3903_v14 = vmul.f32 %v7916_v42, %v3902_v31 }
 0xd3b   : > { %7917 = vpow2.f32 %v4151_v54 }
 0xd3c   : > { %v3904_v35 = vadd.f32 %v7916_v42, %v3903_v14  ;;  %7919 = vpow2.f32 %v4153_v43 }
 0xd3e   : > { %v10595_v1 = vpop.xlane.xlu2 %4449  ;;  %v3908_v63 = vsel %vm3907_vm12, %v7916_v42, %v3904_v35 }
 0xd3f   : > { %v3913_v34 = vsel %vm3910_vm14, %v3912_v21, %v3908_v63  ;;  %7672 = vrot.lane.b32.xlu0 %v10304_v47, %s8604_s18 }
 0xd40   : > { %v3914_v30 = vmul.f32 %v10490_v38, %v3913_v34  ;;  %v10611_v38 = vpop.xlane.xlu1 %4452 }
 0xd41   : > { %v10603_v12 = vpop.eup %7917 }
 0xd42   : > { %7349 = vmatmul.msk.f32.gmra.mxu1 %vm950_vm0, %v3914_v30  ;;  %v4165_v19 = vsel %vm950_vm0, %v10603_v12, 0.0  ;;  %v10609_v51 = vpop.eup %7919 }
 0xd43   : > { %4166 = vadd.xlane.f32.xlu2 %v4165_v19  ;;  %v4168_v2 = vsel %vm950_vm0, %v10609_v51, 0.0 }
 0xd46   : > { %v3878_v42 = vpop.xlane.xlu2 %3877 }
 0xd47   : > { %7921 = vrcp.f32 %v3878_v42  ;;  %7682 = vrot.lane.b32.xlu0 %v10289_v55, %s8604_s18  ;;  %v3941_v7 = vand.u32 2147483648, %v3878_v42  ;;  %v3939_v54 = vand.u32 2147483647, %v3878_v42  ;;  %vm3935_vm7 = vweird.f32 %v3878_v42 }
 0xd48   : > { %7923 = vpow2.f32 %v4155_v18  ;;  %v4751_v9 = vpop.xlane.xlu1 %4750 }
 0xd49   : > { %v3942_v35 = vor.u32 1.1754944e-38, %v3941_v7  ;;  %vm3940_vm9 = vcmp.eq.f32.partialorder %v3939_v54, 8.507059e+37  ;;  %v4767_v57 = vsub.f32 %v10503_v61, %v4751_v9 }
 0xd4a   : > { %7350 = vmatmul.msk.f32.gmra.mxu1 %vm950_vm0, %v3929_v59 }
 0xd4b   : > { %4169 = vadd.xlane.f32.xlu2 %v4168_v2  ;;  %v4773_v11 = vmul.f32 1.442695, %v4767_v57 }
 0xd4d   : > { %v7922_v24 = vpop.eup %7921 }
 0xd4e   : > { %v3931_v13 = vmul.f32 %v7922_v24, %v3878_v42  ;;  %v3881_v49 = vpop.xlane.xlu2 %3880  ;;  %v10619_v53 = vpop.eup %7923  ;;  %vm3936_vm6 = vweird.f32 %v7922_v24 }
 0xd4f   : > { %7925 = vrcp.f32 %v3881_v49  ;;  %7687 = vrot.lane.b32.xlu0 %v10344_v20, %s8604_s18  ;;  %v4171_v40 = vsel %vm950_vm0, %v10619_v53, 0.0  ;;  %vm3937_vm8 = vmor %vm3935_vm7, %vm3936_vm6  ;;  %v3956_v19 = vand.u32 2147483648, %v3881_v49  ;;  %v3954_v23 = vand.u32 2147483647, %v3881_v49 }
 0xd50   : > { %v3932_v31 = vsub.f32 1.0, %v3931_v13  ;;  %v10629_v8 = vpop.xlane.xlu1 %4753  ;;  %vm3950_vm11 = vweird.f32 %v3881_v49 }
 0xd51   : > { %vm3955_vm13 = vcmp.eq.f32.partialorder %v3954_v23, 8.507059e+37 }
 0xd52   : > { %v3933_v41 = vmul.f32 %v7922_v24, %v3932_v31 }
 0xd53   : > { %4172 = vadd.xlane.f32.xlu2 %v4171_v40 }
 0xd54   : > { %v3934_v14 = vadd.f32 %v7922_v24, %v3933_v41 }
 0xd55   : > { %v7926_v58 = vpop.eup %7925 }
 0xd56   : > { %v3946_v43 = vmul.f32 %v7926_v58, %v3881_v49  ;;  %v4140_v21 = vpop.xlane.xlu2 %4139  ;;  %v3938_v48 = vsel %vm3937_vm8, %v7922_v24, %v3934_v14  ;;  %vm3951_vm10 = vweird.f32 %v7926_v58 }
 0xd57   : > { %v4146_v25 = vsub.f32 %v10552_v50, %v4140_v21  ;;  %v3943_v63 = vsel %vm3940_vm9, %v3942_v35, %v3938_v48  ;;  %vm3952_vm12 = vmor %vm3950_vm11, %vm3951_vm10  ;;  %v3957_v50 = vor.u32 1.1754944e-38, %v3956_v19 }
 0xd58   : > { %v3947_v5 = vsub.f32 1.0, %v3946_v43  ;;  %v3944_v34 = vmul.f32 %v10534_v62, %v3943_v63  ;;  %v4760_v49 = vpop.xlane.xlu1 %4759 }
 0xd59   : > { %v4157_v30 = vmul.f32 1.442695, %v4146_v25  ;;  %v4770_v41 = vsub.f32 %v10532_v15, %v4760_v49 }
 0xd5a   : > { %v3948_v4 = vmul.f32 %v7926_v58, %v3947_v5  ;;  %7351 = vmatmul.msk.f32.gmra.mxu1 %vm950_vm0, %v3944_v34  ;;  %v10647_v5 = vpop.xlane.xlu0 %4455 }
 0xd5b   : > { %7927 = vpow2.f32 %v4157_v30  ;;  %v4779_v35 = vmul.f32 1.442695, %v4770_v41 }
 0xd5c   : > { %v3949_v18 = vadd.f32 %v7926_v58, %v3948_v4 }
 0xd5e   : > { %v3884_v42 = vpop.xlane.xlu2 %3883  ;;  %v3953_v59 = vsel %vm3952_vm12, %v7926_v58, %v3949_v18 }
 0xd5f   : > { %7929 = vrcp.f32 %v3884_v42  ;;  %v3958_v61 = vsel %vm3955_vm13, %v3957_v50, %v3953_v59  ;;  %v3971_v14 = vand.u32 2147483648, %v3884_v42  ;;  %v3969_v58 = vand.u32 2147483647, %v3884_v42 }
 0xd60   : > { %7931 = vpow2.f32 %v4773_v11  ;;  %v3959_v2 = vmul.f32 %v10545_v45, %v3958_v61  ;;  %vm3965_vm15 = vweird.f32 %v3884_v42 }
 0xd61   : > { %v10631_v62 = vpop.eup %7927  ;;  %v3972_v21 = vor.u32 1.1754944e-38, %v3971_v14  ;;  %vm3970_vm2 = vcmp.eq.f32.partialorder %v3969_v58, 8.507059e+37 }
 0xd62   : > { %v4174_v24 = vsel %vm950_vm0, %v10631_v62, 0.0  ;;  %7352 = vmatmul.msk.f32.gmra.mxu1 %vm950_vm0, %v3959_v2  ;;  %v4757_v11 = vpop.xlane.xlu0 %4756  ;;  %v4768_v2 = vsub.f32 %v10516_v52, %v10629_v8 }
 0xd63   : > { %4175 = vadd.xlane.f32.xlu1 %v4174_v24  ;;  %v4769_v52 = vsub.f32 %v10522_v56, %v4757_v11 }
 0xd64   : > { %v4775_v24 = vmul.f32 1.442695, %v4768_v2 }
 0xd65   : > { %v7930_v13 = vpop.eup %7929 }
 0xd66   : > { %v3961_v31 = vmul.f32 %v7930_v13, %v3884_v42  ;;  %v10637_v9 = vpop.xlane.xlu2 %4762  ;;  %v10639_v7 = vpop.eup %7931  ;;  %vm3966_vm14 = vweird.f32 %v7930_v13 }
 0xd67   : > { %v4785_v45 = vsel %vm950_vm0, %v10639_v7, 0.0  ;;  %vm3967_vm1 = vmor %vm3965_vm15, %vm3966_vm14 }
 0xd68   : > { %v3962_v54 = vsub.f32 1.0, %v3961_v31 }
 0xd6a   : > { %v3963_v40 = vmul.f32 %v7930_v13, %v3962_v54 }
 0xd6b   : > { %4786 = vadd.xlane.f32.xlu1 %v4785_v45  ;;  %7667 = vrot.lane.b32.xlu2 %v10289_v55, %s8603_s11 }
 0xd6c   : > { %v3964_v43 = vadd.f32 %v7930_v13, %v3963_v40  ;;  %v4777_v40 = vmul.f32 1.442695, %v4769_v52 }
 0xd6e   : > { %v4161_v48 = vpop.xlane.xlu2 %4160  ;;  %v3968_v25 = vsel %vm3967_vm1, %v7930_v13, %v3964_v43  ;;  %v4766_v13 = vpop.xlane.xlu0 %4765 }
 0xd6f   : > { %7933 = vrcp.f32 %v4161_v48  ;;  %v3973_v15 = vsel %vm3970_vm2, %v3972_v21, %v3968_v25  ;;  %v4188_v4 = vand.u32 2147483648, %v4161_v48  ;;  %v4186_v18 = vand.u32 2147483647, %v4161_v48 }
 0xd70   : > { %7935 = vpow2.f32 %v4779_v35  ;;  %v3974_v63 = vmul.f32 %v10556_v46, %v3973_v15  ;;  %vm4182_vm7 = vweird.f32 %v4161_v48  ;;  %v4460_v35 = vsub.f32 %v10519_v27, %v10595_v1 }
 0xd71   : > { %v4189_v46 = vor.u32 1.1754944e-38, %v4188_v4  ;;  %vm4187_vm9 = vcmp.eq.f32.partialorder %v4186_v18, 8.507059e+37  ;;  %7937 = vpow2.f32 %v4775_v24  ;;  %v4771_v1 = vsub.f32 %v10562_v32, %v10637_v9 }
 0xd72   : > { %7353 = vmatmul.msk.f32.gmra.mxu1 %vm950_vm0, %v3974_v63 }
 0xd75   : > { %v7934_v34 = vpop.eup %7933 }
 0xd76   : > { %v10650_v57 = vpop.eup %7935  ;;  %v4178_v55 = vmul.f32 %v7934_v34, %v4161_v48  ;;  %vm4183_vm6 = vweird.f32 %v7934_v34  ;;  %v4469_v48 = vmul.f32 1.442695, %v4460_v35 }
 0xd77   : > { %v4794_v19 = vsel %vm950_vm0, %v10650_v57, 0.0  ;;  %vm4184_vm8 = vmor %vm4182_vm7, %vm4183_vm6  ;;  %v10662_v31 = vpop.eup %7937 }
 0xd78   : > { %v4179_v30 = vsub.f32 1.0, %v4178_v55  ;;  %v4788_v41 = vsel %vm950_vm0, %v10662_v31, 0.0 }
 0xd79   : > { %4795 = vadd.xlane.f32.xlu0 %v4794_v19  ;;  %v4772_v19 = vsub.f32 %v10537_v60, %v4766_v13 }
 0xd7a   : > { %v4180_v23 = vmul.f32 %v7934_v34, %v4179_v30  ;;  %v4781_v30 = vmul.f32 1.442695, %v4771_v1 }
 0xd7c   : > { %v4181_v50 = vadd.f32 %v7934_v34, %v4180_v23 }
 0xd7e   : > { %v4185_v42 = vsel %vm4184_vm8, %v7934_v34, %v4181_v50  ;;  %v4783_v50 = vmul.f32 1.442695, %v4772_v19 }
 0xd7f   : > { %v4190_v59 = vsel %vm4187_vm9, %v4189_v46, %v4185_v42 }
 0xd80   : > { %v4191_v61 = vmul.f32 %v10566_v33, %v4190_v59 }
 0xd82   : > { %7366 = vmatmul.msk.f32.vlgmr.msra.gmra.mxu3 %vm950_vm0, %v4191_v61 }
 0xd84   : > { %7662 = vrot.lane.b32.xlu1 %v10304_v47, %s8603_s11 }
 0xd8e   : > { %v10660_v49 = vpop.xlane.xlu0 %4476 }
 0xd8f   : > { %v4504_v13 = vand.u32 2147483648, %v10660_v49  ;;  %vm4498_vm15 = vweird.f32 %v10660_v49  ;;  %v4502_v52 = vand.u32 2147483647, %v10660_v49 }
 0xd91   : > { %vm4503_vm2 = vcmp.eq.f32.partialorder %v4502_v52, 8.507059e+37 }
 0xd94   : > { %4789 = vadd.xlane.f32.xlu2 %v4788_v41 }
 0xd96   : > { %v4164_v33 = vpop.xlane.xlu0 %4163 }
 0xd97   : > { %7939 = vrcp.f32 %v4164_v33  ;;  %v4203_v47 = vand.u32 2147483648, %v4164_v33  ;;  %v4201_v58 = vand.u32 2147483647, %v4164_v33  ;;  %vm4197_vm11 = vweird.f32 %v4164_v33 }
 0xd98   : > { %7941 = vpow2.f32 %v4777_v40 }
 0xd99   : > { %7943 = vrcp.f32 %v10660_v49  ;;  %v4204_v21 = vor.u32 1.1754944e-38, %v4203_v47  ;;  %vm4202_vm13 = vcmp.eq.f32.partialorder %v4201_v58, 8.507059e+37  ;;  %v4505_v58 = vor.u32 1.1754944e-38, %v4504_v13 }
 0xd9a   : > { %7945 = vpow2.f32 %v4469_v48 }
 0xd9d   : > { %v7940_v8 = vpop.eup %7939 }
 0xd9e   : > { %v4193_v54 = vmul.f32 %v7940_v8, %v4164_v33  ;;  %vm4198_vm10 = vweird.f32 %v7940_v8  ;;  %v10671_v63 = vpop.eup %7941  ;;  %v10673_v34 = vpop.xlane.xlu0 %4479 }
 0xd9f   : > { %vm4199_vm12 = vmor %vm4197_vm11, %vm4198_vm10  ;;  %v7944_v27 = vpop.eup %7943  ;;  %v4791_v55 = vsel %vm950_vm0, %v10671_v63, 0.0  ;;  %7947 = vrcp.f32 %v10673_v34  ;;  %vm4513_vm9 = vweird.f32 %v10673_v34 }
 0xda0   : > { %v4194_v14 = vsub.f32 1.0, %v4193_v54  ;;  %v10684_v4 = vpop.eup %7945  ;;  %7949 = vpow2.f32 %v4781_v30  ;;  %vm4499_vm14 = vweird.f32 %v7944_v27 }
 0xda1   : > { %v4484_v9 = vsel %vm950_vm0, %v10684_v4, 0.0  ;;  %vm4500_vm1 = vmor %vm4498_vm15, %vm4499_vm14 }
 0xda2   : > { %v4195_v45 = vmul.f32 %v7940_v8, %v4194_v14 }
 0xda4   : > { %v4196_v43 = vadd.f32 %v7940_v8, %v4195_v45 }
 0xda5   : > { %v10687_v32 = vpop.eup %7947 }
 0xda6   : > { %v4200_v56 = vsel %vm4199_vm12, %v7940_v8, %v4196_v43  ;;  %v4509_v60 = vmul.f32 %v10687_v32, %v10673_v34  ;;  %v10693_v59 = vpop.eup %7949  ;;  %vm4514_vm7 = vweird.f32 %v10687_v32 }
 0xda7   : > { %v4205_v25 = vsel %vm4202_vm13, %v4204_v21, %v4200_v56  ;;  %v4797_v54 = vsel %vm950_vm0, %v10693_v59, 0.0  ;;  %vm10722_vm11 = vmor %vm4513_vm9, %vm4514_vm7 }
 0xda8   : > { %v4206_v15 = vmul.f32 %v10577_v0, %v4205_v25  ;;  %v4494_v0 = vmul.f32 %v7944_v27, %v10660_v49  ;;  %v4510_v41 = vsub.f32 1.0, %v4509_v60  ;;  %v4459_v25 = vsub.f32 %v10481_v29, %v10583_v17 }
 0xdaa   : > { %7367 = vmatmul.msk.f32.gmra.mxu3 %vm950_vm0, %v4206_v15  ;;  %v4495_v18 = vsub.f32 1.0, %v4494_v0  ;;  %v4511_v35 = vmul.f32 %v10687_v32, %v4510_v41 }
 0xdac   : > { %7677 = vrot.lane.b32.xlu2 %v10344_v20, %s8603_s11  ;;  %v4496_v42 = vmul.f32 %v7944_v27, %v4495_v18  ;;  %v4517_v18 = vand.u32 2147483647, %v10673_v34 }
 0xdae   : > { %4792 = vadd.xlane.f32.xlu1 %v4791_v55  ;;  %v4497_v2 = vadd.f32 %v7944_v27, %v4496_v42  ;;  %v4512_v55 = vadd.f32 %v10687_v32, %v4511_v35  ;;  %vm4518_vm13 = vcmp.eq.f32.partialorder %v4517_v18, 8.507059e+37 }
 0xdb0   : > { %v4501_v47 = vsel %vm4500_vm1, %v7944_v27, %v4497_v2  ;;  %v4516_v60 = vsel %vm10722_vm11, %v10687_v32, %v4512_v55 }
 0xdb1   : > { %v7673_v23 = vpop.permute.xlu0 %7672  ;;  %v4506_v49 = vsel %vm4503_vm2, %v4505_v58, %v4501_v47 }
 0xdb2   : > { %v7674_v11 = vunpack.i.l.bf16 %v7673_v23  ;;  %v7675_v20 = vunpack.i.h.bf16 %v7673_v23  ;;  %v4507_v19 = vmul.f32 %v10572_v10, %v4506_v49  ;;  %v4519_v23 = vand.u32 2147483648, %v10673_v34 }
 0xdb4   : > { %4629 = vmatpush.msrb.mxu1 %v7674_v11 }
 0xdb6   : > { %v4167_v46 = vpop.xlane.xlu2 %4166  ;;  %4485 = vadd.xlane.f32.xlu1 %v4484_v9  ;;  %4630 = vmatpush.msrb.mxu1 %v7675_v20 }
 0xdb7   : > { %7951 = vrcp.f32 %v4167_v46  ;;  %v4218_v56 = vand.u32 2147483648, %v4167_v46  ;;  %v4216_v15 = vand.u32 2147483647, %v4167_v46  ;;  %vm4212_vm8 = vweird.f32 %v4167_v46 }
 0xdb8   : > { %7953 = vpow2.f32 %v4783_v50  ;;  %v4467_v50 = vmul.f32 1.442695, %v4459_v25 }
 0xdb9   : > { %v7683_v61 = vpop.permute.xlu0 %7682  ;;  %v4219_v11 = vor.u32 1.1754944e-38, %v4218_v56  ;;  %vm4217_vm12 = vcmp.eq.f32.partialorder %v4216_v15, 8.507059e+37 }
 0xdba   : > { %v7684_v24 = vunpack.i.l.bf16 %v7683_v61  ;;  %v7685_v8 = vunpack.i.h.bf16 %v7683_v61  ;;  %v4520_v61 = vor.u32 1.1754944e-38, %v4519_v23 }
 0xdbc   : > { %4631 = vmatpush.msrb.mxu1 %v7684_v24  ;;  %v4521_v52 = vsel %vm4518_vm13, %v4520_v61, %v4516_v60 }
 0xdbd   : > { %v7952_v33 = vpop.eup %7951 }
 0xdbe   : > { %v4208_v40 = vmul.f32 %v7952_v33, %v4167_v46  ;;  %v4170_v14 = vpop.xlane.xlu2 %4169  ;;  %4798 = vadd.xlane.f32.xlu1 %v4797_v54  ;;  %4632 = vmatpush.msrb.mxu1 %v7685_v8  ;;  %v10700_v45 = vpop.eup %7953  ;;  %vm4213_vm6 = vweird.f32 %v7952_v33 }
 0xdbf   : > { %7955 = vrcp.f32 %v4170_v14  ;;  %v4800_v27 = vsel %vm950_vm0, %v10700_v45, 0.0  ;;  %vm10713_vm10 = vmor %vm4212_vm8, %vm4213_vm6  ;;  %v4233_v2 = vand.u32 2147483648, %v4170_v14  ;;  %v4231_v41 = vand.u32 2147483647, %v4170_v14 }
 0xdc0   : > { %v4209_v43 = vsub.f32 1.0, %v4208_v40  ;;  %vm4227_vm15 = vweird.f32 %v4170_v14 }
 0xdc1   : > { %v7688_v48 = vpop.permute.xlu0 %7687  ;;  %v4234_v32 = vor.u32 1.1754944e-38, %v4233_v2  ;;  %vm4232_vm2 = vcmp.eq.f32.partialorder %v4231_v41, 8.507059e+37 }
 0xdc2   : > { %v4210_v21 = vmul.f32 %v7952_v33, %v4209_v43  ;;  %v7689_v1 = vunpack.i.l.bf16 %v7688_v48  ;;  %v7690_v17 = vunpack.i.h.bf16 %v7688_v48 }
 0xdc4   : > { %v4211_v0 = vadd.f32 %v7952_v33, %v4210_v21  ;;  %4633 = vmatpush.msrb.mxu1 %v7689_v1  ;;  %v4462_v21 = vsub.f32 %v10506_v22, %v10647_v5 }
 0xdc5   : > { %v7956_v30 = vpop.eup %7955 }
 0xdc6   : > { %v4223_v20 = vmul.f32 %v7956_v30, %v4170_v14  ;;  %v4173_v9 = vpop.xlane.xlu2 %4172  ;;  %4801 = vadd.xlane.f32.xlu1 %v4800_v27  ;;  %v4215_v10 = vsel %vm10713_vm10, %v7952_v33, %v4211_v0  ;;  %4634 = vmatpush.msrb.mxu1 %v7690_v17  ;;  %vm4228_vm14 = vweird.f32 %v7956_v30  ;;  %v4461_v33 = vsub.f32 %v10493_v16, %v10611_v38 }
 0xdc7   : > { %7957 = vrcp.f32 %v4173_v9  ;;  %7384 = vmatmul.msk.f32.vlgmr.msrb.gmra.mxu1 %vm950_vm0, %v4507_v19  ;;  %v4220_v34 = vsel %vm4217_vm12, %v4219_v11, %v4215_v10  ;;  %vm4229_vm1 = vmor %vm4227_vm15, %vm4228_vm14  ;;  %v4248_v14 = vand.u32 2147483648, %v4173_v9  ;;  %v4246_v56 = vand.u32 2147483647, %v4173_v9 }
 0xdc8   : > { %v4224_v42 = vsub.f32 1.0, %v4223_v20  ;;  %v4221_v24 = vmul.f32 %v10603_v12, %v4220_v34  ;;  %7959 = vpow2.f32 %v4467_v50  ;;  %v4522_v12 = vmul.f32 %v10585_v28, %v4521_v52 }
 0xdc9   : > { %v4471_v58 = vmul.f32 1.442695, %v4461_v33  ;;  %vm4242_vm7 = vweird.f32 %v4173_v9  ;;  %v4473_v1 = vmul.f32 1.442695, %v4462_v21  ;;  %vm4247_vm9 = vcmp.eq.f32.partialorder %v4246_v56, 8.507059e+37 }
 0xdca   : > { %v4225_v13 = vmul.f32 %v7956_v30, %v4224_v42  ;;  %7368 = vmatmul.msk.f32.gmra.mxu3 %vm950_vm0, %v4221_v24 }
 0xdcb   : > { %7961 = vpow2.f32 %v4471_v58 }
 0xdcc   : > { %v4226_v8 = vadd.f32 %v7956_v30, %v4225_v13 }
 0xdcd   : > { %v7958_v54 = vpop.eup %7957 }
 0xdce   : > { %v4238_v40 = vmul.f32 %v7958_v54, %v4173_v9  ;;  %v4230_v47 = vsel %vm4229_vm1, %v7956_v30, %v4226_v8  ;;  %v10737_v38 = vpop.eup %7959  ;;  %vm4243_vm6 = vweird.f32 %v7958_v54  ;;  %v7668_v60 = vpop.permute.xlu2 %7667 }
 0xdcf   : > { %v4235_v35 = vsel %vm4232_vm2, %v4234_v32, %v4230_v47  ;;  %7385 = vmatmul.msk.f32.gmra.mxu1 %vm950_vm0, %v4522_v12  ;;  %v4481_v48 = vsel %vm950_vm0, %v10737_v38, 0.0  ;;  %vm4244_vm8 = vmor %vm4242_vm7, %vm4243_vm6  ;;  %v7669_v24 = vunpack.i.l.bf16 %v7668_v60  ;;  %v7670_v13 = vunpack.i.h.bf16 %v7668_v60 }
 0xdd0   : > { %v4239_v43 = vsub.f32 1.0, %v4238_v40  ;;  %v4236_v16 = vmul.f32 %v10609_v51, %v4235_v35  ;;  %v4249_v51 = vor.u32 1.1754944e-38, %v4248_v14 }
 0xdd1   : > { %v10744_v55 = vpop.eup %7961 }
 0xdd2   : > { %v4240_v49 = vmul.f32 %v7958_v54, %v4239_v43  ;;  %7369 = vmatmul.msk.f32.gmra.mxu3 %vm950_vm0, %v4236_v16  ;;  %v4487_v5 = vsel %vm950_vm0, %v10744_v55, 0.0 }
 0xdd4   : > { %v4241_v28 = vadd.f32 %v7958_v54, %v4240_v49  ;;  %v10756_v49 = vpop.f32.mrf.mxu1 }
 0xdd5   : > { %4482 = vadd.xlane.f32.xlu2 %v4481_v48 }
 0xdd6   : > { %v4176_v25 = vpop.xlane.xlu1 %4175  ;;  %v4245_v15 = vsel %vm4244_vm8, %v7958_v54, %v4241_v28 }
 0xdd7   : > { %7963 = vrcp.f32 %v4176_v25  ;;  %v4250_v27 = vsel %vm4247_vm9, %v4249_v51, %v4245_v15  ;;  %v4263_v29 = vand.u32 2147483648, %v4176_v25  ;;  %v4261_v18 = vand.u32 2147483647, %v4176_v25 }
 0xdd8   : > { %v4251_v22 = vmul.f32 %v10619_v53, %v4250_v27  ;;  %7965 = vpow2.f32 %v4473_v1  ;;  %vm4257_vm11 = vweird.f32 %v4176_v25 }
 0xdd9   : > { %v4264_v20 = vor.u32 1.1754944e-38, %v4263_v29  ;;  %vm4262_vm13 = vcmp.eq.f32.partialorder %v4261_v18, 8.507059e+37 }
 0xdda   : > { %7370 = vmatmul.msk.f32.gmra.mxu3 %vm950_vm0, %v4251_v22 }
 0xddc   : > { %v10760_v22 = vpop.f32.mrf.mxu1 }
 0xddd   : > { %v7964_v0 = vpop.eup %7963  ;;  %4488 = vadd.xlane.f32.xlu2 %v4487_v5 }
 0xdde   : > { %v4253_v30 = vmul.f32 %v7964_v0, %v4176_v25  ;;  %v10750_v23 = vpop.eup %7965  ;;  %vm4258_vm10 = vweird.f32 %v7964_v0  ;;  %v4787_v46 = vpop.xlane.xlu1 %4786 }
 0xddf   : > { %v4490_v53 = vsel %vm950_vm0, %v10750_v23, 0.0  ;;  %vm4259_vm12 = vmor %vm4257_vm11, %vm4258_vm10  ;;  %7967 = vrcp.f32 %v4787_v46  ;;  %v4814_v54 = vand.u32 2147483648, %v4787_v46  ;;  %vm4808_vm15 = vweird.f32 %v4787_v46 }
 0xde0   : > { %v4254_v19 = vsub.f32 1.0, %v4253_v30  ;;  %v4812_v32 = vand.u32 2147483647, %v4787_v46 }
 0xde1   : > { %v4815_v47 = vor.u32 1.1754944e-38, %v4814_v54 }
 0xde2   : > { %v4255_v17 = vmul.f32 %v7964_v0, %v4254_v19  ;;  %vm4813_vm2 = vcmp.eq.f32.partialorder %v4812_v32, 8.507059e+37 }
 0xde4   : > { %v4256_v11 = vadd.f32 %v7964_v0, %v4255_v17  ;;  %v10764_v19 = vpop.f32.mrf.mxu1 }
 0xde5   : > { %4491 = vadd.xlane.f32.xlu2 %v4490_v53  ;;  %v7968_v2 = vpop.eup %7967 }
 0xde6   : > { %v4260_v9 = vsel %vm4259_vm12, %v7964_v0, %v4256_v11  ;;  %v4804_v41 = vmul.f32 %v7968_v2, %v4787_v46  ;;  %vm4809_vm14 = vweird.f32 %v7968_v2 }
 0xde7   : > { %v4265_v10 = vsel %vm4262_vm13, %v4264_v20, %v4260_v9  ;;  %vm4810_vm1 = vmor %vm4808_vm15, %vm4809_vm14 }
 0xde8   : > { %v4266_v50 = vmul.f32 %v10631_v62, %v4265_v10  ;;  %v4805_v33 = vsub.f32 1.0, %v4804_v41 }
 0xdea   : > { %7371 = vmatmul.msk.f32.gmra.mxu3 %vm950_vm0, %v4266_v50  ;;  %v4806_v52 = vmul.f32 %v7968_v2, %v4805_v33 }
 0xdec   : > { %v4807_v62 = vadd.f32 %v7968_v2, %v4806_v52  ;;  %v4796_v5 = vpop.xlane.xlu0 %4795  ;;  %v10768_v9 = vpop.f32.mrf.mxu1 }
 0xded   : > { %v4859_v33 = vand.u32 2147483648, %v4796_v5  ;;  %vm4853_vm15 = vweird.f32 %v4796_v5 }
 0xdee   : > { %v4811_v40 = vsel %vm4810_vm1, %v7968_v2, %v4807_v62 }
 0xdef   : > { %v4816_v43 = vsel %vm4813_vm2, %v4815_v47, %v4811_v40  ;;  %v4860_v40 = vor.u32 1.1754944e-38, %v4859_v33 }
 0xdf0   : > { %v4817_v28 = vmul.f32 %v10639_v7, %v4816_v43 }
 0xdf4   : > { %v10772_v54 = vpop.f32.mrf.mxu1 }
 0xdf6   : > { %v7663_v42 = vpop.permute.xlu1 %7662 }
 0xdf7   : > { %v7664_v34 = vunpack.i.l.bf16 %v7663_v42  ;;  %v7665_v61 = vunpack.i.h.bf16 %v7663_v42 }
 0xdf9   : > { %4939 = vmatpush.msrb.mxu3 %v7664_v34 }
 0xdfb   : > { %4940 = vmatpush.msrb.mxu3 %v7665_v61 }
 0xdfd   : > { %4941 = vmatpush.msrb.mxu3 %v7669_v24 }
 0xdff   : > { %4942 = vmatpush.msrb.mxu3 %v7670_v13 }
 0xe05   : > { %v4326_v17 = vpop.f32.mrf.mxu3 }
 0xe07   : > { %v4790_v8 = vpop.xlane.xlu2 %4789 }
 0xe08   : > { %7969 = vrcp.f32 %v4790_v8  ;;  %v4829_v21 = vand.u32 2147483648, %v4790_v8  ;;  %v4827_v51 = vand.u32 2147483647, %v4790_v8  ;;  %vm4823_vm7 = vweird.f32 %v4790_v8 }
 0xe09   : > { %7971 = vrcp.f32 %v4796_v5 }
 0xe0a   : > { %v4830_v15 = vor.u32 1.1754944e-38, %v4829_v21  ;;  %vm4828_vm9 = vcmp.eq.f32.partialorder %v4827_v51, 8.507059e+37  ;;  %v10776_v21 = vpop.f32.mrf.mxu1 }
 0xe0e   : > { %v7970_v12 = vpop.eup %7969 }
 0xe0f   : > { %v4819_v58 = vmul.f32 %v7970_v12, %v4790_v8  ;;  %v7678_v35 = vpop.permute.xlu2 %7677  ;;  %vm4824_vm6 = vweird.f32 %v7970_v12  ;;  %v7972_v30 = vpop.eup %7971  ;;  %v4857_v8 = vand.u32 2147483647, %v4796_v5 }
 0xe10   : > { %v7679_v16 = vunpack.i.l.bf16 %v7678_v35  ;;  %v7680_v56 = vunpack.i.h.bf16 %v7678_v35  ;;  %vm4825_vm8 = vmor %vm4823_vm7, %vm4824_vm6  ;;  %v4849_v29 = vmul.f32 %v7972_v30, %v4796_v5  ;;  %vm4854_vm13 = vweird.f32 %v7972_v30 }
 0xe11   : > { %v4820_v14 = vsub.f32 1.0, %v4819_v58  ;;  %vm4855_vm1 = vmor %vm4853_vm15, %vm4854_vm13  ;;  %vm4858_vm2 = vcmp.eq.f32.partialorder %v4857_v8, 8.507059e+37 }
 0xe12   : > { %4943 = vmatpush.msrb.mxu3 %v7679_v16  ;;  %v4850_v20 = vsub.f32 1.0, %v4849_v29 }
 0xe13   : > { %v4821_v48 = vmul.f32 %v7970_v12, %v4820_v14 }
 0xe14   : > { %4944 = vmatpush.msrb.mxu3 %v7680_v56  ;;  %v4851_v46 = vmul.f32 %v7972_v30, %v4850_v20 }
 0xe15   : > { %v4822_v25 = vadd.f32 %v7970_v12, %v4821_v48  ;;  %7402 = vmatmul.msk.f32.vlgmr.msrb.gmra.mxu3 %vm950_vm0, %v4817_v28 }
 0xe16   : > { %v4852_v41 = vadd.f32 %v7972_v30, %v4851_v46 }
 0xe17   : > { %v4826_v1 = vsel %vm4825_vm8, %v7970_v12, %v4822_v25 }
 0xe18   : > { %v4831_v27 = vsel %vm4828_vm9, %v4830_v15, %v4826_v1  ;;  %v4856_v32 = vsel %vm4855_vm1, %v7972_v30, %v4852_v41 }
 0xe19   : > { %v4832_v0 = vmul.f32 %v10662_v31, %v4831_v27  ;;  %v4861_v35 = vsel %vm4858_vm2, %v4860_v40, %v4856_v32 }
 0xe1a   : > { %v4862_v14 = vmul.f32 %v10650_v57, %v4861_v35 }
 0xe1d   : > { %7403 = vmatmul.msk.f32.gmra.mxu3 %vm950_vm0, %v4832_v0 }
 0xe21   : > { %v4793_v7 = vpop.xlane.xlu1 %4792 }
 0xe22   : > { %7973 = vrcp.f32 %v4793_v7  ;;  %v4844_v31 = vand.u32 2147483648, %v4793_v7  ;;  %v4842_v42 = vand.u32 2147483647, %v4793_v7  ;;  %vm4838_vm11 = vweird.f32 %v4793_v7 }
 0xe24   : > { %v4845_v2 = vor.u32 1.1754944e-38, %v4844_v31  ;;  %vm4843_vm14 = vcmp.eq.f32.partialorder %v4842_v42, 8.507059e+37 }
 0xe28   : > { %v7974_v18 = vpop.eup %7973 }
 0xe29   : > { %v4834_v11 = vmul.f32 %v7974_v18, %v4793_v7  ;;  %v10766_v53 = vpop.xlane.xlu1 %4485  ;;  %vm4839_vm10 = vweird.f32 %v7974_v18 }
 0xe2a   : > { %vm4840_vm12 = vmor %vm4838_vm11, %vm4839_vm10 }
 0xe2b   : > { %v4835_v10 = vsub.f32 1.0, %v4834_v11 }
 0xe2d   : > { %v4836_v50 = vmul.f32 %v7974_v18, %v4835_v10  ;;  %v4329_v34 = vpop.f32.mrf.mxu3 }
 0xe2e   : > { %v7691_v61 = vpack.i.bf16 %v4329_v34, %v4326_v17 }
 0xe2f   : > { %v4837_v60 = vadd.f32 %v7974_v18, %v4836_v50 }
 0xe30   : > { %7692 = vrot.lane.b32.xlu0 %v7691_v61, %s8603_s11 }
 0xe31   : > { %v4799_v24 = vpop.xlane.xlu1 %4798  ;;  %v4841_v13 = vsel %vm4840_vm12, %v7974_v18, %v4837_v60 }
 0xe32   : > { %7975 = vrcp.f32 %v4799_v24  ;;  %v4846_v52 = vsel %vm4843_vm14, %v4845_v2, %v4841_v13  ;;  %v4874_v16 = vand.u32 2147483648, %v4799_v24  ;;  %v4872_v56 = vand.u32 2147483647, %v4799_v24 }
 0xe33   : > { %v4847_v62 = vmul.f32 %v10671_v63, %v4846_v52  ;;  %vm4868_vm7 = vweird.f32 %v4799_v24 }
 0xe34   : > { %v4875_v51 = vor.u32 1.1754944e-38, %v4874_v16  ;;  %vm4873_vm9 = vcmp.eq.f32.partialorder %v4872_v56, 8.507059e+37 }
 0xe35   : > { %7404 = vmatmul.msk.f32.gmra.mxu3 %vm950_vm0, %v4847_v62 }
 0xe38   : > { %v7976_v12 = vpop.eup %7975 }
 0xe39   : > { %v4864_v47 = vmul.f32 %v7976_v12, %v4799_v24  ;;  %v4802_v58 = vpop.xlane.xlu1 %4801  ;;  %vm4869_vm6 = vweird.f32 %v7976_v12 }
 0xe3a   : > { %7977 = vrcp.f32 %v4802_v58  ;;  %vm4870_vm8 = vmor %vm4868_vm7, %vm4869_vm6  ;;  %v4889_v0 = vand.u32 2147483648, %v4802_v58  ;;  %v4887_v30 = vand.u32 2147483647, %v4802_v58  ;;  %vm4883_vm11 = vweird.f32 %v4802_v58 }
 0xe3b   : > { %v4865_v43 = vsub.f32 1.0, %v4864_v47  ;;  %7979 = vrcp.f32 %v10766_v53  ;;  %v4549_v47 = vand.u32 2147483648, %v10766_v53  ;;  %vm4543_vm7 = vweird.f32 %v10766_v53 }
 0xe3c   : > { %v4890_v18 = vor.u32 1.1754944e-38, %v4889_v0  ;;  %vm4888_vm13 = vcmp.eq.f32.partialorder %v4887_v30, 8.507059e+37 }
 0xe3d   : > { %v4866_v63 = vmul.f32 %v7976_v12, %v4865_v43  ;;  %7405 = vmatmul.msk.f32.gmra.mxu3 %vm950_vm0, %v4862_v14  ;;  %v4547_v43 = vand.u32 2147483647, %v10766_v53  ;;  %v4550_v56 = vor.u32 1.1754944e-38, %v4549_v47  ;;  %v5054_v47 = vld [vmem:[%s8973_s1 + $0x418] sm:$0xff] }
 0xe3f   : > { %v4867_v28 = vadd.f32 %v7976_v12, %v4866_v63 }
 0xe40   : > { %v7978_v48 = vpop.eup %7977 }
 0xe41   : > { %v4879_v25 = vmul.f32 %v7978_v48, %v4802_v58  ;;  %v4871_v15 = vsel %vm4870_vm8, %v7976_v12, %v4867_v28  ;;  %vm4884_vm10 = vweird.f32 %v7978_v48  ;;  %v7980_v11 = vpop.eup %7979 }
 0xe42   : > { %v4876_v1 = vsel %vm4873_vm9, %v4875_v51, %v4871_v15  ;;  %vm4885_vm12 = vmor %vm4883_vm11, %vm4884_vm10  ;;  %v4539_v50 = vmul.f32 %v7980_v11, %v10766_v53  ;;  %vm4544_vm2 = vweird.f32 %v7980_v11  ;;  %vm4548_vm9 = vcmp.eq.f32.partialorder %v4547_v43, 8.507059e+37 }
 0xe43   : > { %v4880_v27 = vsub.f32 1.0, %v4879_v25  ;;  %v4877_v5 = vmul.f32 %v10693_v59, %v4876_v1  ;;  %vm4545_vm8 = vmor %vm4543_vm7, %vm4544_vm2 }
 0xe44   : > { %v4636_v7 = vpop.f32.mrf.mxu1  ;;  %v4540_v61 = vsub.f32 1.0, %v4539_v50 }
 0xe45   : > { %v4881_v57 = vmul.f32 %v7978_v48, %v4880_v27  ;;  %7406 = vmatmul.msk.f32.gmra.mxu3 %vm950_vm0, %v4877_v5 }
 0xe46   : > { %v4541_v41 = vmul.f32 %v7980_v11, %v4540_v61  ;;  %v5067_v61 = vld [vmem:[%s8973_s1 + $0x758] sm:$0xff] }
 0xe47   : > { %v4882_v29 = vadd.f32 %v7978_v48, %v4881_v57 }
 0xe48   : > { %v4483_v17 = vpop.xlane.xlu2 %4482  ;;  %v4542_v12 = vadd.f32 %v7980_v11, %v4541_v41  ;;  %v5063_v41 = vld [vmem:[%s8973_s1 + $0x658] sm:$0xff] }
 0xe49   : > { %7981 = vrcp.f32 %v4483_v17  ;;  %v4886_v20 = vsel %vm4885_vm12, %v7978_v48, %v4882_v29  ;;  %v4534_v13 = vand.u32 2147483648, %v4483_v17  ;;  %v4532_v33 = vand.u32 2147483647, %v4483_v17 }
 0xe4a   : > { %v4891_v10 = vsel %vm4888_vm13, %v4890_v18, %v4886_v20  ;;  %vm4528_vm15 = vweird.f32 %v4483_v17  ;;  %v4546_v63 = vsel %vm4545_vm8, %v7980_v11, %v4542_v12  ;;  %v5055_v12 = vld [vmem:[%s8973_s1 + $0x458] sm:$0xff] }
 0xe4b   : > { %v4892_v59 = vmul.f32 %v10700_v45, %v4891_v10  ;;  %v4535_v8 = vor.u32 1.1754944e-38, %v4534_v13  ;;  %vm4533_vm6 = vcmp.eq.f32.partialorder %v4532_v33, 8.507059e+37  ;;  %v4551_v51 = vsel %vm4548_vm9, %v4550_v56, %v4546_v63  ;;  %v5064_v13 = vld [vmem:[%s8973_s1 + $0x698] sm:$0xff] }
 0xe4c   : > { %v4639_v31 = vpop.f32.mrf.mxu1  ;;  %v4552_v53 = vmul.f32 %v10684_v4, %v4551_v51  ;;  %v5062_v33 = vld [vmem:[%s8973_s1 + $0x618] sm:$0xff] }
 0xe4d   : > { %v7696_v46 = vpack.i.bf16 %v4639_v31, %v4636_v7  ;;  %7407 = vmatmul.msk.f32.gmra.mxu3 %vm950_vm0, %v4892_v59  ;;  %v4332_v10 = vpop.f32.mrf.mxu3 }
 0xe4f   : > { %v7982_v42 = vpop.eup %7981  ;;  %7697 = vrot.lane.b32.xlu1 %v7696_v46, %s8604_s18 }
 0xe50   : > { %v4524_v34 = vmul.f32 %v7982_v42, %v4483_v17  ;;  %v4489_v60 = vpop.xlane.xlu2 %4488  ;;  %vm4529_vm14 = vweird.f32 %v7982_v42 }
 0xe51   : > { %7983 = vrcp.f32 %v4489_v60  ;;  %vm4530_vm1 = vmor %vm4528_vm15, %vm4529_vm14  ;;  %v4564_v15 = vand.u32 2147483648, %v4489_v60  ;;  %vm4558_vm11 = vweird.f32 %v4489_v60  ;;  %v4562_v27 = vand.u32 2147483647, %v4489_v60 }
 0xe52   : > { %v4525_v2 = vsub.f32 1.0, %v4524_v34  ;;  %v5068_v34 = vld [vmem:[%s8973_s1 + $0x798] sm:$0xff] }
 0xe53   : > { %v4565_v57 = vor.u32 1.1754944e-38, %v4564_v15  ;;  %vm4563_vm13 = vcmp.eq.f32.partialorder %v4562_v27, 8.507059e+37 }
 0xe54   : > { %v4526_v24 = vmul.f32 %v7982_v42, %v4525_v2  ;;  %v5066_v2 = vld [vmem:[%s8973_s1 + $0x718] sm:$0xff] }
 0xe55   : > { %v4335_v59 = vpop.f32.mrf.mxu3 }
 0xe56   : > { %v4527_v45 = vadd.f32 %v7982_v42, %v4526_v24  ;;  %v7701_v46 = vpack.i.bf16 %v4335_v59, %v4332_v10  ;;  %v5065_v24 = vld [vmem:[%s8973_s1 + $0x6d8] sm:$0xff] }
 0xe57   : > { %v7984_v52 = vpop.eup %7983 }
 0xe58   : > { %v4554_v62 = vmul.f32 %v7984_v52, %v4489_v60  ;;  %v4492_v32 = vpop.xlane.xlu2 %4491  ;;  %v4531_v40 = vsel %vm4530_vm1, %v7982_v42, %v4527_v45  ;;  %vm4559_vm10 = vweird.f32 %v7984_v52  ;;  %v5061_v45 = vld [vmem:[%s8973_s1 + $0x5d8] sm:$0xff] }
 0xe59   : > { %7985 = vrcp.f32 %v4492_v32  ;;  %v4536_v35 = vsel %vm4533_vm6, %v4535_v8, %v4531_v40  ;;  %vm4560_vm12 = vmor %vm4558_vm11, %vm4559_vm10  ;;  %v4579_v30 = vand.u32 2147483648, %v4492_v32  ;;  %vm4573_vm15 = vweird.f32 %v4492_v32  ;;  %v5059_v8 = vld [vmem:[%s8973_s1 + $0x558] sm:$0xff] }
 0xe5a   : > { %v4555_v58 = vsub.f32 1.0, %v4554_v62  ;;  %v4537_v16 = vmul.f32 %v10737_v38, %v4536_v35  ;;  %v4577_v29 = vand.u32 2147483647, %v4492_v32  ;;  %v5058_v62 = vld [vmem:[%s8973_s1 + $0x518] sm:$0xff] }
 0xe5b   : > { %v4580_v4 = vor.u32 1.1754944e-38, %v4579_v30  ;;  %v5056_v40 = vld [vmem:[%s8973_s1 + $0x498] sm:$0xff] }
 0xe5c   : > { %v4556_v14 = vmul.f32 %v7984_v52, %v4555_v58  ;;  %7386 = vmatmul.msk.f32.gmra.mxu1 %vm950_vm0, %v4537_v16  ;;  %vm4578_vm2 = vcmp.eq.f32.partialorder %v4577_v29, 8.507059e+37 }
 0xe5d   : > { %v4338_v50 = vpop.f32.mrf.mxu3 }
 0xe5e   : > { %v4557_v25 = vadd.f32 %v7984_v52, %v4556_v14 }
 0xe5f   : > { %v7986_v28 = vpop.eup %7985 }
 0xe60   : > { %v4569_v48 = vmul.f32 %v7986_v28, %v4492_v32  ;;  %v4561_v5 = vsel %vm4560_vm12, %v7984_v52, %v4557_v25  ;;  %vm4574_vm14 = vweird.f32 %v7986_v28  ;;  %v5060_v52 = vld [vmem:[%s8973_s1 + $0x598] sm:$0xff] }
 0xe61   : > { %v4566_v0 = vsel %vm4563_vm13, %v4565_v57, %v4561_v5  ;;  %vm4575_vm1 = vmor %vm4573_vm15, %vm4574_vm14  ;;  %v5057_v32 = vld [vmem:[%s8973_s1 + $0x4d8] sm:$0xff] }
 0xe62   : > { %v4570_v1 = vsub.f32 1.0, %v4569_v48  ;;  %v4567_v17 = vmul.f32 %v10744_v55, %v4566_v0 }
 0xe64   : > { %v4571_v38 = vmul.f32 %v7986_v28, %v4570_v1  ;;  %7387 = vmatmul.msk.f32.gmra.mxu1 %vm950_vm0, %v4552_v53 }
 0xe66   : > { %v4572_v7 = vadd.f32 %v7986_v28, %v4571_v38 }
 0xe68   : > { %v4576_v18 = vsel %vm4575_vm1, %v7986_v28, %v4572_v7 }
 0xe69   : > { %v4581_v11 = vsel %vm4578_vm2, %v4580_v4, %v4576_v18 }
 0xe6a   : > { %v4582_v20 = vmul.f32 %v10750_v23, %v4581_v11  ;;  %v5069_v23 = vld [vmem:[%s8973_s1 + $0x7d8] sm:$0xff] }
 0xe6b   : > { %5071 = vmatpush.msra.mxu0 %v5069_v23 }
 0xe6c   : > { %7388 = vmatmul.msk.f32.gmra.mxu1 %vm950_vm0, %v4567_v17 }
 0xe6d   : > { %v4341_v31 = vpop.f32.mrf.mxu3  ;;  %5072 = vmatpush.msra.mxu0 %v5068_v34 }
 0xe6f   : > { %5073 = vmatpush.msra.mxu0 %v5067_v61 }
 0xe71   : > { %5074 = vmatpush.msra.mxu0 %v5066_v2 }
 0xe73   : > { %5075 = vmatpush.msra.mxu0 %v5065_v24 }
 0xe74   : > { %7389 = vmatmul.msk.f32.gmra.mxu1 %vm950_vm0, %v4582_v20 }
 0xe75   : > { %5076 = vmatpush.msra.mxu0 %v5064_v13 }
 0xe77   : > { %5077 = vmatpush.msra.mxu0 %v5063_v41 }
 0xe79   : > { %5078 = vmatpush.msra.mxu0 %v5062_v33  ;;  %v10851_v33 = vld [vmem:[%s8981_s17 + $0x20] sm:$0xff] }
 0xe7b   : > { %5079 = vmatpush.msra.mxu0 %v5061_v45 }
 0xe7d   : > { %5080 = vmatpush.msra.mxu0 %v5060_v52 }
 0xe7f   : > { %5081 = vmatpush.msra.mxu0 %v5059_v8 }
 0xe81   : > { %5082 = vmatpush.msra.mxu0 %v5058_v62 }
 0xe83   : > { %5083 = vmatpush.msra.mxu0 %v5057_v32 }
 0xe85   : > { %5084 = vmatpush.msra.mxu0 %v5056_v40 }
 0xe87   : > { %5085 = vmatpush.msra.mxu0 %v5055_v12 }
 0xe89   : > { %5086 = vmatpush.msra.mxu0 %v5054_v47 }
 0xe98   : > { %v4946_v55 = vpop.f32.mrf.mxu3 }
 0xe99   : > { %5018 = vrot.lane.b32.xlu2 %v4946_v55, %s8602_s2 }
 0xea0   : > { %v4949_v42 = vpop.f32.mrf.mxu3 }
 0xea1   : > { %7702 = vrot.lane.b32.xlu2 %v7701_v46, %s8603_s11  ;;  %5020 = vrot.lane.b32.xlu0 %v4949_v42, %s8602_s2 }
 0xea2   : > { %v7693_v63 = vpop.permute.xlu0 %7692 }
 0xea3   : > { %v7694_v28 = vunpack.i.l.bf16 %v7693_v63  ;;  %v7695_v38 = vunpack.i.h.bf16 %v7693_v63 }
 0xea5   : > { %v5036_v15 = vsel %vm1316_vm5, %v10756_v49, %v7694_v28  ;;  %v5037_v57 = vsel %vm1316_vm5, %v10760_v22, %v7695_v38  ;;  %v5302_v38 = vld [vmem:[%s8973_s1 + $0x7a0] sm:$0xff] }
 0xeb8   : > { %v4952_v60 = vpop.f32.mrf.mxu3 }
 0xeb9   : > { %5022 = vrot.lane.b32.xlu1 %v4952_v60, %s8602_s2 }
 0xec0   : > { %v4955_v35 = vpop.f32.mrf.mxu3 }
 0xec1   : > { %4978 = vrot.lane.b32.xlu1 %v4338_v50, %s8603_s11  ;;  %v7698_v56 = vpop.permute.xlu1 %7697 }
 0xec2   : > { %v7699_v48 = vunpack.i.l.bf16 %v7698_v56  ;;  %v7700_v5 = vunpack.i.h.bf16 %v7698_v56 }
 0xec4   : > { %v5042_v27 = vsel %vm2611_vm3, %v5036_v15, %v7699_v48  ;;  %v5043_v7 = vsel %vm2611_vm3, %v5037_v57, %v7700_v5  ;;  %v5306_v15 = vld [vmem:[%s8973_s1 + $0x7e0] sm:$0xff]  ;;  %v5303_v5 = vld [vmem:[%s8973_s1 + $0x7a8] sm:$0xff]  ;;  %v5304_v57 = vld [vmem:[%s8973_s1 + $0x7b0] sm:$0xff] }
 0xec5   : > { %5314 = vmatpush.msra.mxu1 %v5306_v15  ;;  %v5269_v15 = vld [vmem:[%s8973_s1 + $0x578] sm:$0xff] }
 0xec7   : > { %5315 = vmatpush.msra.mxu1 %v5302_v38  ;;  %v5264_v38 = vld [vmem:[%s8973_s1 + $0x530] sm:$0xff] }
 0xec8   : > { %v4958_v16 = vpop.f32.mrf.mxu3 }
 0xec9   : > { %4980 = vrot.lane.b32.xlu1 %v4341_v31, %s8603_s11 }
 0xed0   : > { %v4961_v51 = vpop.f32.mrf.mxu3 }
 0xed9   : > { %v4642_v58 = vpop.f32.mrf.mxu1 }
 0xeda   : > { %4998 = vrot.lane.b32.xlu0 %v4642_v58, %s8604_s18 }
 0xee1   : > { %v4645_v43 = vpop.f32.mrf.mxu1 }
 0xee2   : > { %5024 = vrot.lane.b32.xlu0 %v4955_v35, %s8602_s2  ;;  %5000 = vrot.lane.b32.xlu2 %v4645_v43, %s8604_s18 }
 0xee9   : > { %v4648_v14 = vpop.f32.mrf.mxu1 }
 0xeea   : > { %5026 = vrot.lane.b32.xlu0 %v4958_v16, %s8602_s2  ;;  %5002 = vrot.lane.b32.xlu2 %v4648_v14, %s8604_s18 }
 0xef1   : > { %v4651_v25 = vpop.f32.mrf.mxu1 }
 0xef2   : > { %5028 = vrot.lane.b32.xlu0 %v4961_v51, %s8602_s2  ;;  %5004 = vrot.lane.b32.xlu2 %v4651_v25, %s8604_s18 }
 0xef3   : > { %v5019_v1 = vpop.permute.xlu2 %5018 }
 0xef4   : > { %v5048_v53 = vsel %vm2618_vm4, %v5042_v27, %v5019_v1  ;;  %v5307_v1 = vld [vmem:[%s8973_s1 + $0x7e8] sm:$0xff]  ;;  %v5308_v27 = vld [vmem:[%s8973_s1 + $0x7f0] sm:$0xff] }
 0xef5   : > { %5087 = vmatmul.f32.vlgmr.msra.gmra.mxu0 %v5048_v53  ;;  %5349 = vmatpush.msra.mxu2 %v5307_v1  ;;  %v5309_v53 = vld [vmem:[%s8973_s1 + $0x7f8] sm:$0xff] }
 0xef6   : > { %5384 = vmatpush.msra.mxu3 %v5308_v27  ;;  %5419 = vmatpush.msrb.mxu0 %v5309_v53  ;;  %v5262_v27 = vld [vmem:[%s8973_s1 + $0x520] sm:$0xff]  ;;  %v5263_v53 = vld [vmem:[%s8973_s1 + $0x528] sm:$0xff] }
 0xef7   : > { %5350 = vmatpush.msra.mxu2 %v5303_v5  ;;  %v5265_v5 = vld [vmem:[%s8973_s1 + $0x538] sm:$0xff] }
 0xef8   : > { %5385 = vmatpush.msra.mxu3 %v5304_v57  ;;  %v5258_v57 = vld [vmem:[%s8973_s1 + $0x4e0] sm:$0xff] }
 0xefb   : > { %v7703_v30 = vpop.permute.xlu2 %7702 }
 0xefc   : > { %v7704_v29 = vunpack.i.l.bf16 %v7703_v30  ;;  %v7705_v59 = vunpack.i.h.bf16 %v7703_v30 }
 0xefe   : > { %v5038_v18 = vsel %vm1316_vm5, %v10764_v19, %v7704_v29  ;;  %v5039_v22 = vsel %vm1316_vm5, %v10768_v9, %v7705_v59  ;;  %v5298_v29 = vld [vmem:[%s8973_s1 + $0x760] sm:$0xff]  ;;  %v5296_v59 = vld [vmem:[%s8973_s1 + $0x730] sm:$0xff] }
 0xeff   : > { %5316 = vmatpush.msra.mxu1 %v5298_v29  ;;  %v5261_v29 = vld [vmem:[%s8973_s1 + $0x4f8] sm:$0xff] }
 0xf13   : > { %v5021_v0 = vpop.permute.xlu0 %5020 }
 0xf14   : > { %v5049_v49 = vsel %vm2618_vm4, %v5043_v7, %v5021_v0  ;;  %v5305_v7 = vld [vmem:[%s8973_s1 + $0x7b8] sm:$0xff] }
 0xf15   : > { %5090 = vmatmul.f32.gmra.mxu0 %v5049_v49 }
 0xf16   : > { %5420 = vmatpush.msrb.mxu0 %v5305_v7  ;;  %v5260_v7 = vld [vmem:[%s8973_s1 + $0x4f0] sm:$0xff] }
 0xf2b   : > { %v5023_v17 = vpop.permute.xlu1 %5022 }
 0xf33   : > { %v4979_v46 = vpop.permute.xlu1 %4978 }
 0xf34   : > { %v5040_v19 = vsel %vm1316_vm5, %v10772_v54, %v4979_v46  ;;  %v5070_v54 = vperm.slane %v10851_v33, 3 }
 0xf3b   : > { %v4981_v61 = vpop.permute.xlu1 %4980 }
 0xf3c   : > { %v5001_v11 = vpop.permute.xlu2 %5000  ;;  %v5041_v2 = vsel %vm1316_vm5, %v10776_v21, %v4981_v61  ;;  %v5289_v61 = vld [vmem:[%s8973_s1 + $0x6b8] sm:$0xff] }
 0xf3d   : > { %v5045_v50 = vsel %vm2611_vm3, %v5039_v22, %v5001_v11  ;;  %v5297_v22 = vld [vmem:[%s8973_s1 + $0x738] sm:$0xff] }
 0xf44   : > { %v5003_v42 = vpop.permute.xlu2 %5002 }
 0xf45   : > { %v5046_v23 = vsel %vm2611_vm3, %v5040_v19, %v5003_v42  ;;  %v5293_v42 = vld [vmem:[%s8973_s1 + $0x6f8] sm:$0xff] }
 0xf4c   : > { %v4999_v4 = vpop.permute.xlu0 %4998  ;;  %v5005_v9 = vpop.permute.xlu2 %5004 }
 0xf4d   : > { %v5044_v20 = vsel %vm2611_vm3, %v5038_v18, %v4999_v4  ;;  %v5047_v24 = vsel %vm2611_vm3, %v5041_v2, %v5005_v9  ;;  %v5300_v18 = vld [vmem:[%s8973_s1 + $0x770] sm:$0xff]  ;;  %v5301_v4 = vld [vmem:[%s8973_s1 + $0x778] sm:$0xff]  ;;  %v5282_v2 = vld [vmem:[%s8973_s1 + $0x660] sm:$0xff] }
 0xf4e   : > { %v5050_v10 = vsel %vm2618_vm4, %v5044_v20, %v5023_v17  ;;  %v5299_v17 = vld [vmem:[%s8973_s1 + $0x768] sm:$0xff]  ;;  %5386 = vmatpush.msra.mxu3 %v5300_v18  ;;  %5421 = vmatpush.msrb.mxu0 %v5301_v4  ;;  %v5294_v20 = vld [vmem:[%s8973_s1 + $0x720] sm:$0xff] }
 0xf4f   : > { %5093 = vmatmul.f32.gmra.mxu0 %v5050_v10  ;;  %5351 = vmatpush.msra.mxu2 %v5299_v17  ;;  %v5295_v10 = vld [vmem:[%s8973_s1 + $0x728] sm:$0xff]  ;;  %v5254_v17 = vld [vmem:[%s8973_s1 + $0x4a0] sm:$0xff] }
 0xf50   : > { %5317 = vmatpush.msra.mxu1 %v5294_v20  ;;  %5387 = vmatpush.msra.mxu3 %v5296_v59  ;;  %v5255_v4 = vld [vmem:[%s8973_s1 + $0x4a8] sm:$0xff]  ;;  %v5257_v20 = vld [vmem:[%s8973_s1 + $0x4b8] sm:$0xff] }
 0xf51   : > { %5352 = vmatpush.msra.mxu2 %v5295_v10  ;;  %5422 = vmatpush.msrb.mxu0 %v5297_v22  ;;  %v5250_v10 = vld [vmem:[%s8973_s1 + $0x460] sm:$0xff]  ;;  %v5251_v22 = vld [vmem:[%s8973_s1 + $0x468] sm:$0xff] }
 0xf53   : > { %5423 = vmatpush.msrb.mxu0 %v5293_v42  ;;  %v5247_v42 = vld [vmem:[%s8973_s1 + $0x428] sm:$0xff] }
 0xf54   : > { %v5025_v31 = vpop.permute.xlu0 %5024 }
 0xf55   : > { %v5051_v55 = vsel %vm2618_vm4, %v5045_v50, %v5025_v31  ;;  %v5290_v50 = vld [vmem:[%s8973_s1 + $0x6e0] sm:$0xff]  ;;  %v5291_v31 = vld [vmem:[%s8973_s1 + $0x6e8] sm:$0xff]  ;;  %5424 = vmatpush.msrb.mxu0 %v5289_v61 }
 0xf56   : > { %5318 = vmatpush.msra.mxu1 %v5290_v50  ;;  %5353 = vmatpush.msra.mxu2 %v5291_v31  ;;  %v5252_v50 = vld [vmem:[%s8973_s1 + $0x470] sm:$0xff]  ;;  %v5253_v31 = vld [vmem:[%s8973_s1 + $0x478] sm:$0xff] }
 0xf57   : > { %5096 = vmatmul.f32.gmra.mxu0 %v5051_v55  ;;  %v5292_v55 = vld [vmem:[%s8973_s1 + $0x6f0] sm:$0xff] }
 0xf58   : > { %5388 = vmatpush.msra.mxu3 %v5292_v55 }
 0xf5c   : > { %v5027_v34 = vpop.permute.xlu0 %5026 }
 0xf5d   : > { %v5052_v60 = vsel %vm2618_vm4, %v5046_v23, %v5027_v34  ;;  %v5286_v23 = vld [vmem:[%s8973_s1 + $0x6a0] sm:$0xff]  ;;  %v5287_v34 = vld [vmem:[%s8973_s1 + $0x6a8] sm:$0xff] }
 0xf5e   : > { %5319 = vmatpush.msra.mxu1 %v5286_v23  ;;  %5354 = vmatpush.msra.mxu2 %v5287_v34  ;;  %v5249_v23 = vld [vmem:[%s8973_s1 + $0x438] sm:$0xff] }
 0xf5f   : > { %5099 = vmatmul.f32.gmra.mxu0 %v5052_v60  ;;  %v5288_v60 = vld [vmem:[%s8973_s1 + $0x6b0] sm:$0xff] }
 0xf60   : > { %5389 = vmatpush.msra.mxu3 %v5288_v60  ;;  %5320 = vmatpush.msra.mxu1 %v5282_v2 }
 0xf64   : > { %v5029_v13 = vpop.permute.xlu0 %5028 }
 0xf65   : > { %v5053_v41 = vsel %vm2618_vm4, %v5047_v24, %v5029_v13  ;;  %v5283_v24 = vld [vmem:[%s8973_s1 + $0x668] sm:$0xff]  ;;  %v5284_v13 = vld [vmem:[%s8973_s1 + $0x670] sm:$0xff] }
 0xf66   : > { %5355 = vmatpush.msra.mxu2 %v5283_v24  ;;  %5390 = vmatpush.msra.mxu3 %v5284_v13 }
 0xf67   : > { %5102 = vmatmul.f32.gmra.mxu0 %v5053_v41  ;;  %v5285_v41 = vld [vmem:[%s8973_s1 + $0x678] sm:$0xff] }
 0xf68   : > { %5425 = vmatpush.msrb.mxu0 %v5285_v41 }
 0xf72   : > { %v5088_v45 = vpop.f32.mrf.mxu0 }
 0xf73   : > { %v5089_v52 = vadd.f32 %v5088_v45, %v5070_v54  ;;  %v5278_v45 = vld [vmem:[%s8973_s1 + $0x620] sm:$0xff] }
 0xf74   : > { %5321 = vmatpush.msra.mxu1 %v5278_v45 }
 0xf75   : > { %v10855_v8 = vadd.f32 %v5089_v52, %v10146_v6  ;;  %v5279_v52 = vld [vmem:[%s8973_s1 + $0x628] sm:$0xff] }
 0xf76   : > { %5356 = vmatpush.msra.mxu2 %v5279_v52  ;;  %v10980_v52 = vperm.slane %v10851_v33, 4 }
 0xf77   : > { %5112 = vadd.xlane.f32.xlu1 %v10855_v8 }
 0xf92   : > { %v5091_v62 = vpop.f32.mrf.mxu0 }
 0xf93   : > { %v5092_v32 = vadd.f32 %v5091_v62, %v5070_v54  ;;  %v5280_v62 = vld [vmem:[%s8973_s1 + $0x630] sm:$0xff] }
 0xf94   : > { %5391 = vmatpush.msra.mxu3 %v5280_v62 }
 0xf95   : > { %v10859_v21 = vadd.f32 %v5092_v32, %v10150_v44  ;;  %v5281_v32 = vld [vmem:[%s8973_s1 + $0x638] sm:$0xff] }
 0xf96   : > { %5426 = vmatpush.msrb.mxu0 %v5281_v32 }
 0xf97   : > { %5114 = vadd.xlane.f32.xlu2 %v10859_v21 }
 0xfcc   : > { %v5094_v40 = vpop.f32.mrf.mxu0 }
 0xfcd   : > { %v5095_v12 = vadd.f32 %v5094_v40, %v5070_v54  ;;  %v5274_v40 = vld [vmem:[%s8973_s1 + $0x5e0] sm:$0xff] }
 0xfce   : > { %5322 = vmatpush.msra.mxu1 %v5274_v40  ;;  %v10984_v40 = vperm.slane %v10851_v33, 5 }
 0xfcf   : > { %v10863_v47 = vadd.f32 %v5095_v12, %v10154_v39  ;;  %v5275_v12 = vld [vmem:[%s8973_s1 + $0x5e8] sm:$0xff] }
 0xfd0   : > { %5357 = vmatpush.msra.mxu2 %v5275_v12 }
 0xfd1   : > { %5116 = vadd.xlane.f32.xlu0 %v10863_v47 }
 0xfd4   : > { %v5097_v58 = vpop.f32.mrf.mxu0 }
 0xfd5   : > { %v5098_v35 = vadd.f32 %v5097_v58, %v5070_v54  ;;  %v5276_v58 = vld [vmem:[%s8973_s1 + $0x5f0] sm:$0xff] }
 0xfd6   : > { %5392 = vmatpush.msra.mxu3 %v5276_v58 }
 0xfd7   : > { %v10867_v6 = vadd.f32 %v5098_v35, %v10158_v26 }
 0xfd9   : > { %5118 = vadd.xlane.f32.xlu1 %v10867_v6 }
 0xfdc   : > { %v5100_v43 = vpop.f32.mrf.mxu0 }
 0xfdd   : > { %v5101_v16 = vadd.f32 %v5100_v43, %v5070_v54  ;;  %v5277_v43 = vld [vmem:[%s8973_s1 + $0x5f8] sm:$0xff] }
 0xfde   : > { %5427 = vmatpush.msrb.mxu0 %v5277_v43 }
 0xfdf   : > { %v10871_v44 = vadd.f32 %v5101_v16, %v10162_v37 }
 0xfe1   : > { %5120 = vadd.xlane.f32.xlu2 %v10871_v44 }
 0xfe4   : > { %v5103_v39 = vpop.f32.mrf.mxu0 }
 0xfe5   : > { %v5104_v14 = vadd.f32 %v5103_v39, %v5070_v54  ;;  %v5270_v39 = vld [vmem:[%s8973_s1 + $0x5a0] sm:$0xff] }
 0xfe6   : > { %5323 = vmatpush.msra.mxu1 %v5270_v39 }
 0xfe7   : > { %v10875_v63 = vadd.f32 %v5104_v14, %v10166_v3  ;;  %v5271_v14 = vld [vmem:[%s8973_s1 + $0x5a8] sm:$0xff] }
 0xfe8   : > { %5358 = vmatpush.msra.mxu2 %v5271_v14 }
 0xfe9   : > { %5122 = vadd.xlane.f32.xlu0 %v10875_v63 }
 0xfea   : > { %v5113_v26 = vpop.xlane.xlu1 %5112 }
 0xfeb   : > { %v5124_v56 = vmul.f32 %v5113_v26, %v9051_v36  ;;  %v5272_v26 = vld [vmem:[%s8973_s1 + $0x5b0] sm:$0xff] }
 0xfec   : > { %5393 = vmatpush.msra.mxu3 %v5272_v26 }
 0xfed   : > { %v10880_v28 = vsub.f32 %v10855_v8, %v5124_v56  ;;  %v5273_v56 = vld [vmem:[%s8973_s1 + $0x5b8] sm:$0xff] }
 0xfee   : > { %5428 = vmatpush.msrb.mxu0 %v5273_v56 }
 0xfef   : > { %v5136_v37 = vmul.f32 %v10880_v28, %v10880_v28 }
 0xff0   : > { %5429 = vmatpush.msrb.mxu0 %v5269_v15 }
 0xff1   : > { %5142 = vadd.xlane.f32.xlu1 %v5136_v37 }
 0xff2   : > { %5430 = vmatpush.msrb.mxu0 %v5265_v5 }
 0xff4   : > { %5431 = vmatpush.msrb.mxu0 %v5261_v29 }
 0xff6   : > { %5432 = vmatpush.msrb.mxu0 %v5257_v20 }
 0xff8   : > { %5433 = vmatpush.msrb.mxu0 %v5253_v31 }
 0xffa   : > { %5434 = vmatpush.msrb.mxu0 %v5249_v23  ;;  %v5732_v23 = vld [vmem:[%s8975_s16 + $0x3f0] sm:$0xff] }
0x100a   : > { %v5115_v48 = vpop.xlane.xlu2 %5114 }
0x100b   : > { %v5125_v3 = vmul.f32 %v5115_v48, %v9051_v36  ;;  %v5266_v48 = vld [vmem:[%s8973_s1 + $0x560] sm:$0xff] }
0x100c   : > { %5324 = vmatpush.msra.mxu1 %v5266_v48 }
0x100d   : > { %v10886_v51 = vsub.f32 %v10859_v21, %v5125_v3  ;;  %v5267_v3 = vld [vmem:[%s8973_s1 + $0x568] sm:$0xff] }
0x100e   : > { %5359 = vmatpush.msra.mxu2 %v5267_v3  ;;  %5325 = vmatpush.msra.mxu1 %v5262_v27 }
0x100f   : > { %v5137_v25 = vmul.f32 %v10886_v51, %v10886_v51 }
0x1010   : > { %5360 = vmatpush.msra.mxu2 %v5263_v53  ;;  %5326 = vmatpush.msra.mxu1 %v5258_v57 }
0x1011   : > { %5144 = vadd.xlane.f32.xlu2 %v5137_v25  ;;  %v5268_v25 = vld [vmem:[%s8973_s1 + $0x570] sm:$0xff] }
0x1012   : > { %5394 = vmatpush.msra.mxu3 %v5268_v25  ;;  %5327 = vmatpush.msra.mxu1 %v5254_v17 }
0x1014   : > { %5395 = vmatpush.msra.mxu3 %v5264_v38  ;;  %5328 = vmatpush.msra.mxu1 %v5250_v10 }
0x1016   : > { %5396 = vmatpush.msra.mxu3 %v5260_v7 }
0x1044   : > { %v5117_v0 = vpop.xlane.xlu0 %5116 }
0x1045   : > { %v5126_v49 = vmul.f32 %v5117_v0, %v9051_v36  ;;  %v5259_v0 = vld [vmem:[%s8973_s1 + $0x4e8] sm:$0xff] }
0x1046   : > { %5361 = vmatpush.msra.mxu2 %v5259_v0 }
0x1047   : > { %v10900_v30 = vsub.f32 %v10863_v47, %v5126_v49 }
0x1048   : > { %5362 = vmatpush.msra.mxu2 %v5255_v4 }
0x1049   : > { %v5138_v11 = vmul.f32 %v10900_v30, %v10900_v30 }
0x104a   : > { %5363 = vmatpush.msra.mxu2 %v5251_v22 }
0x104b   : > { %5146 = vadd.xlane.f32.xlu0 %v5138_v11  ;;  %v5256_v11 = vld [vmem:[%s8973_s1 + $0x4b0] sm:$0xff] }
0x104c   : > { %v5119_v46 = vpop.xlane.xlu1 %5118  ;;  %5397 = vmatpush.msra.mxu3 %v5256_v11  ;;  %5364 = vmatpush.msra.mxu2 %v5247_v42  ;;  %v5684_v42 = vld [vmem:[%s8975_s16 + $0x270] sm:$0xff] }
0x104d   : > { %v5127_v19 = vmul.f32 %v5119_v46, %v9051_v36  ;;  %v5246_v46 = vld [vmem:[%s8973_s1 + $0x420] sm:$0xff] }
0x104e   : > { %5398 = vmatpush.msra.mxu3 %v5252_v50  ;;  %5329 = vmatpush.msra.mxu1 %v5246_v46  ;;  %v5733_v46 = vld [vmem:[%s8975_s16 + $0x3f8] sm:$0xff] }
0x104f   : > { %v10922_v9 = vsub.f32 %v10867_v6, %v5127_v19  ;;  %v5248_v19 = vld [vmem:[%s8973_s1 + $0x430] sm:$0xff]  ;;  %5839 = vmatpush.msra.mxu0 %v5733_v46  ;;  %v5677_v46 = vld [vmem:[%s8975_s16 + $0x238] sm:$0xff]  ;;  %s927_s1 = scalar_lea.vmem %s11717_s25, %s7256_s9 }
0x1050   : > { %5399 = vmatpush.msra.mxu3 %v5248_v19 }
0x1051   : > { %v5139_v54 = vmul.f32 %v10922_v9, %v10922_v9  ;;  %5840 = vmatpush.msra.mxu0 %v5732_v23  ;;  %v5725_v23 = vld [vmem:[%s8975_s16 + $0x3b8] sm:$0xff] }
0x1053   : > { %5148 = vadd.xlane.f32.xlu1 %v5139_v54 }
0x1054   : > { %v5121_v35 = vpop.xlane.xlu2 %5120 }
0x1055   : > { %v5128_v16 = vmul.f32 %v5121_v35, %v9051_v36 }
0x1057   : > { %v10944_v37 = vsub.f32 %v10871_v44, %v5128_v16 }
0x1059   : > { %v5140_v1 = vmul.f32 %v10944_v37, %v10944_v37 }
0x105b   : > { %5150 = vadd.xlane.f32.xlu2 %v5140_v1 }
0x105c   : > { %v5123_v49 = vpop.xlane.xlu0 %5122 }
0x105d   : > { %v5129_v18 = vmul.f32 %v5123_v49, %v9051_v36 }
0x105f   : > { %v10967_v59 = vsub.f32 %v10875_v63, %v5129_v18 }
0x1061   : > { %v5141_v55 = vmul.f32 %v10967_v59, %v10967_v59 }
0x1063   : > { %5152 = vadd.xlane.f32.xlu0 %v5141_v55  ;;  %v5685_v55 = vld [vmem:[%s8975_s16 + $0x278] sm:$0xff] }
0x1064   : > { %v5143_v34 = vpop.xlane.xlu1 %5142  ;;  %5734 = vmatpush.msrb.mxu1 %v5685_v55 }
0x1065   : > { %v5154_v60 = vmul.f32 %v5143_v34, %v9051_v36  ;;  %v5683_v34 = vld [vmem:[%s8975_s16 + $0x268] sm:$0xff] }
0x1066   : > { %5735 = vmatpush.msrb.mxu1 %v5684_v42  ;;  %v5696_v42 = vld [vmem:[%s8975_s16 + $0x2d0] sm:$0xff] }
0x1067   : > { %v5160_v61 = vadd.f32 1e-06, %v5154_v60 }
0x1068   : > { %5736 = vmatpush.msrb.mxu1 %v5683_v34 }
0x1069   : > { %7987 = vrsqrt.f32 %v5160_v61  ;;  %vm5172_vm3 = vweird.f32 %v5160_v61 }
0x106f   : > { %v7988_v2 = vpop.eup %7987 }
0x1070   : > { %v5167_v24 = vmul.f32 %v7988_v2, %v5160_v61  ;;  %vm5173_vm5 = vweird.f32 %v7988_v2 }
0x1071   : > { %vm5174_vm4 = vmor %vm5172_vm3, %vm5173_vm5 }
0x1072   : > { %v5168_v13 = vmul.f32 %v7988_v2, %v5167_v24  ;;  %v5701_v24 = vld [vmem:[%s8975_s16 + $0x2f8] sm:$0xff] }
0x1073   : > { %5769 = vmatpush.msrb.mxu2 %v5701_v24  ;;  %v5711_v24 = vld [vmem:[%s8975_s16 + $0x348] sm:$0xff] }
0x1074   : > { %v5169_v41 = vmul.f32 0.5, %v5168_v13  ;;  %v5717_v13 = vld [vmem:[%s8975_s16 + $0x378] sm:$0xff] }
0x1075   : > { %5804 = vmatpush.msrb.mxu3 %v5717_v13  ;;  %v5724_v13 = vld [vmem:[%s8975_s16 + $0x3b0] sm:$0xff] }
0x1076   : > { %v5170_v54 = vsub.f32 1.5, %v5169_v41 }
0x1078   : > { %v5171_v45 = vmul.f32 %v7988_v2, %v5170_v54 }
0x107a   : > { %v5175_v62 = vsel %vm5174_vm4, %v7988_v2, %v5171_v45  ;;  %v5731_v2 = vld [vmem:[%s8975_s16 + $0x3e8] sm:$0xff] }
0x107b   : > { %v5226_v32 = vmul.f32 %v5175_v62, %v10880_v28  ;;  %5841 = vmatpush.msra.mxu0 %v5731_v2 }
0x107d   : > { %v5233_v12 = vmul.f32 %v10980_v52, %v5226_v32 }
0x107f   : > { %v5240_v58 = vadd.f32 %v10984_v40, %v5233_v12 }
0x1081   : > { %5330 = vmatmul.f32.vlgmr.msra.gmra.mxu1 %v5240_v58  ;;  %5365 = vmatmul.f32.vlgmr.msra.gmra.mxu2 %v5240_v58 }
0x1082   : > { %5400 = vmatmul.f32.vlgmr.msra.gmra.mxu3 %v5240_v58  ;;  %5435 = vmatmul.f32.vlgmr.msrb.gmra.mxu0 %v5240_v58  ;;  %v5682_v58 = vld [vmem:[%s8975_s16 + $0x260] sm:$0xff] }
0x1083   : > { %5737 = vmatpush.msrb.mxu1 %v5682_v58  ;;  %v5692_v58 = vld [vmem:[%s8975_s16 + $0x2b0] sm:$0xff] }
0x1084   : > { %v5145_v35 = vpop.xlane.xlu2 %5144 }
0x1085   : > { %v5155_v43 = vmul.f32 %v5145_v35, %v9051_v36  ;;  %v5730_v35 = vld [vmem:[%s8975_s16 + $0x3e0] sm:$0xff] }
0x1086   : > { %5842 = vmatpush.msra.mxu0 %v5730_v35  ;;  %v5708_v35 = vld [vmem:[%s8975_s16 + $0x330] sm:$0xff] }
0x1087   : > { %v5161_v16 = vadd.f32 1e-06, %v5155_v43 }
0x1089   : > { %7989 = vrsqrt.f32 %v5161_v16  ;;  %vm5182_vm7 = vweird.f32 %v5161_v16 }
0x108f   : > { %v7990_v39 = vpop.eup %7989 }
0x1090   : > { %v5177_v14 = vmul.f32 %v7990_v39, %v5161_v16  ;;  %vm5183_vm6 = vweird.f32 %v7990_v39 }
0x1091   : > { %vm5184_vm8 = vmor %vm5182_vm7, %vm5183_vm6 }
0x1092   : > { %v5178_v26 = vmul.f32 %v7990_v39, %v5177_v14 }
0x1094   : > { %v5179_v28 = vmul.f32 0.5, %v5178_v26 }
0x1096   : > { %v5180_v56 = vsub.f32 1.5, %v5179_v28 }
0x1098   : > { %v5181_v48 = vmul.f32 %v7990_v39, %v5180_v56  ;;  %v5681_v56 = vld [vmem:[%s8975_s16 + $0x258] sm:$0xff] }
0x1099   : > { %5738 = vmatpush.msrb.mxu1 %v5681_v56  ;;  %v5671_v56 = vld [vmem:[%s8975_s16 + $0x208] sm:$0xff] }
0x109a   : > { %v5185_v3 = vsel %vm5184_vm8, %v7990_v39, %v5181_v48  ;;  %v5700_v48 = vld [vmem:[%s8975_s16 + $0x2f0] sm:$0xff] }
0x109b   : > { %v5227_v25 = vmul.f32 %v5185_v3, %v10886_v51  ;;  %v5716_v3 = vld [vmem:[%s8975_s16 + $0x370] sm:$0xff]  ;;  %5770 = vmatpush.msrb.mxu2 %v5700_v48  ;;  %v5690_v48 = vld [vmem:[%s8975_s16 + $0x2a0] sm:$0xff] }
0x109c   : > { %5805 = vmatpush.msrb.mxu3 %v5716_v3  ;;  %v5706_v3 = vld [vmem:[%s8975_s16 + $0x320] sm:$0xff] }
0x109d   : > { %v5234_v15 = vmul.f32 %v10980_v52, %v5227_v25 }
0x109f   : > { %v5241_v1 = vadd.f32 %v10984_v40, %v5234_v15 }
0x10a1   : > { %5333 = vmatmul.f32.gmra.mxu1 %v5241_v1  ;;  %5368 = vmatmul.f32.gmra.mxu2 %v5241_v1 }
0x10a2   : > { %5403 = vmatmul.f32.gmra.mxu3 %v5241_v1  ;;  %5438 = vmatmul.f32.gmra.mxu0 %v5241_v1 }
0x10be   : > { %v5147_v27 = vpop.xlane.xlu0 %5146 }
0x10bf   : > { %v5156_v53 = vmul.f32 %v5147_v27, %v9051_v36 }
0x10c1   : > { %v5162_v38 = vadd.f32 1e-06, %v5156_v53  ;;  %v5680_v53 = vld [vmem:[%s8975_s16 + $0x250] sm:$0xff] }
0x10c2   : > { %5739 = vmatpush.msrb.mxu1 %v5680_v53  ;;  %v5705_v53 = vld [vmem:[%s8975_s16 + $0x318] sm:$0xff] }
0x10c3   : > { %7991 = vrsqrt.f32 %v5162_v38  ;;  %vm5192_vm10 = vweird.f32 %v5162_v38 }
0x10c6   : > { %v5149_v5 = vpop.xlane.xlu1 %5148 }
0x10c7   : > { %v5157_v57 = vmul.f32 %v5149_v5, %v9051_v36  ;;  %v5715_v5 = vld [vmem:[%s8975_s16 + $0x368] sm:$0xff] }
0x10c8   : > { %5806 = vmatpush.msrb.mxu3 %v5715_v5  ;;  %v5688_v5 = vld [vmem:[%s8975_s16 + $0x290] sm:$0xff] }
0x10c9   : > { %v7992_v0 = vpop.eup %7991  ;;  %v5163_v7 = vadd.f32 1e-06, %v5157_v57  ;;  %v5728_v57 = vld [vmem:[%s8975_s16 + $0x3d0] sm:$0xff] }
0x10ca   : > { %v5187_v49 = vmul.f32 %v7992_v0, %v5162_v38  ;;  %vm5193_vm9 = vweird.f32 %v7992_v0  ;;  %v5699_v38 = vld [vmem:[%s8975_s16 + $0x2e8] sm:$0xff] }
0x10cb   : > { %7993 = vrsqrt.f32 %v5163_v7  ;;  %vm5194_vm11 = vmor %vm5192_vm10, %vm5193_vm9  ;;  %vm5202_vm13 = vweird.f32 %v5163_v7  ;;  %5771 = vmatpush.msrb.mxu2 %v5699_v38  ;;  %v5718_v38 = vld [vmem:[%s8975_s16 + $0x380] sm:$0xff] }
0x10cc   : > { %v5188_v51 = vmul.f32 %v7992_v0, %v5187_v49  ;;  %v5679_v49 = vld [vmem:[%s8975_s16 + $0x248] sm:$0xff] }
0x10cd   : > { %5740 = vmatpush.msrb.mxu1 %v5679_v49  ;;  %v5687_v49 = vld [vmem:[%s8975_s16 + $0x288] sm:$0xff] }
0x10ce   : > { %v5189_v29 = vmul.f32 0.5, %v5188_v51  ;;  %v5151_v17 = vpop.xlane.xlu2 %5150  ;;  %v5698_v51 = vld [vmem:[%s8975_s16 + $0x2e0] sm:$0xff] }
0x10cf   : > { %v5158_v18 = vmul.f32 %v5151_v17, %v9051_v36  ;;  %v5714_v17 = vld [vmem:[%s8975_s16 + $0x360] sm:$0xff]  ;;  %5772 = vmatpush.msrb.mxu2 %v5698_v51 }
0x10d0   : > { %v5190_v4 = vsub.f32 1.5, %v5189_v29  ;;  %5807 = vmatpush.msrb.mxu3 %v5714_v17 }
0x10d1   : > { %v7994_v11 = vpop.eup %7993  ;;  %v10995_v20 = vadd.f32 1e-06, %v5158_v18  ;;  %v5727_v18 = vld [vmem:[%s8975_s16 + $0x3c8] sm:$0xff] }
0x10d2   : > { %v5191_v10 = vmul.f32 %v7992_v0, %v5190_v4  ;;  %v5197_v22 = vmul.f32 %v7994_v11, %v5163_v7  ;;  %vm5203_vm12 = vweird.f32 %v7994_v11 }
0x10d3   : > { %7995 = vrsqrt.f32 %v10995_v20  ;;  %vm5204_vm14 = vmor %vm5202_vm13, %vm5203_vm12  ;;  %vm5212_vm1 = vweird.f32 %v10995_v20  ;;  %vm6756_vm13 = vcmask 17408  }
0x10d4   : > { %v5195_v50 = vsel %vm5194_vm11, %v7992_v0, %v5191_v10  ;;  %v5198_v31 = vmul.f32 %v7994_v11, %v5197_v22  ;;  %v5713_v22 = vld [vmem:[%s8975_s16 + $0x358] sm:$0xff] }
0x10d5   : > { %v5228_v19 = vmul.f32 %v5195_v50, %v10900_v30  ;;  %v5726_v50 = vld [vmem:[%s8975_s16 + $0x3c0] sm:$0xff]  ;;  %5808 = vmatpush.msrb.mxu3 %v5713_v22 }
0x10d6   : > { %v5199_v60 = vmul.f32 0.5, %v5198_v31  ;;  %v5153_v61 = vpop.xlane.xlu0 %5152 }
0x10d7   : > { %v5159_v41 = vmul.f32 %v5153_v61, %v9051_v36  ;;  %v5235_v54 = vmul.f32 %v10980_v52, %v5228_v19  ;;  %v5712_v19 = vld [vmem:[%s8975_s16 + $0x350] sm:$0xff]  ;;  %v5695_v61 = vld [vmem:[%s8975_s16 + $0x2c8] sm:$0xff] }
0x10d8   : > { %v5200_v45 = vsub.f32 1.5, %v5199_v60  ;;  %v5676_v60 = vld [vmem:[%s8975_s16 + $0x230] sm:$0xff]  ;;  %5809 = vmatpush.msrb.mxu3 %v5712_v19 }
0x10d9   : > { %v7996_v30 = vpop.eup %7995  ;;  %v11009_v62 = vadd.f32 1e-06, %v5159_v41  ;;  %v5242_v32 = vadd.f32 %v10984_v40, %v5235_v54  ;;  %v5675_v41 = vld [vmem:[%s8975_s16 + $0x228] sm:$0xff]  ;;  %v5694_v54 = vld [vmem:[%s8975_s16 + $0x2c0] sm:$0xff] }
0x10da   : > { %v5201_v12 = vmul.f32 %v7994_v11, %v5200_v45  ;;  %v5207_v36 = vmul.f32 %v7996_v30, %v10995_v20  ;;  %vm5213_vm15 = vweird.f32 %v7996_v30  ;;  %v5697_v20 = vld [vmem:[%s8975_s16 + $0x2d8] sm:$0xff]  ;;  %5810 = vmatpush.msrb.mxu3 %v5711_v24 }
0x10db   : > { %7997 = vrsqrt.f32 %v11009_v62  ;;  %5336 = vmatmul.f32.gmra.mxu1 %v5242_v32  ;;  %5371 = vmatmul.f32.gmra.mxu2 %v5242_v32  ;;  %vm5214_vm2 = vmor %vm5212_vm1, %vm5213_vm15  ;;  %vm5222_vm3 = vweird.f32 %v11009_v62 }
0x10dc   : > { %v5205_v43 = vsel %vm5204_vm14, %v7994_v11, %v5201_v12  ;;  %v5208_v16 = vmul.f32 %v7996_v30, %v5207_v36  ;;  %5406 = vmatmul.f32.gmra.mxu3 %v5242_v32  ;;  %5441 = vmatmul.f32.gmra.mxu0 %v5242_v32  ;;  %v5678_v11 = vld [vmem:[%s8975_s16 + $0x240] sm:$0xff]  ;;  %v5709_v12 = vld [vmem:[%s8975_s16 + $0x338] sm:$0xff] }
0x10dd   : > { %v5229_v39 = vmul.f32 %v5205_v43, %v10922_v9  ;;  %v5729_v9 = vld [vmem:[%s8975_s16 + $0x3d8] sm:$0xff]  ;;  %5741 = vmatpush.msrb.mxu1 %v5678_v11  ;;  %5773 = vmatpush.msrb.mxu2 %v5697_v20  ;;  %v5674_v32 = vld [vmem:[%s8975_s16 + $0x220] sm:$0xff] }
0x10de   : > { %v5209_v14 = vmul.f32 0.5, %v5208_v16  ;;  %5843 = vmatpush.msra.mxu0 %v5729_v9  ;;  %v5722_v36 = vld [vmem:[%s8975_s16 + $0x3a0] sm:$0xff]  ;;  %v5721_v43 = vld [vmem:[%s8975_s16 + $0x398] sm:$0xff]  ;;  %v5672_v16 = vld [vmem:[%s8975_s16 + $0x210] sm:$0xff] }
0x10df   : > { %v5236_v26 = vmul.f32 %v10980_v52, %v5229_v39  ;;  %5742 = vmatpush.msrb.mxu1 %v5677_v46  ;;  %5774 = vmatpush.msrb.mxu2 %v5696_v42  ;;  %v5691_v39 = vld [vmem:[%s8975_s16 + $0x2a8] sm:$0xff]  ;;  %v5670_v9 = vld [vmem:[%s8975_s16 + $0x200] sm:$0xff] }
0x10e0   : > { %v5210_v28 = vsub.f32 1.5, %v5209_v14  ;;  %5844 = vmatpush.msra.mxu0 %v5728_v57  ;;  %v5707_v14 = vld [vmem:[%s8975_s16 + $0x328] sm:$0xff]  ;;  %v5686_v11 = vld [vmem:[%s8975_s16 + $0x280] sm:$0xff] }
0x10e1   : > { %v7998_v25 = vpop.eup %7997  ;;  %v5243_v15 = vadd.f32 %v10984_v40, %v5236_v26  ;;  %5743 = vmatpush.msrb.mxu1 %v5676_v60  ;;  %5775 = vmatpush.msrb.mxu2 %v5695_v61  ;;  %v5720_v26 = vld [vmem:[%s8975_s16 + $0x390] sm:$0xff] }
0x10e2   : > { %v5211_v1 = vmul.f32 %v7996_v30, %v5210_v28  ;;  %v5217_v27 = vmul.f32 %v7998_v25, %v11009_v62  ;;  %vm5223_vm5 = vweird.f32 %v7998_v25  ;;  %5845 = vmatpush.msra.mxu0 %v5727_v18  ;;  %v5723_v62 = vld [vmem:[%s8975_s16 + $0x3a8] sm:$0xff]  ;;  %v1011_v28 = vld [vmem:[%s8981_s17 + $0x38] sm:$0xff] }
0x10e3   : > { %5339 = vmatmul.f32.gmra.mxu1 %v5243_v15  ;;  %5374 = vmatmul.f32.gmra.mxu2 %v5243_v15  ;;  %vm5224_vm4 = vmor %vm5222_vm3, %vm5223_vm5  ;;  %v8100_v18 = vld [vmem:[%s8981_s17 + $0x28] sm:$0xff] }
0x10e4   : > { %v5215_v0 = vsel %vm5214_vm2, %v7996_v30, %v5211_v1  ;;  %v5218_v7 = vmul.f32 %v7998_v25, %v5217_v27  ;;  %5409 = vmatmul.f32.gmra.mxu3 %v5243_v15  ;;  %5444 = vmatmul.f32.gmra.mxu0 %v5243_v15  ;;  %v5710_v30 = vld [vmem:[%s8975_s16 + $0x340] sm:$0xff]  ;;  %v11075_v15 = vperm.slane %v10851_v33, 6  ;;  %v5689_v1 = vld [vmem:[%s8975_s16 + $0x298] sm:$0xff]  ;;  %v11079_v27 = vperm.slane %v1011_v28, 6  ;;  %v5704_v33 = vld [vmem:[%s8975_s16 + $0x310] sm:$0xff] }
0x10e5   : > { %v5230_v29 = vmul.f32 %v5215_v0, %v10944_v37  ;;  %5846 = vmatpush.msra.mxu0 %v5726_v50  ;;  %5744 = vmatpush.msrb.mxu1 %v5675_v41  ;;  %v5702_v50 = vld [vmem:[%s8975_s16 + $0x300] sm:$0xff] }
0x10e6   : > { %v5219_v4 = vmul.f32 0.5, %v5218_v7  ;;  %5776 = vmatpush.msrb.mxu2 %v5694_v54  ;;  %5811 = vmatpush.msrb.mxu3 %v5710_v30 }
0x10e7   : > { %v5237_v10 = vmul.f32 %v10980_v52, %v5230_v29  ;;  %5847 = vmatpush.msra.mxu0 %v5725_v23  ;;  %5745 = vmatpush.msrb.mxu1 %v5674_v32  ;;  %v5703_v29 = vld [vmem:[%s8975_s16 + $0x308] sm:$0xff] }
0x10e8   : > { %v5220_v31 = vsub.f32 1.5, %v5219_v4  ;;  %5812 = vmatpush.msrb.mxu3 %v5709_v12  ;;  %v11090_v4 = vperm.slane %v8100_v18, 6 }
0x10e9   : > { %v5244_v37 = vadd.f32 %v10984_v40, %v5237_v10  ;;  %5848 = vmatpush.msra.mxu0 %v5724_v13  ;;  %v8101_v10 = vld [vmem:[%s8981_s17 + $0x30] sm:$0xff] }
0x10ea   : > { %v5221_v55 = vmul.f32 %v7998_v25, %v5220_v31  ;;  %5813 = vmatpush.msrb.mxu3 %v5708_v35  ;;  %v11094_v22 = vperm.slane %v8101_v10, 6 }
0x10eb   : > { %5342 = vmatmul.f32.gmra.mxu1 %v5244_v37  ;;  %5377 = vmatmul.f32.gmra.mxu2 %v5244_v37 }
0x10ec   : > { %v5225_v34 = vsel %vm5224_vm4, %v7998_v25, %v5221_v55  ;;  %5412 = vmatmul.f32.gmra.mxu3 %v5244_v37  ;;  %5447 = vmatmul.f32.gmra.mxu0 %v5244_v37  ;;  %v5719_v25 = vld [vmem:[%s8975_s16 + $0x388] sm:$0xff] }
0x10ed   : > { %v5231_v2 = vmul.f32 %v5225_v34, %v10967_v59  ;;  %5849 = vmatpush.msra.mxu0 %v5723_v62  ;;  %5814 = vmatpush.msrb.mxu3 %v5707_v14 }
0x10ef   : > { %v5238_v45 = vmul.f32 %v10980_v52, %v5231_v2  ;;  %v5693_v52 = vld [vmem:[%s8975_s16 + $0x2b8] sm:$0xff]  ;;  %5850 = vmatpush.msra.mxu0 %v5722_v36  ;;  %5815 = vmatpush.msrb.mxu3 %v5706_v3 }
0x10f0   : > { %5777 = vmatpush.msrb.mxu2 %v5693_v52 }
0x10f1   : > { %v5245_v59 = vadd.f32 %v10984_v40, %v5238_v45  ;;  %v5673_v40 = vld [vmem:[%s8975_s16 + $0x218] sm:$0xff]  ;;  %5851 = vmatpush.msra.mxu0 %v5721_v43  ;;  %5816 = vmatpush.msrb.mxu3 %v5705_v53 }
0x10f2   : > { %5746 = vmatpush.msrb.mxu1 %v5673_v40  ;;  %5778 = vmatpush.msrb.mxu2 %v5692_v58 }
0x10f3   : > { %5345 = vmatmul.f32.gmra.mxu1 %v5245_v59  ;;  %5380 = vmatmul.f32.gmra.mxu2 %v5245_v59 }
0x10f4   : > { %5415 = vmatmul.f32.gmra.mxu3 %v5245_v59  ;;  %5450 = vmatmul.f32.gmra.mxu0 %v5245_v59 }
0x10f5   : > { %5747 = vmatpush.msrb.mxu1 %v5672_v16  ;;  %5779 = vmatpush.msrb.mxu2 %v5691_v39 }
0x10f6   : > { %5852 = vmatpush.msra.mxu0 %v5720_v26  ;;  %5817 = vmatpush.msrb.mxu3 %v5704_v33 }
0x10f7   : > { %5748 = vmatpush.msrb.mxu1 %v5671_v56  ;;  %5780 = vmatpush.msrb.mxu2 %v5690_v48 }
0x10f8   : > { %5853 = vmatpush.msra.mxu0 %v5719_v25  ;;  %5818 = vmatpush.msrb.mxu3 %v5703_v29 }
0x10f9   : > { %5749 = vmatpush.msrb.mxu1 %v5670_v9  ;;  %5781 = vmatpush.msrb.mxu2 %v5689_v1 }
0x10fa   : > { %5854 = vmatpush.msra.mxu0 %v5718_v38  ;;  %5819 = vmatpush.msrb.mxu3 %v5702_v50 }
0x10fb   : > { %5782 = vmatpush.msrb.mxu2 %v5688_v5 }
0x10fd   : > { %5783 = vmatpush.msrb.mxu2 %v5687_v49 }
0x10fe   : > { %v5331_v57 = vpop.f32.mrf.mxu1 }
0x10ff   : > { %v5332_v0 = vadd.f32 %v5331_v57, %v11075_v15  ;;  %v5436_v7 = vpop.f32.mrf.mxu0  ;;  %5784 = vmatpush.msrb.mxu2 %v5686_v11 }
0x1100   : > { %v5437_v51 = vadd.f32 %v5436_v7, %v11079_v27 }
0x1101   : > { %v5478_v17 = vmul.f32 0.044715, %v5332_v0  ;;  %v5454_v58 = vmul.f32 0.5, %v5332_v0 }
0x1102   : > { %v5481_v20 = vmul.f32 0.044715, %v5437_v51  ;;  %v5457_v43 = vmul.f32 0.5, %v5437_v51 }
0x1103   : > { %v5502_v31 = vmul.f32 %v5478_v17, %v5332_v0 }
0x1104   : > { %v5505_v37 = vmul.f32 %v5481_v20, %v5437_v51  ;;  %v5366_v55 = vpop.f32.mrf.mxu2 }
0x1105   : > { %v5526_v46 = vmul.f32 %v5502_v31, %v5332_v0  ;;  %v5367_v42 = vadd.f32 %v5366_v55, %v11090_v4  ;;  %v5401_v19 = vpop.f32.mrf.mxu3 }
0x1106   : > { %v5529_v23 = vmul.f32 %v5505_v37, %v5437_v51  ;;  %v5402_v34 = vadd.f32 %v5401_v19, %v11094_v22 }
0x1107   : > { %v5550_v60 = vadd.f32 %v5526_v46, %v5332_v0  ;;  %v5479_v61 = vmul.f32 0.044715, %v5367_v42  ;;  %v5455_v56 = vmul.f32 0.5, %v5367_v42 }
0x1108   : > { %v5553_v2 = vadd.f32 %v5529_v23, %v5437_v51  ;;  %v5480_v24 = vmul.f32 0.044715, %v5402_v34  ;;  %v5456_v3 = vmul.f32 0.5, %v5402_v34 }
0x1109   : > { %v5574_v13 = vmul.f32 0.7978846, %v5550_v60  ;;  %v5503_v41 = vmul.f32 %v5479_v61, %v5367_v42 }
0x110a   : > { %v5577_v54 = vmul.f32 0.7978846, %v5553_v2  ;;  %v5504_v45 = vmul.f32 %v5480_v24, %v5402_v34 }
0x110b   : > { %7999 = vtanh.f32 %v5574_v13  ;;  %v5527_v30 = vmul.f32 %v5503_v41, %v5367_v42 }
0x110c   : > { %8001 = vtanh.f32 %v5577_v54  ;;  %v5528_v62 = vmul.f32 %v5504_v45, %v5402_v34 }
0x110d   : > { %v5551_v59 = vadd.f32 %v5527_v30, %v5367_v42 }
0x110e   : > { %v5552_v32 = vadd.f32 %v5528_v62, %v5402_v34 }
0x110f   : > { %v5575_v52 = vmul.f32 0.7978846, %v5551_v59 }
0x1110   : > { %v5576_v12 = vmul.f32 0.7978846, %v5552_v32 }
0x1111   : > { %v8000_v36 = vpop.eup %7999  ;;  %8003 = vtanh.f32 %v5575_v52 }
0x1112   : > { %v8002_v40 = vpop.eup %8001  ;;  %8005 = vtanh.f32 %v5576_v12  ;;  %v5622_v35 = vadd.f32 1.0, %v8000_v36 }
0x1113   : > { %v5625_v16 = vadd.f32 1.0, %v8002_v40 }
0x1114   : > { %v5646_v39 = vmul.f32 %v5622_v35, %v5454_v58 }
0x1115   : > { %v5649_v14 = vmul.f32 %v5625_v16, %v5457_v43 }
0x1116   : > { %5750 = vmatmul.f32.vlgmr.msrb.gmra.mxu1 %v5646_v39 }
0x1117   : > { %v8004_v26 = vpop.eup %8003  ;;  %5855 = vmatmul.f32.vlgmr.msra.gmra.mxu0 %v5649_v14 }
0x1118   : > { %v8006_v28 = vpop.eup %8005  ;;  %v5623_v48 = vadd.f32 1.0, %v8004_v26 }
0x1119   : > { %v5624_v25 = vadd.f32 1.0, %v8006_v28 }
0x111a   : > { %v5647_v9 = vmul.f32 %v5623_v48, %v5455_v56 }
0x111b   : > { %v5648_v1 = vmul.f32 %v5624_v25, %v5456_v3 }
0x111c   : > { %5785 = vmatmul.f32.vlgmr.msrb.gmra.mxu2 %v5647_v9 }
0x111d   : > { %5820 = vmatmul.f32.vlgmr.msrb.gmra.mxu3 %v5648_v1 }
0x111e   : > { %v5334_v53 = vpop.f32.mrf.mxu1 }
0x111f   : > { %v5335_v38 = vadd.f32 %v5334_v53, %v11075_v15  ;;  %v5439_v5 = vpop.f32.mrf.mxu0 }
0x1120   : > { %v5440_v57 = vadd.f32 %v5439_v5, %v11079_v27 }
0x1121   : > { %v5482_v33 = vmul.f32 0.044715, %v5335_v38  ;;  %v5458_v54 = vmul.f32 0.5, %v5335_v38 }
0x1122   : > { %v5485_v0 = vmul.f32 0.044715, %v5440_v57  ;;  %v5461_v30 = vmul.f32 0.5, %v5440_v57 }
0x1123   : > { %v5506_v7 = vmul.f32 %v5482_v33, %v5335_v38 }
0x1124   : > { %v5369_v49 = vpop.f32.mrf.mxu2  ;;  %v5509_v51 = vmul.f32 %v5485_v0, %v5440_v57 }
0x1125   : > { %v5370_v29 = vadd.f32 %v5369_v49, %v11090_v4  ;;  %v5404_v17 = vpop.f32.mrf.mxu3  ;;  %v5530_v18 = vmul.f32 %v5506_v7, %v5335_v38 }
0x1126   : > { %v5405_v11 = vadd.f32 %v5404_v17, %v11094_v22  ;;  %v5533_v20 = vmul.f32 %v5509_v51, %v5440_v57 }
0x1127   : > { %v5483_v10 = vmul.f32 0.044715, %v5370_v29  ;;  %v5554_v50 = vadd.f32 %v5530_v18, %v5335_v38  ;;  %v5459_v36 = vmul.f32 0.5, %v5370_v29 }
0x1128   : > { %v5484_v31 = vmul.f32 0.044715, %v5405_v11  ;;  %v5557_v37 = vadd.f32 %v5533_v20, %v5440_v57  ;;  %v5460_v58 = vmul.f32 0.5, %v5405_v11 }
0x1129   : > { %v5578_v55 = vmul.f32 0.7978846, %v5554_v50  ;;  %v5507_v46 = vmul.f32 %v5483_v10, %v5370_v29 }
0x112a   : > { %v5581_v42 = vmul.f32 0.7978846, %v5557_v37  ;;  %v5508_v19 = vmul.f32 %v5484_v31, %v5405_v11 }
0x112b   : > { %8007 = vtanh.f32 %v5578_v55  ;;  %v5531_v23 = vmul.f32 %v5507_v46, %v5370_v29 }
0x112c   : > { %8009 = vtanh.f32 %v5581_v42  ;;  %v5532_v34 = vmul.f32 %v5508_v19, %v5405_v11 }
0x112d   : > { %v5555_v60 = vadd.f32 %v5531_v23, %v5370_v29 }
0x112e   : > { %v5556_v61 = vadd.f32 %v5532_v34, %v5405_v11 }
0x112f   : > { %v5579_v2 = vmul.f32 0.7978846, %v5555_v60 }
0x1130   : > { %v5580_v24 = vmul.f32 0.7978846, %v5556_v61 }
0x1131   : > { %v8008_v13 = vpop.eup %8007  ;;  %8011 = vtanh.f32 %v5579_v2 }
0x1132   : > { %v8010_v41 = vpop.eup %8009  ;;  %v5626_v45 = vadd.f32 1.0, %v8008_v13  ;;  %8013 = vtanh.f32 %v5580_v24 }
0x1133   : > { %v5629_v62 = vadd.f32 1.0, %v8010_v41 }
0x1134   : > { %v5650_v59 = vmul.f32 %v5626_v45, %v5458_v54 }
0x1135   : > { %v5653_v32 = vmul.f32 %v5629_v62, %v5461_v30 }
0x1136   : > { %5753 = vmatmul.f32.gmra.mxu1 %v5650_v59 }
0x1137   : > { %v8012_v52 = vpop.eup %8011  ;;  %5858 = vmatmul.f32.gmra.mxu0 %v5653_v32 }
0x1138   : > { %v8014_v12 = vpop.eup %8013  ;;  %v5627_v40 = vadd.f32 1.0, %v8012_v52 }
0x1139   : > { %v5628_v35 = vadd.f32 1.0, %v8014_v12 }
0x113a   : > { %v5651_v43 = vmul.f32 %v5627_v40, %v5459_v36 }
0x113b   : > { %v5652_v16 = vmul.f32 %v5628_v35, %v5460_v58 }
0x113c   : > { %5788 = vmatmul.f32.gmra.mxu2 %v5651_v43 }
0x113d   : > { %5823 = vmatmul.f32.gmra.mxu3 %v5652_v16 }
0x1158   : > { %v5337_v39 = vpop.f32.mrf.mxu1 }
0x1159   : > { %v5338_v14 = vadd.f32 %v5337_v39, %v11075_v15  ;;  %v5442_v26 = vpop.f32.mrf.mxu0 }
0x115a   : > { %v5443_v28 = vadd.f32 %v5442_v26, %v11079_v27 }
0x115b   : > { %v5486_v56 = vmul.f32 0.044715, %v5338_v14  ;;  %v5462_v41 = vmul.f32 0.5, %v5338_v14 }
0x115c   : > { %v5489_v48 = vmul.f32 0.044715, %v5443_v28  ;;  %v5465_v16 = vmul.f32 0.5, %v5443_v28 }
0x115d   : > { %v5510_v3 = vmul.f32 %v5486_v56, %v5338_v14 }
0x115e   : > { %v5372_v25 = vpop.f32.mrf.mxu2  ;;  %v5513_v9 = vmul.f32 %v5489_v48, %v5443_v28 }
0x115f   : > { %v5373_v1 = vadd.f32 %v5372_v25, %v11090_v4  ;;  %v5407_v53 = vpop.f32.mrf.mxu3  ;;  %v5534_v38 = vmul.f32 %v5510_v3, %v5338_v14 }
0x1160   : > { %v5408_v5 = vadd.f32 %v5407_v53, %v11094_v22  ;;  %v5340_v57 = vpop.f32.mrf.mxu1  ;;  %v5537_v33 = vmul.f32 %v5513_v9, %v5443_v28 }
0x1161   : > { %v5487_v0 = vmul.f32 0.044715, %v5373_v1  ;;  %v11108_v7 = vadd.f32 %v5340_v57, %v11075_v15  ;;  %v5445_v49 = vpop.f32.mrf.mxu0  ;;  %v5558_v51 = vadd.f32 %v5534_v38, %v5338_v14  ;;  %v5463_v56 = vmul.f32 0.5, %v5373_v1 }
0x1162   : > { %v5488_v29 = vmul.f32 0.044715, %v5408_v5  ;;  %v5446_v17 = vadd.f32 %v5445_v49, %v11079_v27  ;;  %v5561_v18 = vadd.f32 %v5537_v33, %v5443_v28  ;;  %v5464_v57 = vmul.f32 0.5, %v5408_v5 }
0x1163   : > { %v5490_v11 = vmul.f32 0.044715, %v11108_v7  ;;  %v5582_v20 = vmul.f32 0.7978846, %v5558_v51  ;;  %v5511_v10 = vmul.f32 %v5487_v0, %v5373_v1 }
0x1164   : > { %v5493_v50 = vmul.f32 0.044715, %v5446_v17  ;;  %v5585_v31 = vmul.f32 0.7978846, %v5561_v18  ;;  %v5512_v37 = vmul.f32 %v5488_v29, %v5408_v5 }
0x1165   : > { %8015 = vtanh.f32 %v5582_v20  ;;  %v5535_v55 = vmul.f32 %v5511_v10, %v5373_v1  ;;  %v5514_v46 = vmul.f32 %v5490_v11, %v11108_v7  ;;  %v5466_v11 = vmul.f32 0.5, %v11108_v7 }
0x1166   : > { %v5375_v42 = vpop.f32.mrf.mxu2  ;;  %8017 = vtanh.f32 %v5585_v31  ;;  %v5536_v19 = vmul.f32 %v5512_v37, %v5408_v5  ;;  %v5517_v23 = vmul.f32 %v5493_v50, %v5446_v17 }
0x1167   : > { %v11114_v34 = vadd.f32 %v5375_v42, %v11090_v4  ;;  %v5410_v60 = vpop.f32.mrf.mxu3  ;;  %v5559_v61 = vadd.f32 %v5535_v55, %v5373_v1  ;;  %v5538_v2 = vmul.f32 %v5514_v46, %v11108_v7 }
0x1168   : > { %v11118_v24 = vadd.f32 %v5410_v60, %v11094_v22  ;;  %v5343_v13 = vpop.f32.mrf.mxu1  ;;  %v5560_v54 = vadd.f32 %v5536_v19, %v5408_v5  ;;  %v5541_v45 = vmul.f32 %v5517_v23, %v5446_v17  ;;  %v5469_v5 = vmul.f32 0.5, %v5446_v17 }
0x1169   : > { %v5491_v30 = vmul.f32 0.044715, %v11114_v34  ;;  %v11122_v62 = vadd.f32 %v5343_v13, %v11075_v15  ;;  %v5448_v59 = vpop.f32.mrf.mxu0  ;;  %v5583_v32 = vmul.f32 0.7978846, %v5559_v61  ;;  %v5562_v52 = vadd.f32 %v5538_v2, %v11108_v7 }
0x116a   : > { %v5492_v12 = vmul.f32 0.044715, %v11118_v24  ;;  %v11127_v36 = vadd.f32 %v5448_v59, %v11079_v27  ;;  %v5584_v40 = vmul.f32 0.7978846, %v5560_v54  ;;  %v5565_v58 = vadd.f32 %v5541_v45, %v5446_v17 }
0x116b   : > { %v8016_v35 = vpop.eup %8015  ;;  %v5494_v43 = vmul.f32 0.044715, %v11122_v62  ;;  %8019 = vtanh.f32 %v5583_v32  ;;  %v5586_v39 = vmul.f32 0.7978846, %v5562_v52  ;;  %v5515_v9 = vmul.f32 %v5491_v30, %v11114_v34 }
0x116c   : > { %v8018_v14 = vpop.eup %8017  ;;  %v5630_v26 = vadd.f32 1.0, %v8016_v35  ;;  %8021 = vtanh.f32 %v5584_v40  ;;  %v5589_v48 = vmul.f32 0.7978846, %v5565_v58  ;;  %v5497_v3 = vmul.f32 0.044715, %v11127_v36 }
0x116d   : > { %v5633_v25 = vadd.f32 1.0, %v8018_v14  ;;  %8023 = vtanh.f32 %v5586_v39  ;;  %v5516_v33 = vmul.f32 %v5492_v12, %v11118_v24  ;;  %v5539_v1 = vmul.f32 %v5515_v9, %v11114_v34 }
0x116e   : > { %v5378_v53 = vpop.f32.mrf.mxu2  ;;  %v5654_v38 = vmul.f32 %v5630_v26, %v5462_v41  ;;  %8025 = vtanh.f32 %v5589_v48  ;;  %v5518_v51 = vmul.f32 %v5494_v43, %v11122_v62  ;;  %v5521_v46 = vmul.f32 %v5497_v3, %v11127_v36 }
0x116f   : > { %v11134_v28 = vadd.f32 %v5378_v53, %v11090_v4  ;;  %v5413_v0 = vpop.f32.mrf.mxu3  ;;  %v5657_v49 = vmul.f32 %v5633_v25, %v5465_v16  ;;  %v5540_v20 = vmul.f32 %v5516_v33, %v11118_v24  ;;  %v5563_v37 = vadd.f32 %v5539_v1, %v11114_v34 }
0x1170   : > { %v11139_v29 = vadd.f32 %v5413_v0, %v11094_v22  ;;  %v5346_v18 = vpop.f32.mrf.mxu1  ;;  %5756 = vmatmul.f32.gmra.mxu1 %v5654_v38  ;;  %v5542_v55 = vmul.f32 %v5518_v51, %v11122_v62  ;;  %v5545_v35 = vmul.f32 %v5521_v46, %v11127_v36  ;;  %v5468_v53 = vmul.f32 0.5, %v11118_v24 }
0x1171   : > { %v8020_v10 = vpop.eup %8019  ;;  %v11144_v50 = vadd.f32 %v5346_v18, %v11075_v15  ;;  %v5451_v31 = vpop.f32.mrf.mxu0  ;;  %5861 = vmatmul.f32.gmra.mxu0 %v5657_v49  ;;  %v5495_v19 = vmul.f32 0.044715, %v11134_v28  ;;  %v5564_v23 = vadd.f32 %v5540_v20, %v11118_v24  ;;  %v5587_v2 = vmul.f32 0.7978846, %v5563_v37 }
0x1172   : > { %v8022_v42 = vpop.eup %8021  ;;  %v11151_v7 = vadd.f32 %v5451_v31, %v11079_v27  ;;  %v5631_v17 = vadd.f32 1.0, %v8020_v10  ;;  %v5496_v15 = vmul.f32 0.044715, %v11139_v29  ;;  %v5566_v13 = vadd.f32 %v5542_v55, %v11122_v62 }
0x1173   : > { %v8024_v60 = vpop.eup %8023  ;;  %v5632_v61 = vadd.f32 1.0, %v8022_v42  ;;  %v5498_v54 = vmul.f32 0.044715, %v11144_v50  ;;  %v5588_v59 = vmul.f32 0.7978846, %v5564_v23  ;;  %8027 = vtanh.f32 %v5587_v2 }
0x1174   : > { %v8026_v41 = vpop.eup %8025  ;;  %v5655_v45 = vmul.f32 %v5631_v17, %v5463_v56  ;;  %v5634_v30 = vadd.f32 1.0, %v8024_v60  ;;  %v5590_v27 = vmul.f32 0.7978846, %v5566_v13  ;;  %v5501_v12 = vmul.f32 0.044715, %v11151_v7 }
0x1175   : > { %v5656_v32 = vmul.f32 %v5632_v61, %v5464_v57  ;;  %v5637_v52 = vadd.f32 1.0, %v8026_v41  ;;  %8029 = vtanh.f32 %v5588_v59  ;;  %v5519_v14 = vmul.f32 %v5495_v19, %v11134_v28 }
0x1176   : > { %v5381_v40 = vpop.f32.mrf.mxu2  ;;  %5791 = vmatmul.f32.gmra.mxu2 %v5655_v45  ;;  %v5658_v58 = vmul.f32 %v5634_v30, %v5466_v11  ;;  %8031 = vtanh.f32 %v5590_v27  ;;  %v5569_v56 = vadd.f32 %v5545_v35, %v11127_v36  ;;  %v5520_v48 = vmul.f32 %v5496_v15, %v11139_v29 }
0x1177   : > { %v11160_v43 = vadd.f32 %v5381_v40, %v11090_v4  ;;  %v5416_v16 = vpop.f32.mrf.mxu3  ;;  %5826 = vmatmul.f32.gmra.mxu3 %v5656_v32  ;;  %v5661_v39 = vmul.f32 %v5637_v52, %v5469_v5  ;;  %v5467_v4 = vmul.f32 0.5, %v11114_v34  ;;  %v5543_v25 = vmul.f32 %v5519_v14, %v11134_v28 }
0x1178   : > { %v11164_v26 = vadd.f32 %v5416_v16, %v11094_v22  ;;  %5759 = vmatmul.f32.gmra.mxu1 %v5658_v58  ;;  %v5522_v9 = vmul.f32 %v5498_v54, %v11144_v50  ;;  %v5470_v38 = vmul.f32 0.5, %v11122_v62  ;;  %v5593_v22 = vmul.f32 0.7978846, %v5569_v56 }
0x1179   : > { %v5499_v3 = vmul.f32 0.044715, %v11160_v43  ;;  %5864 = vmatmul.f32.gmra.mxu0 %v5661_v39  ;;  %v5544_v57 = vmul.f32 %v5520_v48, %v11139_v29  ;;  %v8028_v33 = vpop.eup %8027  ;;  %v5567_v49 = vadd.f32 %v5543_v25, %v11134_v28  ;;  %v5525_v34 = vmul.f32 %v5501_v12, %v11151_v7 }
0x117a   : > { %v5500_v0 = vmul.f32 0.044715, %v11164_v26  ;;  %v5546_v1 = vmul.f32 %v5522_v9, %v11144_v50  ;;  %v5635_v18 = vadd.f32 1.0, %v8028_v33  ;;  %8033 = vtanh.f32 %v5593_v22 }
0x117b   : > { %v8030_v51 = vpop.eup %8029  ;;  %v5568_v11 = vadd.f32 %v5544_v57, %v11139_v29  ;;  %v5523_v24 = vmul.f32 %v5499_v3, %v11160_v43  ;;  %v5591_v20 = vmul.f32 0.7978846, %v5567_v49  ;;  %v5549_v31 = vmul.f32 %v5525_v34, %v11151_v7 }
0x117c   : > { %v8032_v62 = vpop.eup %8031  ;;  %v5636_v5 = vadd.f32 1.0, %v8030_v51  ;;  %v5570_v10 = vadd.f32 %v5546_v1, %v11144_v50  ;;  %v5659_v37 = vmul.f32 %v5635_v18, %v5467_v4  ;;  %v5524_v2 = vmul.f32 %v5500_v0, %v11164_v26 }
0x117d   : > { %v5638_v55 = vadd.f32 1.0, %v8032_v62  ;;  %v5592_v46 = vmul.f32 0.7978846, %v5568_v11  ;;  %v5547_v42 = vmul.f32 %v5523_v24, %v11160_v43  ;;  %8035 = vtanh.f32 %v5591_v20 }
0x117e   : > { %v5660_v19 = vmul.f32 %v5636_v5, %v5468_v53  ;;  %v5594_v17 = vmul.f32 0.7978846, %v5570_v10  ;;  %v5573_v23 = vadd.f32 %v5549_v31, %v11151_v7  ;;  %5794 = vmatmul.f32.gmra.mxu2 %v5659_v37  ;;  %v5473_v54 = vmul.f32 0.5, %v11127_v36 }
0x117f   : > { %v5662_v60 = vmul.f32 %v5638_v55, %v5470_v38  ;;  %8037 = vtanh.f32 %v5592_v46  ;;  %v5571_v15 = vadd.f32 %v5547_v42, %v11160_v43  ;;  %v5548_v30 = vmul.f32 %v5524_v2, %v11164_v26 }
0x1180   : > { %5829 = vmatmul.f32.gmra.mxu3 %v5660_v19  ;;  %8039 = vtanh.f32 %v5594_v17  ;;  %v5597_v61 = vmul.f32 0.7978846, %v5573_v23  ;;  %v8034_v13 = vpop.eup %8033  ;;  %v5471_v12 = vmul.f32 0.5, %v11134_v28  ;;  %v5472_v35 = vmul.f32 0.5, %v11139_v29 }
0x1181   : > { %5762 = vmatmul.f32.gmra.mxu1 %v5662_v60  ;;  %v5595_v41 = vmul.f32 0.7978846, %v5571_v15  ;;  %v5641_v45 = vadd.f32 1.0, %v8034_v13  ;;  %v5572_v52 = vadd.f32 %v5548_v30, %v11164_v26  ;;  %v5474_v14 = vmul.f32 0.5, %v11144_v50 }
0x1182   : > { %8041 = vtanh.f32 %v5597_v61  ;;  %v5477_v9 = vmul.f32 0.5, %v11151_v7  ;;  %v5475_v29 = vmul.f32 0.5, %v11160_v43  ;;  %v5476_v50 = vmul.f32 0.5, %v11164_v26 }
0x1183   : > { %8043 = vtanh.f32 %v5595_v41  ;;  %v8036_v59 = vpop.eup %8035  ;;  %v5665_v32 = vmul.f32 %v5641_v45, %v5473_v54  ;;  %v5596_v39 = vmul.f32 0.7978846, %v5572_v52 }
0x1184   : > { %v5639_v40 = vadd.f32 1.0, %v8036_v59 }
0x1185   : > { %v8038_v27 = vpop.eup %8037  ;;  %5867 = vmatmul.f32.gmra.mxu0 %v5665_v32  ;;  %8045 = vtanh.f32 %v5596_v39 }
0x1186   : > { %v8040_v58 = vpop.eup %8039  ;;  %v5640_v16 = vadd.f32 1.0, %v8038_v27  ;;  %v5663_v36 = vmul.f32 %v5639_v40, %v5471_v12 }
0x1187   : > { %v5642_v56 = vadd.f32 1.0, %v8040_v58 }
0x1188   : > { %v8042_v48 = vpop.eup %8041  ;;  %v5664_v3 = vmul.f32 %v5640_v16, %v5472_v35  ;;  %5797 = vmatmul.f32.gmra.mxu2 %v5663_v36  ;;  %v8102_v35 = vld [vmem:[%s8981_s17 + $0x20] sm:$0xff] }
0x1189   : > { %v8044_v4 = vpop.eup %8043  ;;  %v5666_v25 = vmul.f32 %v5642_v56, %v5474_v14  ;;  %v5645_v28 = vadd.f32 1.0, %v8042_v48  ;;  %v5880_v16 = vperm.slane %v8102_v35, 7  ;;  %v6124_v35 = vld [vmem:[%s8983_s0 + $0x48] sm:$0xff] }
0x118a   : > { %5832 = vmatmul.f32.gmra.mxu3 %v5664_v3  ;;  %v5643_v53 = vadd.f32 1.0, %v8044_v4 }
0x118b   : > { %5765 = vmatmul.f32.gmra.mxu1 %v5666_v25  ;;  %v5669_v38 = vmul.f32 %v5645_v28, %v5477_v9  ;;  %v8046_v57 = vpop.eup %8045 }
0x118c   : > { %v5667_v22 = vmul.f32 %v5643_v53, %v5475_v29  ;;  %v5644_v33 = vadd.f32 1.0, %v8046_v57 }
0x118d   : > { %5870 = vmatmul.f32.gmra.mxu0 %v5669_v38 }
0x118e   : > { %v5668_v0 = vmul.f32 %v5644_v33, %v5476_v50 }
0x1190   : > { %5800 = vmatmul.f32.gmra.mxu2 %v5667_v22 }
0x1192   : > { %5835 = vmatmul.f32.gmra.mxu3 %v5668_v0 }
0x1193   : > { %v5751_v49 = vpop.f32.mrf.mxu1 }
0x1194   : > { %v5856_v7 = vpop.f32.mrf.mxu0 }
0x119f   : > { %v5786_v1 = vpop.f32.mrf.mxu2 }
0x11a0   : > { %v5821_v34 = vpop.f32.mrf.mxu3  ;;  %v5787_v17 = vadd.f32 %v5786_v1, %v5751_v49  ;;  %v1012_v1 = vld [vmem:[%s8981_s17 + $0x40] sm:$0xff] }
0x11a2   : > { %v5822_v54 = vadd.f32 %v5821_v34, %v5787_v17  ;;  %v6129_v34 = vld [vmem:[%s8983_s0 + $0x70] sm:$0xff]  ;;  %v6127_v17 = vld [vmem:[%s8983_s0 + $0x60] sm:$0xff] }
0x11a4   : > { %v5857_v12 = vadd.f32 %v5856_v7, %v5822_v54  ;;  %v6162_v7 = vld [vmem:[%s8983_s0 + $0x178] sm:$0xff] }
0x11a5   : > { %6379 = vmatpush.msra.mxu2 %v6162_v7  ;;  %v6158_v54 = vld [vmem:[%s8983_s0 + $0x158] sm:$0xff] }
0x11a6   : > { %v5874_v4 = vadd.f32 %v5857_v12, %v10855_v8 }
0x11b3   : > { %v5754_v51 = vpop.f32.mrf.mxu1 }
0x11b4   : > { %v5859_v24 = vpop.f32.mrf.mxu0 }
0x11bf   : > { %v5789_v18 = vpop.f32.mrf.mxu2 }
0x11c0   : > { %v5824_v11 = vpop.f32.mrf.mxu3  ;;  %v5790_v42 = vadd.f32 %v5789_v18, %v5754_v51  ;;  %v6161_v18 = vld [vmem:[%s8983_s0 + $0x170] sm:$0xff] }
0x11c1   : > { %6380 = vmatpush.msra.mxu2 %v6161_v18  ;;  %v5948_v18 = vld [vmem:[#allocation16] sm:$0x3] }
0x11c2   : > { %v5825_v15 = vadd.f32 %v5824_v11, %v5790_v42 }
0x11c4   : > { %v5860_v32 = vadd.f32 %v5859_v24, %v5825_v15  ;;  %v6128_v24 = vld [vmem:[%s8983_s0 + $0x68] sm:$0xff] }
0x11c6   : > { %v5875_v39 = vadd.f32 %v5860_v32, %v10859_v21  ;;  %v6176_v32 = vld [vmem:[%s8983_s0 + $0x1e8] sm:$0xff] }
0x11c8   : > { %v5882_v38 = vadd.f32 %v5880_v16, %v5875_v39  ;;  %v6156_v39 = vld [vmem:[%s8983_s0 + $0x148] sm:$0xff] }
0x11ca   : > { %v5912_v57 = vmax.f32 %v5882_v38, 1e-06 }
0x11ed   : > { %v5757_v62 = vpop.f32.mrf.mxu1 }
0x11ee   : > { %v5862_v20 = vpop.f32.mrf.mxu0 }
0x11f5   : > { %v5760_v10 = vpop.f32.mrf.mxu1 }
0x11f6   : > { %v5865_v26 = vpop.f32.mrf.mxu0 }
0x11f9   : > { %v5792_v5 = vpop.f32.mrf.mxu2 }
0x11fa   : > { %v5827_v43 = vpop.f32.mrf.mxu3  ;;  %v5793_v46 = vadd.f32 %v5792_v5, %v5757_v62  ;;  %v11209_v5 = vperm.slane %v1012_v1, 0  ;;  %v6118_v1 = vld [vmem:[%s8983_s0 + $0x18] sm:$0xff] }
0x11fc   : > { %v5828_v60 = vadd.f32 %v5827_v43, %v5793_v46  ;;  %vm5979_vm6 = vweird.f32 %v11209_v5 }
0x11fe   : > { %v5763_v23 = vpop.f32.mrf.mxu1  ;;  %v5863_v30 = vadd.f32 %v5862_v20, %v5828_v60  ;;  %v6160_v20 = vld [vmem:[%s8983_s0 + $0x168] sm:$0xff] }
0x11ff   : > { %6381 = vmatpush.msra.mxu2 %v6160_v20  ;;  %v5994_v20 = vld [vmem:[#allocation18 + $0x18] sm:$0xf] }
0x1200   : > { %v5876_v40 = vadd.f32 %v5863_v30, %v10863_v47 }
0x1201   : > { %v5795_v31 = vpop.f32.mrf.mxu2 }
0x1202   : > { %v5796_v55 = vadd.f32 %v5795_v31, %v5760_v10  ;;  %v5868_v45 = vpop.f32.mrf.mxu0  ;;  %v5883_v28 = vadd.f32 %v5880_v16, %v5876_v40  ;;  %v5991_v31 = vld [vmem:[#allocation18] sm:$0xff] }
0x1203   : > { %v5830_v37 = vpop.f32.mrf.mxu3 }
0x1204   : > { %v5831_v19 = vadd.f32 %v5830_v37, %v5796_v55  ;;  %v5913_v21 = vmax.f32 %v5883_v28, 1e-06  ;;  %v5887_v37 = vld [vmem:[#allocation15] sm:$0x3] }
0x1206   : > { %v5866_v2 = vadd.f32 %v5865_v26, %v5831_v19  ;;  %v6178_v19 = vld [vmem:[%s8983_s0 + $0x1f8] sm:$0xff] }
0x1208   : > { %v5877_v52 = vadd.f32 %v5866_v2, %v10867_v6  ;;  %v5766_v36 = vpop.f32.mrf.mxu1  ;;  %v6177_v2 = vld [vmem:[%s8983_s0 + $0x1f0] sm:$0xff] }
0x120a   : > { %v5884_v3 = vadd.f32 %v5880_v16, %v5877_v52  ;;  %v5871_v53 = vpop.f32.mrf.mxu0  ;;  %v6125_v52 = vld [vmem:[%s8983_s0 + $0x50] sm:$0xff] }
0x120b   : > { %v5798_v61 = vpop.f32.mrf.mxu2 }
0x120c   : > { %v5799_v13 = vadd.f32 %v5798_v61, %v5763_v23  ;;  %v5914_v29 = vmax.f32 %v5884_v3, 1e-06  ;;  %v6159_v23 = vld [vmem:[%s8983_s0 + $0x160] sm:$0xff] }
0x120d   : > { %v5833_v41 = vpop.f32.mrf.mxu3  ;;  %6382 = vmatpush.msra.mxu2 %v6159_v23  ;;  %v6143_v23 = vld [vmem:[%s8983_s0 + $0xe0] sm:$0xff] }
0x120e   : > { %v5834_v59 = vadd.f32 %v5833_v41, %v5799_v13  ;;  %v6126_v13 = vld [vmem:[%s8983_s0 + $0x58] sm:$0xff] }
0x120f   : > { %6383 = vmatpush.msra.mxu2 %v6158_v54  ;;  %v6192_v54 = vld [vmem:[%s8983_s0 + $0x268] sm:$0xff] }
0x1210   : > { %v5869_v27 = vadd.f32 %v5868_v45, %v5834_v59 }
0x1212   : > { %v5878_v58 = vadd.f32 %v5869_v27, %v10871_v44  ;;  %v5881_v44 = vadd.f32 %v5880_v16, %v5874_v4  ;;  %v6157_v27 = vld [vmem:[%s8983_s0 + $0x150] sm:$0xff] }
0x1213   : > { %v5801_v14 = vpop.f32.mrf.mxu2  ;;  %6384 = vmatpush.msra.mxu2 %v6157_v27  ;;  %v6191_v27 = vld [vmem:[%s8983_s0 + $0x260] sm:$0xff] }
0x1214   : > { %v5802_v56 = vadd.f32 %v5801_v14, %v5766_v36  ;;  %v5885_v48 = vadd.f32 %v5880_v16, %v5878_v58  ;;  %v5911_v33 = vmax.f32 %v5881_v44, 1e-06  ;;  %v6175_v58 = vld [vmem:[%s8983_s0 + $0x1e0] sm:$0xff] }
0x1215   : > { %v5836_v25 = vpop.f32.mrf.mxu3  ;;  %6385 = vmatpush.msra.mxu2 %v6156_v39  ;;  %v6240_v39 = vld [vmem:[%s8983_s0 + $0x3e8] sm:$0xff] }
0x1216   : > { %v5837_v9 = vadd.f32 %v5836_v25, %v5802_v56  ;;  %v5915_v6 = vmax.f32 %v5885_v48, 1e-06  ;;  %v6174_v56 = vld [vmem:[%s8983_s0 + $0x1d8] sm:$0xff]  ;;  %v6173_v25 = vld [vmem:[%s8983_s0 + $0x1d0] sm:$0xff] }
0x1218   : > { %v5872_v47 = vadd.f32 %v5871_v53, %v5837_v9  ;;  %8047 = vlog2.f32 %v5915_v6  ;;  %v6122_v9 = vld [vmem:[%s8983_s0 + $0x38] sm:$0xff] }
0x1219   : > { %8049 = vlog2.f32 %v5914_v29  ;;  %v6154_v6 = vld [vmem:[%s8983_s0 + $0x138] sm:$0xff]  ;;  %v6153_v29 = vld [vmem:[%s8983_s0 + $0x130] sm:$0xff] }
0x121a   : > { %v5879_v22 = vadd.f32 %v5872_v47, %v10875_v63  ;;  %8051 = vlog2.f32 %v5913_v21  ;;  %v6130_v63 = vld [vmem:[%s8983_s0 + $0x78] sm:$0xff]  ;;  %v6121_v47 = vld [vmem:[%s8983_s0 + $0x30] sm:$0xff]  ;;  %v5993_v21 = vld [vmem:[#allocation18 + $0x10] sm:$0xff] }
0x121b   : > { %8053 = vlog2.f32 %v5912_v57  ;;  %6339 = vmatpush.msrb.mxu0 %v6130_v63  ;;  %v6120_v57 = vld [vmem:[%s8983_s0 + $0x28] sm:$0xff] }
0x121c   : > { %v5886_v50 = vadd.f32 %v5880_v16, %v5879_v22  ;;  %v5992_v16 = vld [vmem:[#allocation18 + $0x8] sm:$0xff] }
0x121d   : > { %6340 = vmatpush.msrb.mxu0 %v6129_v34  ;;  %v6171_v22 = vld [vmem:[%s8983_s0 + $0x1c0] sm:$0xff] }
0x121e   : > { %v5916_v8 = vmax.f32 %v5886_v50, 1e-06  ;;  %5901 = vmatpush.msra.mxu1 %v5886_v50  ;;  %6017 = vmatpush.msra.mxu3 %v5886_v50  ;;  %v8048_v0 = vpop.eup %8047  ;;  %v6151_v34 = vld [vmem:[%s8983_s0 + $0x120] sm:$0xff] }
0x121f   : > { %v8050_v49 = vpop.eup %8049  ;;  %v5926_v51 = vmul.f32 0.6931472, %v8048_v0  ;;  %6341 = vmatpush.msrb.mxu0 %v6128_v24  ;;  %v6152_v0 = vld [vmem:[%s8983_s0 + $0x128] sm:$0xff] }
0x1220   : > { %8055 = vlog2.f32 %v5916_v8  ;;  %5902 = vmatpush.msra.mxu1 %v5885_v48  ;;  %6018 = vmatpush.msra.mxu3 %v5885_v48  ;;  %v8052_v11 = vpop.eup %8051  ;;  %v5924_v43 = vmul.f32 0.6931472, %v8050_v49  ;;  %v6123_v48 = vld [vmem:[%s8983_s0 + $0x40] sm:$0xff]  ;;  %v6169_v49 = vld [vmem:[%s8983_s0 + $0x1b0] sm:$0xff] }
0x1221   : > { %8057 = vlog2.f32 %v5911_v33  ;;  %v8054_v62 = vpop.eup %8053  ;;  %v5934_v46 = vmul.f32 %v11209_v5, %v5926_v51  ;;  %v5922_v42 = vmul.f32 0.6931472, %v8052_v11  ;;  %6342 = vmatpush.msrb.mxu0 %v6127_v17  ;;  %v6170_v33 = vld [vmem:[%s8983_s0 + $0x1b8] sm:$0xff]  ;;  %v6119_v8 = vld [vmem:[%s8983_s0 + $0x20] sm:$0xff]  ;;  %v6168_v51 = vld [vmem:[%s8983_s0 + $0x1a8] sm:$0xff] }
0x1222   : > { %5903 = vmatpush.msra.mxu1 %v5884_v3  ;;  %6019 = vmatpush.msra.mxu3 %v5884_v3  ;;  %v5933_v15 = vmul.f32 %v11209_v5, %v5924_v43  ;;  %v5920_v61 = vmul.f32 0.6931472, %v8054_v62  ;;  %v6155_v3 = vld [vmem:[%s8983_s0 + $0x140] sm:$0xff]  ;;  %v6117_v11 = vld [vmem:[%s8983_s0 + $0x10] sm:$0xff]  ;;  %v6146_v62 = vld [vmem:[%s8983_s0 + $0xf8] sm:$0xff] }
0x1223   : > { %v5944_v30 = vmul.f32 1.442695, %v5934_v46  ;;  %v5932_v59 = vmul.f32 %v11209_v5, %v5922_v42  ;;  %6343 = vmatpush.msrb.mxu0 %v6126_v13  ;;  %6386 = vmatpush.msra.mxu2 %v6155_v3  ;;  %v6150_v43 = vld [vmem:[%s8983_s0 + $0x118] sm:$0xff]  ;;  %v6144_v46 = vld [vmem:[%s8983_s0 + $0xe8] sm:$0xff]  ;;  %v6137_v3 = vld [vmem:[%s8983_s0 + $0xb0] sm:$0xff] }
0x1224   : > { %5904 = vmatpush.msra.mxu1 %v5883_v28  ;;  %6020 = vmatpush.msra.mxu3 %v5883_v28  ;;  %v5942_v12 = vmul.f32 1.442695, %v5933_v15  ;;  %v5931_v40 = vmul.f32 %v11209_v5, %v5920_v61  ;;  %v6166_v42 = vld [vmem:[%s8983_s0 + $0x198] sm:$0xff]  ;;  %v6147_v15 = vld [vmem:[%s8983_s0 + $0x100] sm:$0xff]  ;;  %v6193_v61 = vld [vmem:[%s8983_s0 + $0x270] sm:$0xff] }
0x1225   : > { %6344 = vmatpush.msrb.mxu0 %v6125_v52  ;;  %v5940_v36 = vmul.f32 1.442695, %v5932_v59  ;;  %6387 = vmatpush.msra.mxu2 %v6154_v6  ;;  %v6194_v17 = vld [vmem:[%s8983_s0 + $0x278] sm:$0xff]  ;;  %v6164_v13 = vld [vmem:[%s8983_s0 + $0x188] sm:$0xff]  ;;  %v6225_v59 = vld [vmem:[%s8983_s0 + $0x370] sm:$0xff] }
0x1226   : > { %v8056_v10 = vpop.eup %8055  ;;  %5905 = vmatpush.msra.mxu1 %v5882_v38  ;;  %6021 = vmatpush.msra.mxu3 %v5882_v38  ;;  %v5938_v4 = vmul.f32 1.442695, %v5931_v40  ;;  %v6172_v38 = vld [vmem:[%s8983_s0 + $0x1c8] sm:$0xff]  ;;  %v6241_v40 = vld [vmem:[%s8983_s0 + $0x3f0] sm:$0xff] }
0x1227   : > { %v8058_v26 = vpop.eup %8057  ;;  %v5928_v55 = vmul.f32 0.6931472, %v8056_v10  ;;  %6345 = vmatpush.msrb.mxu0 %v6124_v35  ;;  %6388 = vmatpush.msra.mxu2 %v6153_v29  ;;  %v6116_v10 = vld [vmem:[%s8983_s0 + $0x8] sm:$0xff]  ;;  %v6190_v35 = vld [vmem:[%s8983_s0 + $0x258] sm:$0xff] }
0x1228   : > { %5906 = vmatpush.msra.mxu1 %v5881_v44  ;;  %6022 = vmatpush.msra.mxu3 %v5881_v44  ;;  %v5918_v41 = vmul.f32 0.6931472, %v8058_v26  ;;  %v6149_v26 = vld [vmem:[%s8983_s0 + $0x110] sm:$0xff]  ;;  %v6140_v52 = vld [vmem:[%s8983_s0 + $0xc8] sm:$0xff]  ;;  %v6186_v29 = vld [vmem:[%s8983_s0 + $0x238] sm:$0xff] }
0x1229   : > { %v5935_v60 = vmul.f32 %v11209_v5, %v5928_v55  ;;  %7410 = vmatmul.msk.f32.vlgmr.msra.gmra.mxu3 %vm950_vm0, %v5991_v31  ;;  %7408 = vmatmul.msk.f32.vlgmr.msra.gmra.mxu1 %vm950_vm0, %v5887_v37  ;;  %v6145_v31 = vld [vmem:[%s8983_s0 + $0xf0] sm:$0xff]  ;;  %v6167_v37 = vld [vmem:[%s8983_s0 + $0x1a0] sm:$0xff]  ;;  %v6136_v6 = vld [vmem:[%s8983_s0 + $0xa8] sm:$0xff] }
0x122a   : > { %6399 = vmatpush.msrb.mxu3 %v6178_v19  ;;  %v5930_v14 = vmul.f32 %v11209_v5, %v5918_v41  ;;  %6346 = vmatpush.msrb.mxu0 %v6123_v48  ;;  %v6115_v55 = vld [vmem:[%s8983_s0] sm:$0xff]  ;;  %v6148_v19 = vld [vmem:[%s8983_s0 + $0x108] sm:$0xff]  ;;  %v6226_v41 = vld [vmem:[%s8983_s0 + $0x378] sm:$0xff] }
0x122b   : > { %v5946_v45 = vmul.f32 1.442695, %v5935_v60  ;;  %6389 = vmatpush.msra.mxu2 %v6152_v0  ;;  %v6165_v60 = vld [vmem:[%s8983_s0 + $0x190] sm:$0xff]  ;;  %v6239_v48 = vld [vmem:[%s8983_s0 + $0x3e0] sm:$0xff]  ;;  %v6184_v0 = vld [vmem:[%s8983_s0 + $0x228] sm:$0xff] }
0x122c   : > { %6400 = vmatpush.msrb.mxu3 %v6177_v2  ;;  %v5936_v53 = vmul.f32 1.442695, %v5930_v14  ;;  %6347 = vmatpush.msrb.mxu0 %v6122_v9  ;;  %v6142_v2 = vld [vmem:[%s8983_s0 + $0xd8] sm:$0xff]  ;;  %v6189_v14 = vld [vmem:[%s8983_s0 + $0x250] sm:$0xff] }
0x122d   : > { %8059 = vpow2.f32 %v5946_v45  ;;  %6390 = vmatpush.msra.mxu2 %v6151_v34  ;;  %v6141_v45 = vld [vmem:[%s8983_s0 + $0xd0] sm:$0xff]  ;;  %v6238_v9 = vld [vmem:[%s8983_s0 + $0x3d8] sm:$0xff]  ;;  %v6183_v34 = vld [vmem:[%s8983_s0 + $0x220] sm:$0xff] }
0x122e   : > { %6401 = vmatpush.msrb.mxu3 %v6176_v32  ;;  %8061 = vpow2.f32 %v5944_v30  ;;  %6348 = vmatpush.msrb.mxu0 %v6121_v47  ;;  %v6163_v30 = vld [vmem:[%s8983_s0 + $0x180] sm:$0xff]  ;;  %v6242_v32 = vld [vmem:[%s8983_s0 + $0x3f8] sm:$0xff] }
0x122f   : > { %8063 = vpow2.f32 %v5942_v12  ;;  %6391 = vmatpush.msra.mxu2 %v6150_v43  ;;  %v6224_v12 = vld [vmem:[%s8983_s0 + $0x368] sm:$0xff]  ;;  %v6135_v47 = vld [vmem:[%s8983_s0 + $0xa0] sm:$0xff] }
0x1230   : > { %6402 = vmatpush.msrb.mxu3 %v6175_v58  ;;  %8065 = vpow2.f32 %v5940_v36  ;;  %6349 = vmatpush.msrb.mxu0 %v6120_v57  ;;  %v6139_v58 = vld [vmem:[%s8983_s0 + $0xc0] sm:$0xff]  ;;  %v6138_v36 = vld [vmem:[%s8983_s0 + $0xb8] sm:$0xff]  ;;  %v6185_v57 = vld [vmem:[%s8983_s0 + $0x230] sm:$0xff] }
0x1231   : > { %7411 = vmatmul.msk.f32.gmra.mxu3 %vm950_vm0, %v5992_v16  ;;  %8067 = vpow2.f32 %v5938_v4  ;;  %6392 = vmatpush.msra.mxu2 %v6149_v26  ;;  %v6223_v16 = vld [vmem:[%s8983_s0 + $0x360] sm:$0xff]  ;;  %v6188_v4 = vld [vmem:[%s8983_s0 + $0x248] sm:$0xff] }
0x1232   : > { %6403 = vmatpush.msrb.mxu3 %v6174_v56  ;;  %8069 = vpow2.f32 %v5936_v53  ;;  %6350 = vmatpush.msrb.mxu0 %v6119_v8  ;;  %v6222_v56 = vld [vmem:[%s8983_s0 + $0x358] sm:$0xff]  ;;  %v6220_v53 = vld [vmem:[%s8983_s0 + $0x348] sm:$0xff]  ;;  %v6133_v8 = vld [vmem:[%s8983_s0 + $0x90] sm:$0xff] }
0x1233   : > { %v8060_v28 = vpop.eup %8059  ;;  %6393 = vmatpush.msra.mxu2 %v6148_v19  ;;  %v6232_v43 = vld [vmem:[%s8983_s0 + $0x3a8] sm:$0xff]  ;;  %v6207_v19 = vld [vmem:[%s8983_s0 + $0x2e0] sm:$0xff]  ;;  %8071 = vrcp.f32 %v11209_v5 }
0x1234   : > { %5962 = vmatpush.msrb.mxu1 %v8060_v28  ;;  %6404 = vmatpush.msrb.mxu3 %v6173_v25  ;;  %v8062_v44 = vpop.eup %8061  ;;  %v6221_v25 = vld [vmem:[%s8983_s0 + $0x350] sm:$0xff]  ;;  %v6187_v28 = vld [vmem:[%s8983_s0 + $0x240] sm:$0xff]  ;;  %v6180_v26 = vld [vmem:[%s8983_s0 + $0x208] sm:$0xff] }
0x1235   : > { %v8064_v50 = vpop.eup %8063  ;;  %6351 = vmatpush.msrb.mxu0 %v6118_v1  ;;  %6394 = vmatpush.msra.mxu2 %v6147_v15  ;;  %v6132_v1 = vld [vmem:[%s8983_s0 + $0x88] sm:$0xff]  ;;  %v6203_v15 = vld [vmem:[%s8983_s0 + $0x2c0] sm:$0xff] }
0x1236   : > { %5963 = vmatpush.msrb.mxu1 %v8062_v44  ;;  %6405 = vmatpush.msrb.mxu3 %v6172_v38  ;;  %v8066_v63 = vpop.eup %8065  ;;  %v6237_v38 = vld [vmem:[%s8983_s0 + $0x3d0] sm:$0xff]  ;;  %v6219_v44 = vld [vmem:[%s8983_s0 + $0x340] sm:$0xff] }
0x1237   : > { %v8068_v7 = vpop.eup %8067  ;;  %6352 = vmatpush.msrb.mxu0 %v6117_v11  ;;  %6459 = vmatpush.msrb.mxu2 %v6226_v41  ;;  %v6182_v11 = vld [vmem:[%s8983_s0 + $0x218] sm:$0xff]  ;;  %v6199_v41 = vld [vmem:[%s8983_s0 + $0x2a0] sm:$0xff] }
0x1238   : > { %5964 = vmatpush.msrb.mxu1 %v8064_v50  ;;  %6406 = vmatpush.msrb.mxu3 %v6171_v22  ;;  %v8070_v24 = vpop.eup %8069  ;;  %v6236_v22 = vld [vmem:[%s8983_s0 + $0x3c8] sm:$0xff]  ;;  %v6218_v50 = vld [vmem:[%s8983_s0 + $0x338] sm:$0xff] }
0x1239   : > { %7412 = vmatmul.msk.f32.gmra.mxu3 %vm950_vm0, %v5993_v21  ;;  %6353 = vmatpush.msrb.mxu0 %v6116_v10  ;;  %v6134_v21 = vld [vmem:[%s8983_s0 + $0x98] sm:$0xff]  ;;  %v6209_v10 = vld [vmem:[%s8983_s0 + $0x2f0] sm:$0xff] }
0x123a   : > { %5965 = vmatpush.msrb.mxu1 %v8066_v63  ;;  %6407 = vmatpush.msrb.mxu3 %v6170_v33  ;;  %v6235_v33 = vld [vmem:[%s8983_s0 + $0x3c0] sm:$0xff]  ;;  %v6217_v63 = vld [vmem:[%s8983_s0 + $0x330] sm:$0xff] }
0x123b   : > { %6354 = vmatpush.msrb.mxu0 %v6115_v55  ;;  %6460 = vmatpush.msrb.mxu2 %v6225_v59  ;;  %v6208_v55 = vld [vmem:[%s8983_s0 + $0x2e8] sm:$0xff] }
0x123c   : > { %5966 = vmatpush.msrb.mxu1 %v8068_v7  ;;  %6408 = vmatpush.msrb.mxu3 %v6169_v49  ;;  %v6234_v49 = vld [vmem:[%s8983_s0 + $0x3b8] sm:$0xff]  ;;  %v6216_v7 = vld [vmem:[%s8983_s0 + $0x328] sm:$0xff] }
0x123d   : > { %6419 = vmatpush.msra.mxu0 %v6194_v17  ;;  %6461 = vmatpush.msrb.mxu2 %v6224_v12  ;;  %v6206_v17 = vld [vmem:[%s8983_s0 + $0x2d8] sm:$0xff]  ;;  %v6196_v59 = vld [vmem:[%s8983_s0 + $0x288] sm:$0xff]  ;;  %v6211_v12 = vld [vmem:[%s8983_s0 + $0x300] sm:$0xff] }
0x123e   : > { %5967 = vmatpush.msrb.mxu1 %v8070_v24  ;;  %6409 = vmatpush.msrb.mxu3 %v6168_v51  ;;  %v6233_v51 = vld [vmem:[%s8983_s0 + $0x3b0] sm:$0xff]  ;;  %v6210_v24 = vld [vmem:[%s8983_s0 + $0x2f8] sm:$0xff] }
0x123f   : > { %7409 = vmatmul.msk.f32.vlgmr.msrb.gmra.mxu1 %vm950_vm0, %v5948_v18  ;;  %6420 = vmatpush.msra.mxu0 %v6193_v61  ;;  %v6131_v18 = vld [vmem:[%s8983_s0 + $0x80] sm:$0xff]  ;;  %v6202_v61 = vld [vmem:[%s8983_s0 + $0x2b8] sm:$0xff] }
0x1240   : > { %6359 = vmatpush.msra.mxu1 %v6146_v62  ;;  %6410 = vmatpush.msrb.mxu3 %v6167_v37  ;;  %v6215_v62 = vld [vmem:[%s8983_s0 + $0x320] sm:$0xff] }
0x1241   : > { %7413 = vmatmul.msk.f32.gmra.mxu3 %vm950_vm0, %v5994_v20  ;;  %6421 = vmatpush.msra.mxu0 %v6192_v54  ;;  %v6181_v20 = vld [vmem:[%s8983_s0 + $0x210] sm:$0xff]  ;;  %v6231_v37 = vld [vmem:[%s8983_s0 + $0x3a0] sm:$0xff]  ;;  %v6198_v54 = vld [vmem:[%s8983_s0 + $0x298] sm:$0xff]  ;;  %vm6074_vm0 = vcmask 1041408  }
0x1242   : > { %6360 = vmatpush.msra.mxu1 %v6145_v31  ;;  %6411 = vmatpush.msrb.mxu3 %v6166_v42  ;;  %v6214_v31 = vld [vmem:[%s8983_s0 + $0x318] sm:$0xff] }
0x1243   : > { %6422 = vmatpush.msra.mxu0 %v6191_v27  ;;  %6462 = vmatpush.msrb.mxu2 %v6223_v16  ;;  %v6230_v42 = vld [vmem:[%s8983_s0 + $0x398] sm:$0xff]  ;;  %v6195_v27 = vld [vmem:[%s8983_s0 + $0x280] sm:$0xff] }
0x1244   : > { %6361 = vmatpush.msra.mxu1 %v6144_v46  ;;  %6412 = vmatpush.msrb.mxu3 %v6165_v60  ;;  %v6213_v46 = vld [vmem:[%s8983_s0 + $0x310] sm:$0xff]  ;;  %v6204_v60 = vld [vmem:[%s8983_s0 + $0x2c8] sm:$0xff] }
0x1245   : > { %6423 = vmatpush.msra.mxu0 %v6190_v35  ;;  %6463 = vmatpush.msrb.mxu2 %v6222_v56  ;;  %v6258_v35 = vld [vmem:[%s8983_s0 + $0x478] sm:$0xff] }
0x1246   : > { %6362 = vmatpush.msra.mxu1 %v6143_v23  ;;  %6413 = vmatpush.msrb.mxu3 %v6164_v13  ;;  %v6205_v23 = vld [vmem:[%s8983_s0 + $0x2d0] sm:$0xff]  ;;  %v6200_v13 = vld [vmem:[%s8983_s0 + $0x2a8] sm:$0xff] }
0x1247   : > { %6424 = vmatpush.msra.mxu0 %v6189_v14  ;;  %6464 = vmatpush.msrb.mxu2 %v6221_v25 }
0x1248   : > { %6363 = vmatpush.msra.mxu1 %v6142_v2  ;;  %6414 = vmatpush.msrb.mxu3 %v6163_v30  ;;  %v6201_v2 = vld [vmem:[%s8983_s0 + $0x2b0] sm:$0xff]  ;;  %v6179_v30 = vld [vmem:[%s8983_s0 + $0x200] sm:$0xff] }
0x1249   : > { %6425 = vmatpush.msra.mxu0 %v6188_v4  ;;  %6465 = vmatpush.msrb.mxu2 %v6220_v53  ;;  %v6290_v4 = vld [vmem:[%s8983_s0 + $0x578] sm:$0xff] }
0x124a   : > { %6364 = vmatpush.msra.mxu1 %v6141_v45  ;;  %6479 = vmatpush.msra.mxu3 %v6242_v32  ;;  %v6197_v45 = vld [vmem:[%s8983_s0 + $0x290] sm:$0xff]  ;;  %v6212_v32 = vld [vmem:[%s8983_s0 + $0x308] sm:$0xff] }
0x124b   : > { %6426 = vmatpush.msra.mxu0 %v6187_v28  ;;  %6466 = vmatpush.msrb.mxu2 %v6219_v44  ;;  %v6273_v28 = vld [vmem:[%s8983_s0 + $0x4f0] sm:$0xff] }
0x124c   : > { %6365 = vmatpush.msra.mxu1 %v6140_v52  ;;  %6480 = vmatpush.msra.mxu3 %v6241_v40  ;;  %v6229_v52 = vld [vmem:[%s8983_s0 + $0x390] sm:$0xff]  ;;  %v6228_v40 = vld [vmem:[%s8983_s0 + $0x388] sm:$0xff] }
0x124d   : > { %6427 = vmatpush.msra.mxu0 %v6186_v29  ;;  %6467 = vmatpush.msrb.mxu2 %v6218_v50  ;;  %v6288_v50 = vld [vmem:[%s8983_s0 + $0x568] sm:$0xff] }
0x124e   : > { %6366 = vmatpush.msra.mxu1 %v6139_v58  ;;  %6481 = vmatpush.msra.mxu3 %v6240_v39  ;;  %v6227_v58 = vld [vmem:[%s8983_s0 + $0x380] sm:$0xff] }
0x124f   : > { %6428 = vmatpush.msra.mxu0 %v6185_v57  ;;  %6468 = vmatpush.msrb.mxu2 %v6217_v63  ;;  %v6271_v63 = vld [vmem:[%s8983_s0 + $0x4e0] sm:$0xff] }
0x1250   : > { %6367 = vmatpush.msra.mxu1 %v6138_v36  ;;  %6482 = vmatpush.msra.mxu3 %v6239_v48  ;;  %v6257_v48 = vld [vmem:[%s8983_s0 + $0x470] sm:$0xff] }
0x1251   : > { %6429 = vmatpush.msra.mxu0 %v6184_v0  ;;  %6469 = vmatpush.msrb.mxu2 %v6216_v7  ;;  %v6254_v0 = vld [vmem:[%s8983_s0 + $0x458] sm:$0xff]  ;;  %v6287_v7 = vld [vmem:[%s8983_s0 + $0x560] sm:$0xff] }
0x1252   : > { %6368 = vmatpush.msra.mxu1 %v6137_v3  ;;  %6483 = vmatpush.msra.mxu3 %v6238_v9  ;;  %v6274_v3 = vld [vmem:[%s8983_s0 + $0x4f8] sm:$0xff] }
0x1253   : > { %6430 = vmatpush.msra.mxu0 %v6183_v34  ;;  %6470 = vmatpush.msrb.mxu2 %v6215_v62 }
0x1254   : > { %6369 = vmatpush.msra.mxu1 %v6136_v6  ;;  %6484 = vmatpush.msra.mxu3 %v6237_v38  ;;  %v6256_v6 = vld [vmem:[%s8983_s0 + $0x468] sm:$0xff]  ;;  %v6289_v38 = vld [vmem:[%s8983_s0 + $0x570] sm:$0xff] }
0x1255   : > { %6431 = vmatpush.msra.mxu0 %v6182_v11  ;;  %6471 = vmatpush.msrb.mxu2 %v6214_v31  ;;  %v6286_v31 = vld [vmem:[%s8983_s0 + $0x558] sm:$0xff] }
0x1256   : > { %6370 = vmatpush.msra.mxu1 %v6135_v47  ;;  %6485 = vmatpush.msra.mxu3 %v6236_v22  ;;  %v6306_v47 = vld [vmem:[%s8983_s0 + $0x5f8] sm:$0xff]  ;;  %v6255_v22 = vld [vmem:[%s8983_s0 + $0x460] sm:$0xff] }
0x1257   : > { %6432 = vmatpush.msra.mxu0 %v6181_v20  ;;  %6472 = vmatpush.msrb.mxu2 %v6213_v46  ;;  %v6270_v20 = vld [vmem:[%s8983_s0 + $0x4d8] sm:$0xff] }
0x1258   : > { %6371 = vmatpush.msra.mxu1 %v6134_v21  ;;  %6486 = vmatpush.msra.mxu3 %v6235_v33  ;;  %v6272_v21 = vld [vmem:[%s8983_s0 + $0x4e8] sm:$0xff]  ;;  %v6305_v33 = vld [vmem:[%s8983_s0 + $0x5f0] sm:$0xff] }
0x1259   : > { %6433 = vmatpush.msra.mxu0 %v6180_v26  ;;  %6473 = vmatpush.msrb.mxu2 %v6212_v32  ;;  %v6250_v32 = vld [vmem:[%s8983_s0 + $0x438] sm:$0xff] }
0x125a   : > { %6372 = vmatpush.msra.mxu1 %v6133_v8  ;;  %6487 = vmatpush.msra.mxu3 %v6234_v49 }
0x125b   : > { %6434 = vmatpush.msra.mxu0 %v6179_v30  ;;  %6474 = vmatpush.msrb.mxu2 %v6211_v12  ;;  %v6301_v30 = vld [vmem:[%s8983_s0 + $0x5d0] sm:$0xff] }
0x125c   : > { %6373 = vmatpush.msra.mxu1 %v6132_v1  ;;  %6488 = vmatpush.msra.mxu3 %v6233_v51  ;;  %v6304_v51 = vld [vmem:[%s8983_s0 + $0x5e8] sm:$0xff] }
0x125e   : > { %6374 = vmatpush.msra.mxu1 %v6131_v18  ;;  %6489 = vmatpush.msra.mxu3 %v6232_v43  ;;  %v6253_v43 = vld [vmem:[%s8983_s0 + $0x450] sm:$0xff] }
0x1260   : > { %6439 = vmatpush.msrb.mxu1 %v6210_v24  ;;  %6490 = vmatpush.msra.mxu3 %v6231_v37  ;;  %v6303_v37 = vld [vmem:[%s8983_s0 + $0x5e0] sm:$0xff] }
0x1262   : > { %6440 = vmatpush.msrb.mxu1 %v6209_v10  ;;  %6491 = vmatpush.msra.mxu3 %v6230_v42 }
0x1264   : > { %6441 = vmatpush.msrb.mxu1 %v6208_v55  ;;  %6492 = vmatpush.msra.mxu3 %v6229_v52  ;;  %v6267_v52 = vld [vmem:[%s8983_s0 + $0x4c0] sm:$0xff] }
0x1266   : > { %6442 = vmatpush.msrb.mxu1 %v6207_v19  ;;  %6493 = vmatpush.msra.mxu3 %v6228_v40  ;;  %v6252_v19 = vld [vmem:[%s8983_s0 + $0x448] sm:$0xff]  ;;  %v6283_v40 = vld [vmem:[%s8983_s0 + $0x540] sm:$0xff] }
0x1268   : > { %6443 = vmatpush.msrb.mxu1 %v6206_v17  ;;  %6494 = vmatpush.msra.mxu3 %v6227_v58  ;;  %v6269_v17 = vld [vmem:[%s8983_s0 + $0x4d0] sm:$0xff]  ;;  %v6300_v58 = vld [vmem:[%s8983_s0 + $0x5c8] sm:$0xff] }
0x126a   : > { %6444 = vmatpush.msrb.mxu1 %v6205_v23 }
0x126c   : > { %6445 = vmatpush.msrb.mxu1 %v6204_v60  ;;  %v6285_v60 = vld [vmem:[%s8983_s0 + $0x550] sm:$0xff] }
0x126e   : > { %6446 = vmatpush.msrb.mxu1 %v6203_v15  ;;  %v6302_v15 = vld [vmem:[%s8983_s0 + $0x5d8] sm:$0xff] }
0x1270   : > { %6447 = vmatpush.msrb.mxu1 %v6202_v61 }
0x1272   : > { %6448 = vmatpush.msrb.mxu1 %v6201_v2 }
0x1274   : > { %6449 = vmatpush.msrb.mxu1 %v6200_v13  ;;  %v6251_v13 = vld [vmem:[%s8983_s0 + $0x440] sm:$0xff] }
0x1276   : > { %6450 = vmatpush.msrb.mxu1 %v6199_v41  ;;  %v6268_v41 = vld [vmem:[%s8983_s0 + $0x4c8] sm:$0xff] }
0x1278   : > { %6451 = vmatpush.msrb.mxu1 %v6198_v54 }
0x127a   : > { %6452 = vmatpush.msrb.mxu1 %v6197_v45  ;;  %v6284_v45 = vld [vmem:[%s8983_s0 + $0x548] sm:$0xff] }
0x127c   : > { %6453 = vmatpush.msrb.mxu1 %v6196_v59 }
0x127e   : > { %6454 = vmatpush.msrb.mxu1 %v6195_v27 }
0x12ac   : > { %v6024_v16 = vpop.f32.mrf.mxu3 }
0x12ad   : > { %v6037_v39 = vrot.slane %v6024_v16, 2  ;;  %v6039_v36 = vrot.slane %v6024_v16, 4  ;;  %v6041_v14 = vrot.slane %v6024_v16, 6  ;;  %v6060_v56 = vmul.f32 %v6024_v16, %v6024_v16  ;;  %6355 = vmatmul.f32.vlgmr.msrb.gmra.mxu0 %v6024_v16 }
0x12ae   : > { %6499 = vmatpush.msrb.mxu0 %v6258_v35 }
0x12af   : > { %v6061_v25 = vmul.f32 %v6037_v39, %v6037_v39  ;;  %v6062_v9 = vmul.f32 %v6039_v36, %v6039_v36  ;;  %6375 = vmatmul.f32.vlgmr.msra.gmra.mxu1 %v6037_v39  ;;  %6395 = vmatmul.f32.vlgmr.msra.gmra.mxu2 %v6039_v36  ;;  %v6063_v53 = vmul.f32 %v6041_v14, %v6041_v14  ;;  %v6075_v29 = vsel %vm6074_vm0, %v6060_v56, 0.0  ;;  %v6266_v56 = vld [vmem:[%s8983_s0 + $0x4b8] sm:$0xff] }
0x12b0   : > { %6500 = vmatpush.msrb.mxu0 %v6257_v48  ;;  %6519 = vmatpush.msra.mxu1 %v6274_v3  ;;  %v6282_v3 = vld [vmem:[%s8983_s0 + $0x538] sm:$0xff] }
0x12b1   : > { %v6076_v44 = vsel %vm6074_vm0, %v6061_v25, 0.0  ;;  %6539 = vmatpush.msra.mxu2 %v6290_v4  ;;  %6415 = vmatmul.f32.vlgmr.msrb.gmra.mxu3 %v6041_v14  ;;  %v6078_v8 = vsel %vm6074_vm0, %v6062_v9, 0.0  ;;  %v6080_v1 = vsel %vm6074_vm0, %v6063_v53, 0.0  ;;  %v6249_v14 = vld [vmem:[%s8983_s0 + $0x430] sm:$0xff]  ;;  %v6299_v4 = vld [vmem:[%s8983_s0 + $0x5c0] sm:$0xff]  ;;  %v6248_v53 = vld [vmem:[%s8983_s0 + $0x428] sm:$0xff] }
0x12b2   : > { %v6077_v57 = vadd.f32 %v6076_v44, %v6075_v29  ;;  %6501 = vmatpush.msrb.mxu0 %v6256_v6  ;;  %6520 = vmatpush.msra.mxu1 %v6273_v28  ;;  %v6281_v29 = vld [vmem:[%s8983_s0 + $0x530] sm:$0xff]  ;;  %v6298_v44 = vld [vmem:[%s8983_s0 + $0x5b8] sm:$0xff] }
0x12b3   : > { %6540 = vmatpush.msra.mxu2 %v6289_v38  ;;  %6559 = vmatpush.msrb.mxu3 %v6306_v47  ;;  %v6265_v38 = vld [vmem:[%s8983_s0 + $0x4b0] sm:$0xff] }
0x12b4   : > { %v6079_v49 = vadd.f32 %v6078_v8, %v6077_v57  ;;  %6502 = vmatpush.msrb.mxu0 %v6255_v22  ;;  %6521 = vmatpush.msra.mxu1 %v6272_v21  ;;  %v11364_v34 = vpop.f32.mrf.mxu3  ;;  %v6247_v21 = vld [vmem:[%s8983_s0 + $0x420] sm:$0xff] }
0x12b5   : > { %6541 = vmatpush.msra.mxu2 %v6288_v50  ;;  %6560 = vmatpush.msrb.mxu3 %v6305_v33  ;;  %v11369_v18 = vrot.slane %v11364_v34, 2  ;;  %v11372_v11 = vrot.slane %v11364_v34, 4  ;;  %v11375_v24 = vrot.slane %v11364_v34, 6  ;;  %v6064_v62 = vmul.f32 %v11364_v34, %v11364_v34  ;;  %v6264_v50 = vld [vmem:[%s8983_s0 + $0x4a8] sm:$0xff] }
0x12b6   : > { %v6081_v10 = vadd.f32 %v6080_v1, %v6079_v49  ;;  %6503 = vmatpush.msrb.mxu0 %v6254_v0  ;;  %6522 = vmatpush.msra.mxu1 %v6271_v63  ;;  %v6280_v33 = vld [vmem:[%s8983_s0 + $0x528] sm:$0xff]  ;;  %v6297_v0 = vld [vmem:[%s8983_s0 + $0x5b0] sm:$0xff]  ;;  %v6246_v1 = vld [vmem:[%s8983_s0 + $0x418] sm:$0xff] }
0x12b7   : > { %v6065_v26 = vmul.f32 %v11369_v18, %v11369_v18  ;;  %v6066_v55 = vmul.f32 %v11372_v11, %v11372_v11  ;;  %v6067_v46 = vmul.f32 %v11375_v24, %v11375_v24  ;;  %v6082_v42 = vsel %vm6074_vm0, %v6064_v62, 0.0  ;;  %6542 = vmatpush.msra.mxu2 %v6287_v7  ;;  %6561 = vmatpush.msrb.mxu3 %v6304_v51 }
0x12b8   : > { %v6083_v23 = vadd.f32 %v6082_v42, %v6081_v10  ;;  %6504 = vmatpush.msrb.mxu0 %v6253_v43  ;;  %6523 = vmatpush.msra.mxu1 %v6270_v20  ;;  %v6263_v43 = vld [vmem:[%s8983_s0 + $0x4a0] sm:$0xff] }
0x12b9   : > { %v6084_v61 = vsel %vm6074_vm0, %v6065_v26, 0.0  ;;  %v6086_v2 = vsel %vm6074_vm0, %v6066_v55, 0.0  ;;  %6543 = vmatpush.msra.mxu2 %v6286_v31  ;;  %6562 = vmatpush.msrb.mxu3 %v6303_v37  ;;  %v6088_v59 = vsel %vm6074_vm0, %v6067_v46, 0.0  ;;  %v6279_v20 = vld [vmem:[%s8983_s0 + $0x520] sm:$0xff]  ;;  %v6245_v26 = vld [vmem:[%s8983_s0 + $0x410] sm:$0xff]  ;;  %v6262_v55 = vld [vmem:[%s8983_s0 + $0x498] sm:$0xff] }
0x12ba   : > { %v6085_v54 = vadd.f32 %v6084_v61, %v6083_v23  ;;  %6505 = vmatpush.msrb.mxu0 %v6252_v19  ;;  %6524 = vmatpush.msra.mxu1 %v6269_v17  ;;  %v6295_v46 = vld [vmem:[%s8983_s0 + $0x5a0] sm:$0xff]  ;;  %v6261_v19 = vld [vmem:[%s8983_s0 + $0x490] sm:$0xff]  ;;  %v6260_v61 = vld [vmem:[%s8983_s0 + $0x488] sm:$0xff] }
0x12bb   : > { %6544 = vmatpush.msra.mxu2 %v6285_v60  ;;  %6563 = vmatpush.msrb.mxu3 %v6302_v15  ;;  %v6277_v23 = vld [vmem:[%s8983_s0 + $0x510] sm:$0xff]  ;;  %v6294_v60 = vld [vmem:[%s8983_s0 + $0x598] sm:$0xff]  ;;  %v6243_v15 = vld [vmem:[%s8983_s0 + $0x400] sm:$0xff] }
0x12bc   : > { %v6087_v27 = vadd.f32 %v6086_v2, %v6085_v54  ;;  %6506 = vmatpush.msrb.mxu0 %v6251_v13  ;;  %6525 = vmatpush.msra.mxu1 %v6268_v41  ;;  %v11403_v12 = vpop.f32.mrf.mxu3  ;;  %v6276_v2 = vld [vmem:[%s8983_s0 + $0x508] sm:$0xff]  ;;  %v11472_v41 = vpop.f32.mrf.mxu1 }
0x12bd   : > { %6545 = vmatpush.msra.mxu2 %v6284_v45  ;;  %6564 = vmatpush.msrb.mxu3 %v6301_v30  ;;  %v11408_v35 = vrot.slane %v11403_v12, 2  ;;  %v11411_v16 = vrot.slane %v11403_v12, 4  ;;  %v11414_v39 = vrot.slane %v11403_v12, 6  ;;  %v6068_v36 = vmul.f32 %v11403_v12, %v11403_v12  ;;  %v11474_v54 = vpop.eup %8071  ;;  %v6322_v45 = vld [vmem:[%s8983_s0 + $0x678] sm:$0xff]  ;;  %v6259_v30 = vld [vmem:[%s8983_s0 + $0x480] sm:$0xff] }
0x12be   : > { %v6089_v48 = vadd.f32 %v6088_v59, %v6087_v27  ;;  %6507 = vmatpush.msrb.mxu0 %v6250_v32  ;;  %6526 = vmatpush.msra.mxu1 %v6267_v52  ;;  %v6275_v59 = vld [vmem:[%s8983_s0 + $0x500] sm:$0xff]  ;;  %v6292_v32 = vld [vmem:[%s8983_s0 + $0x588] sm:$0xff]  ;;  %v6321_v52 = vld [vmem:[%s8983_s0 + $0x670] sm:$0xff]  ;;  %v5975_v27 = vmul.f32 %v11474_v54, %v11209_v5  ;;  %vm5980_vm7 = vweird.f32 %v11474_v54 }
0x12bf   : > { %v6069_v25 = vmul.f32 %v11408_v35, %v11408_v35  ;;  %v6070_v9 = vmul.f32 %v11411_v16, %v11411_v16  ;;  %v6071_v6 = vmul.f32 %v11414_v39, %v11414_v39  ;;  %v6090_v28 = vsel %vm6074_vm0, %v6068_v36, 0.0  ;;  %6546 = vmatpush.msra.mxu2 %v6283_v40  ;;  %6565 = vmatpush.msrb.mxu3 %v6300_v58  ;;  %v6338_v40 = vld [vmem:[%s8983_s0 + $0x6f8] sm:$0xff]  ;;  %v6291_v58 = vld [vmem:[%s8983_s0 + $0x580] sm:$0xff]  ;;  %v6320_v36 = vld [vmem:[%s8983_s0 + $0x668] sm:$0xff] }
0x12c0   : > { %v6091_v47 = vadd.f32 %v6090_v28, %v6089_v48  ;;  %6508 = vmatpush.msrb.mxu0 %v6249_v14  ;;  %6527 = vmatpush.msra.mxu1 %v6266_v56  ;;  %v6337_v14 = vld [vmem:[%s8983_s0 + $0x6f0] sm:$0xff]  ;;  %v6637_v56 = vld [vmem:[%s8989_s28 + $0x78] sm:$0xff]  ;;  %v5976_v48 = vsub.f32 1.0, %v5975_v27  ;;  %v6335_v28 = vld [vmem:[%s8983_s0 + $0x6e0] sm:$0xff] }
0x12c1   : > { %v6092_v22 = vsel %vm6074_vm0, %v6069_v25, 0.0  ;;  %6547 = vmatpush.msra.mxu2 %v6282_v3  ;;  %6566 = vmatpush.msrb.mxu3 %v6299_v4  ;;  %v6094_v57 = vsel %vm6074_vm0, %v6070_v9, 0.0  ;;  %v6096_v63 = vsel %vm6074_vm0, %v6071_v6, 0.0  ;;  %v6319_v3 = vld [vmem:[%s8983_s0 + $0x660] sm:$0xff]  ;;  %v6636_v4 = vld [vmem:[%s8989_s28 + $0x70] sm:$0xff]  ;;  %v6318_v6 = vld [vmem:[%s8983_s0 + $0x658] sm:$0xff] }
0x12c2   : > { %6509 = vmatpush.msrb.mxu0 %v6248_v53  ;;  %6528 = vmatpush.msra.mxu1 %v6265_v38  ;;  %v6093_v8 = vadd.f32 %v6092_v22, %v6091_v47  ;;  %v6652_v25 = vld [vmem:[%s8989_s28 + $0xf0] sm:$0xff]  ;;  %v5977_v53 = vmul.f32 %v11474_v54, %v5976_v48  ;;  %v6334_v47 = vld [vmem:[%s8983_s0 + $0x6d8] sm:$0xff]  ;;  %v6316_v22 = vld [vmem:[%s8983_s0 + $0x648] sm:$0xff] }
0x12c3   : > { %6548 = vmatpush.msra.mxu2 %v6281_v29  ;;  %6567 = vmatpush.msrb.mxu3 %v6298_v44  ;;  %v6317_v38 = vld [vmem:[%s8983_s0 + $0x650] sm:$0xff]  ;;  %v6634_v29 = vld [vmem:[%s8989_s28 + $0x60] sm:$0xff]  ;;  %vm11521_vm8 = vmor %vm5979_vm6, %vm5980_vm7 }
0x12c4   : > { %6475 = vmatmul.f32.vlgmr.msrb.gmra.mxu2 %v11372_v11  ;;  %6510 = vmatpush.msrb.mxu0 %v6247_v21  ;;  %v11441_v49 = vpop.f32.mrf.mxu3  ;;  %v6095_v7 = vadd.f32 %v6094_v57, %v6093_v8  ;;  %v6296_v11 = vld [vmem:[%s8983_s0 + $0x5a8] sm:$0xff]  ;;  %v5969_v9 = vpop.f32.mrf.mxu1  ;;  %v6650_v44 = vld [vmem:[%s8989_s28 + $0xe0] sm:$0xff]  ;;  %v6333_v21 = vld [vmem:[%s8983_s0 + $0x6d0] sm:$0xff]  ;;  %v5985_v57 = vand.u32 2147483648, %v11209_v5  ;;  %v5978_v8 = vadd.f32 %v11474_v54, %v5977_v53 }
0x12c5   : > { %6529 = vmatpush.msra.mxu1 %v6264_v50  ;;  %6549 = vmatpush.msra.mxu2 %v6280_v33  ;;  %v11445_v51 = vrot.slane %v11441_v49, 2  ;;  %v6072_v62 = vmul.f32 %v11441_v49, %v11441_v49  ;;  %8073 = vlog2.f32 %v5969_v9  ;;  %v6633_v50 = vld [vmem:[%s8989_s28 + $0x58] sm:$0xff]  ;;  %v6640_v9 = vld [vmem:[%s8989_s28 + $0x90] sm:$0xff] }
0x12c6   : > { %6568 = vmatpush.msrb.mxu3 %v6297_v0  ;;  %6435 = vmatmul.f32.vlgmr.msra.gmra.mxu0 %v11364_v34  ;;  %v6097_v10 = vadd.f32 %v6096_v63, %v6095_v7  ;;  %v6278_v34 = vld [vmem:[%s8983_s0 + $0x518] sm:$0xff]  ;;  %v5983_v0 = vand.u32 2147483647, %v11209_v5  ;;  %v6315_v63 = vld [vmem:[%s8983_s0 + $0x640] sm:$0xff]  ;;  %v5986_v5 = vor.u32 1.1754944e-38, %v5985_v57 }
0x12c7   : > { %v6073_v31 = vmul.f32 %v11445_v51, %v11445_v51  ;;  %v6098_v37 = vsel %vm6074_vm0, %v6072_v62, 0.0  ;;  %6495 = vmatmul.f32.vlgmr.msra.gmra.mxu3 %v11375_v24  ;;  %6511 = vmatpush.msrb.mxu0 %v6246_v1  ;;  %v6244_v24 = vld [vmem:[%s8983_s0 + $0x408] sm:$0xff]  ;;  %v6649_v33 = vld [vmem:[%s8989_s28 + $0xd8] sm:$0xff]  ;;  %v6632_v62 = vld [vmem:[%s8989_s28 + $0x50] sm:$0xff] }
0x12c8   : > { %6530 = vmatpush.msra.mxu1 %v6263_v43  ;;  %6550 = vmatpush.msra.mxu2 %v6279_v20  ;;  %v6099_v42 = vadd.f32 %v6098_v37, %v6097_v10  ;;  %v6332_v1 = vld [vmem:[%s8983_s0 + $0x6c8] sm:$0xff]  ;;  %v6648_v43 = vld [vmem:[%s8989_s28 + $0xd0] sm:$0xff]  ;;  %v6331_v10 = vld [vmem:[%s8983_s0 + $0x6c0] sm:$0xff]  ;;  %vm5984_vm9 = vcmp.eq.f32.partialorder %v5983_v0, 8.507059e+37 }
0x12c9   : > { %6569 = vmatpush.msrb.mxu3 %v6296_v11  ;;  %6455 = vmatmul.f32.vlgmr.msrb.gmra.mxu1 %v11369_v18  ;;  %v6100_v17 = vsel %vm6074_vm0, %v6073_v31, 0.0  ;;  %v6293_v18 = vld [vmem:[%s8983_s0 + $0x590] sm:$0xff]  ;;  %v6314_v11 = vld [vmem:[%s8983_s0 + $0x638] sm:$0xff]  ;;  %v5982_v31 = vsel %vm11521_vm8, %v11474_v54, %v5978_v8  ;;  %v6631_v37 = vld [vmem:[%s8989_s28 + $0x48] sm:$0xff] }
0x12ca   : > { %6512 = vmatpush.msrb.mxu0 %v6245_v26  ;;  %6531 = vmatpush.msra.mxu1 %v6262_v55  ;;  %v6101_v13 = vadd.f32 %v6100_v17, %v6099_v42  ;;  %v6647_v26 = vld [vmem:[%s8989_s28 + $0xc8] sm:$0xff]  ;;  %v6313_v55 = vld [vmem:[%s8983_s0 + $0x630] sm:$0xff]  ;;  %v6630_v42 = vld [vmem:[%s8989_s28 + $0x40] sm:$0xff] }
0x12cb   : > { %6551 = vmatpush.msra.mxu2 %v6278_v34  ;;  %6570 = vmatpush.msrb.mxu3 %v6295_v46  ;;  %v8074_v20 = vpop.eup %8073  ;;  %v6330_v34 = vld [vmem:[%s8983_s0 + $0x6b8] sm:$0xff]  ;;  %v6329_v17 = vld [vmem:[%s8983_s0 + $0x6b0] sm:$0xff]  ;;  %v6659_v8 = vld [vmem:[%s8989_s28 + $0x128] sm:$0xff] }
0x12cc   : > { %6513 = vmatpush.msrb.mxu0 %v6244_v24  ;;  %6532 = vmatpush.msra.mxu1 %v6261_v19  ;;  %v5973_v46 = vmul.f32 0.6931472, %v8074_v20  ;;  %v6646_v24 = vld [vmem:[%s8989_s28 + $0xc0] sm:$0xff]  ;;  %v6312_v19 = vld [vmem:[%s8983_s0 + $0x628] sm:$0xff]  ;;  %v6644_v54 = vld [vmem:[%s8989_s28 + $0xb0] sm:$0xff] }
0x12cd   : > { %6552 = vmatpush.msra.mxu2 %v6277_v23  ;;  %6571 = vmatpush.msrb.mxu3 %v6294_v60  ;;  %v5987_v23 = vsel %vm5984_vm9, %v5986_v5, %v5982_v31  ;;  %v6629_v60 = vld [vmem:[%s8989_s28 + $0x38] sm:$0xff] }
0x12ce   : > { %6514 = vmatpush.msrb.mxu0 %v6243_v15  ;;  %6533 = vmatpush.msra.mxu1 %v6260_v61  ;;  %v6645_v15 = vld [vmem:[%s8989_s28 + $0xb8] sm:$0xff]  ;;  %v6311_v61 = vld [vmem:[%s8983_s0 + $0x620] sm:$0xff] }
0x12cf   : > { %6553 = vmatpush.msra.mxu2 %v6276_v2  ;;  %6572 = vmatpush.msrb.mxu3 %v6293_v18  ;;  %v6328_v2 = vld [vmem:[%s8983_s0 + $0x6a8] sm:$0xff]  ;;  %v5988_v18 = vmul.f32 %v5987_v23, %v5973_v46  ;;  %v6326_v27 = vld [vmem:[%s8983_s0 + $0x698] sm:$0xff] }
0x12d0   : > { %6579 = vmatpush.msra.mxu0 %v6322_v45  ;;  %6102 = vadd.xlane.f32.xlu1 %v6101_v13  ;;  %v6628_v13 = vld [vmem:[%s8989_s28 + $0x30] sm:$0xff]  ;;  %v6310_v45 = vld [vmem:[%s8983_s0 + $0x618] sm:$0xff] }
0x12d1   : > { %6515 = vmatmul.f32.vlgmr.msrb.gmra.mxu0 %v11403_v12  ;;  %6534 = vmatpush.msra.mxu1 %v6259_v30  ;;  %v6653_v12 = vld [vmem:[%s8989_s28 + $0xf8] sm:$0xff]  ;;  %v6327_v30 = vld [vmem:[%s8983_s0 + $0x6a0] sm:$0xff] }
0x12d2   : > { %6554 = vmatpush.msra.mxu2 %v6275_v59  ;;  %6573 = vmatpush.msrb.mxu3 %v6292_v32  ;;  %v6627_v59 = vld [vmem:[%s8989_s28 + $0x28] sm:$0xff]  ;;  %v6641_v48 = vld [vmem:[%s8989_s28 + $0x98] sm:$0xff] }
0x12d3   : > { %6555 = vmatmul.f32.vlgmr.msra.gmra.mxu2 %v11411_v16  ;;  %6580 = vmatpush.msra.mxu0 %v6321_v52  ;;  %v6336_v16 = vld [vmem:[%s8983_s0 + $0x6e8] sm:$0xff]  ;;  %v6309_v52 = vld [vmem:[%s8983_s0 + $0x610] sm:$0xff]  ;;  %v6661_v57 = vld [vmem:[%s8989_s28 + $0x138] sm:$0xff] }
0x12d4   : > { %6599 = vmatpush.msrb.mxu1 %v6338_v40  ;;  %6574 = vmatpush.msrb.mxu3 %v6291_v58  ;;  %v6643_v32 = vld [vmem:[%s8989_s28 + $0xa8] sm:$0xff]  ;;  %v5989_v40 = vmul.f32 1.442695, %v5988_v18  ;;  %v6626_v58 = vld [vmem:[%s8989_s28 + $0x20] sm:$0xff] }
0x12d5   : > { %6535 = vmatmul.f32.vlgmr.msra.gmra.mxu1 %v11408_v35  ;;  %6575 = vmatmul.f32.vlgmr.msrb.gmra.mxu3 %v11414_v39  ;;  %v6635_v35 = vld [vmem:[%s8989_s28 + $0x68] sm:$0xff] }
0x12d6   : > { %6581 = vmatpush.msra.mxu0 %v6320_v36  ;;  %6600 = vmatpush.msrb.mxu1 %v6337_v14  ;;  %v6651_v39 = vld [vmem:[%s8989_s28 + $0xe8] sm:$0xff]  ;;  %v6642_v36 = vld [vmem:[%s8989_s28 + $0xa0] sm:$0xff]  ;;  %8075 = vpow2.f32 %v5989_v40 }
0x12d7   : > { %6671 = vmatpush.msrb.mxu2 %v6637_v56  ;;  %6691 = vmatpush.msra.mxu3 %v6653_v12  ;;  %v6308_v14 = vld [vmem:[%s8983_s0 + $0x608] sm:$0xff]  ;;  %v6325_v56 = vld [vmem:[%s8983_s0 + $0x690] sm:$0xff]  ;;  %v6625_v12 = vld [vmem:[%s8989_s28 + $0x18] sm:$0xff] }
0x12d8   : > { %6582 = vmatpush.msra.mxu0 %v6319_v3  ;;  %6601 = vmatpush.msrb.mxu1 %v6336_v16  ;;  %v6307_v3 = vld [vmem:[%s8983_s0 + $0x600] sm:$0xff]  ;;  %v6324_v16 = vld [vmem:[%s8983_s0 + $0x688] sm:$0xff] }
0x12d9   : > { %6672 = vmatpush.msrb.mxu2 %v6636_v4  ;;  %6692 = vmatpush.msra.mxu3 %v6652_v25  ;;  %v6624_v4 = vld [vmem:[%s8989_s28 + $0x10] sm:$0xff]  ;;  %v6323_v25 = vld [vmem:[%s8983_s0 + $0x680] sm:$0xff] }
0x12da   : > { %6583 = vmatpush.msra.mxu0 %v6318_v6  ;;  %6602 = vmatpush.msrb.mxu1 %v6335_v28  ;;  %v6623_v6 = vld [vmem:[%s8989_s28 + $0x8] sm:$0xff] }
0x12db   : > { %6673 = vmatpush.msrb.mxu2 %v6635_v35  ;;  %6693 = vmatpush.msra.mxu3 %v6651_v39  ;;  %v6639_v28 = vld [vmem:[%s8989_s28 + $0x88] sm:$0xff]  ;;  %v6622_v35 = vld [vmem:[%s8989_s28] sm:$0xff] }
0x12dc   : > { %6584 = vmatpush.msra.mxu0 %v6317_v38  ;;  %6603 = vmatpush.msrb.mxu1 %v6334_v47  ;;  %v6638_v39 = vld [vmem:[%s8989_s28 + $0x80] sm:$0xff]  ;;  %v11569_v53 = vpop.eup %8075  ;;  %v6667_v38 = vld [vmem:[%s8989_s28 + $0x168] sm:$0xff] }
0x12dd   : > { %6674 = vmatpush.msrb.mxu2 %v6634_v29  ;;  %6694 = vmatpush.msra.mxu3 %v6650_v44  ;;  %v6666_v47 = vld [vmem:[%s8989_s28 + $0x160] sm:$0xff]  ;;  %v6665_v29 = vld [vmem:[%s8989_s28 + $0x158] sm:$0xff]  ;;  %v6664_v44 = vld [vmem:[%s8989_s28 + $0x150] sm:$0xff] }
0x12de   : > { %6585 = vmatpush.msra.mxu0 %v6316_v22  ;;  %6604 = vmatpush.msrb.mxu1 %v6333_v21  ;;  %v6663_v22 = vld [vmem:[%s8989_s28 + $0x148] sm:$0xff]  ;;  %v6662_v21 = vld [vmem:[%s8989_s28 + $0x140] sm:$0xff] }
0x12df   : > { %6675 = vmatpush.msrb.mxu2 %v6633_v50  ;;  %6695 = vmatpush.msra.mxu3 %v6649_v33  ;;  %v6660_v50 = vld [vmem:[%s8989_s28 + $0x130] sm:$0xff] }
0x12e0   : > { %6586 = vmatpush.msra.mxu0 %v6315_v63  ;;  %6605 = vmatpush.msrb.mxu1 %v6332_v1 }
0x12e1   : > { %6676 = vmatpush.msrb.mxu2 %v6632_v62  ;;  %6696 = vmatpush.msra.mxu3 %v6648_v43  ;;  %v6658_v43 = vld [vmem:[%s8989_s28 + $0x120] sm:$0xff] }
0x12e2   : > { %6587 = vmatpush.msra.mxu0 %v6314_v11  ;;  %6606 = vmatpush.msrb.mxu1 %v6331_v10 }
0x12e3   : > { %6677 = vmatpush.msrb.mxu2 %v6631_v37  ;;  %6697 = vmatpush.msra.mxu3 %v6647_v26  ;;  %v6657_v37 = vld [vmem:[%s8989_s28 + $0x118] sm:$0xff]  ;;  %v6656_v26 = vld [vmem:[%s8989_s28 + $0x110] sm:$0xff] }
0x12e4   : > { %6588 = vmatpush.msra.mxu0 %v6313_v55  ;;  %6607 = vmatpush.msrb.mxu1 %v6330_v34  ;;  %v6655_v34 = vld [vmem:[%s8989_s28 + $0x108] sm:$0xff] }
0x12e5   : > { %6678 = vmatpush.msrb.mxu2 %v6630_v42  ;;  %6698 = vmatpush.msra.mxu3 %v6646_v24  ;;  %v6654_v42 = vld [vmem:[%s8989_s28 + $0x100] sm:$0xff] }
0x12e6   : > { %6589 = vmatpush.msra.mxu0 %v6312_v19  ;;  %6608 = vmatpush.msrb.mxu1 %v6329_v17 }
0x12e7   : > { %6679 = vmatpush.msrb.mxu2 %v6629_v60  ;;  %6699 = vmatpush.msra.mxu3 %v6645_v15 }
0x12e8   : > { %6590 = vmatpush.msra.mxu0 %v6311_v61  ;;  %6609 = vmatpush.msrb.mxu1 %v6328_v2 }
0x12e9   : > { %6680 = vmatpush.msrb.mxu2 %v6628_v13  ;;  %6700 = vmatpush.msra.mxu3 %v6644_v54 }
0x12ea   : > { %6591 = vmatpush.msra.mxu0 %v6310_v45  ;;  %6610 = vmatpush.msrb.mxu1 %v6327_v30 }
0x12eb   : > { %6681 = vmatpush.msrb.mxu2 %v6627_v59  ;;  %6701 = vmatpush.msra.mxu3 %v6643_v32 }
0x12ec   : > { %6592 = vmatpush.msra.mxu0 %v6309_v52  ;;  %6611 = vmatpush.msrb.mxu1 %v6326_v27 }
0x12ed   : > { %6682 = vmatpush.msrb.mxu2 %v6626_v58  ;;  %6702 = vmatpush.msra.mxu3 %v6642_v36 }
0x12ee   : > { %6593 = vmatpush.msra.mxu0 %v6308_v14  ;;  %6612 = vmatpush.msrb.mxu1 %v6325_v56 }
0x12ef   : > { %6683 = vmatpush.msrb.mxu2 %v6625_v12  ;;  %6703 = vmatpush.msra.mxu3 %v6641_v48  ;;  %v8103_v12 = vld [vmem:[%s8981_s17 + $0x40] sm:$0xff]  ;;  %s931_s17 = scalar_lea.vmem %s11718_s20, %s7257_s3 }
0x12f0   : > { %6594 = vmatpush.msra.mxu0 %v6307_v3  ;;  %6613 = vmatpush.msrb.mxu1 %v6324_v16  ;;  %v6620_v48 = vperm.slane %v8103_v12, 1 }
0x12f1   : > { %6595 = vmatmul.f32.vlgmr.msra.gmra.mxu0 %v11441_v49  ;;  %6684 = vmatpush.msrb.mxu2 %v6624_v4  ;;  %v6669_v49 = vld [vmem:[%s8989_s28 + $0x178] sm:$0xff] }
0x12f2   : > { %6614 = vmatpush.msrb.mxu1 %v6323_v25  ;;  %6704 = vmatpush.msra.mxu3 %v6640_v9  ;;  %v6734_v25 = vrot.slane %v8103_v12, 4  ;;  %v6670_v9 = vperm.slane %v8103_v12, 2 }
0x12f3   : > { %6615 = vmatmul.f32.vlgmr.msrb.gmra.mxu1 %v11445_v51  ;;  %6685 = vmatpush.msrb.mxu2 %v6623_v6  ;;  %v6668_v51 = vld [vmem:[%s8989_s28 + $0x170] sm:$0xff] }
0x12f4   : > { %6705 = vmatpush.msra.mxu3 %v6639_v28  ;;  %6711 = vmatpush.msrb.mxu0 %v6669_v49 }
0x12f5   : > { %6686 = vmatpush.msrb.mxu2 %v6622_v35  ;;  %6751 = vmatpush.xpose.msra.mxu1 %v6734_v25 }
0x12f6   : > { %6687 = vmatmul.f32.vlgmr.msrb.gmra.mxu2 %v11472_v41  ;;  %6706 = vmatpush.msra.mxu3 %v6638_v39 }
0x12f7   : > { %6707 = vmatmul.f32.vlgmr.msra.gmra.mxu3 %v11569_v53  ;;  %6712 = vmatpush.msrb.mxu0 %v6668_v51 }
0x12f9   : > { %6713 = vmatpush.msrb.mxu0 %v6667_v38 }
0x12fb   : > { %6714 = vmatpush.msrb.mxu0 %v6666_v47  ;;  %v6732_v47 = vperm.slane %v8103_v12, 3 }
0x12fd   : > { %6715 = vmatpush.msrb.mxu0 %v6665_v29 }
0x12ff   : > { %6716 = vmatpush.msrb.mxu0 %v6664_v44 }
0x1301   : > { %6717 = vmatpush.msrb.mxu0 %v6663_v22 }
0x1303   : > { %6718 = vmatpush.msrb.mxu0 %v6662_v21 }
0x1305   : > { %6719 = vmatpush.msrb.mxu0 %v6661_v57 }
0x1307   : > { %6720 = vmatpush.msrb.mxu0 %v6660_v50 }
0x1309   : > { %6721 = vmatpush.msrb.mxu0 %v6659_v8 }
0x130b   : > { %6722 = vmatpush.msrb.mxu0 %v6658_v43 }
0x130d   : > { %6723 = vmatpush.msrb.mxu0 %v6657_v37 }
0x130f   : > { %6724 = vmatpush.msrb.mxu0 %v6656_v26 }
0x1311   : > { %6725 = vmatpush.msrb.mxu0 %v6655_v34 }
0x1313   : > { %6726 = vmatpush.msrb.mxu0 %v6654_v42  ;;  %v6830_v42 = vld [vmem:[#allocation19 + $0x70] sm:$0xff] }
0x132a   : > { %v6356_v0 = vpop.f32.mrf.mxu0 }
0x132c   : > { %v6376_v33 = vpop.f32.mrf.mxu1 }
0x132d   : > { %v6377_v1 = vadd.f32 %v6376_v33, %v6356_v0  ;;  %v8605_v0 = vmov 2  }
0x132e   : > { %7708 = vset.pattern.permute.xlu0 %v8605_v0 }
0x1332   : > { %v6396_v63 = vpop.f32.mrf.mxu2 }
0x1333   : > { %v6397_v7 = vadd.f32 %v6396_v63, %v6377_v1  ;;  %v8606_v63 = vmov 1   ;;  %v8607_v1 = vmov 0  }
0x1334   : > { %v6416_v20 = vpop.f32.mrf.mxu3  ;;  %7707 = vset.pattern.permute.xlu2 %v8606_v63  ;;  %7706 = vset.pattern.permute.xlu1 %v8607_v1 }
0x1335   : > { %v6417_v10 = vadd.f32 %v6416_v20, %v6397_v7 }
0x1343   : > { %v6103_v62 = vpop.xlane.xlu1 %6102  ;;  %v6436_v5 = vpop.f32.mrf.mxu0 }
0x1344   : > { %v6104_v11 = vmax.f32 %v6103_v62, 1e-24  ;;  %v6437_v31 = vadd.f32 %v6436_v5, %v6417_v10 }
0x1346   : > { %8077 = vrsqrt.f32 %v6104_v11  ;;  %v6456_v55 = vpop.f32.mrf.mxu1  ;;  %vm6111_vm11 = vweird.f32 %v6104_v11 }
0x1347   : > { %v6457_v46 = vadd.f32 %v6456_v55, %v6437_v31  ;;  %v6476_v24 = vpop.f32.mrf.mxu2 }
0x1349   : > { %v6477_v17 = vadd.f32 %v6476_v24, %v6457_v46  ;;  %v6831_v46 = vld [vmem:[#allocation19 + $0x78] sm:$0xff]  ;;  %v6829_v24 = vld [vmem:[#allocation19 + $0x68] sm:$0xff] }
0x134a   : > { %v6496_v60 = vpop.f32.mrf.mxu3  ;;  %6833 = vmatpush.msra.mxu2 %v6831_v46 }
0x134b   : > { %v6497_v61 = vadd.f32 %v6496_v60, %v6477_v17  ;;  %v6827_v17 = vld [vmem:[#allocation19 + $0x58] sm:$0xff] }
0x134c   : > { %v8078_v19 = vpop.eup %8077  ;;  %6834 = vmatpush.msra.mxu2 %v6830_v42 }
0x134d   : > { %v6106_v23 = vmul.f32 %v8078_v19, %v6104_v11  ;;  %vm6112_vm10 = vweird.f32 %v8078_v19 }
0x134e   : > { %v6516_v15 = vpop.f32.mrf.mxu0  ;;  %vm6113_vm12 = vmor %vm6111_vm11, %vm6112_vm10  ;;  %6835 = vmatpush.msra.mxu2 %v6829_v24 }
0x134f   : > { %v6107_v2 = vmul.f32 %v8078_v19, %v6106_v23  ;;  %v6517_v18 = vadd.f32 %v6516_v15, %v6497_v61 }
0x1351   : > { %v6108_v54 = vmul.f32 0.5, %v6107_v2 }
0x1352   : > { %v6536_v13 = vpop.f32.mrf.mxu1 }
0x1353   : > { %v6537_v30 = vadd.f32 %v6536_v13, %v6517_v18  ;;  %v6109_v32 = vsub.f32 1.5, %v6108_v54 }
0x1355   : > { %v6110_v58 = vmul.f32 %v8078_v19, %v6109_v32  ;;  %v6825_v32 = vld [vmem:[#allocation19 + $0x48] sm:$0xff] }
0x1356   : > { %v6556_v45 = vpop.f32.mrf.mxu2 }
0x1357   : > { %v6557_v59 = vadd.f32 %v6556_v45, %v6537_v30  ;;  %v6114_v3 = vsel %vm6113_vm12, %v8078_v19, %v6110_v58  ;;  %v6828_v19 = vld [vmem:[#allocation19 + $0x60] sm:$0xff]  ;;  %v6819_v58 = vld [vmem:[#allocation19 + $0x18] sm:$0xff] }
0x1358   : > { %v6576_v52 = vpop.f32.mrf.mxu3  ;;  %6836 = vmatpush.msra.mxu2 %v6828_v19 }
0x1359   : > { %v6577_v27 = vadd.f32 %v6576_v52, %v6557_v59  ;;  %v6826_v59 = vld [vmem:[#allocation19 + $0x50] sm:$0xff]  ;;  %v6824_v52 = vld [vmem:[#allocation19 + $0x40] sm:$0xff] }
0x135a   : > { %6837 = vmatpush.msra.mxu2 %v6827_v17 }
0x135c   : > { %6838 = vmatpush.msra.mxu2 %v6826_v59 }
0x135e   : > { %6839 = vmatpush.msra.mxu2 %v6825_v32 }
0x1360   : > { %6840 = vmatpush.msra.mxu2 %v6824_v52 }
0x136e   : > { %v6596_v40 = vpop.f32.mrf.mxu0 }
0x136f   : > { %v6597_v36 = vadd.f32 %v6596_v40, %v6577_v27  ;;  %v6823_v27 = vld [vmem:[#allocation19 + $0x38] sm:$0xff]  ;;  %v6822_v40 = vld [vmem:[#allocation19 + $0x30] sm:$0xff] }
0x1370   : > { %v6616_v14 = vpop.f32.mrf.mxu1  ;;  %6841 = vmatpush.msra.mxu2 %v6823_v27 }
0x1371   : > { %v6617_v56 = vadd.f32 %v6616_v14, %v6597_v36  ;;  %v6818_v36 = vld [vmem:[#allocation19 + $0x10] sm:$0xff]  ;;  %v6817_v14 = vld [vmem:[#allocation19 + $0x8] sm:$0xff] }
0x1372   : > { %6842 = vmatpush.msra.mxu2 %v6822_v40 }
0x1373   : > { %v6619_v16 = vmul.f32 %v6617_v56, %v6114_v3  ;;  %v6816_v56 = vld [vmem:[#allocation19] sm:$0xff] }
0x1375   : > { %v11590_v4 = vadd.f32 %v6620_v48, %v6619_v16 }
0x1377   : > { %6727 = vmatmul.f32.vlgmr.msrb.gmra.mxu0 %v11590_v4 }
0x1379   : > { %v6688_v6 = vpop.f32.mrf.mxu2 }
0x137a   : > { %v6689_v28 = vadd.f32 %v6688_v6, %v6670_v9  ;;  %v6708_v35 = vpop.f32.mrf.mxu3 }
0x137c   : > { %v6709_v39 = vadd.f32 %v6708_v35, %v6689_v28 }
0x13f4   : > { %v6728_v49 = vpop.f32.mrf.mxu0 }
0x13f5   : > { %v6729_v51 = vadd.f32 %v6728_v49, %v6709_v39  ;;  %v6889_v39 = vld [vmem:[#allocation21 + $0x78] sm:$0xff]  ;;  %v6888_v49 = vld [vmem:[#allocation21 + $0x70] sm:$0xff] }
0x13f6   : > { %6890 = vmatpush.msrb.mxu3 %v6889_v39 }
0x13f7   : > { %v6731_v38 = vmax.f32 %v6729_v51, 0.0  ;;  %v6887_v51 = vld [vmem:[#allocation21 + $0x68] sm:$0xff] }
0x13f8   : > { %6891 = vmatpush.msrb.mxu3 %v6888_v49 }
0x13f9   : > { %6752 = vmatmul.f32.vlgmr.msra.gmra.mxu1 %v6731_v38  ;;  %v6886_v38 = vld [vmem:[#allocation21 + $0x60] sm:$0xff] }
0x13fa   : > { %6892 = vmatpush.msrb.mxu3 %v6887_v51 }
0x13fc   : > { %6893 = vmatpush.msrb.mxu3 %v6886_v38 }
0x1476   : > { %v6753_v29 = vpop.f32.mrf.mxu1 }
0x1477   : > { %v6754_v44 = vadd.f32 %v6753_v29, %v6732_v47  ;;  %v6885_v47 = vld [vmem:[#allocation21 + $0x58] sm:$0xff]  ;;  %v11597_v29 = vld [vmem:[#allocation22] sm:$0xff] }
0x1478   : > { %6894 = vmatpush.msrb.mxu3 %v6885_v47 }
0x1479   : > { %v6757_v22 = vsel %vm6756_vm13, %v6754_v44, -inf }
0x147a   : > { %6758 = vmax.xlane.f32.xlu2 %v6757_v22  ;;  %v6853_v22 = vperm.slane %v11597_v29, 1 }
0x14ed   : > { %v6759_v21 = vpop.xlane.xlu2 %6758 }
0x14ee   : > { %v6760_v57 = vsub.f32 %v6754_v44, %v6759_v21  ;;  %v6832_v44 = vperm.slane %v11597_v29, 0 }
0x14f0   : > { %v6761_v50 = vmul.f32 1.442695, %v6760_v57 }
0x14f2   : > { %8079 = vpow2.f32 %v6761_v50  ;;  %v6855_v50 = vperm.slane %v11597_v29, 2 }
0x14f8   : > { %v8080_v33 = vpop.eup %8079 }
0x14f9   : > { %v6763_v8 = vsel %vm6756_vm13, %v8080_v33, 0.0 }
0x14fa   : > { %6764 = vadd.xlane.f32.xlu0 %v6763_v8 }
0x156d   : > { %v6765_v7 = vpop.xlane.xlu0 %6764 }
0x156e   : > { %8081 = vrcp.f32 %v6765_v7  ;;  %v6777_v11 = vand.u32 2147483648, %v6765_v7  ;;  %v6775_v5 = vand.u32 2147483647, %v6765_v7  ;;  %vm6771_vm15 = vweird.f32 %v6765_v7 }
0x1570   : > { %v6778_v37 = vor.u32 1.1754944e-38, %v6777_v11  ;;  %vm6776_vm2 = vcmp.eq.f32.partialorder %v6775_v5, 8.507059e+37  ;;  %v6880_v11 = vld [vmem:[#allocation21 + $0x30] sm:$0xff]  ;;  %v6878_v5 = vld [vmem:[#allocation21 + $0x20] sm:$0xff] }
0x1574   : > { %v8082_v62 = vpop.eup %8081 }
0x1575   : > { %v6767_v43 = vmul.f32 %v8082_v62, %v6765_v7  ;;  %vm6772_vm14 = vweird.f32 %v8082_v62  ;;  %v6884_v7 = vld [vmem:[#allocation21 + $0x50] sm:$0xff] }
0x1576   : > { %vm6773_vm1 = vmor %vm6771_vm15, %vm6772_vm14  ;;  %6895 = vmatpush.msrb.mxu3 %v6884_v7 }
0x1577   : > { %v6768_v20 = vsub.f32 1.0, %v6767_v43  ;;  %v6882_v43 = vld [vmem:[#allocation21 + $0x40] sm:$0xff] }
0x1579   : > { %v6769_v10 = vmul.f32 %v8082_v62, %v6768_v20  ;;  %v6881_v20 = vld [vmem:[#allocation21 + $0x38] sm:$0xff] }
0x157b   : > { %v6770_v31 = vadd.f32 %v8082_v62, %v6769_v10  ;;  %v6879_v10 = vld [vmem:[#allocation21 + $0x28] sm:$0xff] }
0x157d   : > { %v6774_v26 = vsel %vm6773_vm1, %v8082_v62, %v6770_v31  ;;  %v6883_v62 = vld [vmem:[#allocation21 + $0x48] sm:$0xff]  ;;  %v6877_v31 = vld [vmem:[#allocation21 + $0x18] sm:$0xff] }
0x157e   : > { %v6779_v55 = vsel %vm6776_vm2, %v6778_v37, %v6774_v26  ;;  %6896 = vmatpush.msrb.mxu3 %v6883_v62  ;;  %v6876_v37 = vld [vmem:[#allocation21 + $0x10] sm:$0xff]  ;;  %v6875_v26 = vld [vmem:[#allocation21 + $0x8] sm:$0xff] }
0x157f   : > { %v6780_v34 = vmul.f32 %v8080_v33, %v6779_v55  ;;  %v6874_v55 = vld [vmem:[#allocation21] sm:$0xff] }
0x1580   : > { %6897 = vmatpush.msrb.mxu3 %v6882_v43 }
0x1581   : > { %6794 = vperm.xlu0 %7708, %v6780_v34   ;;  %6788 = vperm.xlu2 %7707, %v6780_v34  }
0x1582   : > { %6783 = vperm.xlu1 %7706, %v6780_v34   ;;  %6898 = vmatpush.msrb.mxu3 %v6881_v20 }
0x1584   : > { %6899 = vmatpush.msrb.mxu3 %v6880_v11 }
0x1586   : > { %6900 = vmatpush.msrb.mxu3 %v6879_v10 }
0x1588   : > { %6901 = vmatpush.msrb.mxu3 %v6878_v5 }
0x158a   : > { %6902 = vmatpush.msrb.mxu3 %v6877_v31 }
0x158c   : > { %6903 = vmatpush.msrb.mxu3 %v6876_v37 }
0x158e   : > { %6904 = vmatpush.msrb.mxu3 %v6875_v26 }
0x1590   : > { %6905 = vmatpush.msrb.mxu3 %v6874_v55 }
0x15db   : > { %v6789_v23 = vpop.permute.xlu2 %6788 }
0x15dc   : > { %v6791_v61 = vmul.f32 %v11569_v53, %v6789_v23  ;;  %v6821_v53 = vld [vmem:[#allocation19 + $0x28] sm:$0xff] }
0x15dd   : > { %6843 = vmatpush.msra.mxu2 %v6821_v53 }
0x15f3   : > { %v6795_v60 = vpop.permute.xlu0 %6794 }
0x15f4   : > { %v6784_v15 = vpop.permute.xlu1 %6783  ;;  %v6797_v18 = vmul.f32 %v6795_v60, %v11590_v4 }
0x15f5   : > { %v6786_v2 = vmul.f32 %v6784_v15, %v11472_v41  ;;  %v6820_v41 = vld [vmem:[#allocation19 + $0x20] sm:$0xff] }
0x15f6   : > { %6844 = vmatpush.msra.mxu2 %v6820_v41  ;;  %v6926_v41 = vperm.slane %v11597_v29, 3 }
0x15f7   : > { %v6792_v13 = vadd.f32 %v6791_v61, %v6786_v2 }
0x15f8   : > { %6845 = vmatpush.msra.mxu2 %v6819_v58  ;;  %v6928_v58 = vperm.slane %v11597_v29, 4 }
0x15f9   : > { %v6798_v54 = vadd.f32 %v6797_v18, %v6792_v13 }
0x15fa   : > { %6846 = vmatpush.msra.mxu2 %v6818_v36 }
0x15fb   : > { %v6799_v45 = vmul.f32 %v6798_v54, %v6798_v54 }
0x15fc   : > { %6847 = vmatpush.msra.mxu2 %v6817_v14  ;;  %v6931_v14 = vld [vmem:[%s927_s1] sm:$0x3] }
0x15fd   : > { %v6800_v30 = vsel %vm6074_vm0, %v6799_v45, 0.0 }
0x15fe   : > { %6801 = vadd.xlane.f32.xlu1 %v6800_v30  ;;  %6848 = vmatpush.msra.mxu2 %v6816_v56 }
0x1671   : > { %v6802_v12 = vpop.xlane.xlu1 %6801 }
0x1672   : > { %v6803_v48 = vmax.f32 %v6802_v12, 1e-24 }
0x1674   : > { %8083 = vrsqrt.f32 %v6803_v48  ;;  %vm6810_vm3 = vweird.f32 %v6803_v48 }
0x167a   : > { %v8084_v3 = vpop.eup %8083 }
0x167b   : > { %v6805_v16 = vmul.f32 %v8084_v3, %v6803_v48  ;;  %vm6811_vm5 = vweird.f32 %v8084_v3 }
0x167c   : > { %vm6812_vm4 = vmor %vm6810_vm3, %vm6811_vm5 }
0x167d   : > { %v6806_v4 = vmul.f32 %v8084_v3, %v6805_v16  ;;  %v6933_v16 = vsub.f32 1.0, %v6931_v14 }
0x167f   : > { %v6807_v25 = vmul.f32 0.5, %v6806_v4 }
0x1681   : > { %v6808_v9 = vsub.f32 1.5, %v6807_v25 }
0x1683   : > { %v6809_v6 = vmul.f32 %v8084_v3, %v6808_v9 }
0x1685   : > { %v6813_v28 = vsel %vm6812_vm4, %v8084_v3, %v6809_v6 }
0x1686   : > { %v6814_v35 = vmul.f32 %v6813_v28, %v6798_v54 }
0x1688   : > { %6849 = vmatmul.f32.vlgmr.msra.gmra.mxu2 %v6814_v35 }
0x170b   : > { %v6850_v21 = vpop.f32.mrf.mxu2 }
0x170c   : > { %v6851_v57 = vadd.f32 %v6850_v21, %v6832_v44 }
0x170e   : > { %v6854_v33 = vmul.f32 %v6853_v22, %v6851_v57 }
0x1710   : > { %v6856_v8 = vadd.f32 %v6855_v50, %v6854_v33 }
0x1712   : > { %v6857_v0 = vmax.f32 %v6856_v8, 0.0 }
0x1714   : > { %v6858_v63 = vmul.f32 %v6857_v0, %v6857_v0 }
0x1716   : > { %v6859_v1 = vsel %vm6074_vm0, %v6858_v63, 0.0 }
0x1717   : > { %6860 = vadd.xlane.f32.xlu2 %v6859_v1 }
0x178a   : > { %v6861_v34 = vpop.xlane.xlu2 %6860 }
0x178b   : > { %v6862_v46 = vmax.f32 %v6861_v34, 1e-24 }
0x178d   : > { %8085 = vrsqrt.f32 %v6862_v46  ;;  %vm6869_vm7 = vweird.f32 %v6862_v46 }
0x1793   : > { %v8086_v42 = vpop.eup %8085 }
0x1794   : > { %v6864_v24 = vmul.f32 %v8086_v42, %v6862_v46  ;;  %vm6870_vm6 = vweird.f32 %v8086_v42 }
0x1795   : > { %vm6871_vm8 = vmor %vm6869_vm7, %vm6870_vm6 }
0x1796   : > { %v6865_v19 = vmul.f32 %v8086_v42, %v6864_v24 }
0x1798   : > { %v6866_v17 = vmul.f32 0.5, %v6865_v19 }
0x179a   : > { %v6867_v23 = vsub.f32 1.5, %v6866_v17 }
0x179c   : > { %v6868_v60 = vmul.f32 %v8086_v42, %v6867_v23 }
0x179e   : > { %v6872_v15 = vsel %vm6871_vm8, %v8086_v42, %v6868_v60 }
0x179f   : > { %v6873_v61 = vmul.f32 %v6872_v15, %v6857_v0 }
0x17a1   : > { %6906 = vmatmul.f32.vlgmr.msrb.gmra.mxu3 %v6873_v61 }
0x1824   : > { %v6907_v2 = vpop.f32.mrf.mxu3 }
0x1825   : > { %v6910_v18 = vmul.f32 %v6907_v2, %v6907_v2  ;;  %v6927_v48 = vmul.f32 %v6926_v41, %v6907_v2  ;;  %v6934_v9 = vmul.f32 %v6933_v16, %v6907_v2 }
0x1827   : > { %v6911_v13 = vmax.f32 %v6910_v18, 0.0 }
0x1829   : > { %v6912_v54 = vmin.f32 %v6911_v13, 1.0 }
0x182b   : > { %v6913_v45 = vsub.f32 1.0, %v6912_v54 }
0x182d   : > { %8087 = vrsqrt.f32 %v6913_v45  ;;  %vm6921_vm9 = vcmp.eq.f32.partialorder %v6913_v45, inf  ;;  %v6924_v36 = vand.u32 2147483648, %v6913_v45  ;;  %vm6923_vm10 = vcmp.eq.f32.partialorder %v6913_v45, 0.0 }
0x1833   : > { %v8088_v30 = vpop.eup %8087 }
0x1834   : > { %v6915_v59 = vmul.f32 %v8088_v30, %v6913_v45 }
0x1836   : > { %v6916_v32 = vmul.f32 %v8088_v30, %v6915_v59 }
0x1838   : > { %v6917_v52 = vmul.f32 0.5, %v6916_v32 }
0x183a   : > { %v6918_v27 = vsub.f32 1.5, %v6917_v52 }
0x183c   : > { %v6919_v40 = vmul.f32 %v8088_v30, %v6918_v27 }
0x183e   : > { %v6920_v53 = vmul.f32 %v6919_v40, %v6913_v45 }
0x1840   : > { %v6922_v56 = vsel %vm6921_vm9, %v6913_v45, %v6920_v53 }
0x1841   : > { %v6925_v12 = vsel %vm6923_vm10, %v6924_v36, %v6922_v56 }
0x1842   : > { %v6929_v3 = vmul.f32 %v6928_v58, %v6925_v12 }
0x1844   : > { %v6930_v4 = vsub.f32 %v6927_v48, %v6929_v3 }
0x1846   : > { %v6932_v25 = vmul.f32 %v6931_v14, %v6930_v4 }
0x1848   : > { %v6935_v6 = vadd.f32 %v6934_v9, %v6932_v25 }
0x184a   : > { %v6936_v28 = vmul.f32 64.0, %v6935_v6 }
0x184c   : > { %v6937_v35 = vsel %vm6074_vm0, %v6936_v28, 0.0 }
0x184d   : > { %6938 = vst [vmem:[%s931_s17] sm:$0xff] %v6937_v35 }
0x184e PF: > { %s11719_s24 = sld [smem:[#allocation36_spill]] }
0x184f   : > { %s11720_s21 = sld [smem:[#allocation32_spill]] }
0x1850   : > { %s11721_s22 = sld [smem:[#allocation33_spill]] }
0x1851   : > { %s11722_s23 = sld [smem:[#allocation37_spill]] }
0x1854   : > { %p39_p1 = scmp.ge.s32.totalorder %s11719_s24, 4  }
0x1856   :  { %41 = sbr.rel (!%p39_p1) target bundleno = 25 (0x19), region = 230 }
0x185b   :  { %6958 = vsyncpa [#allocation3], 1 }
0x185c   :  { %6960 = vsyncpa [#allocation3 + $0x1], 1 }
0x185d   :  { %6961 = vsyncpa [#allocation5], 1 }
0x185e   :  { %6963 = vsyncpa [#allocation5 + $0x1], 1 }
0x185f   :  { %6964 = vsyncpa [#allocation8], 1 }
0x1860   :  { %6966 = vsyncpa [#allocation8 + $0x1], 1 }
0x1861   :  { %6967 = vsyncpa [#allocation11], 1 }
0x1862   :  { %6969 = vsyncpa [#allocation11 + $0x1], 1 }
0x1863   :  { %6970 = vsyncpa [#allocation14], 1 }
0x1864   :  { %6971 = vsyncpa [#allocation17], 1 }
0x1865   :  { %6972 = vsyncpa [#allocation20], 1 }
0x1866   :  { %6973 = vsyncpa [#allocation23], 1 }

</bundles_post_ra>
